<compile_context>
chip_gen: v7x
topology: tpu7x:2x2x1
jax: 0.10.0
libtpu: 0.0.40
codegen_flags: <defaults>
</compile_context>

<pallas_src>
import functools
import math

import jax
import jax.numpy as jnp
from jax.experimental import pallas as pl
from jax.experimental.pallas import tpu as pltpu


_LANE = 128                      # conv/FC channels padded to a multiple of this
_COMPUTE_DTYPE = jnp.bfloat16    # bf16 operands, f32 MXU accumulation
# Scoped-VMEM limit safe on every generation (v7x: 64 MiB physical; v5e/v6e have
# 128 MiB and can raise this toward ~96 MiB along with max_rows_per_tile).
_VMEM_LIMIT_BYTES = 48 * 1024 * 1024
_ROW_TILE_BUDGET_BYTES = int(0.75 * _VMEM_LIMIT_BYTES)


def _round_up(n, m):
    return (n + m - 1) // m * m


def _pick_row_tile(H, W, cin, cout, itemsize, pooled, *,
                   budget_bytes=_ROW_TILE_BUDGET_BYTES, max_rows_per_tile=8):
    """Largest H-row tile that divides H (even when a 2x2 pool is fused) whose
    double-buffered I/O blocks + halo scratch + f32 accumulator fit the VMEM
    budget.  max_rows_per_tile is kept small so the toy 16x16 layer exercises
    >1 row tile; at real 224x224 sizes raise it (~16-24 on v7x, 16-32 on
    v5e/v6e) and let the budget check bind instead (also makes TH*W >= 256 so
    the MXU M dimension is full)."""
    best = 0
    for th in range(1, min(H, max_rows_per_tile) + 1):
        if H % th:
            continue
        if pooled and th % 2:
            continue
        in_blk = th * W * cin * itemsize
        halo_blk = 2 * W * cin * itemsize
        out_r, out_c = (th // 2, W // 2) if pooled else (th, W)
        out_blk = out_r * out_c * cout * itemsize
        xpad = (th + 2) * (W + 2) * cin * itemsize
        wgt = 9 * cin * cout * itemsize + cout * 4
        acc = th * W * cout * 4
        need = 2 * (in_blk + halo_blk + out_blk + wgt) + xpad + acc
        if need <= budget_bytes:
            best = th
    if best == 0:
        raise ValueError("no conv row tile fits the VMEM budget")
    return best


# -----------------------------------------------------------------------------
# Conv3x3 (pad=1) + folded-BN + ReLU, with optional fused 2x2/2 max or avg pool.
# Grid = (batch, H row tiles); halo rows come in as two extra 1-row streams.
# -----------------------------------------------------------------------------
def _conv3x3_bn_relu_kernel(x_ref, xt_ref, xb_ref, w_ref, b_ref, o_ref,
                            xpad_ref, *, pool):
    # x_ref:  (1, TH, W, Cin)      xt_ref/xb_ref: (1, 1, W, Cin) halo rows
    # w_ref:  (9, Cin, Cout)       b_ref: (1, Cout) f32 (BN-folded bias)
    # o_ref:  (1, THo, Wo, Cout)   xpad_ref: (TH+2, W+2, Cin) scratch (x.dtype)
    _, TH, W, Cin = x_ref.shape
    Cout = o_ref.shape[-1]
    dt = x_ref.dtype
    hi = pl.program_id(1)
    n_tiles = pl.num_programs(1)

    # Zero only the halo columns (padding=1 along W), not the whole buffer.
    xpad_ref[:, 0:1, :] = jnp.zeros((TH + 2, 1, Cin), dt)
    xpad_ref[:, W + 1:W + 2, :] = jnp.zeros((TH + 2, 1, Cin), dt)
    # Halo rows: neighbouring row tile, or zeros at the image border.
    top = xt_ref[0]
    bot = xb_ref[0]
    top = jnp.where(hi == 0, jnp.zeros_like(top), top)
    bot = jnp.where(hi == n_tiles - 1, jnp.zeros_like(bot), bot)
    xpad_ref[0:1, 1:W + 1, :] = top
    xpad_ref[TH + 1:TH + 2, 1:W + 1, :] = bot
    # Interior rows (single copy).
    # TODO(synk): the offset-1 W store is sublane-shifted; it could be avoided by
    # masking the W edges at matmul time instead of materialising a W halo.
    xpad_ref[1:TH + 1, 1:W + 1, :] = x_ref[0]

    # 3x3 conv as 9 accumulated MXU matmuls (no materialised im2col buffer).
    # At very large row tiles switch to an explicit f32 VMEM accumulator or loop
    # over W sub-blocks; at these tile sizes a value accumulator is fine.
    acc = jnp.zeros((TH * W, Cout), jnp.float32)
    for t in range(9):
        dh, dw = t // 3, t % 3
        tap = xpad_ref[dh:dh + TH, dw:dw + W, :].reshape(TH * W, Cin)
        acc += jnp.dot(tap, w_ref[t], preferred_element_type=jnp.float32)
    acc = jnp.maximum(acc + b_ref[...], 0.0)        # folded-BN bias + ReLU

    y = acc.reshape(TH, W, Cout)
    if pool == "max":                                # fused MaxPool2d(2, 2)
        y = y.reshape(TH, W // 2, 2, Cout)
        y = jnp.maximum(y[:, :, 0, :], y[:, :, 1, :])
        y = y.reshape(TH // 2, 2, W // 2, Cout)
        y = jnp.maximum(y[:, 0], y[:, 1])
    elif pool == "avg":                              # fused trailing AvgPool2d(2)
        y = y.reshape(TH, W // 2, 2, Cout)
        y = y[:, :, 0, :] + y[:, :, 1, :]
        y = y.reshape(TH // 2, 2, W // 2, Cout)
        y = (y[:, 0] + y[:, 1]) * 0.25
    o_ref[...] = y[None].astype(o_ref.dtype)


def conv3x3_bn_relu(x, w, b, pool=None):
    """x: (B,H,W,Cin) NHWC; w: (9,Cin,Cout) BN-folded; b: (1,Cout) f32."""
    B, H, W, Cin = x.shape
    Cout = w.shape[-1]
    if pool is not None:
        assert H % 2 == 0 and W % 2 == 0, "2x2 pooling needs even H and W"
    TH = _pick_row_tile(H, W, Cin, Cout, x.dtype.itemsize, pool is not None)
    n_tiles = H // TH
    THo, Wo = (TH // 2, W // 2) if pool else (TH, W)
    Ho = H // 2 if pool else H

    return pl.pallas_call(
        functools.partial(_conv3x3_bn_relu_kernel, pool=pool),
        out_shape=jax.ShapeDtypeStruct((B, Ho, Wo, Cout), x.dtype),
        grid=(B, n_tiles),
        in_specs=[
            # main row tile
            pl.BlockSpec((1, TH, W, Cin), lambda bi, hi: (bi, hi, 0, 0)),
            # top / bottom halo rows (block size 1 along H => block idx == row);
            # clamped at the border and overwritten with zeros in-kernel.
            # If input DMA becomes exposed (most likely on v5e once the copy pass
            # is gone) add pipeline_mode=pl.Buffered(3) to these specs.
            pl.BlockSpec((1, 1, W, Cin),
                         lambda bi, hi: (bi, jnp.maximum(hi * TH - 1, 0), 0, 0)),
            pl.BlockSpec((1, 1, W, Cin),
                         lambda bi, hi: (bi, jnp.minimum((hi + 1) * TH, H - 1), 0, 0)),
            pl.BlockSpec((9, Cin, Cout), lambda bi, hi: (0, 0, 0)),
            pl.BlockSpec((1, Cout), lambda bi, hi: (0, 0)),
        ],
        out_specs=pl.BlockSpec((1, THo, Wo, Cout), lambda bi, hi: (bi, hi, 0, 0)),
        scratch_shapes=[pltpu.VMEM((TH + 2, W + 2, Cin), x.dtype)],
        compiler_params=pltpu.CompilerParams(
            # batch and row tiles are independent (halo is re-fetched) -> both
            # parallel so v7x's two TensorCores can split either axis.
            dimension_semantics=("parallel", "parallel"),
            vmem_limit_bytes=_VMEM_LIMIT_BYTES),
    )(x, x, x, w, b)


# -----------------------------------------------------------------------------
# Standalone 2x2 stride-2 pool.  Only a fallback for cfg corner cases
# (consecutive 'M', or a cfg ending in 'M'); in the standard VGG cfg every pool
# is fused into the preceding conv and this kernel is never launched.
# -----------------------------------------------------------------------------
def _pool2_kernel(x_ref, o_ref, *, op):
    _, H, W, C = x_ref.shape
    x = x_ref[0]
    x = x.reshape(H, W // 2, 2, C)
    a, b = x[:, :, 0, :], x[:, :, 1, :]
    y = jnp.maximum(a, b) if op == "max" else a + b
    y = y.reshape(H // 2, 2, W // 2, C)
    a, b = y[:, 0], y[:, 1]
    z = jnp.maximum(a, b) if op == "max" else (a + b) * 0.25
    o_ref[...] = z[None].astype(o_ref.dtype)


def pool2(x, op):
    B, H, W, C = x.shape
    return pl.pallas_call(
        functools.partial(_pool2_kernel, op=op),
        out_shape=jax.ShapeDtypeStruct((B, H // 2, W // 2, C), x.dtype),
        grid=(B,),
        in_specs=[pl.BlockSpec((1, H, W, C), lambda bi: (bi, 0, 0, 0))],
        out_specs=pl.BlockSpec((1, H // 2, W // 2, C), lambda bi: (bi, 0, 0, 0)),
        compiler_params=pltpu.CompilerParams(
            dimension_semantics=("parallel",),
            vmem_limit_bytes=_VMEM_LIMIT_BYTES),
    )(x)


# -----------------------------------------------------------------------------
# Classifier: tiled y = x @ W + b (grid over N and K, f32 accumulator).
# W is pre-transposed, NHWC-permuted (incl. channel padding) and lane-padded.
# -----------------------------------------------------------------------------
def _linear_kernel(x_ref, w_ref, b_ref, o_ref, acc_ref):
    @pl.when(pl.program_id(1) == 0)
    def _():
        acc_ref[...] = jnp.zeros_like(acc_ref)
    acc_ref[...] += jnp.dot(x_ref[...], w_ref[...],
                            preferred_element_type=jnp.float32)
    @pl.when(pl.program_id(1) == pl.num_programs(1) - 1)
    def _():
        o_ref[...] = (acc_ref[...] + b_ref[...]).astype(o_ref.dtype)


def linear(x, w_fc, b_fc):
    """x: (B, F); w_fc: (F, Npad); b_fc: (1, Npad) f32 -> (B, Npad) f32."""
    B, F = x.shape
    n_pad = w_fc.shape[-1]
    tn = 128
    tk = 256 if F % 256 == 0 else (128 if F % 128 == 0 else F)
    # Note: B=2 leaves the MXU M dimension nearly empty; with a bigger batch the
    # same kernel tiles M too (block last-two-dim rule is satisfied by B = full).
    return pl.pallas_call(
        _linear_kernel,
        out_shape=jax.ShapeDtypeStruct((B, n_pad), jnp.float32),
        grid=(n_pad // tn, F // tk),
        in_specs=[
            pl.BlockSpec((B, tk), lambda n, k: (0, k)),
            pl.BlockSpec((tk, tn), lambda n, k: (k, n)),
            pl.BlockSpec((1, tn), lambda n, k: (0, n)),
        ],
        out_specs=pl.BlockSpec((B, tn), lambda n, k: (0, n)),
        scratch_shapes=[pltpu.VMEM((B, tn), jnp.float32)],
        compiler_params=pltpu.CompilerParams(
            dimension_semantics=("parallel", "arbitrary"),
            vmem_limit_bytes=_VMEM_LIMIT_BYTES),
    )(x, w_fc, b_fc)


# -----------------------------------------------------------------------------
# Parameter construction (deterministic, mirrors _initialize_weights).
# BN fold, tap layout, channel lane-padding, FC transpose and the NCHW->NHWC
# flatten permutation are all done ONCE here, never per forward call.
# -----------------------------------------------------------------------------
def init_params(key, cfg, in_channels, num_classes, input_hw,
                dtype=_COMPUTE_DTYPE):
    eps = 1e-5
    bn_scale = 0.5 / math.sqrt(1.0 + eps)   # gamma=0.5, beta=0, eval-mode stats
    conv_params = []
    c_real, c_pad, hw = in_channels, in_channels, input_hw
    for v in cfg:
        if v == 'M':
            hw //= 2
            continue
        v_pad = _round_up(v, _LANE)          # lane-dense Cout (zero-padded chans)
        key, kw = jax.random.split(key)
        std = math.sqrt(2.0 / (3 * 3 * v))   # n = k*k*out_channels (torch init)
        w = std * jax.random.normal(kw, (v, c_real, 3, 3), dtype=jnp.float32)
        w = jnp.transpose(w, (2, 3, 1, 0)) * bn_scale          # (kh,kw,Cin,Cout)
        w = jnp.pad(w, ((0, 0), (0, 0), (0, c_pad - c_real), (0, v_pad - v)))
        w = w.reshape(9, c_pad, v_pad).astype(dtype)           # (tap, Cin, Cout)
        b = jnp.zeros((1, v_pad), jnp.float32)                 # conv bias 0, beta 0
        conv_params.append((w, b))
        c_real, c_pad = v, v_pad
    hw //= 2                                                   # trailing AvgPool2d(2)

    feat_real = c_real * hw * hw
    key, kw = jax.random.split(key)
    wl = 0.01 * jax.random.normal(kw, (num_classes, feat_real), dtype=jnp.float32)
    # torch flattens NCHW; our features are NHWC with zero-padded channels ->
    # permute + pad the columns at init so the forward flatten is free.
    wl = jnp.transpose(wl.reshape(num_classes, c_real, hw, hw), (0, 2, 3, 1))
    wl = jnp.pad(wl, ((0, 0), (0, 0), (0, 0), (0, c_pad - c_real)))
    wl = wl.reshape(num_classes, hw * hw * c_pad).T            # (F_pad, ncls)
    n_pad = _round_up(num_classes, _LANE)                      # lane-dense FC out
    w_fc = jnp.pad(wl, ((0, 0), (0, n_pad - num_classes))).astype(dtype)
    b_fc = jnp.zeros((1, n_pad), jnp.float32)
    return conv_params, (w_fc, b_fc, num_classes)


# -----------------------------------------------------------------------------
# Forward pass (matches VGG.forward): features -> AvgPool2d(2) -> flatten -> fc.
# -----------------------------------------------------------------------------
def vgg_forward(x_nchw, cfg, conv_params, linear_params, dtype=_COMPUTE_DTYPE):
    x = jnp.transpose(x_nchw, (0, 2, 3, 1)).astype(dtype)   # NCHW->NHWC, bf16
    ci, i, n = 0, 0, len(cfg)
    while i < n:
        if cfg[i] == 'M':                    # 'M' not preceded by a conv
            x = pool2(x, op="max")
            i += 1
            continue
        w, b = conv_params[ci]
        ci += 1
        fuse_max = (i + 1 < n) and cfg[i + 1] == 'M'
        step = 2 if fuse_max else 1
        is_last = (i + step) >= n
        if fuse_max:
            x = conv3x3_bn_relu(x, w, b, pool="max")
        elif is_last:
            x = conv3x3_bn_relu(x, w, b, pool="avg")   # fused trailing AvgPool2d(2)
        else:
            x = conv3x3_bn_relu(x, w, b, pool=None)
        i += step
    if cfg[-1] == 'M':                       # avg pool could not be fused
        x = pool2(x, op="avg")

    feats = x.reshape(x.shape[0], -1)        # contiguous NHWC flatten (free);
                                             # FC weight already permuted/padded
    w_fc, b_fc, num_classes = linear_params
    y = linear(feats, w_fc, b_fc)            # (B, n_pad) f32, lane-dense store
    return y[:, :num_classes]


if __name__ == "__main__":
    key = jax.random.PRNGKey(0)

    # Small synthetic configuration consistent with the module structure.
    batch, in_channels, spatial = 2, 4, 16
    num_classes = 6
    cfg = [8, 'M', 16, 'M', 16]   # conv/BN/ReLU blocks with 'M' maxpools

    key, kx, kp = jax.random.split(key, 3)
    x = jax.random.normal(kx, (batch, in_channels, spatial, spatial),
                          dtype=jnp.float32)  # PyTorch NCHW input

    conv_params, linear_params = init_params(kp, cfg, in_channels,
                                             num_classes, spatial)

    fwd = jax.jit(lambda xx: vgg_forward(xx, cfg, conv_params, linear_params))
    y = jax.block_until_ready(fwd(x))
    assert y.shape == (batch, num_classes) and y.dtype == jnp.float32
    print("KERNEL_OK")
</pallas_src>

<mosaic_0001>
module attributes {stable_mosaic.version = 11 : i64} {
  func.func @_conv3x3_bn_relu_kernel(%arg0: i32, %arg1: i32, %arg2: memref<1x8x16x4xbf16, #tpu.memory_space<vmem>>, %arg3: memref<1x1x16x4xbf16, #tpu.memory_space<vmem>>, %arg4: memref<1x1x16x4xbf16, #tpu.memory_space<vmem>>, %arg5: memref<9x4x128xbf16, #tpu.memory_space<vmem>>, %arg6: memref<1x128xf32, #tpu.memory_space<vmem>>, %arg7: memref<1x4x8x128xbf16, #tpu.memory_space<vmem>>, %arg8: memref<10x18x4xbf16, #tpu.memory_space<vmem>>) attributes {dimension_semantics = [#tpu.dimension_semantics<parallel>, #tpu.dimension_semantics<parallel>], iteration_bounds = array<i64: 2, 2>, scalar_prefetch = 0 : i64, scratch_operands = 1 : i64, tpu.core_type = #tpu.core_type<tc>, window_params = [{transform_indices = @transform_0, window_bounds = array<i64: 1, 8, 16, 4>}, {transform_indices = @transform_1, window_bounds = array<i64: 1, 1, 16, 4>}, {transform_indices = @transform_2, window_bounds = array<i64: 1, 1, 16, 4>}, {pipeline_mode = #tpu.pipeline_mode<synchronous>, transform_indices = @transform_3, window_bounds = array<i64: 9, 4, 128>}, {pipeline_mode = #tpu.pipeline_mode<synchronous>, transform_indices = @transform_4, window_bounds = array<i64: 1, 128>}, {transform_indices = @transform_5, window_bounds = array<i64: 1, 4, 8, 128>}]} {
    %cst = arith.constant 0.000000e+00 : bf16
    %0 = vector.broadcast %cst : bf16 to vector<10x1x4xbf16>
    %c0 = arith.constant 0 : index
    %c0_0 = arith.constant 0 : index
    %c0_1 = arith.constant 0 : index
    %1 = vector.load %arg8[%c0, %c0_0, %c0_1] : memref<10x18x4xbf16, #tpu.memory_space<vmem>>, vector<10x1x4xbf16>
    tpu.vector_store %arg8[%c0, %c0_0, %c0_1], %0 {strides = array<i32>} : memref<10x18x4xbf16, #tpu.memory_space<vmem>>, vector<10x1x4xbf16>,
    %cst_2 = arith.constant 0.000000e+00 : bf16
    %2 = vector.broadcast %cst_2 : bf16 to vector<10x1x4xbf16>
    %c0_3 = arith.constant 0 : index
    %c17 = arith.constant 17 : index
    %c0_4 = arith.constant 0 : index
    %3 = vector.load %arg8[%c0_3, %c17, %c0_4] : memref<10x18x4xbf16, #tpu.memory_space<vmem>>, vector<10x1x4xbf16>
    tpu.vector_store %arg8[%c0_3, %c17, %c0_4], %2 {strides = array<i32>} : memref<10x18x4xbf16, #tpu.memory_space<vmem>>, vector<10x1x4xbf16>,
    %c0_5 = arith.constant 0 : index
    %c0_6 = arith.constant 0 : index
    %c0_7 = arith.constant 0 : index
    %c0_8 = arith.constant 0 : index
    %4 = vector.load %arg3[%c0_5, %c0_6, %c0_7, %c0_8] : memref<1x1x16x4xbf16, #tpu.memory_space<vmem>>, vector<1x1x16x4xbf16>
    %5 = vector.shape_cast %4 : vector<1x1x16x4xbf16> to vector<1x16x4xbf16>
    %c0_9 = arith.constant 0 : index
    %c0_10 = arith.constant 0 : index
    %c0_11 = arith.constant 0 : index
    %c0_12 = arith.constant 0 : index
    %6 = vector.load %arg4[%c0_9, %c0_10, %c0_11, %c0_12] : memref<1x1x16x4xbf16, #tpu.memory_space<vmem>>, vector<1x1x16x4xbf16>
    %7 = vector.shape_cast %6 : vector<1x1x16x4xbf16> to vector<1x16x4xbf16>
    %c0_i32 = arith.constant 0 : i32
    %8 = arith.cmpi eq, %arg1, %c0_i32 : i32
    %cst_13 = arith.constant 0.000000e+00 : bf16
    %9 = vector.broadcast %cst_13 : bf16 to vector<1x16x4xbf16>
    %10 = arith.select %8, %9, %5 : vector<1x16x4xbf16>
    %c1_i32 = arith.constant 1 : i32
    %11 = arith.cmpi eq, %arg1, %c1_i32 : i32
    %cst_14 = arith.constant 0.000000e+00 : bf16
    %12 = vector.broadcast %cst_14 : bf16 to vector<1x16x4xbf16>
    %13 = arith.select %11, %12, %7 : vector<1x16x4xbf16>
    %c0_15 = arith.constant 0 : index
    %c1 = arith.constant 1 : index
    %c0_16 = arith.constant 0 : index
    %14 = vector.load %arg8[%c0_15, %c1, %c0_16] : memref<10x18x4xbf16, #tpu.memory_space<vmem>>, vector<1x16x4xbf16>
    tpu.vector_store %arg8[%c0_15, %c1, %c0_16], %10 {strides = array<i32>} : memref<10x18x4xbf16, #tpu.memory_space<vmem>>, vector<1x16x4xbf16>,
    %c9 = arith.constant 9 : index
    %c1_17 = arith.constant 1 : index
    %c0_18 = arith.constant 0 : index
    %15 = vector.load %arg8[%c9, %c1_17, %c0_18] : memref<10x18x4xbf16, #tpu.memory_space<vmem>>, vector<1x16x4xbf16>
    tpu.vector_store %arg8[%c9, %c1_17, %c0_18], %13 {strides = array<i32>} : memref<10x18x4xbf16, #tpu.memory_space<vmem>>, vector<1x16x4xbf16>,
    %c0_19 = arith.constant 0 : index
    %c0_20 = arith.constant 0 : index
    %c0_21 = arith.constant 0 : index
    %c0_22 = arith.constant 0 : index
    %16 = vector.load %arg2[%c0_19, %c0_20, %c0_21, %c0_22] : memref<1x8x16x4xbf16, #tpu.memory_space<vmem>>, vector<1x8x16x4xbf16>
    %17 = vector.shape_cast %16 : vector<1x8x16x4xbf16> to vector<8x16x4xbf16>
    %c1_23 = arith.constant 1 : index
    %c1_24 = arith.constant 1 : index
    %c0_25 = arith.constant 0 : index
    %18 = vector.load %arg8[%c1_23, %c1_24, %c0_25] : memref<10x18x4xbf16, #tpu.memory_space<vmem>>, vector<8x16x4xbf16>
    tpu.vector_store %arg8[%c1_23, %c1_24, %c0_25], %17 {strides = array<i32>} : memref<10x18x4xbf16, #tpu.memory_space<vmem>>, vector<8x16x4xbf16>,
    %cst_26 = arith.constant 0.000000e+00 : f32
    %19 = vector.broadcast %cst_26 : f32 to vector<128x128xf32>
    %c0_27 = arith.constant 0 : index
    %c0_28 = arith.constant 0 : index
    %c0_29 = arith.constant 0 : index
    %20 = vector.load %arg8[%c0_27, %c0_28, %c0_29] : memref<10x18x4xbf16, #tpu.memory_space<vmem>>, vector<8x16x4xbf16>
    %21 = vector.shape_cast %20 : vector<8x16x4xbf16> to vector<128x4xbf16>
    %c0_30 = arith.constant 0 : index
    %c0_31 = arith.constant 0 : index
    %c0_32 = arith.constant 0 : index
    %22 = vector.load %arg5[%c0_30, %c0_31, %c0_32] : memref<9x4x128xbf16, #tpu.memory_space<vmem>>, vector<1x4x128xbf16>
    %23 = vector.shape_cast %22 : vector<1x4x128xbf16> to vector<4x128xbf16>
    %cst_33 = arith.constant dense<0.000000e+00> : vector<128x128xf32>
    %24 = tpu.matmul %21, %23, %cst_33 {dimension_numbers = #tpu.dot_dimension_numbers<[1], [0], [0], [1], [0, 0, 1, 1], [], []>} : vector<128x4xbf16>, vector<4x128xbf16>, vector<128x128xf32> -> vector<128x128xf32>
    %25 = arith.addf %19, %24 : vector<128x128xf32>
    %c0_34 = arith.constant 0 : index
    %c1_35 = arith.constant 1 : index
    %c0_36 = arith.constant 0 : index
    %26 = vector.load %arg8[%c0_34, %c1_35, %c0_36] : memref<10x18x4xbf16, #tpu.memory_space<vmem>>, vector<8x16x4xbf16>
    %27 = vector.shape_cast %26 : vector<8x16x4xbf16> to vector<128x4xbf16>
    %c1_37 = arith.constant 1 : index
    %c0_38 = arith.constant 0 : index
    %c0_39 = arith.constant 0 : index
    %28 = vector.load %arg5[%c1_37, %c0_38, %c0_39] : memref<9x4x128xbf16, #tpu.memory_space<vmem>>, vector<1x4x128xbf16>
    %29 = vector.shape_cast %28 : vector<1x4x128xbf16> to vector<4x128xbf16>
    %cst_40 = arith.constant dense<0.000000e+00> : vector<128x128xf32>
    %30 = tpu.matmul %27, %29, %cst_40 {dimension_numbers = #tpu.dot_dimension_numbers<[1], [0], [0], [1], [0, 0, 1, 1], [], []>} : vector<128x4xbf16>, vector<4x128xbf16>, vector<128x128xf32> -> vector<128x128xf32>
    %31 = arith.addf %25, %30 : vector<128x128xf32>
    %c0_41 = arith.constant 0 : index
    %c2 = arith.constant 2 : index
    %c0_42 = arith.constant 0 : index
    %32 = vector.load %arg8[%c0_41, %c2, %c0_42] : memref<10x18x4xbf16, #tpu.memory_space<vmem>>, vector<8x16x4xbf16>
    %33 = vector.shape_cast %32 : vector<8x16x4xbf16> to vector<128x4xbf16>
    %c2_43 = arith.constant 2 : index
    %c0_44 = arith.constant 0 : index
    %c0_45 = arith.constant 0 : index
    %34 = vector.load %arg5[%c2_43, %c0_44, %c0_45] : memref<9x4x128xbf16, #tpu.memory_space<vmem>>, vector<1x4x128xbf16>
    %35 = vector.shape_cast %34 : vector<1x4x128xbf16> to vector<4x128xbf16>
    %cst_46 = arith.constant dense<0.000000e+00> : vector<128x128xf32>
    %36 = tpu.matmul %33, %35, %cst_46 {dimension_numbers = #tpu.dot_dimension_numbers<[1], [0], [0], [1], [0, 0, 1, 1], [], []>} : vector<128x4xbf16>, vector<4x128xbf16>, vector<128x128xf32> -> vector<128x128xf32>
    %37 = arith.addf %31, %36 : vector<128x128xf32>
    %c1_47 = arith.constant 1 : index
    %c0_48 = arith.constant 0 : index
    %c0_49 = arith.constant 0 : index
    %38 = vector.load %arg8[%c1_47, %c0_48, %c0_49] : memref<10x18x4xbf16, #tpu.memory_space<vmem>>, vector<8x16x4xbf16>
    %39 = vector.shape_cast %38 : vector<8x16x4xbf16> to vector<128x4xbf16>
    %c3 = arith.constant 3 : index
    %c0_50 = arith.constant 0 : index
    %c0_51 = arith.constant 0 : index
    %40 = vector.load %arg5[%c3, %c0_50, %c0_51] : memref<9x4x128xbf16, #tpu.memory_space<vmem>>, vector<1x4x128xbf16>
    %41 = vector.shape_cast %40 : vector<1x4x128xbf16> to vector<4x128xbf16>
    %cst_52 = arith.constant dense<0.000000e+00> : vector<128x128xf32>
    %42 = tpu.matmul %39, %41, %cst_52 {dimension_numbers = #tpu.dot_dimension_numbers<[1], [0], [0], [1], [0, 0, 1, 1], [], []>} : vector<128x4xbf16>, vector<4x128xbf16>, vector<128x128xf32> -> vector<128x128xf32>
    %43 = arith.addf %37, %42 : vector<128x128xf32>
    %c1_53 = arith.constant 1 : index
    %c1_54 = arith.constant 1 : index
    %c0_55 = arith.constant 0 : index
    %44 = vector.load %arg8[%c1_53, %c1_54, %c0_55] : memref<10x18x4xbf16, #tpu.memory_space<vmem>>, vector<8x16x4xbf16>
    %45 = vector.shape_cast %44 : vector<8x16x4xbf16> to vector<128x4xbf16>
    %c4 = arith.constant 4 : index
    %c0_56 = arith.constant 0 : index
    %c0_57 = arith.constant 0 : index
    %46 = vector.load %arg5[%c4, %c0_56, %c0_57] : memref<9x4x128xbf16, #tpu.memory_space<vmem>>, vector<1x4x128xbf16>
    %47 = vector.shape_cast %46 : vector<1x4x128xbf16> to vector<4x128xbf16>
    %cst_58 = arith.constant dense<0.000000e+00> : vector<128x128xf32>
    %48 = tpu.matmul %45, %47, %cst_58 {dimension_numbers = #tpu.dot_dimension_numbers<[1], [0], [0], [1], [0, 0, 1, 1], [], []>} : vector<128x4xbf16>, vector<4x128xbf16>, vector<128x128xf32> -> vector<128x128xf32>
    %49 = arith.addf %43, %48 : vector<128x128xf32>
    %c1_59 = arith.constant 1 : index
    %c2_60 = arith.constant 2 : index
    %c0_61 = arith.constant 0 : index
    %50 = vector.load %arg8[%c1_59, %c2_60, %c0_61] : memref<10x18x4xbf16, #tpu.memory_space<vmem>>, vector<8x16x4xbf16>
    %51 = vector.shape_cast %50 : vector<8x16x4xbf16> to vector<128x4xbf16>
    %c5 = arith.constant 5 : index
    %c0_62 = arith.constant 0 : index
    %c0_63 = arith.constant 0 : index
    %52 = vector.load %arg5[%c5, %c0_62, %c0_63] : memref<9x4x128xbf16, #tpu.memory_space<vmem>>, vector<1x4x128xbf16>
    %53 = vector.shape_cast %52 : vector<1x4x128xbf16> to vector<4x128xbf16>
    %cst_64 = arith.constant dense<0.000000e+00> : vector<128x128xf32>
    %54 = tpu.matmul %51, %53, %cst_64 {dimension_numbers = #tpu.dot_dimension_numbers<[1], [0], [0], [1], [0, 0, 1, 1], [], []>} : vector<128x4xbf16>, vector<4x128xbf16>, vector<128x128xf32> -> vector<128x128xf32>
    %55 = arith.addf %49, %54 : vector<128x128xf32>
    %c2_65 = arith.constant 2 : index
    %c0_66 = arith.constant 0 : index
    %c0_67 = arith.constant 0 : index
    %56 = vector.load %arg8[%c2_65, %c0_66, %c0_67] : memref<10x18x4xbf16, #tpu.memory_space<vmem>>, vector<8x16x4xbf16>
    %57 = vector.shape_cast %56 : vector<8x16x4xbf16> to vector<128x4xbf16>
    %c6 = arith.constant 6 : index
    %c0_68 = arith.constant 0 : index
    %c0_69 = arith.constant 0 : index
    %58 = vector.load %arg5[%c6, %c0_68, %c0_69] : memref<9x4x128xbf16, #tpu.memory_space<vmem>>, vector<1x4x128xbf16>
    %59 = vector.shape_cast %58 : vector<1x4x128xbf16> to vector<4x128xbf16>
    %cst_70 = arith.constant dense<0.000000e+00> : vector<128x128xf32>
    %60 = tpu.matmul %57, %59, %cst_70 {dimension_numbers = #tpu.dot_dimension_numbers<[1], [0], [0], [1], [0, 0, 1, 1], [], []>} : vector<128x4xbf16>, vector<4x128xbf16>, vector<128x128xf32> -> vector<128x128xf32>
    %61 = arith.addf %55, %60 : vector<128x128xf32>
    %c2_71 = arith.constant 2 : index
    %c1_72 = arith.constant 1 : index
    %c0_73 = arith.constant 0 : index
    %62 = vector.load %arg8[%c2_71, %c1_72, %c0_73] : memref<10x18x4xbf16, #tpu.memory_space<vmem>>, vector<8x16x4xbf16>
    %63 = vector.shape_cast %62 : vector<8x16x4xbf16> to vector<128x4xbf16>
    %c7 = arith.constant 7 : index
    %c0_74 = arith.constant 0 : index
    %c0_75 = arith.constant 0 : index
    %64 = vector.load %arg5[%c7, %c0_74, %c0_75] : memref<9x4x128xbf16, #tpu.memory_space<vmem>>, vector<1x4x128xbf16>
    %65 = vector.shape_cast %64 : vector<1x4x128xbf16> to vector<4x128xbf16>
    %cst_76 = arith.constant dense<0.000000e+00> : vector<128x128xf32>
    %66 = tpu.matmul %63, %65, %cst_76 {dimension_numbers = #tpu.dot_dimension_numbers<[1], [0], [0], [1], [0, 0, 1, 1], [], []>} : vector<128x4xbf16>, vector<4x128xbf16>, vector<128x128xf32> -> vector<128x128xf32>
    %67 = arith.addf %61, %66 : vector<128x128xf32>
    %c2_77 = arith.constant 2 : index
    %c2_78 = arith.constant 2 : index
    %c0_79 = arith.constant 0 : index
    %68 = vector.load %arg8[%c2_77, %c2_78, %c0_79] : memref<10x18x4xbf16, #tpu.memory_space<vmem>>, vector<8x16x4xbf16>
    %69 = vector.shape_cast %68 : vector<8x16x4xbf16> to vector<128x4xbf16>
    %c8 = arith.constant 8 : index
    %c0_80 = arith.constant 0 : index
    %c0_81 = arith.constant 0 : index
    %70 = vector.load %arg5[%c8, %c0_80, %c0_81] : memref<9x4x128xbf16, #tpu.memory_space<vmem>>, vector<1x4x128xbf16>
    %71 = vector.shape_cast %70 : vector<1x4x128xbf16> to vector<4x128xbf16>
    %cst_82 = arith.constant dense<0.000000e+00> : vector<128x128xf32>
    %72 = tpu.matmul %69, %71, %cst_82 {dimension_numbers = #tpu.dot_dimension_numbers<[1], [0], [0], [1], [0, 0, 1, 1], [], []>} : vector<128x4xbf16>, vector<4x128xbf16>, vector<128x128xf32> -> vector<128x128xf32>
    %73 = arith.addf %67, %72 : vector<128x128xf32>
    %c0_83 = arith.constant 0 : index
    %c0_84 = arith.constant 0 : index
    %74 = vector.load %arg6[%c0_83, %c0_84] : memref<1x128xf32, #tpu.memory_space<vmem>>, vector<1x128xf32>
    %75 = vector.broadcast %74 : vector<1x128xf32> to vector<128x128xf32>
    %76 = arith.addf %73, %75 : vector<128x128xf32>
    %cst_85 = arith.constant 0.000000e+00 : f32
    %77 = vector.broadcast %cst_85 : f32 to vector<128x128xf32>
    %78 = arith.maximumf %76, %77 : vector<128x128xf32>
    %79 = vector.shape_cast %78 : vector<128x128xf32> to vector<8x16x128xf32>
    %80 = vector.shape_cast %79 : vector<8x16x128xf32> to vector<8x8x2x128xf32>
    %81 = vector.extract_strided_slice %80 {offsets = [0, 0, 0, 0], sizes = [8, 8, 1, 128], strides = [1, 1, 1, 1]} : vector<8x8x2x128xf32> to vector<8x8x1x128xf32>
    %82 = vector.shape_cast %81 : vector<8x8x1x128xf32> to vector<8x8x128xf32>
    %83 = vector.extract_strided_slice %80 {offsets = [0, 0, 1, 0], sizes = [8, 8, 1, 128], strides = [1, 1, 1, 1]} : vector<8x8x2x128xf32> to vector<8x8x1x128xf32>
    %84 = vector.shape_cast %83 : vector<8x8x1x128xf32> to vector<8x8x128xf32>
    %85 = arith.maximumf %82, %84 : vector<8x8x128xf32>
    %86 = vector.shape_cast %85 : vector<8x8x128xf32> to vector<4x2x8x128xf32>
    %87 = vector.extract_strided_slice %86 {offsets = [0, 0, 0, 0], sizes = [4, 1, 8, 128], strides = [1, 1, 1, 1]} : vector<4x2x8x128xf32> to vector<4x1x8x128xf32>
    %88 = vector.shape_cast %87 : vector<4x1x8x128xf32> to vector<4x8x128xf32>
    %89 = vector.extract_strided_slice %86 {offsets = [0, 1, 0, 0], sizes = [4, 1, 8, 128], strides = [1, 1, 1, 1]} : vector<4x2x8x128xf32> to vector<4x1x8x128xf32>
    %90 = vector.shape_cast %89 : vector<4x1x8x128xf32> to vector<4x8x128xf32>
    %91 = arith.maximumf %88, %90 : vector<4x8x128xf32>
    %92 = vector.shape_cast %91 : vector<4x8x128xf32> to vector<1x4x8x128xf32>
    %93 = arith.truncf %92 : vector<1x4x8x128xf32> to vector<1x4x8x128xbf16>
    %c0_86 = arith.constant 0 : index
    %c0_87 = arith.constant 0 : index
    %c0_88 = arith.constant 0 : index
    %c0_89 = arith.constant 0 : index
    %94 = vector.load %arg7[%c0_86, %c0_87, %c0_88, %c0_89] : memref<1x4x8x128xbf16, #tpu.memory_space<vmem>>, vector<1x4x8x128xbf16>
    tpu.vector_store %arg7[%c0_86, %c0_87, %c0_88, %c0_89], %93 {strides = array<i32>} : memref<1x4x8x128xbf16, #tpu.memory_space<vmem>>, vector<1x4x8x128xbf16>,
    return
  }
  func.func @transform_0(%arg0: i32, %arg1: i32) -> (i32, i32, i32, i32) {
    %c0_i32 = arith.constant 0 : i32
    %c0_i32_0 = arith.constant 0 : i32
    %c0_i32_1 = arith.constant 0 : i32
    return %arg0, %arg1, %c0_i32, %c0_i32_0 : i32, i32, i32, i32
  }
  func.func @transform_1(%arg0: i32, %arg1: i32) -> (i32, i32, i32, i32) {
    %c8_i32 = arith.constant 8 : i32
    %0 = arith.muli %arg1, %c8_i32 : i32
    %c1_i32 = arith.constant 1 : i32
    %1 = arith.subi %0, %c1_i32 : i32
    %c0_i32 = arith.constant 0 : i32
    %2 = arith.maxsi %1, %c0_i32 : i32
    %c0_i32_0 = arith.constant 0 : i32
    %c0_i32_1 = arith.constant 0 : i32
    %c0_i32_2 = arith.constant 0 : i32
    return %arg0, %2, %c0_i32_0, %c0_i32_1 : i32, i32, i32, i32
  }
  func.func @transform_2(%arg0: i32, %arg1: i32) -> (i32, i32, i32, i32) {
    %c1_i32 = arith.constant 1 : i32
    %0 = arith.addi %arg1, %c1_i32 : i32
    %c8_i32 = arith.constant 8 : i32
    %1 = arith.muli %0, %c8_i32 : i32
    %c15_i32 = arith.constant 15 : i32
    %2 = arith.minsi %1, %c15_i32 : i32
    %c0_i32 = arith.constant 0 : i32
    %c0_i32_0 = arith.constant 0 : i32
    %c0_i32_1 = arith.constant 0 : i32
    return %arg0, %2, %c0_i32, %c0_i32_0 : i32, i32, i32, i32
  }
  func.func @transform_3(%arg0: i32, %arg1: i32) -> (i32, i32, i32) {
    %c0_i32 = arith.constant 0 : i32
    %c0_i32_0 = arith.constant 0 : i32
    %c0_i32_1 = arith.constant 0 : i32
    %c0_i32_2 = arith.constant 0 : i32
    return %c0_i32, %c0_i32_0, %c0_i32_1 : i32, i32, i32
  }
  func.func @transform_4(%arg0: i32, %arg1: i32) -> (i32, i32) {
    %c0_i32 = arith.constant 0 : i32
    %c0_i32_0 = arith.constant 0 : i32
    %c0_i32_1 = arith.constant 0 : i32
    return %c0_i32, %c0_i32_0 : i32, i32
  }
  func.func @transform_5(%arg0: i32, %arg1: i32) -> (i32, i32, i32, i32) {
    %c0_i32 = arith.constant 0 : i32
    %c0_i32_0 = arith.constant 0 : i32
    %c0_i32_1 = arith.constant 0 : i32
    return %arg0, %arg1, %c0_i32, %c0_i32_0 : i32, i32, i32, i32
  }
}

module attributes {stable_mosaic.version = 11 : i64} {
  func.func @_conv3x3_bn_relu_kernel(%arg0: i32, %arg1: i32, %arg2: memref<1x8x8x128xbf16, #tpu.memory_space<vmem>>, %arg3: memref<1x1x8x128xbf16, #tpu.memory_space<vmem>>, %arg4: memref<1x1x8x128xbf16, #tpu.memory_space<vmem>>, %arg5: memref<9x128x128xbf16, #tpu.memory_space<vmem>>, %arg6: memref<1x128xf32, #tpu.memory_space<vmem>>, %arg7: memref<1x4x4x128xbf16, #tpu.memory_space<vmem>>, %arg8: memref<10x10x128xbf16, #tpu.memory_space<vmem>>) attributes {dimension_semantics = [#tpu.dimension_semantics<parallel>, #tpu.dimension_semantics<parallel>], iteration_bounds = array<i64: 2, 1>, scalar_prefetch = 0 : i64, scratch_operands = 1 : i64, tpu.core_type = #tpu.core_type<tc>, window_params = [{transform_indices = @transform_0, window_bounds = array<i64: 1, 8, 8, 128>}, {transform_indices = @transform_1, window_bounds = array<i64: 1, 1, 8, 128>}, {transform_indices = @transform_2, window_bounds = array<i64: 1, 1, 8, 128>}, {pipeline_mode = #tpu.pipeline_mode<synchronous>, transform_indices = @transform_3, window_bounds = array<i64: 9, 128, 128>}, {pipeline_mode = #tpu.pipeline_mode<synchronous>, transform_indices = @transform_4, window_bounds = array<i64: 1, 128>}, {transform_indices = @transform_5, window_bounds = array<i64: 1, 4, 4, 128>}]} {
    %cst = arith.constant 0.000000e+00 : bf16
    %0 = vector.broadcast %cst : bf16 to vector<10x1x128xbf16>
    %c0 = arith.constant 0 : index
    %c0_0 = arith.constant 0 : index
    %c0_1 = arith.constant 0 : index
    %1 = vector.load %arg8[%c0, %c0_0, %c0_1] : memref<10x10x128xbf16, #tpu.memory_space<vmem>>, vector<10x1x128xbf16>
    tpu.vector_store %arg8[%c0, %c0_0, %c0_1], %0 {strides = array<i32>} : memref<10x10x128xbf16, #tpu.memory_space<vmem>>, vector<10x1x128xbf16>,
    %cst_2 = arith.constant 0.000000e+00 : bf16
    %2 = vector.broadcast %cst_2 : bf16 to vector<10x1x128xbf16>
    %c0_3 = arith.constant 0 : index
    %c9 = arith.constant 9 : index
    %c0_4 = arith.constant 0 : index
    %3 = vector.load %arg8[%c0_3, %c9, %c0_4] : memref<10x10x128xbf16, #tpu.memory_space<vmem>>, vector<10x1x128xbf16>
    tpu.vector_store %arg8[%c0_3, %c9, %c0_4], %2 {strides = array<i32>} : memref<10x10x128xbf16, #tpu.memory_space<vmem>>, vector<10x1x128xbf16>,
    %c0_5 = arith.constant 0 : index
    %c0_6 = arith.constant 0 : index
    %c0_7 = arith.constant 0 : index
    %c0_8 = arith.constant 0 : index
    %4 = vector.load %arg3[%c0_5, %c0_6, %c0_7, %c0_8] : memref<1x1x8x128xbf16, #tpu.memory_space<vmem>>, vector<1x1x8x128xbf16>
    %5 = vector.shape_cast %4 : vector<1x1x8x128xbf16> to vector<1x8x128xbf16>
    %c0_9 = arith.constant 0 : index
    %c0_10 = arith.constant 0 : index
    %c0_11 = arith.constant 0 : index
    %c0_12 = arith.constant 0 : index
    %6 = vector.load %arg4[%c0_9, %c0_10, %c0_11, %c0_12] : memref<1x1x8x128xbf16, #tpu.memory_space<vmem>>, vector<1x1x8x128xbf16>
    %7 = vector.shape_cast %6 : vector<1x1x8x128xbf16> to vector<1x8x128xbf16>
    %c0_i32 = arith.constant 0 : i32
    %8 = arith.cmpi eq, %arg1, %c0_i32 : i32
    %cst_13 = arith.constant 0.000000e+00 : bf16
    %9 = vector.broadcast %cst_13 : bf16 to vector<1x8x128xbf16>
    %10 = arith.select %8, %9, %5 : vector<1x8x128xbf16>
    %c0_i32_14 = arith.constant 0 : i32
    %11 = arith.cmpi eq, %arg1, %c0_i32_14 : i32
    %cst_15 = arith.constant 0.000000e+00 : bf16
    %12 = vector.broadcast %cst_15 : bf16 to vector<1x8x128xbf16>
    %13 = arith.select %11, %12, %7 : vector<1x8x128xbf16>
    %c0_16 = arith.constant 0 : index
    %c1 = arith.constant 1 : index
    %c0_17 = arith.constant 0 : index
    %14 = vector.load %arg8[%c0_16, %c1, %c0_17] : memref<10x10x128xbf16, #tpu.memory_space<vmem>>, vector<1x8x128xbf16>
    tpu.vector_store %arg8[%c0_16, %c1, %c0_17], %10 {strides = array<i32>} : memref<10x10x128xbf16, #tpu.memory_space<vmem>>, vector<1x8x128xbf16>,
    %c9_18 = arith.constant 9 : index
    %c1_19 = arith.constant 1 : index
    %c0_20 = arith.constant 0 : index
    %15 = vector.load %arg8[%c9_18, %c1_19, %c0_20] : memref<10x10x128xbf16, #tpu.memory_space<vmem>>, vector<1x8x128xbf16>
    tpu.vector_store %arg8[%c9_18, %c1_19, %c0_20], %13 {strides = array<i32>} : memref<10x10x128xbf16, #tpu.memory_space<vmem>>, vector<1x8x128xbf16>,
    %c0_21 = arith.constant 0 : index
    %c0_22 = arith.constant 0 : index
    %c0_23 = arith.constant 0 : index
    %c0_24 = arith.constant 0 : index
    %16 = vector.load %arg2[%c0_21, %c0_22, %c0_23, %c0_24] : memref<1x8x8x128xbf16, #tpu.memory_space<vmem>>, vector<1x8x8x128xbf16>
    %17 = vector.shape_cast %16 : vector<1x8x8x128xbf16> to vector<8x8x128xbf16>
    %c1_25 = arith.constant 1 : index
    %c1_26 = arith.constant 1 : index
    %c0_27 = arith.constant 0 : index
    %18 = vector.load %arg8[%c1_25, %c1_26, %c0_27] : memref<10x10x128xbf16, #tpu.memory_space<vmem>>, vector<8x8x128xbf16>
    tpu.vector_store %arg8[%c1_25, %c1_26, %c0_27], %17 {strides = array<i32>} : memref<10x10x128xbf16, #tpu.memory_space<vmem>>, vector<8x8x128xbf16>,
    %cst_28 = arith.constant 0.000000e+00 : f32
    %19 = vector.broadcast %cst_28 : f32 to vector<64x128xf32>
    %c0_29 = arith.constant 0 : index
    %c0_30 = arith.constant 0 : index
    %c0_31 = arith.constant 0 : index
    %20 = vector.load %arg8[%c0_29, %c0_30, %c0_31] : memref<10x10x128xbf16, #tpu.memory_space<vmem>>, vector<8x8x128xbf16>
    %21 = vector.shape_cast %20 : vector<8x8x128xbf16> to vector<64x128xbf16>
    %c0_32 = arith.constant 0 : index
    %c0_33 = arith.constant 0 : index
    %c0_34 = arith.constant 0 : index
    %22 = vector.load %arg5[%c0_32, %c0_33, %c0_34] : memref<9x128x128xbf16, #tpu.memory_space<vmem>>, vector<1x128x128xbf16>
    %23 = vector.shape_cast %22 : vector<1x128x128xbf16> to vector<128x128xbf16>
    %cst_35 = arith.constant dense<0.000000e+00> : vector<64x128xf32>
    %24 = tpu.matmul %21, %23, %cst_35 {dimension_numbers = #tpu.dot_dimension_numbers<[1], [0], [0], [1], [0, 0, 1, 1], [], []>} : vector<64x128xbf16>, vector<128x128xbf16>, vector<64x128xf32> -> vector<64x128xf32>
    %25 = arith.addf %19, %24 : vector<64x128xf32>
    %c0_36 = arith.constant 0 : index
    %c1_37 = arith.constant 1 : index
    %c0_38 = arith.constant 0 : index
    %26 = vector.load %arg8[%c0_36, %c1_37, %c0_38] : memref<10x10x128xbf16, #tpu.memory_space<vmem>>, vector<8x8x128xbf16>
    %27 = vector.shape_cast %26 : vector<8x8x128xbf16> to vector<64x128xbf16>
    %c1_39 = arith.constant 1 : index
    %c0_40 = arith.constant 0 : index
    %c0_41 = arith.constant 0 : index
    %28 = vector.load %arg5[%c1_39, %c0_40, %c0_41] : memref<9x128x128xbf16, #tpu.memory_space<vmem>>, vector<1x128x128xbf16>
    %29 = vector.shape_cast %28 : vector<1x128x128xbf16> to vector<128x128xbf16>
    %cst_42 = arith.constant dense<0.000000e+00> : vector<64x128xf32>
    %30 = tpu.matmul %27, %29, %cst_42 {dimension_numbers = #tpu.dot_dimension_numbers<[1], [0], [0], [1], [0, 0, 1, 1], [], []>} : vector<64x128xbf16>, vector<128x128xbf16>, vector<64x128xf32> -> vector<64x128xf32>
    %31 = arith.addf %25, %30 : vector<64x128xf32>
    %c0_43 = arith.constant 0 : index
    %c2 = arith.constant 2 : index
    %c0_44 = arith.constant 0 : index
    %32 = vector.load %arg8[%c0_43, %c2, %c0_44] : memref<10x10x128xbf16, #tpu.memory_space<vmem>>, vector<8x8x128xbf16>
    %33 = vector.shape_cast %32 : vector<8x8x128xbf16> to vector<64x128xbf16>
    %c2_45 = arith.constant 2 : index
    %c0_46 = arith.constant 0 : index
    %c0_47 = arith.constant 0 : index
    %34 = vector.load %arg5[%c2_45, %c0_46, %c0_47] : memref<9x128x128xbf16, #tpu.memory_space<vmem>>, vector<1x128x128xbf16>
    %35 = vector.shape_cast %34 : vector<1x128x128xbf16> to vector<128x128xbf16>
    %cst_48 = arith.constant dense<0.000000e+00> : vector<64x128xf32>
    %36 = tpu.matmul %33, %35, %cst_48 {dimension_numbers = #tpu.dot_dimension_numbers<[1], [0], [0], [1], [0, 0, 1, 1], [], []>} : vector<64x128xbf16>, vector<128x128xbf16>, vector<64x128xf32> -> vector<64x128xf32>
    %37 = arith.addf %31, %36 : vector<64x128xf32>
    %c1_49 = arith.constant 1 : index
    %c0_50 = arith.constant 0 : index
    %c0_51 = arith.constant 0 : index
    %38 = vector.load %arg8[%c1_49, %c0_50, %c0_51] : memref<10x10x128xbf16, #tpu.memory_space<vmem>>, vector<8x8x128xbf16>
    %39 = vector.shape_cast %38 : vector<8x8x128xbf16> to vector<64x128xbf16>
    %c3 = arith.constant 3 : index
    %c0_52 = arith.constant 0 : index
    %c0_53 = arith.constant 0 : index
    %40 = vector.load %arg5[%c3, %c0_52, %c0_53] : memref<9x128x128xbf16, #tpu.memory_space<vmem>>, vector<1x128x128xbf16>
    %41 = vector.shape_cast %40 : vector<1x128x128xbf16> to vector<128x128xbf16>
    %cst_54 = arith.constant dense<0.000000e+00> : vector<64x128xf32>
    %42 = tpu.matmul %39, %41, %cst_54 {dimension_numbers = #tpu.dot_dimension_numbers<[1], [0], [0], [1], [0, 0, 1, 1], [], []>} : vector<64x128xbf16>, vector<128x128xbf16>, vector<64x128xf32> -> vector<64x128xf32>
    %43 = arith.addf %37, %42 : vector<64x128xf32>
    %c1_55 = arith.constant 1 : index
    %c1_56 = arith.constant 1 : index
    %c0_57 = arith.constant 0 : index
    %44 = vector.load %arg8[%c1_55, %c1_56, %c0_57] : memref<10x10x128xbf16, #tpu.memory_space<vmem>>, vector<8x8x128xbf16>
    %45 = vector.shape_cast %44 : vector<8x8x128xbf16> to vector<64x128xbf16>
    %c4 = arith.constant 4 : index
    %c0_58 = arith.constant 0 : index
    %c0_59 = arith.constant 0 : index
    %46 = vector.load %arg5[%c4, %c0_58, %c0_59] : memref<9x128x128xbf16, #tpu.memory_space<vmem>>, vector<1x128x128xbf16>
    %47 = vector.shape_cast %46 : vector<1x128x128xbf16> to vector<128x128xbf16>
    %cst_60 = arith.constant dense<0.000000e+00> : vector<64x128xf32>
    %48 = tpu.matmul %45, %47, %cst_60 {dimension_numbers = #tpu.dot_dimension_numbers<[1], [0], [0], [1], [0, 0, 1, 1], [], []>} : vector<64x128xbf16>, vector<128x128xbf16>, vector<64x128xf32> -> vector<64x128xf32>
    %49 = arith.addf %43, %48 : vector<64x128xf32>
    %c1_61 = arith.constant 1 : index
    %c2_62 = arith.constant 2 : index
    %c0_63 = arith.constant 0 : index
    %50 = vector.load %arg8[%c1_61, %c2_62, %c0_63] : memref<10x10x128xbf16, #tpu.memory_space<vmem>>, vector<8x8x128xbf16>
    %51 = vector.shape_cast %50 : vector<8x8x128xbf16> to vector<64x128xbf16>
    %c5 = arith.constant 5 : index
    %c0_64 = arith.constant 0 : index
    %c0_65 = arith.constant 0 : index
    %52 = vector.load %arg5[%c5, %c0_64, %c0_65] : memref<9x128x128xbf16, #tpu.memory_space<vmem>>, vector<1x128x128xbf16>
    %53 = vector.shape_cast %52 : vector<1x128x128xbf16> to vector<128x128xbf16>
    %cst_66 = arith.constant dense<0.000000e+00> : vector<64x128xf32>
    %54 = tpu.matmul %51, %53, %cst_66 {dimension_numbers = #tpu.dot_dimension_numbers<[1], [0], [0], [1], [0, 0, 1, 1], [], []>} : vector<64x128xbf16>, vector<128x128xbf16>, vector<64x128xf32> -> vector<64x128xf32>
    %55 = arith.addf %49, %54 : vector<64x128xf32>
    %c2_67 = arith.constant 2 : index
    %c0_68 = arith.constant 0 : index
    %c0_69 = arith.constant 0 : index
    %56 = vector.load %arg8[%c2_67, %c0_68, %c0_69] : memref<10x10x128xbf16, #tpu.memory_space<vmem>>, vector<8x8x128xbf16>
    %57 = vector.shape_cast %56 : vector<8x8x128xbf16> to vector<64x128xbf16>
    %c6 = arith.constant 6 : index
    %c0_70 = arith.constant 0 : index
    %c0_71 = arith.constant 0 : index
    %58 = vector.load %arg5[%c6, %c0_70, %c0_71] : memref<9x128x128xbf16, #tpu.memory_space<vmem>>, vector<1x128x128xbf16>
    %59 = vector.shape_cast %58 : vector<1x128x128xbf16> to vector<128x128xbf16>
    %cst_72 = arith.constant dense<0.000000e+00> : vector<64x128xf32>
    %60 = tpu.matmul %57, %59, %cst_72 {dimension_numbers = #tpu.dot_dimension_numbers<[1], [0], [0], [1], [0, 0, 1, 1], [], []>} : vector<64x128xbf16>, vector<128x128xbf16>, vector<64x128xf32> -> vector<64x128xf32>
    %61 = arith.addf %55, %60 : vector<64x128xf32>
    %c2_73 = arith.constant 2 : index
    %c1_74 = arith.constant 1 : index
    %c0_75 = arith.constant 0 : index
    %62 = vector.load %arg8[%c2_73, %c1_74, %c0_75] : memref<10x10x128xbf16, #tpu.memory_space<vmem>>, vector<8x8x128xbf16>
    %63 = vector.shape_cast %62 : vector<8x8x128xbf16> to vector<64x128xbf16>
    %c7 = arith.constant 7 : index
    %c0_76 = arith.constant 0 : index
    %c0_77 = arith.constant 0 : index
    %64 = vector.load %arg5[%c7, %c0_76, %c0_77] : memref<9x128x128xbf16, #tpu.memory_space<vmem>>, vector<1x128x128xbf16>
    %65 = vector.shape_cast %64 : vector<1x128x128xbf16> to vector<128x128xbf16>
    %cst_78 = arith.constant dense<0.000000e+00> : vector<64x128xf32>
    %66 = tpu.matmul %63, %65, %cst_78 {dimension_numbers = #tpu.dot_dimension_numbers<[1], [0], [0], [1], [0, 0, 1, 1], [], []>} : vector<64x128xbf16>, vector<128x128xbf16>, vector<64x128xf32> -> vector<64x128xf32>
    %67 = arith.addf %61, %66 : vector<64x128xf32>
    %c2_79 = arith.constant 2 : index
    %c2_80 = arith.constant 2 : index
    %c0_81 = arith.constant 0 : index
    %68 = vector.load %arg8[%c2_79, %c2_80, %c0_81] : memref<10x10x128xbf16, #tpu.memory_space<vmem>>, vector<8x8x128xbf16>
    %69 = vector.shape_cast %68 : vector<8x8x128xbf16> to vector<64x128xbf16>
    %c8 = arith.constant 8 : index
    %c0_82 = arith.constant 0 : index
    %c0_83 = arith.constant 0 : index
    %70 = vector.load %arg5[%c8, %c0_82, %c0_83] : memref<9x128x128xbf16, #tpu.memory_space<vmem>>, vector<1x128x128xbf16>
    %71 = vector.shape_cast %70 : vector<1x128x128xbf16> to vector<128x128xbf16>
    %cst_84 = arith.constant dense<0.000000e+00> : vector<64x128xf32>
    %72 = tpu.matmul %69, %71, %cst_84 {dimension_numbers = #tpu.dot_dimension_numbers<[1], [0], [0], [1], [0, 0, 1, 1], [], []>} : vector<64x128xbf16>, vector<128x128xbf16>, vector<64x128xf32> -> vector<64x128xf32>
    %73 = arith.addf %67, %72 : vector<64x128xf32>
    %c0_85 = arith.constant 0 : index
    %c0_86 = arith.constant 0 : index
    %74 = vector.load %arg6[%c0_85, %c0_86] : memref<1x128xf32, #tpu.memory_space<vmem>>, vector<1x128xf32>
    %75 = vector.broadcast %74 : vector<1x128xf32> to vector<64x128xf32>
    %76 = arith.addf %73, %75 : vector<64x128xf32>
    %cst_87 = arith.constant 0.000000e+00 : f32
    %77 = vector.broadcast %cst_87 : f32 to vector<64x128xf32>
    %78 = arith.maximumf %76, %77 : vector<64x128xf32>
    %79 = vector.shape_cast %78 : vector<64x128xf32> to vector<8x8x128xf32>
    %80 = vector.shape_cast %79 : vector<8x8x128xf32> to vector<8x4x2x128xf32>
    %81 = vector.extract_strided_slice %80 {offsets = [0, 0, 0, 0], sizes = [8, 4, 1, 128], strides = [1, 1, 1, 1]} : vector<8x4x2x128xf32> to vector<8x4x1x128xf32>
    %82 = vector.shape_cast %81 : vector<8x4x1x128xf32> to vector<8x4x128xf32>
    %83 = vector.extract_strided_slice %80 {offsets = [0, 0, 1, 0], sizes = [8, 4, 1, 128], strides = [1, 1, 1, 1]} : vector<8x4x2x128xf32> to vector<8x4x1x128xf32>
    %84 = vector.shape_cast %83 : vector<8x4x1x128xf32> to vector<8x4x128xf32>
    %85 = arith.maximumf %82, %84 : vector<8x4x128xf32>
    %86 = vector.shape_cast %85 : vector<8x4x128xf32> to vector<4x2x4x128xf32>
    %87 = vector.extract_strided_slice %86 {offsets = [0, 0, 0, 0], sizes = [4, 1, 4, 128], strides = [1, 1, 1, 1]} : vector<4x2x4x128xf32> to vector<4x1x4x128xf32>
    %88 = vector.shape_cast %87 : vector<4x1x4x128xf32> to vector<4x4x128xf32>
    %89 = vector.extract_strided_slice %86 {offsets = [0, 1, 0, 0], sizes = [4, 1, 4, 128], strides = [1, 1, 1, 1]} : vector<4x2x4x128xf32> to vector<4x1x4x128xf32>
    %90 = vector.shape_cast %89 : vector<4x1x4x128xf32> to vector<4x4x128xf32>
    %91 = arith.maximumf %88, %90 : vector<4x4x128xf32>
    %92 = vector.shape_cast %91 : vector<4x4x128xf32> to vector<1x4x4x128xf32>
    %93 = arith.truncf %92 : vector<1x4x4x128xf32> to vector<1x4x4x128xbf16>
    %c0_88 = arith.constant 0 : index
    %c0_89 = arith.constant 0 : index
    %c0_90 = arith.constant 0 : index
    %c0_91 = arith.constant 0 : index
    %94 = vector.load %arg7[%c0_88, %c0_89, %c0_90, %c0_91] : memref<1x4x4x128xbf16, #tpu.memory_space<vmem>>, vector<1x4x4x128xbf16>
    tpu.vector_store %arg7[%c0_88, %c0_89, %c0_90, %c0_91], %93 {strides = array<i32>} : memref<1x4x4x128xbf16, #tpu.memory_space<vmem>>, vector<1x4x4x128xbf16>,
    return
  }
  func.func @transform_0(%arg0: i32, %arg1: i32) -> (i32, i32, i32, i32) {
    %c0_i32 = arith.constant 0 : i32
    %c0_i32_0 = arith.constant 0 : i32
    %c0_i32_1 = arith.constant 0 : i32
    return %arg0, %arg1, %c0_i32, %c0_i32_0 : i32, i32, i32, i32
  }
  func.func @transform_1(%arg0: i32, %arg1: i32) -> (i32, i32, i32, i32) {
    %c8_i32 = arith.constant 8 : i32
    %0 = arith.muli %arg1, %c8_i32 : i32
    %c1_i32 = arith.constant 1 : i32
    %1 = arith.subi %0, %c1_i32 : i32
    %c0_i32 = arith.constant 0 : i32
    %2 = arith.maxsi %1, %c0_i32 : i32
    %c0_i32_0 = arith.constant 0 : i32
    %c0_i32_1 = arith.constant 0 : i32
    %c0_i32_2 = arith.constant 0 : i32
    return %arg0, %2, %c0_i32_0, %c0_i32_1 : i32, i32, i32, i32
  }
  func.func @transform_2(%arg0: i32, %arg1: i32) -> (i32, i32, i32, i32) {
    %c1_i32 = arith.constant 1 : i32
    %0 = arith.addi %arg1, %c1_i32 : i32
    %c8_i32 = arith.constant 8 : i32
    %1 = arith.muli %0, %c8_i32 : i32
    %c7_i32 = arith.constant 7 : i32
    %2 = arith.minsi %1, %c7_i32 : i32
    %c0_i32 = arith.constant 0 : i32
    %c0_i32_0 = arith.constant 0 : i32
    %c0_i32_1 = arith.constant 0 : i32
    return %arg0, %2, %c0_i32, %c0_i32_0 : i32, i32, i32, i32
  }
  func.func @transform_3(%arg0: i32, %arg1: i32) -> (i32, i32, i32) {
    %c0_i32 = arith.constant 0 : i32
    %c0_i32_0 = arith.constant 0 : i32
    %c0_i32_1 = arith.constant 0 : i32
    %c0_i32_2 = arith.constant 0 : i32
    return %c0_i32, %c0_i32_0, %c0_i32_1 : i32, i32, i32
  }
  func.func @transform_4(%arg0: i32, %arg1: i32) -> (i32, i32) {
    %c0_i32 = arith.constant 0 : i32
    %c0_i32_0 = arith.constant 0 : i32
    %c0_i32_1 = arith.constant 0 : i32
    return %c0_i32, %c0_i32_0 : i32, i32
  }
  func.func @transform_5(%arg0: i32, %arg1: i32) -> (i32, i32, i32, i32) {
    %c0_i32 = arith.constant 0 : i32
    %c0_i32_0 = arith.constant 0 : i32
    %c0_i32_1 = arith.constant 0 : i32
    return %arg0, %arg1, %c0_i32, %c0_i32_0 : i32, i32, i32, i32
  }
}

module attributes {stable_mosaic.version = 11 : i64} {
  func.func @_conv3x3_bn_relu_kernel(%arg0: i32, %arg1: i32, %arg2: memref<1x4x4x128xbf16, #tpu.memory_space<vmem>>, %arg3: memref<1x1x4x128xbf16, #tpu.memory_space<vmem>>, %arg4: memref<1x1x4x128xbf16, #tpu.memory_space<vmem>>, %arg5: memref<9x128x128xbf16, #tpu.memory_space<vmem>>, %arg6: memref<1x128xf32, #tpu.memory_space<vmem>>, %arg7: memref<1x2x2x128xbf16, #tpu.memory_space<vmem>>, %arg8: memref<6x6x128xbf16, #tpu.memory_space<vmem>>) attributes {dimension_semantics = [#tpu.dimension_semantics<parallel>, #tpu.dimension_semantics<parallel>], iteration_bounds = array<i64: 2, 1>, scalar_prefetch = 0 : i64, scratch_operands = 1 : i64, tpu.core_type = #tpu.core_type<tc>, window_params = [{transform_indices = @transform_0, window_bounds = array<i64: 1, 4, 4, 128>}, {transform_indices = @transform_1, window_bounds = array<i64: 1, 1, 4, 128>}, {transform_indices = @transform_2, window_bounds = array<i64: 1, 1, 4, 128>}, {pipeline_mode = #tpu.pipeline_mode<synchronous>, transform_indices = @transform_3, window_bounds = array<i64: 9, 128, 128>}, {pipeline_mode = #tpu.pipeline_mode<synchronous>, transform_indices = @transform_4, window_bounds = array<i64: 1, 128>}, {transform_indices = @transform_5, window_bounds = array<i64: 1, 2, 2, 128>}]} {
    %cst = arith.constant 0.000000e+00 : bf16
    %0 = vector.broadcast %cst : bf16 to vector<6x1x128xbf16>
    %c0 = arith.constant 0 : index
    %c0_0 = arith.constant 0 : index
    %c0_1 = arith.constant 0 : index
    %1 = vector.load %arg8[%c0, %c0_0, %c0_1] : memref<6x6x128xbf16, #tpu.memory_space<vmem>>, vector<6x1x128xbf16>
    tpu.vector_store %arg8[%c0, %c0_0, %c0_1], %0 {strides = array<i32>} : memref<6x6x128xbf16, #tpu.memory_space<vmem>>, vector<6x1x128xbf16>,
    %cst_2 = arith.constant 0.000000e+00 : bf16
    %2 = vector.broadcast %cst_2 : bf16 to vector<6x1x128xbf16>
    %c0_3 = arith.constant 0 : index
    %c5 = arith.constant 5 : index
    %c0_4 = arith.constant 0 : index
    %3 = vector.load %arg8[%c0_3, %c5, %c0_4] : memref<6x6x128xbf16, #tpu.memory_space<vmem>>, vector<6x1x128xbf16>
    tpu.vector_store %arg8[%c0_3, %c5, %c0_4], %2 {strides = array<i32>} : memref<6x6x128xbf16, #tpu.memory_space<vmem>>, vector<6x1x128xbf16>,
    %c0_5 = arith.constant 0 : index
    %c0_6 = arith.constant 0 : index
    %c0_7 = arith.constant 0 : index
    %c0_8 = arith.constant 0 : index
    %4 = vector.load %arg3[%c0_5, %c0_6, %c0_7, %c0_8] : memref<1x1x4x128xbf16, #tpu.memory_space<vmem>>, vector<1x1x4x128xbf16>
    %5 = vector.shape_cast %4 : vector<1x1x4x128xbf16> to vector<1x4x128xbf16>
    %c0_9 = arith.constant 0 : index
    %c0_10 = arith.constant 0 : index
    %c0_11 = arith.constant 0 : index
    %c0_12 = arith.constant 0 : index
    %6 = vector.load %arg4[%c0_9, %c0_10, %c0_11, %c0_12] : memref<1x1x4x128xbf16, #tpu.memory_space<vmem>>, vector<1x1x4x128xbf16>
    %7 = vector.shape_cast %6 : vector<1x1x4x128xbf16> to vector<1x4x128xbf16>
    %c0_i32 = arith.constant 0 : i32
    %8 = arith.cmpi eq, %arg1, %c0_i32 : i32
    %cst_13 = arith.constant 0.000000e+00 : bf16
    %9 = vector.broadcast %cst_13 : bf16 to vector<1x4x128xbf16>
    %10 = arith.select %8, %9, %5 : vector<1x4x128xbf16>
    %c0_i32_14 = arith.constant 0 : i32
    %11 = arith.cmpi eq, %arg1, %c0_i32_14 : i32
    %cst_15 = arith.constant 0.000000e+00 : bf16
    %12 = vector.broadcast %cst_15 : bf16 to vector<1x4x128xbf16>
    %13 = arith.select %11, %12, %7 : vector<1x4x128xbf16>
    %c0_16 = arith.constant 0 : index
    %c1 = arith.constant 1 : index
    %c0_17 = arith.constant 0 : index
    %14 = vector.load %arg8[%c0_16, %c1, %c0_17] : memref<6x6x128xbf16, #tpu.memory_space<vmem>>, vector<1x4x128xbf16>
    tpu.vector_store %arg8[%c0_16, %c1, %c0_17], %10 {strides = array<i32>} : memref<6x6x128xbf16, #tpu.memory_space<vmem>>, vector<1x4x128xbf16>,
    %c5_18 = arith.constant 5 : index
    %c1_19 = arith.constant 1 : index
    %c0_20 = arith.constant 0 : index
    %15 = vector.load %arg8[%c5_18, %c1_19, %c0_20] : memref<6x6x128xbf16, #tpu.memory_space<vmem>>, vector<1x4x128xbf16>
    tpu.vector_store %arg8[%c5_18, %c1_19, %c0_20], %13 {strides = array<i32>} : memref<6x6x128xbf16, #tpu.memory_space<vmem>>, vector<1x4x128xbf16>,
    %c0_21 = arith.constant 0 : index
    %c0_22 = arith.constant 0 : index
    %c0_23 = arith.constant 0 : index
    %c0_24 = arith.constant 0 : index
    %16 = vector.load %arg2[%c0_21, %c0_22, %c0_23, %c0_24] : memref<1x4x4x128xbf16, #tpu.memory_space<vmem>>, vector<1x4x4x128xbf16>
    %17 = vector.shape_cast %16 : vector<1x4x4x128xbf16> to vector<4x4x128xbf16>
    %c1_25 = arith.constant 1 : index
    %c1_26 = arith.constant 1 : index
    %c0_27 = arith.constant 0 : index
    %18 = vector.load %arg8[%c1_25, %c1_26, %c0_27] : memref<6x6x128xbf16, #tpu.memory_space<vmem>>, vector<4x4x128xbf16>
    tpu.vector_store %arg8[%c1_25, %c1_26, %c0_27], %17 {strides = array<i32>} : memref<6x6x128xbf16, #tpu.memory_space<vmem>>, vector<4x4x128xbf16>,
    %cst_28 = arith.constant 0.000000e+00 : f32
    %19 = vector.broadcast %cst_28 : f32 to vector<16x128xf32>
    %c0_29 = arith.constant 0 : index
    %c0_30 = arith.constant 0 : index
    %c0_31 = arith.constant 0 : index
    %20 = vector.load %arg8[%c0_29, %c0_30, %c0_31] : memref<6x6x128xbf16, #tpu.memory_space<vmem>>, vector<4x4x128xbf16>
    %21 = vector.shape_cast %20 : vector<4x4x128xbf16> to vector<16x128xbf16>
    %c0_32 = arith.constant 0 : index
    %c0_33 = arith.constant 0 : index
    %c0_34 = arith.constant 0 : index
    %22 = vector.load %arg5[%c0_32, %c0_33, %c0_34] : memref<9x128x128xbf16, #tpu.memory_space<vmem>>, vector<1x128x128xbf16>
    %23 = vector.shape_cast %22 : vector<1x128x128xbf16> to vector<128x128xbf16>
    %cst_35 = arith.constant dense<0.000000e+00> : vector<16x128xf32>
    %24 = tpu.matmul %21, %23, %cst_35 {dimension_numbers = #tpu.dot_dimension_numbers<[1], [0], [0], [1], [0, 0, 1, 1], [], []>} : vector<16x128xbf16>, vector<128x128xbf16>, vector<16x128xf32> -> vector<16x128xf32>
    %25 = arith.addf %19, %24 : vector<16x128xf32>
    %c0_36 = arith.constant 0 : index
    %c1_37 = arith.constant 1 : index
    %c0_38 = arith.constant 0 : index
    %26 = vector.load %arg8[%c0_36, %c1_37, %c0_38] : memref<6x6x128xbf16, #tpu.memory_space<vmem>>, vector<4x4x128xbf16>
    %27 = vector.shape_cast %26 : vector<4x4x128xbf16> to vector<16x128xbf16>
    %c1_39 = arith.constant 1 : index
    %c0_40 = arith.constant 0 : index
    %c0_41 = arith.constant 0 : index
    %28 = vector.load %arg5[%c1_39, %c0_40, %c0_41] : memref<9x128x128xbf16, #tpu.memory_space<vmem>>, vector<1x128x128xbf16>
    %29 = vector.shape_cast %28 : vector<1x128x128xbf16> to vector<128x128xbf16>
    %cst_42 = arith.constant dense<0.000000e+00> : vector<16x128xf32>
    %30 = tpu.matmul %27, %29, %cst_42 {dimension_numbers = #tpu.dot_dimension_numbers<[1], [0], [0], [1], [0, 0, 1, 1], [], []>} : vector<16x128xbf16>, vector<128x128xbf16>, vector<16x128xf32> -> vector<16x128xf32>
    %31 = arith.addf %25, %30 : vector<16x128xf32>
    %c0_43 = arith.constant 0 : index
    %c2 = arith.constant 2 : index
    %c0_44 = arith.constant 0 : index
    %32 = vector.load %arg8[%c0_43, %c2, %c0_44] : memref<6x6x128xbf16, #tpu.memory_space<vmem>>, vector<4x4x128xbf16>
    %33 = vector.shape_cast %32 : vector<4x4x128xbf16> to vector<16x128xbf16>
    %c2_45 = arith.constant 2 : index
    %c0_46 = arith.constant 0 : index
    %c0_47 = arith.constant 0 : index
    %34 = vector.load %arg5[%c2_45, %c0_46, %c0_47] : memref<9x128x128xbf16, #tpu.memory_space<vmem>>, vector<1x128x128xbf16>
    %35 = vector.shape_cast %34 : vector<1x128x128xbf16> to vector<128x128xbf16>
    %cst_48 = arith.constant dense<0.000000e+00> : vector<16x128xf32>
    %36 = tpu.matmul %33, %35, %cst_48 {dimension_numbers = #tpu.dot_dimension_numbers<[1], [0], [0], [1], [0, 0, 1, 1], [], []>} : vector<16x128xbf16>, vector<128x128xbf16>, vector<16x128xf32> -> vector<16x128xf32>
    %37 = arith.addf %31, %36 : vector<16x128xf32>
    %c1_49 = arith.constant 1 : index
    %c0_50 = arith.constant 0 : index
    %c0_51 = arith.constant 0 : index
    %38 = vector.load %arg8[%c1_49, %c0_50, %c0_51] : memref<6x6x128xbf16, #tpu.memory_space<vmem>>, vector<4x4x128xbf16>
    %39 = vector.shape_cast %38 : vector<4x4x128xbf16> to vector<16x128xbf16>
    %c3 = arith.constant 3 : index
    %c0_52 = arith.constant 0 : index
    %c0_53 = arith.constant 0 : index
    %40 = vector.load %arg5[%c3, %c0_52, %c0_53] : memref<9x128x128xbf16, #tpu.memory_space<vmem>>, vector<1x128x128xbf16>
    %41 = vector.shape_cast %40 : vector<1x128x128xbf16> to vector<128x128xbf16>
    %cst_54 = arith.constant dense<0.000000e+00> : vector<16x128xf32>
    %42 = tpu.matmul %39, %41, %cst_54 {dimension_numbers = #tpu.dot_dimension_numbers<[1], [0], [0], [1], [0, 0, 1, 1], [], []>} : vector<16x128xbf16>, vector<128x128xbf16>, vector<16x128xf32> -> vector<16x128xf32>
    %43 = arith.addf %37, %42 : vector<16x128xf32>
    %c1_55 = arith.constant 1 : index
    %c1_56 = arith.constant 1 : index
    %c0_57 = arith.constant 0 : index
    %44 = vector.load %arg8[%c1_55, %c1_56, %c0_57] : memref<6x6x128xbf16, #tpu.memory_space<vmem>>, vector<4x4x128xbf16>
    %45 = vector.shape_cast %44 : vector<4x4x128xbf16> to vector<16x128xbf16>
    %c4 = arith.constant 4 : index
    %c0_58 = arith.constant 0 : index
    %c0_59 = arith.constant 0 : index
    %46 = vector.load %arg5[%c4, %c0_58, %c0_59] : memref<9x128x128xbf16, #tpu.memory_space<vmem>>, vector<1x128x128xbf16>
    %47 = vector.shape_cast %46 : vector<1x128x128xbf16> to vector<128x128xbf16>
    %cst_60 = arith.constant dense<0.000000e+00> : vector<16x128xf32>
    %48 = tpu.matmul %45, %47, %cst_60 {dimension_numbers = #tpu.dot_dimension_numbers<[1], [0], [0], [1], [0, 0, 1, 1], [], []>} : vector<16x128xbf16>, vector<128x128xbf16>, vector<16x128xf32> -> vector<16x128xf32>
    %49 = arith.addf %43, %48 : vector<16x128xf32>
    %c1_61 = arith.constant 1 : index
    %c2_62 = arith.constant 2 : index
    %c0_63 = arith.constant 0 : index
    %50 = vector.load %arg8[%c1_61, %c2_62, %c0_63] : memref<6x6x128xbf16, #tpu.memory_space<vmem>>, vector<4x4x128xbf16>
    %51 = vector.shape_cast %50 : vector<4x4x128xbf16> to vector<16x128xbf16>
    %c5_64 = arith.constant 5 : index
    %c0_65 = arith.constant 0 : index
    %c0_66 = arith.constant 0 : index
    %52 = vector.load %arg5[%c5_64, %c0_65, %c0_66] : memref<9x128x128xbf16, #tpu.memory_space<vmem>>, vector<1x128x128xbf16>
    %53 = vector.shape_cast %52 : vector<1x128x128xbf16> to vector<128x128xbf16>
    %cst_67 = arith.constant dense<0.000000e+00> : vector<16x128xf32>
    %54 = tpu.matmul %51, %53, %cst_67 {dimension_numbers = #tpu.dot_dimension_numbers<[1], [0], [0], [1], [0, 0, 1, 1], [], []>} : vector<16x128xbf16>, vector<128x128xbf16>, vector<16x128xf32> -> vector<16x128xf32>
    %55 = arith.addf %49, %54 : vector<16x128xf32>
    %c2_68 = arith.constant 2 : index
    %c0_69 = arith.constant 0 : index
    %c0_70 = arith.constant 0 : index
    %56 = vector.load %arg8[%c2_68, %c0_69, %c0_70] : memref<6x6x128xbf16, #tpu.memory_space<vmem>>, vector<4x4x128xbf16>
    %57 = vector.shape_cast %56 : vector<4x4x128xbf16> to vector<16x128xbf16>
    %c6 = arith.constant 6 : index
    %c0_71 = arith.constant 0 : index
    %c0_72 = arith.constant 0 : index
    %58 = vector.load %arg5[%c6, %c0_71, %c0_72] : memref<9x128x128xbf16, #tpu.memory_space<vmem>>, vector<1x128x128xbf16>
    %59 = vector.shape_cast %58 : vector<1x128x128xbf16> to vector<128x128xbf16>
    %cst_73 = arith.constant dense<0.000000e+00> : vector<16x128xf32>
    %60 = tpu.matmul %57, %59, %cst_73 {dimension_numbers = #tpu.dot_dimension_numbers<[1], [0], [0], [1], [0, 0, 1, 1], [], []>} : vector<16x128xbf16>, vector<128x128xbf16>, vector<16x128xf32> -> vector<16x128xf32>
    %61 = arith.addf %55, %60 : vector<16x128xf32>
    %c2_74 = arith.constant 2 : index
    %c1_75 = arith.constant 1 : index
    %c0_76 = arith.constant 0 : index
    %62 = vector.load %arg8[%c2_74, %c1_75, %c0_76] : memref<6x6x128xbf16, #tpu.memory_space<vmem>>, vector<4x4x128xbf16>
    %63 = vector.shape_cast %62 : vector<4x4x128xbf16> to vector<16x128xbf16>
    %c7 = arith.constant 7 : index
    %c0_77 = arith.constant 0 : index
    %c0_78 = arith.constant 0 : index
    %64 = vector.load %arg5[%c7, %c0_77, %c0_78] : memref<9x128x128xbf16, #tpu.memory_space<vmem>>, vector<1x128x128xbf16>
    %65 = vector.shape_cast %64 : vector<1x128x128xbf16> to vector<128x128xbf16>
    %cst_79 = arith.constant dense<0.000000e+00> : vector<16x128xf32>
    %66 = tpu.matmul %63, %65, %cst_79 {dimension_numbers = #tpu.dot_dimension_numbers<[1], [0], [0], [1], [0, 0, 1, 1], [], []>} : vector<16x128xbf16>, vector<128x128xbf16>, vector<16x128xf32> -> vector<16x128xf32>
    %67 = arith.addf %61, %66 : vector<16x128xf32>
    %c2_80 = arith.constant 2 : index
    %c2_81 = arith.constant 2 : index
    %c0_82 = arith.constant 0 : index
    %68 = vector.load %arg8[%c2_80, %c2_81, %c0_82] : memref<6x6x128xbf16, #tpu.memory_space<vmem>>, vector<4x4x128xbf16>
    %69 = vector.shape_cast %68 : vector<4x4x128xbf16> to vector<16x128xbf16>
    %c8 = arith.constant 8 : index
    %c0_83 = arith.constant 0 : index
    %c0_84 = arith.constant 0 : index
    %70 = vector.load %arg5[%c8, %c0_83, %c0_84] : memref<9x128x128xbf16, #tpu.memory_space<vmem>>, vector<1x128x128xbf16>
    %71 = vector.shape_cast %70 : vector<1x128x128xbf16> to vector<128x128xbf16>
    %cst_85 = arith.constant dense<0.000000e+00> : vector<16x128xf32>
    %72 = tpu.matmul %69, %71, %cst_85 {dimension_numbers = #tpu.dot_dimension_numbers<[1], [0], [0], [1], [0, 0, 1, 1], [], []>} : vector<16x128xbf16>, vector<128x128xbf16>, vector<16x128xf32> -> vector<16x128xf32>
    %73 = arith.addf %67, %72 : vector<16x128xf32>
    %c0_86 = arith.constant 0 : index
    %c0_87 = arith.constant 0 : index
    %74 = vector.load %arg6[%c0_86, %c0_87] : memref<1x128xf32, #tpu.memory_space<vmem>>, vector<1x128xf32>
    %75 = vector.broadcast %74 : vector<1x128xf32> to vector<16x128xf32>
    %76 = arith.addf %73, %75 : vector<16x128xf32>
    %cst_88 = arith.constant 0.000000e+00 : f32
    %77 = vector.broadcast %cst_88 : f32 to vector<16x128xf32>
    %78 = arith.maximumf %76, %77 : vector<16x128xf32>
    %79 = vector.shape_cast %78 : vector<16x128xf32> to vector<4x4x128xf32>
    %80 = vector.shape_cast %79 : vector<4x4x128xf32> to vector<4x2x2x128xf32>
    %81 = vector.extract_strided_slice %80 {offsets = [0, 0, 0, 0], sizes = [4, 2, 1, 128], strides = [1, 1, 1, 1]} : vector<4x2x2x128xf32> to vector<4x2x1x128xf32>
    %82 = vector.shape_cast %81 : vector<4x2x1x128xf32> to vector<4x2x128xf32>
    %83 = vector.extract_strided_slice %80 {offsets = [0, 0, 1, 0], sizes = [4, 2, 1, 128], strides = [1, 1, 1, 1]} : vector<4x2x2x128xf32> to vector<4x2x1x128xf32>
    %84 = vector.shape_cast %83 : vector<4x2x1x128xf32> to vector<4x2x128xf32>
    %85 = arith.addf %82, %84 : vector<4x2x128xf32>
    %86 = vector.shape_cast %85 : vector<4x2x128xf32> to vector<2x2x2x128xf32>
    %87 = vector.extract_strided_slice %86 {offsets = [0, 0, 0, 0], sizes = [2, 1, 2, 128], strides = [1, 1, 1, 1]} : vector<2x2x2x128xf32> to vector<2x1x2x128xf32>
    %88 = vector.shape_cast %87 : vector<2x1x2x128xf32> to vector<2x2x128xf32>
    %89 = vector.extract_strided_slice %86 {offsets = [0, 1, 0, 0], sizes = [2, 1, 2, 128], strides = [1, 1, 1, 1]} : vector<2x2x2x128xf32> to vector<2x1x2x128xf32>
    %90 = vector.shape_cast %89 : vector<2x1x2x128xf32> to vector<2x2x128xf32>
    %91 = arith.addf %88, %90 : vector<2x2x128xf32>
    %cst_89 = arith.constant 2.500000e-01 : f32
    %92 = vector.broadcast %cst_89 : f32 to vector<2x2x128xf32>
    %93 = arith.mulf %91, %92 : vector<2x2x128xf32>
    %94 = vector.shape_cast %93 : vector<2x2x128xf32> to vector<1x2x2x128xf32>
    %95 = arith.truncf %94 : vector<1x2x2x128xf32> to vector<1x2x2x128xbf16>
    %c0_90 = arith.constant 0 : index
    %c0_91 = arith.constant 0 : index
    %c0_92 = arith.constant 0 : index
    %c0_93 = arith.constant 0 : index
    %96 = vector.load %arg7[%c0_90, %c0_91, %c0_92, %c0_93] : memref<1x2x2x128xbf16, #tpu.memory_space<vmem>>, vector<1x2x2x128xbf16>
    tpu.vector_store %arg7[%c0_90, %c0_91, %c0_92, %c0_93], %95 {strides = array<i32>} : memref<1x2x2x128xbf16, #tpu.memory_space<vmem>>, vector<1x2x2x128xbf16>,
    return
  }
  func.func @transform_0(%arg0: i32, %arg1: i32) -> (i32, i32, i32, i32) {
    %c0_i32 = arith.constant 0 : i32
    %c0_i32_0 = arith.constant 0 : i32
    %c0_i32_1 = arith.constant 0 : i32
    return %arg0, %arg1, %c0_i32, %c0_i32_0 : i32, i32, i32, i32
  }
  func.func @transform_1(%arg0: i32, %arg1: i32) -> (i32, i32, i32, i32) {
    %c4_i32 = arith.constant 4 : i32
    %0 = arith.muli %arg1, %c4_i32 : i32
    %c1_i32 = arith.constant 1 : i32
    %1 = arith.subi %0, %c1_i32 : i32
    %c0_i32 = arith.constant 0 : i32
    %2 = arith.maxsi %1, %c0_i32 : i32
    %c0_i32_0 = arith.constant 0 : i32
    %c0_i32_1 = arith.constant 0 : i32
    %c0_i32_2 = arith.constant 0 : i32
    return %arg0, %2, %c0_i32_0, %c0_i32_1 : i32, i32, i32, i32
  }
  func.func @transform_2(%arg0: i32, %arg1: i32) -> (i32, i32, i32, i32) {
    %c1_i32 = arith.constant 1 : i32
    %0 = arith.addi %arg1, %c1_i32 : i32
    %c4_i32 = arith.constant 4 : i32
    %1 = arith.muli %0, %c4_i32 : i32
    %c3_i32 = arith.constant 3 : i32
    %2 = arith.minsi %1, %c3_i32 : i32
    %c0_i32 = arith.constant 0 : i32
    %c0_i32_0 = arith.constant 0 : i32
    %c0_i32_1 = arith.constant 0 : i32
    return %arg0, %2, %c0_i32, %c0_i32_0 : i32, i32, i32, i32
  }
  func.func @transform_3(%arg0: i32, %arg1: i32) -> (i32, i32, i32) {
    %c0_i32 = arith.constant 0 : i32
    %c0_i32_0 = arith.constant 0 : i32
    %c0_i32_1 = arith.constant 0 : i32
    %c0_i32_2 = arith.constant 0 : i32
    return %c0_i32, %c0_i32_0, %c0_i32_1 : i32, i32, i32
  }
  func.func @transform_4(%arg0: i32, %arg1: i32) -> (i32, i32) {
    %c0_i32 = arith.constant 0 : i32
    %c0_i32_0 = arith.constant 0 : i32
    %c0_i32_1 = arith.constant 0 : i32
    return %c0_i32, %c0_i32_0 : i32, i32
  }
  func.func @transform_5(%arg0: i32, %arg1: i32) -> (i32, i32, i32, i32) {
    %c0_i32 = arith.constant 0 : i32
    %c0_i32_0 = arith.constant 0 : i32
    %c0_i32_1 = arith.constant 0 : i32
    return %arg0, %arg1, %c0_i32, %c0_i32_0 : i32, i32, i32, i32
  }
}

module attributes {stable_mosaic.version = 11 : i64} {
  func.func @_linear_kernel(%arg0: i32, %arg1: i32, %arg2: memref<2x256xbf16, #tpu.memory_space<vmem>>, %arg3: memref<256x128xbf16, #tpu.memory_space<vmem>>, %arg4: memref<1x128xf32, #tpu.memory_space<vmem>>, %arg5: memref<2x128xf32, #tpu.memory_space<vmem>>, %arg6: memref<2x128xf32, #tpu.memory_space<vmem>>) attributes {dimension_semantics = [#tpu.dimension_semantics<parallel>, #tpu.dimension_semantics<arbitrary>], iteration_bounds = array<i64: 1, 2>, scalar_prefetch = 0 : i64, scratch_operands = 1 : i64, tpu.core_type = #tpu.core_type<tc>, window_params = [{transform_indices = @transform_0, window_bounds = array<i64: 2, 256>}, {transform_indices = @transform_1, window_bounds = array<i64: 256, 128>}, {transform_indices = @transform_2, window_bounds = array<i64: 1, 128>}, {transform_indices = @transform_3, window_bounds = array<i64: 2, 128>}]} {
    %c0_i32 = arith.constant 0 : i32
    %0 = arith.cmpi eq, %arg1, %c0_i32 : i32
    %1 = arith.extui %0 : i1 to i32
    %c0_i32_0 = arith.constant 0 : i32
    %2 = arith.cmpi ne, %1, %c0_i32_0 : i32
    scf.if %2 {
      %cst_9 = arith.constant 0.000000e+00 : f32
      %12 = vector.broadcast %cst_9 : f32 to vector<2x128xf32>
      %c0_10 = arith.constant 0 : index
      %c0_11 = arith.constant 0 : index
      %13 = vector.load %arg6[%c0_10, %c0_11] : memref<2x128xf32, #tpu.memory_space<vmem>>, vector<2x128xf32>
      tpu.vector_store %arg6[%c0_10, %c0_11], %12 {strides = array<i32>} : memref<2x128xf32, #tpu.memory_space<vmem>>, vector<2x128xf32>,
    } else {
    }
    %c0 = arith.constant 0 : index
    %c0_1 = arith.constant 0 : index
    %3 = vector.load %arg6[%c0, %c0_1] : memref<2x128xf32, #tpu.memory_space<vmem>>, vector<2x128xf32>
    %c0_2 = arith.constant 0 : index
    %c0_3 = arith.constant 0 : index
    %4 = vector.load %arg2[%c0_2, %c0_3] : memref<2x256xbf16, #tpu.memory_space<vmem>>, vector<2x256xbf16>
    %c0_4 = arith.constant 0 : index
    %c0_5 = arith.constant 0 : index
    %5 = vector.load %arg3[%c0_4, %c0_5] : memref<256x128xbf16, #tpu.memory_space<vmem>>, vector<256x128xbf16>
    %cst = arith.constant dense<0.000000e+00> : vector<2x128xf32>
    %6 = tpu.matmul %4, %5, %cst {dimension_numbers = #tpu.dot_dimension_numbers<[1], [0], [0], [1], [0, 0, 1, 1], [], []>} : vector<2x256xbf16>, vector<256x128xbf16>, vector<2x128xf32> -> vector<2x128xf32>
    %7 = arith.addf %3, %6 : vector<2x128xf32>
    %c0_6 = arith.constant 0 : index
    %c0_7 = arith.constant 0 : index
    %8 = vector.load %arg6[%c0_6, %c0_7] : memref<2x128xf32, #tpu.memory_space<vmem>>, vector<2x128xf32>
    tpu.vector_store %arg6[%c0_6, %c0_7], %7 {strides = array<i32>} : memref<2x128xf32, #tpu.memory_space<vmem>>, vector<2x128xf32>,
    %c1_i32 = arith.constant 1 : i32
    %9 = arith.cmpi eq, %arg1, %c1_i32 : i32
    %10 = arith.extui %9 : i1 to i32
    %c0_i32_8 = arith.constant 0 : i32
    %11 = arith.cmpi ne, %10, %c0_i32_8 : i32
    scf.if %11 {
      %c0_9 = arith.constant 0 : index
      %c0_10 = arith.constant 0 : index
      %12 = vector.load %arg6[%c0_9, %c0_10] : memref<2x128xf32, #tpu.memory_space<vmem>>, vector<2x128xf32>
      %c0_11 = arith.constant 0 : index
      %c0_12 = arith.constant 0 : index
      %13 = vector.load %arg4[%c0_11, %c0_12] : memref<1x128xf32, #tpu.memory_space<vmem>>, vector<1x128xf32>
      %14 = vector.broadcast %13 : vector<1x128xf32> to vector<2x128xf32>
      %15 = arith.addf %12, %14 : vector<2x128xf32>
      %c0_13 = arith.constant 0 : index
      %c0_14 = arith.constant 0 : index
      %16 = vector.load %arg5[%c0_13, %c0_14] : memref<2x128xf32, #tpu.memory_space<vmem>>, vector<2x128xf32>
      tpu.vector_store %arg5[%c0_13, %c0_14], %15 {strides = array<i32>} : memref<2x128xf32, #tpu.memory_space<vmem>>, vector<2x128xf32>,
    } else {
    }
    return
  }
  func.func @transform_0(%arg0: i32, %arg1: i32) -> (i32, i32) {
    %c0_i32 = arith.constant 0 : i32
    %c0_i32_0 = arith.constant 0 : i32
    return %c0_i32, %arg1 : i32, i32
  }
  func.func @transform_1(%arg0: i32, %arg1: i32) -> (i32, i32) {
    %c0_i32 = arith.constant 0 : i32
    return %arg1, %arg0 : i32, i32
  }
  func.func @transform_2(%arg0: i32, %arg1: i32) -> (i32, i32) {
    %c0_i32 = arith.constant 0 : i32
    %c0_i32_0 = arith.constant 0 : i32
    return %c0_i32, %arg0 : i32, i32
  }
  func.func @transform_3(%arg0: i32, %arg1: i32) -> (i32, i32) {
    %c0_i32 = arith.constant 0 : i32
    %c0_i32_0 = arith.constant 0 : i32
    return %c0_i32, %arg0 : i32, i32
  }
}

</mosaic_0001>

<bundles_post_ra>
// kernel: _lambda_.7
= control target key start
LH: loop header
LB: loop body
LE: loop exit
PB: predicated region body
PF: predicated region fallthrough
CT: control target
= control target key end

     0   :  { %8 = vsyncpa [#allocation4], 0  ;;  %s700_s12 = smov 0   ;;  %s702_s13 = smov 0   ;;  %s792_s0 = inlined_call_operand.vmem [shape: bf16[2,512], index: 0, kind: input, shape index: {}]   ;;  %s793_s1 = inlined_call_operand.vmem [shape: bf16[512,128], index: 1, kind: input, shape index: {}]   ;;  %s794_s2 = inlined_call_operand.vmem [shape: f32[1,128], index: 2, kind: input, shape index: {}]   ;;  %s795_s3 = inlined_call_operand.hbm [shape: f32[2,128], index: 3, kind: output, shape index: {}]  }
   0x1   :  { %s704_s14 = smov 0  }
   0x2 LB: > { %s520_s15 = sadd.s32 4294967295, %s675_s14   ;;  %s23_s16 = sadd.s32 1, %s671_s13  ;;  %s675_s14 = sphi %s704_s14, %s14_s14   ;;  %s671_s13 = sphi %s702_s13, %s798_s13   ;;  %s667_s12 = sphi %s700_s12, %s797_s12  }
   0x3   : > { %p24_p0 = scmp.ge.s32.totalorder %s23_s16, 2  ;;  %p524_p1 = scmp.ge.s32.totalorder %s675_s14, 1 }
   0x4   : > { %p174_p2 = scmp.lt.s32.totalorder %s675_s14, 3 }
   0x5   : > { %s800_s16 = smov (%p24_p0, %s23_s16), 0 }
   0x6   : > { %p175_p3 = pnand %p524_p1, %p174_p2 }
   0x7   : > { %s525_s17 = sshll.u32 (!%p175_p3), %s667_s12, 1  ;;  %s526_s18 = sshll.u32 (!%p175_p3), %s667_s12, 5 }
   0x8   : > { %178 = sbr.rel (%p175_p3) target bundleno = 310 (0x136), region = 32  ;;  %p204_p4 = scmp.lt.s32.totalorder (!%p175_p3), %s525_s17, 3 }
   0x9   : > { %p209_p5 = scmp.lt.s32.totalorder (!%p175_p3), %s526_s18, 63  ;;  %p528_p6 = scmp.ne.s32.totalorder (!%p175_p3), %s667_s12, 0 }
   0xf   : > { %s802_s17 = smov (!%p204_p4, %s525_s17), 3  ;;  %s804_s18 = smov (!%p209_p5, %s526_s18), 63 }
  0x10   : > { %s206_s21 = scalar_lea.vmem %s792_s0, %s802_s17  ;;  %s527_s22 = sshll.u32 %s804_s18, 2  ;;  %v677_v0 = vmov (!%p528_p6), 0.0  }
  0x11   : > { %s732_s25 = scalar_lea.vmem %s793_s1, %s527_s22  ;;  %224 = sbr.rel (%p528_p6) target bundleno = 24 (0x18), region = 36  ;;  %225 = vst [vmem:[#allocation2] sm:$0x3] (!%p528_p6), %v677_v0 }
  0x18 PF: > { %v607_v1 = vld [vmem:[%s732_s25 + $0x40] sm:$0xff]   ;;  %v609_v3 = vld [vmem:[%s732_s25 + $0x48] sm:$0xff]   ;;  %v611_v5 = vld [vmem:[%s732_s25 + $0x50] sm:$0xff]   ;;  %v272_v10 = vlaneseq  ;;  %v678_v14 = vmov 1966171168   ;;  %p546_p7 = scmp.ne.s32.totalorder %s667_s12, 1 }
  0x19   : > { %v608_v2 = vld [vmem:[%s732_s25] sm:$0xff]   ;;  %552 = vmatprep.subr.bf16.mxu0 %v607_v1  ;;  %v610_v4 = vld [vmem:[%s732_s25 + $0x8] sm:$0xff]   ;;  %v612_v6 = vld [vmem:[%s732_s25 + $0x10] sm:$0xff]   ;;  %v270_v15 = vunpack.c.l.s4 %v678_v14 }
  0x1a   : > { %553 = vmatpush3.bf16.msra.mxu0 %v608_v2  ;;  %v613_v7 = vld [vmem:[%s732_s25 + $0x58] sm:$0xff]   ;;  %v615_v9 = vld [vmem:[%s732_s25 + $0x60] sm:$0xff]   ;;  %v617_v12 = vld [vmem:[%s732_s25 + $0x68] sm:$0xff]   ;;  %v273_v16 = vshrl.u32 %v272_v10, 7 }
  0x1b   : > { %554 = vmatprep.subr.bf16.mxu0 %v609_v3  ;;  %v614_v8 = vld [vmem:[%s732_s25 + $0x18] sm:$0xff]   ;;  %v616_v11 = vld [vmem:[%s732_s25 + $0x20] sm:$0xff]   ;;  %v618_v17 = vld [vmem:[%s732_s25 + $0x28] sm:$0xff]   ;;  %v271_v19 = vunpack.c.0.s8 %v270_v15 }
  0x1c   : > { %v529_v13 = vld.sshfl [vmem:[%s206_s21] sm:$0x11 pattern:$0x75316420]  ;;  %v619_v20 = vld [vmem:[%s732_s25 + $0x70] sm:$0xff]   ;;  %v621_v24 = vld [vmem:[%s732_s25 + $0x78] sm:$0xff]  }
  0x1d   : > { %v268_v18 = vcombine.high %v529_v13, %v529_v13  ;;  %v274_v21 = vsub.s32 %v271_v19, %v273_v16  ;;  %v620_v22 = vld [vmem:[%s732_s25 + $0x30] sm:$0xff]   ;;  %v622_v25 = vld [vmem:[%s732_s25 + $0x38] sm:$0xff]   ;;  %v226_v28 = vld [vmem:[#allocation2] sm:$0x3] }
  0x1e   : > { %555 = vmatpush3.bf16.msra.mxu0 %v610_v4  ;;  %v547_v35 = vld [vmem:[%s794_s2] ss:$0 sm:$0xff] (!%p546_p7) }
  0x1f   : > { %556 = vmatprep.subr.bf16.mxu0 %v611_v5  ;;  %v282_v23 = vrot.slane %v268_v18, %v274_v21  ;;  %v275_v26 = vrot.slane %v529_v13, %v274_v21 }
  0x21   : > { %413 = vmatprep.mubr.bf16.mxu0 %v282_v23 }
  0x22   : > { %557 = vmatpush3.bf16.msra.mxu0 %v612_v6 }
  0x23   : > { %558 = vmatprep.subr.bf16.mxu0 %v613_v7 }
  0x26   : > { %559 = vmatpush3.bf16.msra.mxu0 %v614_v8 }
  0x27   : > { %560 = vmatprep.subr.bf16.mxu0 %v615_v9 }
  0x2a   : > { %561 = vmatpush3.bf16.msra.mxu0 %v616_v11 }
  0x2b   : > { %562 = vmatprep.subr.bf16.mxu0 %v617_v12 }
  0x2e   : > { %563 = vmatpush3.bf16.msra.mxu0 %v618_v17 }
  0x2f   : > { %564 = vmatprep.subr.bf16.mxu0 %v619_v20 }
  0x32   : > { %565 = vmatpush3.bf16.msra.mxu0 %v620_v22 }
  0x33   : > { %566 = vmatprep.subr.bf16.mxu0 %v621_v24 }
  0x36   : > { %567 = vmatpush3.bf16.msra.mxu0 %v622_v25 }
  0x39   : > { %414 = vmatmul.mubr.bf16.vlgmr.msra.gmra.mrb[0].mxu0 %v275_v26 }
 0x10c   : > { %v568_v27 = vpop.f32.mrb[0].mxu0  ;;  %426 = sbr.rel (%p546_p7) target bundleno = 285 (0x11d), region = 40 }
 0x10d   : > { %v569_v29 = vpop.f32.mrb[1].mxu0 }
 0x10e   : > { %v570_v30 = vadd.f32 %v569_v29, %v568_v27  ;;  %v571_v31 = vpop.f32.mrb[2].mxu0 }
 0x10f   : > { %v572_v32 = vpop.f32.mrb[3].mxu0 }
 0x110   : > { %v421_v33 = vadd.f32 %v570_v30, %v226_v28 }
 0x112   : > { %422 = vst [vmem:[#allocation2] sm:$0x3] %v421_v33 }
 0x119   : > { %v427_v34 = vld [vmem:[#allocation2] sm:$0x3] }
 0x11a   : > { %v435_v36 = vadd.f32 %v547_v35, %v427_v34 }
 0x11c   : > { %436 = vst [vmem:[#allocation3] sm:$0x3] %v435_v36 }
 0x11d PF: > { %p757_p8 = scmp.eq.s32.totalorder %s520_s15, 1  ;;  %s679_s29 = smov [#allocation3]  }
 0x11e   : > { %s446_s30 = sshll.u32 %s679_s29, 4  ;;  %s447_s30 = int_to_ptr.vmem [resolvable:$true] %s446_s30 }
 0x11f   : > { %s623_s4 = scalar_lea.vmem %s447_s30, 32  ;;  %p630_p12 = scmp.lt.s32.totalorder %s447_s30, %s447_s30 }
 0x120   : > { %p624_p9 = scmp.ne.s32.totalorder %s447_s30, %s623_s4  ;;  %p631_p13 = scmp.lt.s32.totalorder %s623_s4, %s623_s4 }
 0x122   : > { %p625_p10 = pnand %p624_p9, %p757_p8  ;;  %p632_p0 = por %p631_p13, %p630_p12 }
 0x124   : > { %p626_p11 = pneg %p625_p10 }
 0x126   : > { %p633_p1 = pnand %p632_p0, %p626_p11 }
 0x128   : > { %636 = shalt.err (!%p633_p1)
}
 0x129   : > { %s637_s7 = scalar_lea.hbm %s795_s3, 32 }
 0x12a   : > { %p638_p2 = scmp.ne.s32.totalorder %s795_s3, %s637_s7  ;;  %p643_p5 = scmp.lt.u32.totalorder %s637_s7, %s795_s3 }
 0x12c   : > { %p639_p3 = pnand %p638_p2, %p757_p8 }
 0x12e   : > { %p640_p4 = pneg %p639_p3 }
 0x130   : > { %p645_p6 = pnand %p643_p5, %p640_p4 }
 0x132   : > { %648 = shalt.err (!%p645_p6)
}
 0x133   : > { %575 = dma.vmem_to_hbm [thread:$0]  (%p757_p8), %s447_s30, 32, %s795_s3, [#allocation4]  }
 0x134   : > { %662 = dma.done.wait (%p757_p8), [#allocation4], 32  }
 0x135   : > { %664 = vsyncadd (%p757_p8), [#allocation4], 4294967264 }
 0x136 PF: > { %s14_s14 = sadd.s32 1, %s675_s14   ;;  %s797_s12 = smov %s671_s13 }
 0x137   : > { %p11_p7 = scmp.ge.s32.totalorder %s14_s14, 4   ;;  %s798_s13 = smov %s800_s16 }
 0x139   :  { %13 = sbr.rel (!%p11_p7) target bundleno = 2 (0x2), region = 74 }
 0x140   :  { %459 = vsyncpa [#allocation4], 1 }
 0x141   :  { %461 = vsyncpa [#allocation4 + $0x1], 1 }

// kernel: _lambda_.6
= control target key start
LH: loop header
LB: loop body
LE: loop exit
PB: predicated region body
PF: predicated region fallthrough
CT: control target
= control target key end

     0   :  { %s3260_s18 = smov 0   ;;  %s3262_s19 = smov 0   ;;  %s3807_s0 = inlined_call_operand.vmem [shape: bf16[2,4,4,128], index: 0, kind: input, shape index: {}, may-alias: {0,1,2}]   ;;  %s3808_s1 = inlined_call_operand.vmem [shape: bf16[2,4,4,128], index: 1, kind: input, shape index: {}, may-alias: {0,1,2}]   ;;  %s3809_s2 = inlined_call_operand.vmem [shape: bf16[2,4,4,128], index: 2, kind: input, shape index: {}, may-alias: {0,1,2}]   ;;  %s3810_s3 = inlined_call_operand.vmem [shape: bf16[9,128,128], index: 3, kind: input, shape index: {}]   ;;  %s3811_s4 = inlined_call_operand.vmem [shape: f32[1,128], index: 4, kind: input, shape index: {}]   ;;  %s3812_s5 = inlined_call_operand.vmem [shape: bf16[2,2,2,128], index: 5, kind: output, shape index: {}]  }
   0x1   :  { %s3264_s20 = smov 0  }
   0x2 LB: > { %s27_s21 = sadd.s32 1, %s3218_s19  ;;  %p2559_p0 = scmp.ge.s32.totalorder %s3222_s20, 1  ;;  %s3222_s20 = sphi %s3264_s20, %s15_s20   ;;  %s3218_s19 = sphi %s3262_s19, %s3826_s19   ;;  %s3214_s18 = sphi %s3260_s18, %s3825_s18  }
   0x3   : > { %p29_p1 = scmp.ge.s32.totalorder %s27_s21, 2  ;;  %p270_p2 = scmp.lt.s32.totalorder %s3222_s20, 3 }
   0x5   : > { %s3828_s21 = smov (%p29_p1, %s27_s21), 0  ;;  %p271_p3 = pnand %p2559_p0, %p270_p2 }
   0x6   : > { %v3116_v0 = vld [vmem:[%s3810_s3 + $0x40] sm:$0xff] (!%p271_p3)   ;;  %v3224_v1 = vmov (!%p271_p3), 0.0   ;;  %v3118_v3 = vld [vmem:[%s3810_s3 + $0x48] sm:$0xff] (!%p271_p3)   ;;  %vm3225_vm0 = vmmov (!%p271_p3), 0   ;;  %p330_p4 = scmp.lt.s32.totalorder (!%p271_p3), %s3214_s18, 1  ;;  %v3120_v5 = vld [vmem:[%s3810_s3 + $0x50] sm:$0xff] (!%p271_p3)   ;;  %v439_v8 = vlaneseq (!%p271_p3) }
   0x7   : > { %274 = sbr.rel (%p271_p3) target bundleno = 439 (0x1b7), region = 40  ;;  %2906 = vmatprep.subr.bf16.mxu0 (!%p271_p3), %v3224_v1  ;;  %2926 = vmatprep.subr.bf16.mxu1 (!%p271_p3), %v3224_v1  ;;  %v3117_v2 = vld [vmem:[%s3810_s3] sm:$0xff] (!%p271_p3)   ;;  %v3119_v4 = vld [vmem:[%s3810_s3 + $0x8] sm:$0xff] (!%p271_p3)   ;;  %v3121_v6 = vld [vmem:[%s3810_s3 + $0x10] sm:$0xff] (!%p271_p3)   ;;  %vm382_vm1 = vcmask (!%p271_p3), 1040384   ;;  %vm403_vm2 = vcmask (!%p271_p3), 1042434  }
   0x8   : > { %2907 = vmatpush3.bf16.msra.mxu0 (!%p271_p3), %v3116_v0  ;;  %2922 = vmatprep.mubr.msk.bf16.mxu0 (!%p271_p3), %vm3225_vm0, %v3224_v1  ;;  %v3122_v7 = vld [vmem:[%s3810_s3 + $0x58] sm:$0xff] (!%p271_p3)   ;;  %v3124_v10 = vld [vmem:[%s3810_s3 + $0x60] sm:$0xff] (!%p271_p3)   ;;  %v3326_v11 = vshrl.u32 (!%p271_p3), %v439_v8, 7  ;;  %vm451_vm3 = vcmask (!%p271_p3), 1042432   ;;  %v3126_v13 = vld [vmem:[%s3810_s3 + $0x68] sm:$0xff] (!%p271_p3)   ;;  %v3226_v16 = vmov (!%p271_p3), 1  }
   0x9   : > { %2927 = vmatpush3.bf16.msra.mxu1 (!%p271_p3), %v3117_v2  ;;  %2908 = vmatprep.subr.bf16.mxu0 (!%p271_p3), %v3224_v1  ;;  %v3123_v9 = vld [vmem:[%s3810_s3 + $0x18] sm:$0xff] (!%p271_p3)   ;;  %v3125_v12 = vld [vmem:[%s3810_s3 + $0x20] sm:$0xff] (!%p271_p3)   ;;  %vm383_vm4 = vsmask.f32 (!%p271_p3), 256  ;;  %v3336_v17 = vpack.c.b16 (!%p271_p3), %v3226_v16, %v3226_v16  ;;  %vm3340_vm5 = vmor (!%p271_p3), %vm382_vm1, %vm403_vm2  ;;  %vm404_vm7 = vsmask.f32 (!%p271_p3), 7946 }
   0xa   : > { %2928 = vmatprep.subr.bf16.mxu1 (!%p271_p3), %v3224_v1  ;;  %2942 = vmatprep.mubr.msk.bf16.mxu1 (!%p271_p3), %vm3225_vm0, %v3224_v1  ;;  %v385_v14 = vld [vmem:[#allocation2] sm:$0x1] (!%p271_p3)  ;;  %v388_v15 = vld [vmem:[#allocation2 + $0x4] sm:$0x1] (!%p271_p3)  ;;  %vm3345_vm6 = vmand (!%p271_p3), %vm382_vm1, %vm383_vm4  ;;  %v3227_v39 = vmov (!%p271_p3), 1983009808  }
   0xb   : > { %v391_v20 = vld [vmem:[#allocation2 + $0x8] sm:$0x1] (!%p271_p3)  ;;  %v394_v21 = vld [vmem:[#allocation2 + $0xc] sm:$0x1] (!%p271_p3)  ;;  %v386_v22 = vsel (!%p271_p3), %vm3345_vm6, 0, %v385_v14  ;;  %v389_v23 = vsel (!%p271_p3), %vm3345_vm6, 0, %v388_v15  ;;  %vm3362_vm8 = vmand (!%p271_p3), %vm403_vm2, %vm404_vm7  ;;  %v437_v40 = vunpack.c.l.s4 (!%p271_p3), %v3227_v39 }
   0xc   : > { %2909 = vmatpush3.bf16.msra.mxu0 (!%p271_p3), %v3118_v3  ;;  %v392_v24 = vsel (!%p271_p3), %vm3345_vm6, 0, %v391_v20  ;;  %v395_v25 = vsel (!%p271_p3), %vm3345_vm6, 0, %v394_v21  ;;  %v406_v27 = vld [vmem:[#allocation2] sm:$0x4] (!%p271_p3)  ;;  %v3127_v28 = vld [vmem:[%s3810_s3 + $0x28] sm:$0xff] (!%p271_p3)   ;;  %v3128_v32 = vld [vmem:[%s3810_s3 + $0x70] sm:$0xff] (!%p271_p3)  }
   0xd   : > { %2929 = vmatpush3.bf16.msra.mxu1 (!%p271_p3), %v3119_v4  ;;  %2910 = vmatprep.subr.bf16.mxu0 (!%p271_p3), %v3224_v1  ;;  %387 = vst [vmem:[#allocation2] sm:$0x1] (!%p271_p3), %v386_v22  ;;  %390 = vst [vmem:[#allocation2 + $0x4] sm:$0x1] (!%p271_p3), %v389_v23  ;;  %v407_v29 = vsel (!%p271_p3), %vm3362_vm8, 0, %v406_v27  ;;  %vm432_vm9 = vcmp.ne.s16.totalorder (!%p271_p3), %v3336_v17, 0  ;;  %v438_v45 = vunpack.c.0.s8 (!%p271_p3), %v437_v40 }
   0xe   : > { %2930 = vmatprep.subr.bf16.mxu1 %v3224_v1  ;;  %s3830_s18 = smov (!%p330_p4, %s3214_s18), 1  ;;  %393 = vst [vmem:[#allocation2 + $0x8] sm:$0x1] %v392_v24  ;;  %396 = vst [vmem:[#allocation2 + $0xc] sm:$0x1] %v395_v25  ;;  %v3129_v36 = vld [vmem:[%s3810_s3 + $0x30] sm:$0xff]  }
   0xf   : > { %s3321_s13 = sshll.u32 %s3830_s18, 3  ;;  %v409_v30 = vld [vmem:[#allocation2 + $0x4] sm:$0x4]  ;;  %v412_v31 = vld [vmem:[#allocation2 + $0x8] sm:$0x4]  ;;  %v3130_v53 = vld [vmem:[%s3810_s3 + $0x78] sm:$0xff]   ;;  %v3403_v54 = vsub.s32 %v438_v45, %v3326_v11 }
  0x10   : > { %2911 = vmatpush3.bf16.msra.mxu0 %v3120_v5  ;;  %s350_s26 = scalar_lea.vmem %s3808_s1, %s3321_s13  ;;  %s3374_s6 = scalar_lea.vmem %s3807_s0, %s3321_s13  ;;  %408 = vst [vmem:[#allocation2] sm:$0x4] %v407_v29  ;;  %v410_v33 = vsel %vm3362_vm8, 0, %v409_v30  ;;  %v413_v34 = vsel %vm3362_vm8, 0, %v412_v31  ;;  %v415_v35 = vld [vmem:[#allocation2 + $0xc] sm:$0x4] }
  0x11   : > { %2931 = vmatpush3.bf16.msra.mxu1 %v3121_v6  ;;  %2912 = vmatprep.subr.bf16.mxu0 %v3224_v1  ;;  %411 = vst [vmem:[#allocation2 + $0x4] sm:$0x4] %v410_v33  ;;  %414 = vst [vmem:[#allocation2 + $0x8] sm:$0x4] %v413_v34  ;;  %v416_v37 = vsel %vm3362_vm8, 0, %v415_v35  ;;  %v3131_v57 = vld [vmem:[%s3810_s3 + $0x38] sm:$0xff]  }
  0x12   : > { %2932 = vmatprep.subr.bf16.mxu1 %v3224_v1  ;;  %v424_v38 = vld [vmem:[%s350_s26] sm:$0x3]  ;;  %417 = vst [vmem:[#allocation2 + $0xc] sm:$0x4] %v416_v37  ;;  %vm452_vm10 = vsmask.f32 2306 }
  0x13   : > { %v2567_v41 = vld.sshfl [vmem:[%s3374_s6] sm:$0x3 pattern:$0x76325410]  ;;  %v433_v49 = vsel %vm432_vm9, 0, %v424_v38  ;;  %vm3407_vm11 = vmand %vm451_vm3, %vm452_vm10  ;;  %vm957_vm4 = vcmask 1044484  }
  0x14   : > { %2913 = vmatpush3.bf16.msra.mxu0 %v3122_v7  ;;  %v2568_v42 = vld.sshfl [vmem:[%s3374_s6 + $0x2] sm:$0x3 pattern:$0x76325410]  ;;  %v514_v43 = vshrl.u32 %v2567_v41, 16  ;;  %v517_v44 = vshll.u32 %v2567_v41, 16  ;;  %v442_v60 = vrot.slane %v433_v49, %v3403_v54  ;;  %vm958_vm10 = vmor %vm3340_vm5, %vm957_vm4 }
  0x15   : > { %2933 = vmatpush3.bf16.msra.mxu1 %v3123_v9  ;;  %2914 = vmatprep.subr.bf16.mxu0 %v3224_v1  ;;  %v2569_v46 = vld.sshfl [vmem:[%s3374_s6 + $0x4] sm:$0x3 pattern:$0x76325410]  ;;  %v521_v47 = vshrl.u32 %v2568_v42, 16  ;;  %v524_v48 = vshll.u32 %v2568_v42, 16 }
  0x16   : > { %2934 = vmatprep.subr.bf16.mxu1 %v3224_v1  ;;  %v516_v50 = vrot.slane %v514_v43, 7  ;;  %v528_v51 = vshrl.u32 %v2569_v46, 16  ;;  %v531_v52 = vshll.u32 %v2569_v46, 16  ;;  %vm618_vm12 = vsmask.f32 1280  ;;  %v3142_v18 = vld [vmem:[%s3810_s3 + $0xa0] sm:$0xff]  }
  0x17   : > { %v523_v56 = vrot.slane %v521_v47, 7  ;;  %v444_v4 = vshrl.u32 %v442_v60, 16  ;;  %v447_v5 = vshll.u32 %v442_v60, 16  ;;  %v454_v9 = vld [vmem:[#allocation2] sm:$0x7]  ;;  %vm959_vm7 = vcmask 1046534  }
  0x18   : > { %2915 = vmatpush3.bf16.msra.mxu0 %v3124_v10  ;;  %v519_v58 = vor.u32 %v517_v44, %v516_v50  ;;  %v530_v59 = vrot.slane %v528_v51, 7  ;;  %v546_v62 = vld [vmem:[#allocation2 + $0x4] sm:$0x7]  ;;  %v549_v63 = vld [vmem:[#allocation2 + $0x8] sm:$0x7]  ;;  %vm3513_vm5 = vmor %vm958_vm10, %vm959_vm7  ;;  %s2823_s14 = sadd.s32 6, %s3321_s13 }
  0x19   : > { %2935 = vmatpush3.bf16.msra.mxu1 %v3125_v12  ;;  %2916 = vmatprep.subr.bf16.mxu0 %v3224_v1  ;;  %v526_v61 = vor.u32 %v524_v48, %v523_v56  ;;  %v552_v3 = vld [vmem:[#allocation2 + $0xc] sm:$0x7]  ;;  %v446_v8 = vrot.slane %v444_v4, 7  ;;  %vm619_vm13 = vsmask.f32 3336  ;;  %s366_s13 = scalar_lea.vmem %s3809_s2, %s2823_s14  ;;  %v3158_v26 = vld [vmem:[%s3810_s3 + $0x118] sm:$0xff]  }
  0x1a   : > { %2936 = vmatprep.subr.bf16.mxu1 %v3224_v1  ;;  %v533_v0 = vor.u32 %v531_v52, %v530_v59  ;;  %v547_v2 = vsel %vm3407_vm11, %v519_v58, %v546_v62  ;;  %vm621_vm14 = vsmask.f32 5392  ;;  %vm623_vm15 = vsmask.f32 7448  ;;  %vm620_vm1 = vmor %vm618_vm12, %vm619_vm13  ;;  %s2566_s9 = sshll.u32 %s3830_s18, 1 }
  0x1b   : > { %548 = vst [vmem:[#allocation2 + $0x4] sm:$0x7] %v547_v2  ;;  %v550_v6 = vsel %vm3407_vm11, %v526_v61, %v549_v63  ;;  %v449_v10 = vor.u32 %v447_v5, %v446_v8  ;;  %vm622_vm2 = vmor %vm620_vm1, %vm621_vm14  ;;  %s378_s12 = scalar_lea.vmem %s3812_s5, %s2566_s9 }
  0x1c   : > { %2917 = vmatpush3.bf16.msra.mxu0 %v3126_v13  ;;  %551 = vst [vmem:[#allocation2 + $0x8] sm:$0x7] %v550_v6  ;;  %v553_v7 = vsel %vm3407_vm11, %v533_v0, %v552_v3  ;;  %vm3430_vm3 = vmor %vm622_vm2, %vm623_vm15  ;;  %v3135_v0 = vld [vmem:[%s3810_s3 + $0xc0] sm:$0xff]  }
  0x1d   : > { %2937 = vmatpush3.bf16.msra.mxu1 %v3127_v28  ;;  %2918 = vmatprep.subr.bf16.mxu0 %v3224_v1  ;;  %554 = vst [vmem:[#allocation2 + $0xc] sm:$0x7] %v553_v7  ;;  %v455_v12 = vsel %vm3407_vm11, %v449_v10, %v454_v9  ;;  %v3137_v7 = vld [vmem:[%s3810_s3 + $0xc8] sm:$0xff]  }
  0x1e   : > { %2938 = vmatprep.subr.bf16.mxu1 %v3224_v1  ;;  %456 = vst [vmem:[#allocation2] sm:$0x7] %v455_v12  ;;  %v3134_v12 = vld [vmem:[%s3810_s3 + $0x80] sm:$0xff]  }
  0x20   : > { %2919 = vmatpush3.bf16.msra.mxu0 %v3128_v32 }
  0x21   : > { %2939 = vmatpush3.bf16.msra.mxu1 %v3129_v36  ;;  %2920 = vmatprep.subr.bf16.mxu0 %v3224_v1 }
  0x22   : > { %2940 = vmatprep.subr.bf16.mxu1 %v3224_v1  ;;  %v2572_v13 = vld.sshfl [vmem:[#allocation2 + $0x4] sm:$0x13 pattern:$0x76325410] }
  0x23   : > { %v2573_v14 = vld.sshfl [vmem:[#allocation2 + $0x8] sm:$0x13 pattern:$0x76325410]  ;;  %v601_v15 = vcombine.high %v2572_v13, %v2572_v13  ;;  %v640_v16 = vshrl.u32 %v2572_v13, 16  ;;  %v643_v20 = vshll.u32 %v2572_v13, 16 }
  0x24   : > { %2921 = vmatpush3.bf16.msra.mxu0 %v3130_v53  ;;  %v2574_v21 = vld.sshfl [vmem:[#allocation2 + $0xc] sm:$0x13 pattern:$0x76325410]  ;;  %v609_v22 = vcombine.high %v2573_v14, %v2573_v14  ;;  %v654_v23 = vshrl.u32 %v2573_v14, 16  ;;  %v657_v24 = vshll.u32 %v2573_v14, 16 }
  0x25   : > { %2941 = vmatpush3.bf16.msra.mxu1 %v3131_v57  ;;  %2946 = vmatprep.subr.bf16.mxu0 %v3224_v1  ;;  %v617_v25 = vcombine.high %v2574_v21, %v2574_v21  ;;  %v642_v27 = vrot.slane %v640_v16, 6  ;;  %v645_v28 = vrot.slane %v643_v20, 7  ;;  %v649_v29 = vshll.u32 %v601_v15, 16  ;;  %v3139_v13 = vld [vmem:[%s3810_s3 + $0xd0] sm:$0xff]  }
  0x26   : > { %2966 = vmatprep.subr.bf16.mxu1 %v3224_v1  ;;  %v656_v30 = vrot.slane %v654_v23, 6  ;;  %v659_v31 = vrot.slane %v657_v24, 7  ;;  %v663_v32 = vshll.u32 %v609_v22, 16  ;;  %v668_v33 = vshrl.u32 %v2574_v21, 16  ;;  %v397_v14 = vld [vmem:[#allocation2 + $0x10] sm:$0x1] }
  0x27   : > { %v646_v34 = vor.u32 %v645_v28, %v642_v27  ;;  %v651_v35 = vrot.slane %v649_v29, 7  ;;  %v671_v36 = vshll.u32 %v2574_v21, 16  ;;  %v677_v37 = vshll.u32 %v617_v25, 16  ;;  %v418_v15 = vld [vmem:[#allocation2 + $0x10] sm:$0x4]  ;;  %v3136_v24 = vld [vmem:[%s3810_s3 + $0x88] sm:$0xff]  }
  0x28   : > { %v3194_v38 = vld.sshfl [vmem:[#allocation2 + $0x8] sm:$0xf pattern:$0x76325410]  ;;  %v660_v40 = vor.u32 %v659_v31, %v656_v30  ;;  %v665_v41 = vrot.slane %v663_v32, 7  ;;  %v670_v42 = vrot.slane %v668_v33, 6 }
  0x29   : > { %v2571_v43 = vld.sshfl [vmem:[#allocation2] sm:$0x13 pattern:$0x76325410]  ;;  %v647_v44 = vrot.slane %v646_v34, 2  ;;  %v673_v45 = vrot.slane %v671_v36, 7 }
  0x2a   : > { %v593_v46 = vcombine.high %v2571_v43, %v2571_v43  ;;  %v626_v47 = vshrl.u32 %v2571_v43, 16  ;;  %v629_v48 = vshll.u32 %v2571_v43, 16  ;;  %v661_v49 = vrot.slane %v660_v40, 2  ;;  %v3141_v28 = vld [vmem:[%s3810_s3 + $0xd8] sm:$0xff]   ;;  %v3138_v33 = vld [vmem:[%s3810_s3 + $0x90] sm:$0xff]   ;;  %v3145_v40 = vld [vmem:[%s3810_s3 + $0xe8] sm:$0xff]  }
  0x2b   : > { %v3436_v50 = vsel %vm3430_vm3, %v647_v44, %v651_v35  ;;  %v674_v51 = vor.u32 %v673_v45, %v670_v42  ;;  %v679_v52 = vrot.slane %v677_v37, 7  ;;  %v3195_v53 = vld.sshfl [vmem:[#allocation2] sm:$0xf pattern:$0x76325410]  ;;  %v398_v20 = vsel %vm3345_vm6, 0, %v397_v14 }
  0x2c   : > { %v628_v56 = vrot.slane %v626_v47, 6  ;;  %v631_v57 = vrot.slane %v629_v48, 7  ;;  %v635_v58 = vshll.u32 %v593_v46, 16  ;;  %v3440_v59 = vsel %vm3430_vm3, %v661_v49, %v665_v41  ;;  %399 = vst [vmem:[#allocation2 + $0x10] sm:$0x1] %v398_v20  ;;  %v3143_v35 = vld [vmem:[%s3810_s3 + $0xe0] sm:$0xff]  }
  0x2d   : > { %v675_v60 = vrot.slane %v674_v51, 2  ;;  %v1350_v61 = vcombine.low %v3436_v50, %v3440_v59  ;;  %v825_v3 = vcombine.low %v3195_v53, %v3194_v38  ;;  %v2570_v21 = vld.sshfl [vmem:[%s3374_s6 + $0x6] sm:$0x3 pattern:$0x76325410]  ;;  %v419_v22 = vsel %vm3362_vm8, 0, %v418_v15 }
  0x2e   : > { %v632_v62 = vor.u32 %v631_v57, %v628_v56  ;;  %v637_v63 = vrot.slane %v635_v58, 7  ;;  %v535_v23 = vshrl.u32 %v2570_v21, 16  ;;  %v2607_v25 = vld.sshfl [vmem:[#allocation2] sm:$0x12 pattern:$0x76325410] }
  0x2f   : > { %v3449_v2 = vsel %vm3430_vm3, %v675_v60, %v679_v52  ;;  %2943 = vmatmul.mubr.bf16.vlgmr.msra.gmra.mrb[0].mxu1 %v825_v3  ;;  %420 = vst [vmem:[#allocation2 + $0x10] sm:$0x4] %v419_v22  ;;  %v538_v27 = vshll.u32 %v2570_v21, 16  ;;  %v931_v36 = vcombine.high %v2607_v25, %v2607_v25  ;;  %v3140_v38 = vld [vmem:[%s3810_s3 + $0x98] sm:$0xff]   ;;  %v2611_v44 = vrot.slane %v2607_v25, 9  ;;  %v3147_v58 = vld [vmem:[%s3810_s3 + $0xf0] sm:$0xff]  }
  0x30   : > { %v633_v4 = vrot.slane %v632_v62, 2  ;;  %v699_v5 = vcombine.low %v3440_v59, %v3449_v2  ;;  %2967 = vmatpush3.bf16.msra.mxu1 %v3135_v0  ;;  %2982 = vmatprep.mubr.msk.bf16.mxu1 %vm3225_vm0, %v3224_v1  ;;  %v2608_v29 = vld.sshfl [vmem:[#allocation2 + $0x4] sm:$0x12 pattern:$0x76325410]  ;;  %v537_v30 = vrot.slane %v535_v23, 7 }
  0x31   : > { %2968 = vmatprep.subr.bf16.mxu1 %v3224_v1  ;;  %v2609_v31 = vld.sshfl [vmem:[#allocation2 + $0x8] sm:$0x12 pattern:$0x76325410]  ;;  %v939_v37 = vcombine.high %v2608_v29, %v2608_v29  ;;  %v2612_v45 = vrot.slane %v2608_v29, 9  ;;  %v963_v47 = vrot.slane %v931_v36, 7 }
  0x32   : > { %v638_v6 = vsel %vm3430_vm3, %v633_v4, %v637_v63  ;;  %v3462_v9 = vrot.slane %v699_v5, %v3403_v54  ;;  %v2610_v32 = vld.sshfl [vmem:[#allocation2 + $0xc] sm:$0x12 pattern:$0x76325410]  ;;  %v540_v34 = vor.u32 %v538_v27, %v537_v30  ;;  %v947_v41 = vcombine.high %v2609_v31, %v2609_v31  ;;  %v3149_v63 = vld [vmem:[%s3810_s3 + $0xf8] sm:$0xff]   ;;  %v3146_v14 = vld [vmem:[%s3810_s3 + $0xb0] sm:$0xff]  }
  0x33   : > { %v698_v8 = vcombine.low %v638_v6, %v3436_v50  ;;  %v955_v42 = vcombine.high %v2610_v32, %v2610_v32  ;;  %v2613_v48 = vrot.slane %v2609_v31, 9  ;;  %v967_v49 = vrot.slane %v939_v37, 7  ;;  %v3196_v57 = vld.sshfl [vmem:[#allocation2 + $0x4] sm:$0xf pattern:$0x76325410] }
  0x34   : > { %2969 = vmatpush3.bf16.msra.mxu1 %v3137_v7  ;;  %v2614_v51 = vrot.slane %v2610_v32, 9  ;;  %v971_v53 = vrot.slane %v947_v41, 7  ;;  %v3144_v60 = vld [vmem:[%s3810_s3 + $0xa8] sm:$0xff]   ;;  %v964_v62 = vsel %vm3513_vm5, %v2611_v44, %v963_v47  ;;  %v3153_v22 = vld [vmem:[%s3810_s3 + $0x140] sm:$0xff]   ;;  %v3148_v25 = vld [vmem:[%s3810_s3 + $0xb8] sm:$0xff]  }
  0x35   : > { %v706_v10 = vrot.slane %v698_v8, %v3403_v54  ;;  %2970 = vmatprep.subr.bf16.mxu1 %v3224_v1  ;;  %v975_v56 = vrot.slane %v955_v42, 7  ;;  %v3532_v0 = vsel %vm3513_vm5, %v2612_v45, %v967_v49  ;;  %v3155_v30 = vld [vmem:[%s3810_s3 + $0x148] sm:$0xff]   ;;  %v3150_v36 = vld [vmem:[%s3810_s3 + $0x100] sm:$0xff]   ;;  %v421_v41 = vld [vmem:[#allocation2 + $0x14] sm:$0x4] }
  0x36   : > { %v555_v43 = vld [vmem:[#allocation2 + $0x10] sm:$0x7]  ;;  %v3536_v3 = vsel %vm3513_vm5, %v2613_v48, %v971_v53  ;;  %v425_v42 = vld [vmem:[%s366_s13] sm:$0x3]  ;;  %v3163_v53 = vld [vmem:[%s3810_s3 + $0x168] sm:$0xff]  }
  0x37   : > { %v714_v16 = vcombine.low %v706_v10, %v3462_v9  ;;  %v556_v46 = vsel %vm3407_vm11, %v540_v34, %v555_v43  ;;  %v3540_v4 = vsel %vm3513_vm5, %v2614_v51, %v975_v56  ;;  %v3156_v43 = vld [vmem:[%s3810_s3 + $0x110] sm:$0xff]   ;;  %v3161_v44 = vld [vmem:[%s3810_s3 + $0x160] sm:$0xff]   ;;  %v434_v47 = vsel %vm432_vm9, 0, %v425_v42 }
  0x38   : > { %2971 = vmatpush3.bf16.msra.mxu1 %v3139_v13  ;;  %557 = vst [vmem:[#allocation2 + $0x10] sm:$0x7] %v556_v46  ;;  %v995_v13 = vcombine.low %v3536_v3, %v3540_v4  ;;  %v422_v46 = vsel %vm3362_vm8, 0, %v421_v41  ;;  %v464_v51 = vrot.slane %v434_v47, %v3403_v54  ;;  %v3179_v41 = vld [vmem:[%s3810_s3 + $0x1e8] sm:$0xff]  }
  0x39   : > { %2923 = vmatmul.mubr.bf16.vlgmr.msra.gmra.mrb[0].mxu0 %v714_v16  ;;  %2972 = vmatprep.subr.bf16.mxu1 %v3224_v1  ;;  %423 = vst [vmem:[#allocation2 + $0x14] sm:$0x4] %v422_v46  ;;  %v3183_v46 = vld [vmem:[%s3810_s3 + $0x1f8] sm:$0xff]  }
  0x3a   : > { %2947 = vmatpush3.bf16.msra.mxu0 %v3134_v12  ;;  %2962 = vmatprep.mubr.msk.bf16.mxu0 %vm3225_vm0, %v3224_v1  ;;  %v994_v12 = vcombine.low %v964_v62, %v3532_v0  ;;  %v466_v19 = vshrl.u32 %v464_v51, 16  ;;  %v3198_v47 = vld.sshfl [vmem:[#allocation2 + $0x8] sm:$0xf pattern:$0x76325410] }
  0x3b   : > { %2948 = vmatprep.subr.bf16.mxu0 %v3224_v1 }
  0x3c   : > { %2973 = vmatpush3.bf16.msra.mxu1 %v3141_v28  ;;  %v1002_v27 = vrot.slane %v994_v12, %v3403_v54  ;;  %v3560_v28 = vrot.slane %v995_v13, %v3403_v54  ;;  %v468_v17 = vrot.slane %v466_v19, 7  ;;  %v3182_v19 = vld [vmem:[%s3810_s3 + $0x1b8] sm:$0xff]  }
  0x3d   : > { %2974 = vmatprep.subr.bf16.mxu1 %v3224_v1 }
  0x3e   : > { %2949 = vmatpush3.bf16.msra.mxu0 %v3136_v24 }
  0x3f   : > { %2950 = vmatprep.subr.bf16.mxu0 %v3224_v1  ;;  %v3197_v5 = vld.sshfl [vmem:[#allocation2 + $0xc] sm:$0xf pattern:$0x76325410] }
  0x40   : > { %2975 = vmatpush3.bf16.msra.mxu1 %v3143_v35  ;;  %v2666_v6 = vld.sshfl [vmem:[#allocation2 + $0x10] sm:$0x13 pattern:$0x76325410]  ;;  %v1144_v15 = vcombine.low %v3196_v57, %v3197_v5  ;;  %v1010_v35 = vcombine.low %v1002_v27, %v3560_v28  ;;  %v3160_v5 = vld [vmem:[%s3810_s3 + $0x120] sm:$0xff]  }
  0x41   : > { %2976 = vmatprep.subr.bf16.mxu1 %v3224_v1  ;;  %v1276_v7 = vcombine.high %v2666_v6, %v2666_v6  ;;  %v1320_v8 = vshrl.u32 %v2666_v6, 16  ;;  %v1323_v10 = vshll.u32 %v2666_v6, 16  ;;  %v2694_v34 = vld.sshfl [vmem:[#allocation2 + $0x10] sm:$0x12 pattern:$0x76325410] }
  0x42   : > { %2951 = vmatpush3.bf16.msra.mxu0 %v3138_v33  ;;  %v3577_v33 = vrot.slane %v1350_v61, %v3403_v54  ;;  %v3154_v61 = vld [vmem:[%s3810_s3 + $0x108] sm:$0xff]   ;;  %v1498_v37 = vcombine.high %v2694_v34, %v2694_v34  ;;  %v2698_v48 = vrot.slane %v2694_v34, 9  ;;  %v3165_v6 = vld [vmem:[%s3810_s3 + $0x170] sm:$0xff]   ;;  %v3168_v27 = vld [vmem:[%s3810_s3 + $0x180] sm:$0xff]  }
  0x43   : > { %2952 = vmatprep.subr.bf16.mxu0 %v3224_v1  ;;  %v1322_v16 = vrot.slane %v1320_v8, 6  ;;  %v1325_v20 = vrot.slane %v1323_v10, 7  ;;  %v1329_v21 = vshll.u32 %v1276_v7, 16  ;;  %v3164_v8 = vld [vmem:[%s3810_s3 + $0x130] sm:$0xff]   ;;  %v3169_v10 = vld [vmem:[%s3810_s3 + $0x1c0] sm:$0xff]  }
  0x44   : > { %2977 = vmatpush3.bf16.msra.mxu1 %v3145_v40  ;;  %v400_v40 = vld [vmem:[#allocation2 + $0x14] sm:$0x1]  ;;  %v1513_v49 = vrot.slane %v1498_v37, 7 }
  0x45   : > { %2978 = vmatprep.subr.bf16.mxu1 %v3224_v1  ;;  %v1326_v23 = vor.u32 %v1325_v20, %v1322_v16  ;;  %v1331_v24 = vrot.slane %v1329_v21, 7  ;;  %v401_v45 = vsel %vm3345_vm6, 0, %v400_v40  ;;  %v3166_v16 = vld [vmem:[%s3810_s3 + $0x138] sm:$0xff]   ;;  %v3171_v20 = vld [vmem:[%s3810_s3 + $0x1c8] sm:$0xff]  }
  0x46   : > { %2953 = vmatpush3.bf16.msra.mxu0 %v3140_v38  ;;  %v3159_v38 = vld [vmem:[%s3810_s3 + $0x158] sm:$0xff]   ;;  %402 = vst [vmem:[#allocation2 + $0x14] sm:$0x1] %v401_v45  ;;  %v1514_v56 = vsel %vm3513_vm5, %v2698_v48, %v1513_v49  ;;  %v3181_v45 = vld [vmem:[%s3810_s3 + $0x1f0] sm:$0xff]  }
  0x47   : > { %2954 = vmatprep.subr.bf16.mxu0 %v3224_v1  ;;  %v1327_v29 = vrot.slane %v1326_v23, 2  ;;  %v1533_v62 = vcombine.low %v3540_v4, %v1514_v56  ;;  %v3167_v4 = vld [vmem:[%s3810_s3 + $0x178] sm:$0xff]  }
  0x48   : > { %2979 = vmatpush3.bf16.msra.mxu1 %v3147_v58  ;;  %v3174_v40 = vld [vmem:[%s3810_s3 + $0x198] sm:$0xff]  }
  0x49   : > { %2980 = vmatprep.subr.bf16.mxu1 %v3224_v1  ;;  %v3569_v31 = vsel %vm3430_vm3, %v1327_v29, %v1331_v24  ;;  %v1547_v55 = vrot.slane %v1533_v62, %v3403_v54  ;;  %v3173_v29 = vld [vmem:[%s3810_s3 + $0x1d0] sm:$0xff]  }
  0x4a   : > { %2955 = vmatpush3.bf16.msra.mxu0 %v3142_v18  ;;  %v1351_v32 = vcombine.low %v3449_v2, %v3569_v31  ;;  %v3157_v2 = vld [vmem:[%s3810_s3 + $0x150] sm:$0xff]   ;;  %v469_v18 = vshll.u32 %v464_v51, 16 }
  0x4b   : > { %2956 = vmatprep.subr.bf16.mxu0 %v3224_v1  ;;  %v3180_v51 = vld [vmem:[%s3810_s3 + $0x1b0] sm:$0xff]  }
  0x4c   : > { %2981 = vmatpush3.bf16.msra.mxu1 %v3149_v63  ;;  %v3590_v50 = vrot.slane %v1351_v32, %v3403_v54  ;;  %v471_v57 = vor.u32 %v469_v18, %v468_v17  ;;  %v3188_v17 = vld [vmem:[%s3810_s3 + $0x210] sm:$0xff]  }
  0x4d   : > { %3006 = vmatprep.subr.bf16.mxu1 %v3224_v1  ;;  %v474_v58 = vld [vmem:[#allocation2 + $0x14] sm:$0x7] }
  0x4e   : > { %2957 = vmatpush3.bf16.msra.mxu0 %v3144_v60  ;;  %v1366_v59 = vcombine.low %v3577_v33, %v3590_v50  ;;  %v1532_v60 = vcombine.low %v3532_v0, %v3536_v3  ;;  %v475_v63 = vsel %vm3407_vm11, %v471_v57, %v474_v58  ;;  %v3162_v3 = vld [vmem:[%s3810_s3 + $0x128] sm:$0xff]   ;;  %v3172_v33 = vld [vmem:[%s3810_s3 + $0x190] sm:$0xff]   ;;  %v3177_v50 = vld [vmem:[%s3810_s3 + $0x1e0] sm:$0xff]  }
  0x4f   : > { %2958 = vmatprep.subr.bf16.mxu0 %v3224_v1  ;;  %2983 = vmatmul.mubr.bf16.vlgmr.msra.gmra.mrb[4].mxu1 %v1144_v15  ;;  %476 = vst [vmem:[#allocation2 + $0x14] sm:$0x7] %v475_v63  ;;  %v3191_v57 = vld [vmem:[%s3810_s3 + $0x228] sm:$0xff]   ;;  %v3192_v58 = vld [vmem:[%s3810_s3 + $0x230] sm:$0xff]  }
  0x50   : > { %3007 = vmatpush3.bf16.msra.mxu1 %v3153_v22  ;;  %3022 = vmatprep.mubr.msk.bf16.mxu1 %vm3225_vm0, %v3224_v1  ;;  %v1540_v0 = vrot.slane %v1532_v60, %v3403_v54  ;;  %v3193_v60 = vld [vmem:[%s3810_s3 + $0x238] sm:$0xff]  }
  0x51   : > { %3008 = vmatprep.subr.bf16.mxu1 %v3224_v1 }
  0x52   : > { %2959 = vmatpush3.bf16.msra.mxu0 %v3146_v14  ;;  %v1548_v7 = vcombine.low %v1540_v0, %v1547_v55 }
  0x53   : > { %2960 = vmatprep.subr.bf16.mxu0 %v3224_v1 }
  0x54   : > { %3009 = vmatpush3.bf16.msra.mxu1 %v3155_v30 }
  0x55   : > { %3010 = vmatprep.subr.bf16.mxu1 %v3224_v1 }
  0x56   : > { %2961 = vmatpush3.bf16.msra.mxu0 %v3148_v25  ;;  %v2750_v12 = vld.sshfl [vmem:[#allocation2 + $0x14] sm:$0x13 pattern:$0x76325410] }
  0x57   : > { %2986 = vmatprep.subr.bf16.mxu0 %v3224_v1  ;;  %v2778_v13 = vld.sshfl [vmem:[#allocation2 + $0x14] sm:$0x12 pattern:$0x76325410]  ;;  %v1859_v21 = vshrl.u32 %v2750_v12, 16  ;;  %v1862_v22 = vshll.u32 %v2750_v12, 16  ;;  %v1815_v30 = vcombine.high %v2750_v12, %v2750_v12 }
  0x58   : > { %3011 = vmatpush3.bf16.msra.mxu1 %v3157_v2  ;;  %v2037_v14 = vcombine.high %v2778_v13, %v2778_v13  ;;  %v2782_v15 = vrot.slane %v2778_v13, 9  ;;  %v3175_v2 = vld [vmem:[%s3810_s3 + $0x1d8] sm:$0xff]   ;;  %v3199_v48 = vld.sshfl [vmem:[#allocation2 + $0x10] sm:$0xf pattern:$0x76325410] }
  0x59   : > { %2963 = vmatmul.mubr.bf16.vlgmr.msra.gmra.mrb[4].mxu0 %v1010_v35  ;;  %3012 = vmatprep.subr.bf16.mxu1 %v3224_v1  ;;  %v1861_v32 = vrot.slane %v1859_v21, 6  ;;  %v1864_v34 = vrot.slane %v1862_v22, 7  ;;  %v1868_v37 = vshll.u32 %v1815_v30, 16  ;;  %v1683_v18 = vcombine.low %v3198_v47, %v3199_v48 }
  0x5a   : > { %2987 = vmatpush3.bf16.msra.mxu0 %v3150_v36  ;;  %3002 = vmatprep.mubr.msk.bf16.mxu0 %vm3225_vm0, %v3224_v1  ;;  %v2052_v23 = vrot.slane %v2037_v14, 7  ;;  %v3170_v36 = vld [vmem:[%s3810_s3 + $0x188] sm:$0xff]  }
  0x5b   : > { %2988 = vmatprep.subr.bf16.mxu0 %v3224_v1 }
  0x5c   : > { %3013 = vmatpush3.bf16.msra.mxu1 %v3159_v38  ;;  %v2053_v24 = vsel %vm3513_vm5, %v2782_v15, %v2052_v23  ;;  %v1870_v38 = vrot.slane %v1868_v37, 7 }
  0x5d   : > { %3014 = vmatprep.subr.bf16.mxu1 %v3224_v1  ;;  %v2072_v25 = vcombine.low %v1514_v56, %v2053_v24  ;;  %v3190_v56 = vld [vmem:[%s3810_s3 + $0x220] sm:$0xff]  }
  0x5e   : > { %2989 = vmatpush3.bf16.msra.mxu0 %v3154_v61  ;;  %v1865_v61 = vor.u32 %v1864_v34, %v1861_v32 }
  0x5f   : > { %2990 = vmatprep.subr.bf16.mxu0 %v3224_v1  ;;  %v3686_v52 = vrot.slane %v2072_v25, %v3403_v54 }
  0x60   : > { %3015 = vmatpush3.bf16.msra.mxu1 %v3161_v44  ;;  %v3176_v44 = vld [vmem:[%s3810_s3 + $0x1a0] sm:$0xff]  }
  0x61   : > { %3016 = vmatprep.subr.bf16.mxu1 %v3224_v1  ;;  %v2087_v35 = vcombine.low %v3560_v28, %v3686_v52 }
  0x62   : > { %2991 = vmatpush3.bf16.msra.mxu0 %v3156_v43 }
  0x63   : > { %2992 = vmatprep.subr.bf16.mxu0 %v3224_v1 }
  0x64   : > { %3017 = vmatpush3.bf16.msra.mxu1 %v3163_v53  ;;  %v3189_v53 = vld [vmem:[%s3810_s3 + $0x218] sm:$0xff]  }
  0x65   : > { %3018 = vmatprep.subr.bf16.mxu1 %v3224_v1 }
  0x66   : > { %2993 = vmatpush3.bf16.msra.mxu0 %v3158_v26  ;;  %v3187_v26 = vld [vmem:[%s3810_s3 + $0x208] sm:$0xff]  }
  0x67   : > { %2994 = vmatprep.subr.bf16.mxu0 %v3224_v1 }
  0x68   : > { %3019 = vmatpush3.bf16.msra.mxu1 %v3165_v6 }
  0x69   : > { %3020 = vmatprep.subr.bf16.mxu1 %v3224_v1 }
  0x6a   : > { %2995 = vmatpush3.bf16.msra.mxu0 %v3160_v5 }
  0x6b   : > { %2996 = vmatprep.subr.bf16.mxu0 %v3224_v1 }
  0x6c   : > { %3021 = vmatpush3.bf16.msra.mxu1 %v3167_v4 }
  0x6d   : > { %3046 = vmatprep.subr.bf16.mxu1 %v3224_v1 }
  0x6e   : > { %2997 = vmatpush3.bf16.msra.mxu0 %v3162_v3 }
  0x6f   : > { %2998 = vmatprep.subr.bf16.mxu0 %v3224_v1  ;;  %3023 = vmatmul.mubr.bf16.vlgmr.msra.gmra.mrb[8].mxu1 %v1548_v7 }
  0x70   : > { %3047 = vmatpush3.bf16.msra.mxu1 %v3169_v10  ;;  %3062 = vmatprep.mubr.msk.bf16.mxu1 %vm3225_vm0, %v3224_v1 }
  0x71   : > { %3048 = vmatprep.subr.bf16.mxu1 %v3224_v1 }
  0x72   : > { %2999 = vmatpush3.bf16.msra.mxu0 %v3164_v8 }
  0x73   : > { %3000 = vmatprep.subr.bf16.mxu0 %v3224_v1 }
  0x74   : > { %3049 = vmatpush3.bf16.msra.mxu1 %v3171_v20 }
  0x75   : > { %3050 = vmatprep.subr.bf16.mxu1 %v3224_v1 }
  0x76   : > { %3001 = vmatpush3.bf16.msra.mxu0 %v3166_v16 }
  0x77   : > { %3026 = vmatprep.subr.bf16.mxu0 %v3224_v1 }
  0x78   : > { %3051 = vmatpush3.bf16.msra.mxu1 %v3173_v29 }
  0x79   : > { %3003 = vmatmul.mubr.bf16.vlgmr.msra.gmra.mrb[8].mxu0 %v1366_v59  ;;  %3052 = vmatprep.subr.bf16.mxu1 %v3224_v1  ;;  %v1866_v59 = vrot.slane %v1865_v61, 2 }
  0x7a   : > { %3027 = vmatpush3.bf16.msra.mxu0 %v3168_v27  ;;  %3042 = vmatprep.mubr.msk.bf16.mxu0 %vm3225_vm0, %v3224_v1 }
  0x7b   : > { %3028 = vmatprep.subr.bf16.mxu0 %v3224_v1  ;;  %v1871_v42 = vsel %vm3430_vm3, %v1866_v59, %v1870_v38 }
  0x7c   : > { %3053 = vmatpush3.bf16.msra.mxu1 %v3175_v2  ;;  %v1890_v43 = vcombine.low %v3569_v31, %v1871_v42  ;;  %v3178_v31 = vld [vmem:[%s3810_s3 + $0x1a8] sm:$0xff]  }
  0x7d   : > { %3054 = vmatprep.subr.bf16.mxu1 %v3224_v1 }
  0x7e   : > { %3029 = vmatpush3.bf16.msra.mxu0 %v3170_v36  ;;  %v1904_v39 = vrot.slane %v1890_v43, %v3403_v54 }
  0x7f   : > { %3030 = vmatprep.subr.bf16.mxu0 %v3224_v1 }
  0x80   : > { %3055 = vmatpush3.bf16.msra.mxu1 %v3177_v50  ;;  %v1905_v49 = vcombine.low %v3462_v9, %v1904_v39  ;;  %v3186_v9 = vld [vmem:[%s3810_s3 + $0x200] sm:$0xff]  }
  0x81   : > { %3056 = vmatprep.subr.bf16.mxu1 %v3224_v1 }
  0x82   : > { %3031 = vmatpush3.bf16.msra.mxu0 %v3172_v33 }
  0x83   : > { %3032 = vmatprep.subr.bf16.mxu0 %v3224_v1 }
  0x84   : > { %3057 = vmatpush3.bf16.msra.mxu1 %v3179_v41 }
  0x85   : > { %3058 = vmatprep.subr.bf16.mxu1 %v3224_v1 }
  0x86   : > { %3033 = vmatpush3.bf16.msra.mxu0 %v3174_v40 }
  0x87   : > { %3034 = vmatprep.subr.bf16.mxu0 %v3224_v1 }
  0x88   : > { %3059 = vmatpush3.bf16.msra.mxu1 %v3181_v45 }
  0x89   : > { %3060 = vmatprep.subr.bf16.mxu1 %v3224_v1 }
  0x8a   : > { %3035 = vmatpush3.bf16.msra.mxu0 %v3176_v44 }
  0x8b   : > { %3036 = vmatprep.subr.bf16.mxu0 %v3224_v1 }
  0x8c   : > { %3061 = vmatpush3.bf16.msra.mxu1 %v3183_v46  ;;  %v2807_v46 = vld [vmem:[%s3811_s4] ss:$0 sm:$0xff] }
  0x8e   : > { %3037 = vmatpush3.bf16.msra.mxu0 %v3178_v31 }
  0x8f   : > { %3038 = vmatprep.subr.bf16.mxu0 %v3224_v1  ;;  %3063 = vmatmul.mubr.bf16.vlgmr.msra.gmra.mrb[12].mxu1 %v1905_v49 }
  0x92   : > { %3039 = vmatpush3.bf16.msra.mxu0 %v3180_v51 }
  0x93   : > { %3040 = vmatprep.subr.bf16.mxu0 %v3224_v1 }
  0x96   : > { %3041 = vmatpush3.bf16.msra.mxu0 %v3182_v19 }
  0x97   : > { %3066 = vmatprep.subr.bf16.mxu0 %v3224_v1 }
  0x99   : > { %3043 = vmatmul.mubr.bf16.vlgmr.msra.gmra.mrb[12].mxu0 %v1683_v18 }
  0x9a   : > { %3067 = vmatpush3.bf16.msra.mxu0 %v3186_v9  ;;  %3082 = vmatprep.mubr.msk.bf16.mxu0 %vm3225_vm0, %v3224_v1  ;;  %vm2400_vm0 = vcmask 1041409  }
  0x9b   : > { %3068 = vmatprep.subr.bf16.mxu0 %v3224_v1 }
  0x9e   : > { %3069 = vmatpush3.bf16.msra.mxu0 %v3187_v26 }
  0x9f   : > { %3070 = vmatprep.subr.bf16.mxu0 %v3224_v1 }
  0xa2   : > { %3071 = vmatpush3.bf16.msra.mxu0 %v3188_v17 }
  0xa3   : > { %3072 = vmatprep.subr.bf16.mxu0 %v3224_v1 }
  0xa6   : > { %3073 = vmatpush3.bf16.msra.mxu0 %v3189_v53 }
  0xa7   : > { %3074 = vmatprep.subr.bf16.mxu0 %v3224_v1 }
  0xaa   : > { %3075 = vmatpush3.bf16.msra.mxu0 %v3190_v56 }
  0xab   : > { %3076 = vmatprep.subr.bf16.mxu0 %v3224_v1 }
  0xae   : > { %3077 = vmatpush3.bf16.msra.mxu0 %v3191_v57  ;;  %v3228_v57 = vmov 1966171168  }
  0xaf   : > { %3078 = vmatprep.subr.bf16.mxu0 %v3224_v1 }
  0xb2   : > { %3079 = vmatpush3.bf16.msra.mxu0 %v3192_v58  ;;  %v2284_v58 = vunpack.c.l.s4 %v3228_v57 }
  0xb3   : > { %3080 = vmatprep.subr.bf16.mxu0 %v3224_v1 }
  0xb6   : > { %3081 = vmatpush3.bf16.msra.mxu0 %v3193_v60 }
  0xb9   : > { %3083 = vmatmul.mubr.bf16.vlgmr.msra.gmra.mrb[16].mxu0 %v2087_v35 }
 0x102   : > { %v909_v62 = vpop.f32.mrb[0].mxu1 }
 0x103   : > { %v2944_v63 = vpop.f32.mrb[1].mxu1 }
 0x104   : > { %v912_v5 = vpop.f32.mrb[2].mxu1 }
 0x105   : > { %v2945_v6 = vpop.f32.mrb[3].mxu1 }
 0x10c   : > { %v798_v0 = vpop.f32.mrb[0].mxu0 }
 0x10d   : > { %v910_v55 = vadd.f32 %v909_v62, %v798_v0  ;;  %v2924_v3 = vpop.f32.mrb[1].mxu0 }
 0x10e   : > { %v801_v4 = vpop.f32.mrb[2].mxu0 }
 0x10f   : > { %v913_v7 = vadd.f32 %v912_v5, %v801_v4  ;;  %v2925_v8 = vpop.f32.mrb[3].mxu0  ;;  %v2285_v4 = vunpack.c.0.s8 %v2284_v58 }
 0x122   : > { %v1228_v10 = vpop.f32.mrb[4].mxu1 }
 0x123   : > { %v2984_v12 = vpop.f32.mrb[5].mxu1 }
 0x124   : > { %v1231_v13 = vpop.f32.mrb[6].mxu1 }
 0x125   : > { %v2985_v14 = vpop.f32.mrb[7].mxu1 }
 0x12c   : > { %v1094_v1 = vpop.f32.mrb[4].mxu0 }
 0x12d   : > { %v1101_v15 = vadd.f32 %v1094_v1, %v910_v55  ;;  %v2964_v16 = vpop.f32.mrb[5].mxu0  ;;  %v3229_v1 = vmov 1935823168  }
 0x12e   : > { %v1097_v20 = vpop.f32.mrb[6].mxu0 }
 0x12f   : > { %v1102_v28 = vadd.f32 %v1097_v20, %v913_v7  ;;  %v1235_v21 = vadd.f32 %v1228_v10, %v1101_v15  ;;  %v2965_v22 = vpop.f32.mrb[7].mxu0  ;;  %v2340_v15 = vunpack.c.l.s4 %v3229_v1 }
 0x131   : > { %v1236_v23 = vadd.f32 %v1231_v13, %v1102_v28 }
 0x142   : > { %v1632_v24 = vpop.f32.mrb[8].mxu1 }
 0x143   : > { %v3024_v25 = vpop.f32.mrb[9].mxu1 }
 0x144   : > { %v1635_v27 = vpop.f32.mrb[10].mxu1 }
 0x145   : > { %v3025_v29 = vpop.f32.mrb[11].mxu1 }
 0x14c   : > { %v1450_v30 = vpop.f32.mrb[8].mxu0 }
 0x14d   : > { %v1457_v32 = vadd.f32 %v1450_v30, %v1235_v21  ;;  %v3004_v34 = vpop.f32.mrb[9].mxu0 }
 0x14e   : > { %v1453_v52 = vpop.f32.mrb[10].mxu0 }
 0x14f   : > { %v1458_v35 = vadd.f32 %v1453_v52, %v1236_v23  ;;  %v1639_v36 = vadd.f32 %v1632_v24, %v1457_v32  ;;  %v3005_v2 = vpop.f32.mrb[11].mxu0  ;;  %v2341_v32 = vunpack.c.0.s8 %v2340_v15 }
 0x151   : > { %v1640_v61 = vadd.f32 %v1635_v27, %v1458_v35 }
 0x162   : > { %v1989_v37 = vpop.f32.mrb[12].mxu1 }
 0x163   : > { %v3064_v33 = vpop.f32.mrb[13].mxu1 }
 0x164   : > { %v1992_v50 = vpop.f32.mrb[14].mxu1 }
 0x165   : > { %v3065_v59 = vpop.f32.mrb[15].mxu1 }
 0x166   : > { %v2344_v59 = vsub.s32 %v2341_v32, %v3326_v11 }
 0x16c   : > { %v1767_v38 = vpop.f32.mrb[12].mxu0 }
 0x16d   : > { %v1774_v40 = vadd.f32 %v1767_v38, %v1639_v36  ;;  %v3044_v41 = vpop.f32.mrb[13].mxu0 }
 0x16e   : > { %v1770_v42 = vpop.f32.mrb[14].mxu0 }
 0x16f   : > { %v1775_v43 = vadd.f32 %v1770_v42, %v1640_v61  ;;  %v1996_v44 = vadd.f32 %v1989_v37, %v1774_v40  ;;  %v3045_v45 = vpop.f32.mrb[15].mxu0 }
 0x171   : > { %v1997_v39 = vadd.f32 %v1992_v50, %v1775_v43 }
 0x18c   : > { %v2171_v31 = vpop.f32.mrb[16].mxu0 }
 0x18d   : > { %v2178_v47 = vadd.f32 %v2171_v31, %v1996_v44  ;;  %v3084_v48 = vpop.f32.mrb[17].mxu0 }
 0x18e   : > { %v2174_v49 = vpop.f32.mrb[18].mxu0 }
 0x18f   : > { %v2187_v51 = vadd.f32 %v2807_v46, %v2178_v47  ;;  %v2179_v19 = vadd.f32 %v2174_v49, %v1997_v39  ;;  %v3085_v18 = vpop.f32.mrb[19].mxu0 }
 0x191   : > { %v2189_v9 = vmax.f32 %v2187_v51, 0.0  ;;  %v2188_v26 = vadd.f32 %v2807_v46, %v2179_v19 }
 0x193   : > { %v2193_v17 = vcombine.high %v2189_v9, %v2189_v9  ;;  %v2200_v53 = vrot.slane %v2189_v9, %v3403_v54  ;;  %v2190_v56 = vmax.f32 %v2188_v26, 0.0 }
 0x195   : > { %v2207_v60 = vrot.slane %v2193_v17, %v3403_v54  ;;  %v2208_v62 = vcombine.high %v2200_v53, %v2200_v53  ;;  %v2808_v63 = vrot.slane %v2200_v53, 9  ;;  %v2210_v5 = vcombine.high %v2190_v56, %v2190_v56 }
 0x196   : > { %v2217_v6 = vrot.slane %v2190_v56, %v3403_v54 }
 0x197   : > { %v2209_v0 = vcombine.high %v2207_v60, %v2207_v60  ;;  %v2809_v55 = vrot.slane %v2208_v62, 9  ;;  %v2810_v3 = vrot.slane %v2207_v60, 9  ;;  %v2224_v7 = vrot.slane %v2210_v5, %v3403_v54 }
 0x198   : > { %v2225_v8 = vcombine.high %v2217_v6, %v2217_v6  ;;  %v2812_v10 = vrot.slane %v2217_v6, 9  ;;  %v2259_v13 = vadd.f32 %v2808_v63, %v2200_v53  ;;  %v2288_v54 = vsub.s32 %v2285_v4, %v3326_v11 }
 0x199   : > { %v2811_v12 = vrot.slane %v2209_v0, 9  ;;  %v2261_v14 = vadd.f32 %v2810_v3, %v2207_v60  ;;  %v2226_v16 = vcombine.high %v2224_v7, %v2224_v7  ;;  %v2814_v28 = vrot.slane %v2224_v7, 9 }
 0x19a   : > { %v2813_v20 = vrot.slane %v2225_v8, 9  ;;  %v2260_v21 = vadd.f32 %v2809_v55, %v2208_v62  ;;  %v2263_v25 = vadd.f32 %v2812_v10, %v2217_v6 }
 0x19b   : > { %v2262_v22 = vadd.f32 %v2811_v12, %v2209_v0  ;;  %v2267_v23 = vadd.f32 %v2261_v14, %v2259_v13  ;;  %v2815_v24 = vrot.slane %v2226_v16, 9  ;;  %v2265_v27 = vadd.f32 %v2814_v28, %v2224_v7 }
 0x19c   : > { %v2264_v34 = vadd.f32 %v2813_v20, %v2225_v8 }
 0x19d   : > { %v2268_v29 = vadd.f32 %v2262_v22, %v2260_v21  ;;  %v2271_v30 = vmul.f32 0.25, %v2267_v23  ;;  %v2266_v52 = vadd.f32 %v2815_v24, %v2226_v16  ;;  %v2269_v35 = vadd.f32 %v2265_v27, %v2263_v25 }
 0x19f   : > { %v2272_v36 = vmul.f32 0.25, %v2268_v29  ;;  %v2275_v2 = vpack.c.bf16 %v2271_v30, %v2271_v30  ;;  %v2270_v61 = vadd.f32 %v2266_v52, %v2264_v34  ;;  %v2273_v37 = vmul.f32 0.25, %v2269_v35 }
 0x1a1   : > { %v2276_v33 = vpack.c.bf16 %v2272_v36, %v2272_v36  ;;  %v2289_v50 = vrot.slane %v2275_v2, %v2288_v54  ;;  %v2274_v38 = vmul.f32 0.25, %v2270_v61  ;;  %v2277_v40 = vpack.c.bf16 %v2273_v37, %v2273_v37 }
 0x1a3   : > { %v2296_v41 = vrot.slane %v2289_v50, %v2288_v54  ;;  %v2303_v42 = vrot.slane %v2276_v33, %v2288_v54  ;;  %v2278_v43 = vpack.c.bf16 %v2274_v38, %v2274_v38  ;;  %v2317_v44 = vrot.slane %v2277_v40, %v2288_v54 }
 0x1a5   : > { %v2310_v45 = vrot.slane %v2303_v42, %v2288_v54  ;;  %v2345_v39 = vrot.slane %v2296_v41, %v2344_v59  ;;  %v2324_v31 = vrot.slane %v2317_v44, %v2288_v54  ;;  %v2331_v46 = vrot.slane %v2278_v43, %v2288_v54 }
 0x1a7   : > { %v2359_v47 = vrot.slane %v2310_v45, %v2344_v59  ;;  %v2338_v48 = vrot.slane %v2331_v46, %v2288_v54  ;;  %v2373_v49 = vrot.slane %v2324_v31, %v2344_v59  ;;  %v2352_v51 = vrot.slane %v2345_v39, %v2344_v59 }
 0x1a9   : > { %v2366_v19 = vrot.slane %v2359_v47, %v2344_v59  ;;  %v2387_v18 = vrot.slane %v2338_v48, %v2344_v59  ;;  %v2380_v11 = vrot.slane %v2373_v49, %v2344_v59  ;;  %v2395_v17 = vunpack.c.l.b16 %v2352_v51 }
 0x1ab   : > { %v2396_v9 = vunpack.c.l.b16 %v2366_v19  ;;  %v2394_v26 = vrot.slane %v2387_v18, %v2344_v59  ;;  %v2397_v60 = vunpack.c.l.b16 %v2380_v11 }
 0x1ad   : > { %v2399_v53 = vrot.slane %v2396_v9, 7  ;;  %v2398_v56 = vunpack.c.l.b16 %v2394_v26 }
 0x1af   : > { %v2401_v57 = vsel %vm2400_vm0, %v2399_v53, %v2395_v17  ;;  %v2402_v62 = vrot.slane %v2398_v56, 7 }
 0x1b0   : > { %v2404_v58 = vpack.c.b16 %v2401_v57, %v2401_v57 }
 0x1b1   : > { %v2403_v5 = vsel %vm2400_vm0, %v2402_v62, %v2397_v60 }
 0x1b2   : > { %v2412_v63 = vrot.slane %v2404_v58, %v2288_v54  ;;  %v2405_v6 = vpack.c.b16 %v2403_v5, %v2403_v5 }
 0x1b4   : > { %2816 = vst.sshfl [vmem:[%s378_s12] sm:$0x1 pattern:$0x73625140] %v2412_v63  ;;  %v2426_v0 = vrot.slane %v2405_v6, %v2288_v54 }
 0x1b6   : > { %2817 = vst.sshfl [vmem:[%s378_s12 + $0x1] sm:$0x1 pattern:$0x73625140] %v2426_v0 }
 0x1b7 PF: > { %s15_s20 = sadd.s32 1, %s3222_s20   ;;  %s3825_s18 = smov %s3218_s19 }
 0x1b8   : > { %p12_p5 = scmp.ge.s32.totalorder %s15_s20, 4   ;;  %s3826_s19 = smov %s3828_s21 }
 0x1ba   :  { %14 = sbr.rel (!%p12_p5) target bundleno = 2 (0x2), region = 87 }

// kernel: _lambda_.5
= control target key start
LH: loop header
LB: loop body
LE: loop exit
PB: predicated region body
PF: predicated region fallthrough
CT: control target
= control target key end

     0   :  { %s4288_s18 = smov 0   ;;  %s4290_s19 = smov 0   ;;  %s5088_s0 = inlined_call_operand.vmem [shape: bf16[2,8,8,128], index: 0, kind: input, shape index: {}, may-alias: {0,1,2}]   ;;  %s5089_s1 = inlined_call_operand.vmem [shape: bf16[2,8,8,128], index: 1, kind: input, shape index: {}, may-alias: {0,1,2}]   ;;  %s5090_s2 = inlined_call_operand.vmem [shape: bf16[2,8,8,128], index: 2, kind: input, shape index: {}, may-alias: {0,1,2}]   ;;  %s5091_s3 = inlined_call_operand.vmem [shape: bf16[9,128,128], index: 3, kind: input, shape index: {}]   ;;  %s5092_s4 = inlined_call_operand.vmem [shape: f32[1,128], index: 4, kind: input, shape index: {}]   ;;  %s5093_s5 = inlined_call_operand.vmem [shape: bf16[2,4,4,128], index: 5, kind: output, shape index: {}]  }
   0x1   :  { %s4292_s20 = smov 0  }
   0x2 LB: > { %s27_s1 = sadd.s32 1, %s4250_s19  ;;  %p3405_p0 = scmp.ge.s32.totalorder %s4254_s20, 1  ;;  %s4254_s20 = sphi %s4292_s20, %s15_s20   ;;  %s4250_s19 = sphi %s4290_s19, %s5105_s19   ;;  %s4246_s18 = sphi %s4288_s18, %s5104_s18  }
   0x3   : > { %p29_p1 = scmp.ge.s32.totalorder %s27_s1, 2  ;;  %p270_p2 = scmp.lt.s32.totalorder %s4254_s20, 3 }
   0x5   : > { %s5107_s1 = smov (%p29_p1, %s27_s1), 0  ;;  %p271_p3 = pnand %p3405_p0, %p270_p2 }
   0x6   : > { %v4148_v0 = vld [vmem:[%s5091_s3 + $0x40] sm:$0xff] (!%p271_p3)   ;;  %v4150_v2 = vld [vmem:[%s5091_s3 + $0x48] sm:$0xff] (!%p271_p3)   ;;  %v4152_v4 = vld [vmem:[%s5091_s3 + $0x50] sm:$0xff] (!%p271_p3)   ;;  %p331_p4 = scmp.lt.s32.totalorder (!%p271_p3), %s4246_s18, 1  ;;  %vm383_vm0 = vcmask (!%p271_p3), 1040384   ;;  %v4256_v20 = vmov (!%p271_p3), 0  }
   0x7   : > { %274 = sbr.rel (%p271_p3) target bundleno = 476 (0x1dc), region = 40  ;;  %v4149_v1 = vld [vmem:[%s5091_s3 + $0x100] sm:$0xff] (!%p271_p3)   ;;  %3826 = vmatprep.subr.bf16.mxu1 (!%p271_p3), %v4148_v0  ;;  %v4151_v3 = vld [vmem:[%s5091_s3 + $0x108] sm:$0xff] (!%p271_p3)   ;;  %v4153_v5 = vld [vmem:[%s5091_s3 + $0x110] sm:$0xff] (!%p271_p3)   ;;  %vm384_vm1 = vsmask.f32 (!%p271_p3), 256 }
   0x8   : > { %3922 = vmatprep.subr.bf16.mxu0 (!%p271_p3), %v4149_v1  ;;  %3827 = vmatpush3.bf16.msra.mxu1 (!%p271_p3), %v4148_v0  ;;  %v4154_v6 = vld [vmem:[%s5091_s3 + $0x58] sm:$0xff] (!%p271_p3)   ;;  %v4156_v8 = vld [vmem:[%s5091_s3 + $0x60] sm:$0xff] (!%p271_p3)   ;;  %v4158_v10 = vld [vmem:[%s5091_s3 + $0x68] sm:$0xff] (!%p271_p3)   ;;  %vm416_vm3 = vsmask.f32 (!%p271_p3), 7938  ;;  %v4365_v21 = vrot.slane (!%p271_p3), %v4256_v20, 7 }
   0x9   : > { %3923 = vmatpush3.bf16.msra.mxu0 (!%p271_p3), %v4149_v1  ;;  %3828 = vmatprep.subr.bf16.mxu1 (!%p271_p3), %v4150_v2  ;;  %v4155_v7 = vld [vmem:[%s5091_s3 + $0x118] sm:$0xff] (!%p271_p3)   ;;  %v4157_v9 = vld [vmem:[%s5091_s3 + $0x120] sm:$0xff] (!%p271_p3)   ;;  %v4159_v11 = vld [vmem:[%s5091_s3 + $0x128] sm:$0xff] (!%p271_p3)   ;;  %vm466_vm5 = vcmask (!%p271_p3), 1043456   ;;  %vm660_vm7 = vsmask.f32 (!%p271_p3), 3328 }
   0xa   : > { %3924 = vmatprep.subr.bf16.mxu0 (!%p271_p3), %v4151_v3  ;;  %v386_v12 = vld [vmem:[#allocation2] sm:$0x1] (!%p271_p3)  ;;  %v389_v13 = vld [vmem:[#allocation2 + $0x8] sm:$0x1] (!%p271_p3)  ;;  %vm4351_vm2 = vmand (!%p271_p3), %vm383_vm0, %vm384_vm1  ;;  %v463_v28 = vrot.slane (!%p271_p3), %v4365_v21, 4  ;;  %vm1082_vm10 = vcmask (!%p271_p3), 1042432  }
   0xb   : > { %v418_v15 = vld [vmem:[#allocation2 + $0x4] sm:$0x1] (!%p271_p3)  ;;  %v421_v16 = vld [vmem:[#allocation2 + $0xc] sm:$0x1] (!%p271_p3)  ;;  %v387_v17 = vsel (!%p271_p3), %vm4351_vm2, 0, %v386_v12  ;;  %v390_v18 = vsel (!%p271_p3), %vm4351_vm2, 0, %v389_v13  ;;  %vm4361_vm4 = vmand (!%p271_p3), %vm383_vm0, %vm416_vm3 }
   0xc   : > { %3829 = vmatpush3.bf16.msra.mxu1 (!%p271_p3), %v4150_v2  ;;  %388 = vst [vmem:[#allocation2] sm:$0x1] (!%p271_p3), %v387_v17  ;;  %391 = vst [vmem:[#allocation2 + $0x8] sm:$0x1] (!%p271_p3), %v390_v18  ;;  %v419_v23 = vsel (!%p271_p3), %vm4361_vm4, 0, %v418_v15  ;;  %v422_v24 = vsel (!%p271_p3), %vm4361_vm4, 0, %v421_v16 }
   0xd   : > { %3925 = vmatpush3.bf16.msra.mxu0 (!%p271_p3), %v4151_v3  ;;  %3830 = vmatprep.subr.bf16.mxu1 (!%p271_p3), %v4152_v4  ;;  %v4160_v27 = vld [vmem:[%s5091_s3 + $0x70] sm:$0xff] (!%p271_p3)   ;;  %420 = vst [vmem:[#allocation2 + $0x4] sm:$0x1] (!%p271_p3), %v419_v23  ;;  %423 = vst [vmem:[#allocation2 + $0xc] sm:$0x1] (!%p271_p3), %v422_v24  ;;  %v4162_v33 = vld [vmem:[%s5091_s3 + $0x78] sm:$0xff] (!%p271_p3)  }
   0xe   : > { %s5109_s18 = smov (!%p331_p4, %s4246_s18), 1  ;;  %3926 = vmatprep.subr.bf16.mxu0 %v4153_v5  ;;  %v4161_v29 = vld [vmem:[%s5091_s3 + $0x130] sm:$0xff]   ;;  %v4163_v37 = vld [vmem:[%s5091_s3 + $0x138] sm:$0xff]   ;;  %vm4391_vm6 = vmand %vm466_vm5, %vm416_vm3  ;;  %vm661_vm8 = vsmask.f32 7440  ;;  %vm1083_vm11 = vcmask 1046532  }
   0xf   : > { %s3713_s13 = sshll.u32 %s5109_s18, 5  ;;  %v392_v31 = vld [vmem:[#allocation2 + $0x10] sm:$0x1]  ;;  %v424_v32 = vld [vmem:[#allocation2 + $0x14] sm:$0x1]  ;;  %v4416_v63 = vld [vmem:[%s5091_s3] sm:$0xff]  }
  0x10   : > { %3831 = vmatpush3.bf16.msra.mxu1 %v4152_v4  ;;  %s4348_s24 = scalar_lea.vmem %s5088_s0, %s3713_s13  ;;  %v393_v34 = vsel %vm4351_vm2, 0, %v392_v31  ;;  %v425_v35 = vsel %vm4361_vm4, 0, %v424_v32  ;;  %v395_v43 = vld [vmem:[#allocation2 + $0x18] sm:$0x1]  ;;  %v427_v44 = vld [vmem:[#allocation2 + $0x1c] sm:$0x1]  ;;  %vm4460_vm9 = vmor %vm660_vm7, %vm661_vm8 }
  0x11   : > { %3927 = vmatpush3.bf16.msra.mxu0 %v4153_v5  ;;  %3832 = vmatprep.subr.bf16.mxu1 %v4154_v6  ;;  %v491_v22 = vld [vmem:[%s4348_s24] sm:$0xf]  ;;  %v492_v36 = vld [vmem:[%s4348_s24 + $0x4] sm:$0xf]  ;;  %394 = vst [vmem:[#allocation2 + $0x10] sm:$0x1] %v393_v34  ;;  %vm4677_vm12 = vmor %vm1082_vm10, %vm1083_vm11 }
  0x12   : > { %3928 = vmatprep.subr.bf16.mxu0 %v4155_v7  ;;  %v500_v25 = vshrl.u32 %v491_v22, 16  ;;  %v503_v26 = vshll.u32 %v491_v22, 16  ;;  %426 = vst [vmem:[#allocation2 + $0x14] sm:$0x1] %v425_v35  ;;  %v508_v41 = vshrl.u32 %v492_v36, 16  ;;  %v511_v42 = vshll.u32 %v492_v36, 16 }
  0x13   : > { %v493_v45 = vld [vmem:[%s4348_s24 + $0x8] sm:$0xf]  ;;  %v396_v47 = vsel %vm4351_vm2, 0, %v395_v43  ;;  %v428_v48 = vsel %vm4361_vm4, 0, %v427_v44  ;;  %v398_v50 = vld [vmem:[#allocation2 + $0x20] sm:$0x1] }
  0x14   : > { %3833 = vmatpush3.bf16.msra.mxu1 %v4154_v6  ;;  %v502_v30 = vrot.slane %v500_v25, 7  ;;  %v510_v46 = vrot.slane %v508_v41, 7  ;;  %v516_v49 = vshrl.u32 %v493_v45, 16  ;;  %v468_v51 = vld [vmem:[#allocation2] sm:$0xf]  ;;  %v519_v53 = vshll.u32 %v493_v45, 16 }
  0x15   : > { %3929 = vmatpush3.bf16.msra.mxu0 %v4155_v7  ;;  %3834 = vmatprep.subr.bf16.mxu1 %v4156_v8  ;;  %v580_v52 = vld [vmem:[#allocation2 + $0x8] sm:$0xf]  ;;  %397 = vst [vmem:[#allocation2 + $0x18] sm:$0x1] %v396_v47  ;;  %429 = vst [vmem:[#allocation2 + $0x1c] sm:$0x1] %v428_v48  ;;  %v469_v55 = vsel %vm4391_vm6, %v4365_v21, %v468_v51 }
  0x16   : > { %3930 = vmatprep.subr.bf16.mxu0 %v4157_v9  ;;  %v505_v39 = vor.u32 %v503_v26, %v502_v30  ;;  %v506_v40 = vrot.slane %v502_v30, 4  ;;  %v399_v54 = vsel %vm4351_vm2, 0, %v398_v50  ;;  %v471_v56 = vld [vmem:[#allocation2 + $0x4] sm:$0x1]  ;;  %v583_v58 = vld [vmem:[#allocation2 + $0xc] sm:$0x1]  ;;  %v513_v59 = vor.u32 %v511_v42, %v510_v46 }
  0x17   : > { %v514_v60 = vrot.slane %v510_v46, 4  ;;  %400 = vst [vmem:[#allocation2 + $0x20] sm:$0x1] %v399_v54  ;;  %470 = vst [vmem:[#allocation2] sm:$0xf] %v469_v55  ;;  %v472_v61 = vsel %vm4351_vm2, %v463_v28, %v471_v56  ;;  %v518_v0 = vrot.slane %v516_v49, 7 }
  0x18   : > { %3835 = vmatpush3.bf16.msra.mxu1 %v4156_v8  ;;  %v581_v57 = vsel %vm4391_vm6, %v505_v39, %v580_v52  ;;  %v584_v62 = vsel %vm4351_vm2, %v506_v40, %v583_v58  ;;  %v430_v1 = vld [vmem:[#allocation2 + $0x24] sm:$0x1]  ;;  %v494_v2 = vld [vmem:[%s4348_s24 + $0xc] sm:$0xf]  ;;  %473 = vst [vmem:[#allocation2 + $0x4] sm:$0x1] %v472_v61 }
  0x19   : > { %3931 = vmatpush3.bf16.msra.mxu0 %v4157_v9  ;;  %3836 = vmatprep.subr.bf16.mxu1 %v4158_v10  ;;  %582 = vst [vmem:[#allocation2 + $0x8] sm:$0xf] %v581_v57  ;;  %585 = vst [vmem:[#allocation2 + $0xc] sm:$0x1] %v584_v62  ;;  %v4422_v3 = vld [vmem:[%s5091_s3 + $0x140] sm:$0xff]   ;;  %v431_v4 = vsel %vm4361_vm4, 0, %v430_v1  ;;  %v521_v9 = vor.u32 %v519_v53, %v518_v0 }
  0x1a   : > { %3932 = vmatprep.subr.bf16.mxu0 %v4159_v11  ;;  %v524_v5 = vshrl.u32 %v494_v2, 16  ;;  %v527_v6 = vshll.u32 %v494_v2, 16  ;;  %v586_v7 = vld [vmem:[#allocation2 + $0x10] sm:$0xf]  ;;  %v589_v8 = vld [vmem:[#allocation2 + $0x14] sm:$0x1] }
  0x1b   : > { %432 = vst [vmem:[#allocation2 + $0x24] sm:$0x1] %v431_v4  ;;  %v590_v12 = vsel %vm4351_vm2, %v514_v60, %v589_v8  ;;  %v4212_v19 = vld [vmem:[%s5091_s3 + $0xe8] sm:$0xff]   ;;  %v4228_v50 = vld [vmem:[%s5091_s3 + $0x220] sm:$0xff]   ;;  %vm3212_vm13 = vcmask 1041409   ;;  %vm3215_vm14 = vcmask 1042434  }
  0x1c   : > { %3837 = vmatpush3.bf16.msra.mxu1 %v4158_v10  ;;  %v522_v10 = vrot.slane %v518_v0, 4  ;;  %v4430_v13 = vrot.slane %v524_v5, 7  ;;  %591 = vst [vmem:[#allocation2 + $0x14] sm:$0x1] %v590_v12  ;;  %v592_v15 = vld [vmem:[#allocation2 + $0x18] sm:$0xf] }
  0x1d   : > { %3933 = vmatpush3.bf16.msra.mxu0 %v4159_v11  ;;  %3838 = vmatprep.subr.bf16.mxu1 %v4160_v27  ;;  %v587_v11 = vsel %vm4391_vm6, %v513_v59, %v586_v7  ;;  %v595_v16 = vld [vmem:[#allocation2 + $0x1c] sm:$0x1]  ;;  %v593_v18 = vsel %vm4391_vm6, %v521_v9, %v592_v15  ;;  %vm3218_vm15 = vcmask 1043459   ;;  %s3717_s7 = sshll.u32 %s5109_s18, 3 }
  0x1e   : > { %3934 = vmatprep.subr.bf16.mxu0 %v4161_v29  ;;  %588 = vst [vmem:[#allocation2 + $0x10] sm:$0xf] %v587_v11  ;;  %v529_v17 = vor.u32 %v527_v6, %v4430_v13  ;;  %v596_v20 = vsel %vm4351_vm2, %v522_v10, %v595_v16  ;;  %v598_v22 = vld [vmem:[#allocation2 + $0x20] sm:$0xf]  ;;  %594 = vst [vmem:[#allocation2 + $0x18] sm:$0xf] %v593_v18  ;;  %s5036_s10 = scalar_lea.vmem %s5093_s5, %s3717_s7 }
  0x1f   : > { %v4439_v23 = vld [vmem:[#allocation2] sm:$0xf]  ;;  %597 = vst [vmem:[#allocation2 + $0x1c] sm:$0x1] %v596_v20  ;;  %v530_v1 = vrot.slane %v4430_v13, 4 }
  0x20   : > { %3839 = vmatpush3.bf16.msra.mxu1 %v4160_v27  ;;  %v4441_v24 = vld [vmem:[#allocation2 + $0x8] sm:$0xf]  ;;  %v599_v26 = vsel %vm4391_vm6, %v529_v17, %v598_v22  ;;  %v4445_v27 = vld [vmem:[#allocation2 + $0x4] sm:$0x1]  ;;  %v664_v30 = vshrl.u32 %v4439_v23, 16  ;;  %v667_v31 = vshll.u32 %v4439_v23, 16 }
  0x21   : > { %3935 = vmatpush3.bf16.msra.mxu0 %v4161_v29  ;;  %3840 = vmatprep.subr.bf16.mxu1 %v4162_v33  ;;  %v1441_v25 = vld [vmem:[#allocation2 + $0x8] sm:$0xf]  ;;  %v4447_v29 = vld [vmem:[#allocation2 + $0xc] sm:$0x1]  ;;  %600 = vst [vmem:[#allocation2 + $0x20] sm:$0xf] %v599_v26 }
  0x22   : > { %3936 = vmatprep.subr.bf16.mxu0 %v4163_v37  ;;  %v673_v32 = vshll.u32 %v4445_v27, 16  ;;  %v681_v34 = vshll.u32 %v4441_v24, 16  ;;  %v687_v35 = vshll.u32 %v4447_v29, 16  ;;  %v4455_v36 = vld [vmem:[#allocation2 + $0xc] sm:$0x1]  ;;  %v669_v39 = vrot.slane %v667_v31, 5 }
  0x23   : > { %v4457_v46 = vld [vmem:[#allocation2 + $0x14] sm:$0x1]  ;;  %v1458_v47 = vshrl.u32 %v1441_v25, 16  ;;  %v1461_v48 = vshll.u32 %v1441_v25, 16  ;;  %v1467_v49 = vshll.u32 %v4455_v36, 16 }
  0x24   : > { %3841 = vmatpush3.bf16.msra.mxu1 %v4162_v33  ;;  %v678_v33 = vshrl.u32 %v4441_v24, 16  ;;  %v675_v40 = vrot.slane %v673_v32, 5  ;;  %v683_v42 = vrot.slane %v681_v34, 5  ;;  %v689_v43 = vrot.slane %v687_v35, 5  ;;  %v4469_v0 = vld [vmem:[#allocation2 + $0x14] sm:$0x1] }
  0x25   : > { %3937 = vmatpush3.bf16.msra.mxu0 %v4163_v37  ;;  %3850 = vmatprep.subr.bf16.mxu1 %v4416_v63  ;;  %v666_v37 = vrot.slane %v664_v30, 4  ;;  %v1443_v44 = vld [vmem:[#allocation2 + $0x10] sm:$0xf]  ;;  %v1481_v54 = vshll.u32 %v4457_v46, 16  ;;  %v1460_v57 = vrot.slane %v1458_v47, 4  ;;  %v1463_v58 = vrot.slane %v1461_v48, 5 }
  0x26   : > { %3946 = vmatprep.subr.bf16.mxu0 %v4422_v3  ;;  %v680_v41 = vrot.slane %v678_v33, 4  ;;  %v1472_v52 = vshrl.u32 %v1443_v44, 16  ;;  %v1475_v53 = vshll.u32 %v1443_v44, 16  ;;  %v4465_v55 = vld [vmem:[#allocation2 + $0x10] sm:$0xf]  ;;  %v1469_v5 = vrot.slane %v1467_v49, 5 }
  0x27   : > { %v670_v45 = vor.u32 %v669_v39, %v666_v37  ;;  %v4467_v59 = vld [vmem:[#allocation2 + $0x18] sm:$0xf]  ;;  %v1464_v4 = vor.u32 %v1463_v58, %v1460_v57  ;;  %v1483_v6 = vrot.slane %v1481_v54, 5  ;;  %v4476_v9 = vld [vmem:[#allocation2 + $0x1c] sm:$0x1]  ;;  %v692_v10 = vshrl.u32 %v4465_v55, 16 }
  0x28   : > { %v684_v51 = vor.u32 %v683_v42, %v680_v41  ;;  %v1474_v61 = vrot.slane %v1472_v52, 4  ;;  %v1477_v62 = vrot.slane %v1475_v53, 5  ;;  %v695_v11 = vshll.u32 %v4465_v55, 16  ;;  %v601_v12 = vld [vmem:[#allocation2 + $0x24] sm:$0x1] }
  0x29   : > { %v671_v56 = vrot.slane %v670_v45, 4  ;;  %v1465_v16 = vrot.slane %v1464_v4, 4  ;;  %v701_v13 = vshll.u32 %v4469_v0, 16  ;;  %v706_v17 = vshrl.u32 %v4467_v59, 16  ;;  %v1445_v18 = vld [vmem:[#allocation2 + $0x18] sm:$0xf] }
  0x2a   : > { %v685_v60 = vrot.slane %v684_v51, 4  ;;  %v1478_v8 = vor.u32 %v1477_v62, %v1474_v61  ;;  %v694_v22 = vrot.slane %v692_v10, 4  ;;  %v697_v25 = vrot.slane %v695_v11, 5  ;;  %v4483_v30 = vld [vmem:[#allocation2 + $0x1c] sm:$0x1]  ;;  %v4166_v62 = vld [vmem:[%s5091_s3 + $0x8] sm:$0xff]  }
  0x2b   : > { %v676_v2 = vsel %vm4460_vm9, %v671_v56, %v675_v40  ;;  %v709_v26 = vshll.u32 %v4467_v59, 16  ;;  %v1470_v31 = vsel %vm4460_vm9, %v1465_v16, %v1469_v5  ;;  %v708_v32 = vrot.slane %v706_v17, 4  ;;  %v1447_v34 = vld [vmem:[#allocation2 + $0x20] sm:$0xf]  ;;  %v401_v4 = vld [vmem:[#allocation2 + $0x28] sm:$0x1] }
  0x2c   : > { %v690_v7 = vsel %vm4460_vm9, %v685_v60, %v689_v43  ;;  %v1479_v20 = vrot.slane %v1478_v8, 4  ;;  %v715_v33 = vshll.u32 %v4476_v9, 16  ;;  %v698_v37 = vor.u32 %v697_v25, %v694_v22  ;;  %v433_v5 = vld [vmem:[#allocation2 + $0x2c] sm:$0x1]  ;;  %v495_v11 = vld [vmem:[%s4348_s24 + $0x10] sm:$0xf] }
  0x2d   : > { %v3430_v15 = vcombine.low %v676_v2, %v690_v7  ;;  %v703_v39 = vrot.slane %v701_v13, 5  ;;  %v711_v40 = vrot.slane %v709_v26, 5  ;;  %v602_v43 = vsel %vm4351_vm2, %v530_v1, %v601_v12  ;;  %v4505_v12 = vld [vmem:[#allocation2 + $0x20] sm:$0xf] }
  0x2e   : > { %v1484_v35 = vsel %vm4460_vm9, %v1479_v20, %v1483_v6  ;;  %v717_v42 = vrot.slane %v715_v33, 5  ;;  %v699_v44 = vrot.slane %v698_v37, 4  ;;  %603 = vst [vmem:[#allocation2 + $0x24] sm:$0x1] %v602_v43  ;;  %v1486_v47 = vshrl.u32 %v1445_v18, 16 }
  0x2f   : > { %3842 = vmatprep.mubr.bf16.mxu1 %v3430_v15  ;;  %v3534_v41 = vcombine.low %v1470_v31, %v1484_v35  ;;  %v712_v45 = vor.u32 %v711_v40, %v708_v32  ;;  %v1489_v48 = vshll.u32 %v1445_v18, 16  ;;  %v1495_v49 = vshll.u32 %v4483_v30, 16  ;;  %v4168_v32 = vld [vmem:[%s5091_s3 + $0x10] sm:$0xff]  }
  0x30   : > { %v1500_v51 = vshrl.u32 %v1447_v34, 16  ;;  %v1503_v52 = vshll.u32 %v1447_v34, 16  ;;  %v704_v53 = vsel %vm4460_vm9, %v699_v44, %v703_v39  ;;  %v1488_v56 = vrot.slane %v1486_v47, 4  ;;  %v404_v34 = vld [vmem:[#allocation2 + $0x30] sm:$0x1] }
  0x31   : > { %3938 = vmatprep.mubr.bf16.mxu0 %v3534_v41  ;;  %v713_v54 = vrot.slane %v712_v45, 4  ;;  %v1491_v57 = vrot.slane %v1489_v48, 5  ;;  %v1497_v58 = vrot.slane %v1495_v49, 5  ;;  %v402_v8 = vsel %vm4351_vm2, 0, %v401_v4  ;;  %v436_v41 = vld [vmem:[#allocation2 + $0x34] sm:$0x1] }
  0x32   : > { %v1502_v60 = vrot.slane %v1500_v51, 4  ;;  %v1505_v61 = vrot.slane %v1503_v52, 5  ;;  %v434_v10 = vsel %vm4361_vm4, 0, %v433_v5  ;;  %403 = vst [vmem:[#allocation2 + $0x28] sm:$0x1] %v402_v8  ;;  %v532_v16 = vshrl.u32 %v495_v11, 16 }
  0x33   : > { %v718_v1 = vsel %vm4460_vm9, %v713_v54, %v717_v42  ;;  %v1492_v2 = vor.u32 %v1491_v57, %v1488_v56  ;;  %435 = vst [vmem:[#allocation2 + $0x2c] sm:$0x1] %v434_v10  ;;  %v535_v13 = vshll.u32 %v495_v11, 16  ;;  %v720_v17 = vshrl.u32 %v4505_v12, 16  ;;  %v4167_v42 = vld [vmem:[%s5091_s3 + $0x148] sm:$0xff]   ;;  %v4172_v4 = vld [vmem:[%s5091_s3 + $0x20] sm:$0xff]  }
  0x34   : > { %v3431_v6 = vcombine.low %v704_v53, %v718_v1  ;;  %v1506_v7 = vor.u32 %v1505_v61, %v1502_v60  ;;  %v723_v20 = vshll.u32 %v4505_v12, 16  ;;  %v534_v26 = vrot.slane %v532_v16, 7  ;;  %v496_v45 = vld [vmem:[%s4348_s24 + $0x14] sm:$0xf]  ;;  %v407_v51 = vld [vmem:[#allocation2 + $0x38] sm:$0x1] }
  0x35   : > { %v1493_v15 = vrot.slane %v1492_v2, 4  ;;  %v4508_v18 = vld [vmem:[#allocation2 + $0x24] sm:$0x1]  ;;  %v4518_v33 = vrot.slane %v720_v17, 4  ;;  %v405_v40 = vsel %vm4351_vm2, 0, %v404_v34  ;;  %v437_v44 = vsel %vm4361_vm4, 0, %v436_v41 }
  0x36   : > { %3843 = vmatmul.mubr.bf16.vlgmr.msra.gmra.mrb[0].mxu1 %v3431_v6  ;;  %v1507_v22 = vrot.slane %v1506_v7, 4  ;;  %v1509_v25 = vshll.u32 %v4508_v18, 16  ;;  %v537_v37 = vor.u32 %v535_v13, %v534_v26  ;;  %v538_v39 = vrot.slane %v534_v26, 4  ;;  %406 = vst [vmem:[#allocation2 + $0x30] sm:$0x1] %v405_v40  ;;  %v4170_v53 = vld [vmem:[%s5091_s3 + $0x18] sm:$0xff]  }
  0x37   : > { %3851 = vmatpush3.bf16.msra.mxu1 %v4416_v63  ;;  %v1498_v31 = vsel %vm4460_vm9, %v1493_v15, %v1497_v58  ;;  %v4520_v63 = vld [vmem:[#allocation2 + $0x24] sm:$0x1]  ;;  %v4527_v43 = vrot.slane %v723_v20, 5  ;;  %438 = vst [vmem:[#allocation2 + $0x34] sm:$0x1] %v437_v44  ;;  %v540_v48 = vshrl.u32 %v496_v45, 16 }
  0x38   : > { %3852 = vmatprep.subr.bf16.mxu1 %v4166_v62  ;;  %v1511_v35 = vrot.slane %v1509_v25, 5  ;;  %v543_v49 = vshll.u32 %v496_v45, 16  ;;  %v408_v57 = vsel %vm4351_vm2, 0, %v407_v51  ;;  %v497_v1 = vld [vmem:[%s4348_s24 + $0x18] sm:$0xf]  ;;  %v4169_v2 = vld [vmem:[%s5091_s3 + $0x150] sm:$0xff]  }
  0x39   : > { %v604_v54 = vld [vmem:[#allocation2 + $0x28] sm:$0xf]  ;;  %v542_v61 = vrot.slane %v540_v48, 7  ;;  %409 = vst [vmem:[#allocation2 + $0x38] sm:$0x1] %v408_v57  ;;  %v729_v5 = vshll.u32 %v4520_v63, 16  ;;  %v726_v11 = vor.u32 %v4527_v43, %v4518_v33 }
  0x3a   : > { %v1512_v47 = vsel %vm4460_vm9, %v1507_v22, %v1511_v35  ;;  %v607_v56 = vld [vmem:[#allocation2 + $0x2c] sm:$0x1]  ;;  %v605_v58 = vsel %vm4391_vm6, %v537_v37, %v604_v54  ;;  %v548_v7 = vshrl.u32 %v497_v1, 16  ;;  %v551_v8 = vshll.u32 %v497_v1, 16  ;;  %v410_v10 = vld [vmem:[#allocation2 + $0x40] sm:$0x1] }
  0x3b   : > { %3853 = vmatpush3.bf16.msra.mxu1 %v4166_v62  ;;  %v3535_v52 = vcombine.low %v1498_v31, %v1512_v47  ;;  %v608_v60 = vsel %vm4351_vm2, %v538_v39, %v607_v56  ;;  %v439_v62 = vld [vmem:[#allocation2 + $0x3c] sm:$0x1]  ;;  %606 = vst [vmem:[#allocation2 + $0x28] sm:$0xf] %v605_v58  ;;  %v545_v15 = vor.u32 %v543_v49, %v542_v61  ;;  %v546_v16 = vrot.slane %v542_v61, 4  ;;  %v4174_v33 = vld [vmem:[%s5091_s3 + $0x28] sm:$0xff]  }
  0x3c   : > { %3854 = vmatprep.subr.bf16.mxu1 %v4168_v32  ;;  %609 = vst [vmem:[#allocation2 + $0x2c] sm:$0x1] %v608_v60  ;;  %v440_v6 = vsel %vm4361_vm4, 0, %v439_v62  ;;  %v411_v13 = vsel %vm4351_vm2, 0, %v410_v10  ;;  %v442_v17 = vld [vmem:[#allocation2 + $0x44] sm:$0x1] }
  0x3d   : > { %3939 = vmatmul.mubr.bf16.vlgmr.msra.gmra.mrb[0].mxu0 %v3535_v52  ;;  %441 = vst [vmem:[#allocation2 + $0x3c] sm:$0x1] %v440_v6  ;;  %v498_v20 = vld [vmem:[%s4348_s24 + $0x1c] sm:$0xf]  ;;  %v550_v22 = vrot.slane %v548_v7, 7  ;;  %v443_v25 = vsel %vm4361_vm4, 0, %v442_v17 }
  0x3e   : > { %3947 = vmatpush3.bf16.msra.mxu0 %v4422_v3  ;;  %412 = vst [vmem:[#allocation2 + $0x40] sm:$0x1] %v411_v13  ;;  %v556_v3 = vshrl.u32 %v498_v20, 16  ;;  %v559_v26 = vshll.u32 %v498_v20, 16  ;;  %v610_v31 = vld [vmem:[#allocation2 + $0x30] sm:$0xf] }
  0x3f   : > { %3855 = vmatpush3.bf16.msra.mxu1 %v4168_v32  ;;  %3948 = vmatprep.subr.bf16.mxu0 %v4167_v42  ;;  %444 = vst [vmem:[#allocation2 + $0x44] sm:$0x1] %v443_v25  ;;  %v4171_v32 = vld [vmem:[%s5091_s3 + $0x158] sm:$0xff]   ;;  %v611_v34 = vsel %vm4391_vm6, %v545_v15, %v610_v31  ;;  %v613_v35 = vld [vmem:[#allocation2 + $0x34] sm:$0x1]  ;;  %v553_v37 = vor.u32 %v551_v8, %v550_v22  ;;  %v1749_v40 = vrot.slane %v4455_v36, 5 }
  0x40   : > { %3856 = vmatprep.subr.bf16.mxu1 %v4170_v53  ;;  %v558_v39 = vrot.slane %v556_v3, 7  ;;  %v1753_v41 = vrot.slane %v4457_v46, 5  ;;  %612 = vst [vmem:[#allocation2 + $0x30] sm:$0xf] %v611_v34  ;;  %v614_v43 = vsel %vm4351_vm2, %v546_v16, %v613_v35  ;;  %v4573_v44 = vrot.slane %v726_v11, 4  ;;  %v4586_v56 = vld [vmem:[%s5091_s3 + $0x160] sm:$0xff]  }
  0x41   : > { %v4575_v45 = vrot.slane %v729_v5, 5  ;;  %615 = vst [vmem:[#allocation2 + $0x34] sm:$0x1] %v614_v43  ;;  %v554_v47 = vrot.slane %v550_v22, 4  ;;  %v616_v48 = vld [vmem:[#allocation2 + $0x38] sm:$0xf] }
  0x42   : > { %3949 = vmatpush3.bf16.msra.mxu0 %v4167_v42  ;;  %v562_v49 = vrot.slane %v558_v39, 4  ;;  %v4577_v51 = vld [vmem:[#allocation2 + $0x28] sm:$0xf]  ;;  %v561_v54 = vor.u32 %v559_v26, %v558_v39  ;;  %v4594_v61 = vld [vmem:[%s5091_s3 + $0x30] sm:$0xff]   ;;  %v1757_v10 = vrot.slane %v4483_v30, 5  ;;  %v1761_v17 = vrot.slane %v4508_v18, 5 }
  0x43   : > { %3857 = vmatpush3.bf16.msra.mxu1 %v4170_v53  ;;  %3950 = vmatprep.subr.bf16.mxu0 %v4169_v2  ;;  %v4579_v52 = vld [vmem:[#allocation2 + $0x2c] sm:$0x1]  ;;  %v1449_v42 = vld [vmem:[#allocation2 + $0x28] sm:$0xf]  ;;  %v617_v53 = vsel %vm4391_vm6, %v553_v37, %v616_v48  ;;  %v734_v57 = vshrl.u32 %v4577_v51, 16  ;;  %v737_v58 = vshll.u32 %v4577_v51, 16  ;;  %v732_v37 = vsel %vm4460_vm9, %v4573_v44, %v4575_v45 }
  0x44   : > { %3858 = vmatprep.subr.bf16.mxu1 %v4172_v4  ;;  %v743_v60 = vshll.u32 %v4579_v52, 16  ;;  %v4596_v62 = vld [vmem:[#allocation2 + $0x2c] sm:$0x1]  ;;  %v1514_v1 = vshrl.u32 %v1449_v42, 16  ;;  %618 = vst [vmem:[#allocation2 + $0x38] sm:$0xf] %v617_v53 }
  0x45   : > { %v1517_v5 = vshll.u32 %v1449_v42, 16  ;;  %v1523_v6 = vshll.u32 %v4596_v62, 16  ;;  %v619_v7 = vld [vmem:[#allocation2 + $0x3c] sm:$0x1]  ;;  %v622_v8 = vld [vmem:[#allocation2 + $0x40] sm:$0xf] }
  0x46   : > { %3951 = vmatpush3.bf16.msra.mxu0 %v4169_v2  ;;  %v736_v11 = vrot.slane %v734_v57, 4  ;;  %v739_v15 = vrot.slane %v737_v58, 5  ;;  %v1516_v16 = vrot.slane %v1514_v1, 4  ;;  %v625_v13 = vld [vmem:[#allocation2 + $0x44] sm:$0x1]  ;;  %v620_v2 = vsel %vm4351_vm2, %v554_v47, %v619_v7  ;;  %v4178_v53 = vld [vmem:[%s5091_s3 + $0x38] sm:$0xff]  }
  0x47   : > { %3859 = vmatpush3.bf16.msra.mxu1 %v4172_v4  ;;  %3952 = vmatprep.subr.bf16.mxu0 %v4171_v32  ;;  %v1519_v20 = vrot.slane %v1517_v5, 5  ;;  %v623_v4 = vsel %vm4391_vm6, %v561_v54, %v622_v8  ;;  %v4605_v22 = vld [vmem:[#allocation2 + $0x8] sm:$0xe]  ;;  %v745_v3 = vrot.slane %v743_v60, 5  ;;  %v1451_v26 = vld [vmem:[#allocation2 + $0x30] sm:$0xf]  ;;  %v626_v35 = vsel %vm4351_vm2, %v562_v49, %v625_v13 }
  0x48   : > { %3860 = vmatprep.subr.bf16.mxu1 %v4174_v33  ;;  %v740_v25 = vor.u32 %v739_v15, %v736_v11  ;;  %v4607_v31 = vrot.slane %v1523_v6, 5  ;;  %621 = vst [vmem:[#allocation2 + $0x3c] sm:$0x1] %v620_v2  ;;  %v4609_v34 = vld [vmem:[#allocation2 + $0x30] sm:$0xf]  ;;  %v1528_v47 = vshrl.u32 %v1451_v26, 16 }
  0x49   : > { %624 = vst [vmem:[#allocation2 + $0x40] sm:$0xf] %v623_v4  ;;  %v4617_v39 = vld [vmem:[#allocation2 + $0x34] sm:$0x1]  ;;  %v1520_v43 = vor.u32 %v1519_v20, %v1516_v16  ;;  %v1531_v48 = vshll.u32 %v1451_v26, 16  ;;  %v748_v44 = vshrl.u32 %v4609_v34, 16 }
  0x4a   : > { %3953 = vmatpush3.bf16.msra.mxu0 %v4171_v32  ;;  %v4619_v42 = vld [vmem:[#allocation2 + $0x34] sm:$0x1]  ;;  %627 = vst [vmem:[#allocation2 + $0x44] sm:$0x1] %v626_v35  ;;  %v4175_v32 = vld [vmem:[%s5091_s3 + $0x168] sm:$0xff]   ;;  %v1537_v49 = vshll.u32 %v4617_v39, 16 }
  0x4b   : > { %3861 = vmatpush3.bf16.msra.mxu1 %v4174_v33  ;;  %3954 = vmatprep.subr.bf16.mxu0 %v4586_v56  ;;  %v741_v33 = vrot.slane %v740_v25, 4  ;;  %v751_v45 = vshll.u32 %v4609_v34, 16  ;;  %v1521_v54 = vrot.slane %v1520_v43, 4  ;;  %v1530_v57 = vrot.slane %v1528_v47, 4  ;;  %v4632_v60 = vld [vmem:[#allocation2 + $0x38] sm:$0xf] }
  0x4c   : > { %3862 = vmatprep.subr.bf16.mxu1 %v4594_v61  ;;  %v1533_v58 = vrot.slane %v1531_v48, 5  ;;  %v757_v1 = vshll.u32 %v4619_v42, 16  ;;  %v4177_v6 = vld [vmem:[%s5091_s3 + $0x170] sm:$0xff]   ;;  %v750_v7 = vrot.slane %v748_v44, 4  ;;  %v1453_v11 = vld [vmem:[#allocation2 + $0x38] sm:$0xf] }
  0x4d   : > { %v746_v5 = vsel %vm4460_vm9, %v741_v33, %v745_v3  ;;  %v753_v8 = vrot.slane %v751_v45, 5  ;;  %v3546_v15 = vrot.slane %v4605_v22, 9  ;;  %v1539_v20 = vrot.slane %v1537_v49, 5  ;;  %v1724_v4 = vld [vmem:[#allocation2 + $0x10] sm:$0xe]  ;;  %v4648_v43 = vld [vmem:[%s5091_s3 + $0x80] sm:$0xff]  }
  0x4e   : > { %3955 = vmatpush3.bf16.msra.mxu0 %v4586_v56  ;;  %v3432_v16 = vcombine.low %v732_v37, %v746_v5  ;;  %v1534_v13 = vor.u32 %v1533_v58, %v1530_v57  ;;  %v759_v2 = vrot.slane %v757_v1, 5  ;;  %v762_v3 = vshrl.u32 %v4632_v60, 16  ;;  %v1059_v18 = vld [vmem:[#allocation2 + $0x8] sm:$0xe] }
  0x4f   : > { %3863 = vmatpush3.bf16.msra.mxu1 %v4594_v61  ;;  %3956 = vmatprep.subr.bf16.mxu0 %v4175_v32  ;;  %v754_v25 = vor.u32 %v753_v8, %v750_v7  ;;  %v765_v26 = vshll.u32 %v4632_v60, 16  ;;  %v1542_v35 = vshrl.u32 %v1453_v11, 16  ;;  %v1526_v56 = vsel %vm4460_vm9, %v1521_v54, %v4607_v31  ;;  %v4653_v37 = vld [vmem:[#allocation2 + $0x3c] sm:$0x1] }
  0x50   : > { %3864 = vmatprep.subr.bf16.mxu1 %v4178_v53  ;;  %3846 = vmatprep.mubr.bf16.mxu1 %v3432_v16  ;;  %v1535_v61 = vrot.slane %v1534_v13, 4  ;;  %v4655_v47 = vld [vmem:[#allocation2 + $0x3c] sm:$0x1]  ;;  %v1545_v48 = vshll.u32 %v1453_v11, 16  ;;  %v764_v49 = vrot.slane %v762_v3, 4  ;;  %v771_v45 = vshll.u32 %v4653_v37, 16 }
  0x51   : > { %v755_v33 = vrot.slane %v754_v25, 4  ;;  %v767_v44 = vrot.slane %v765_v26, 5  ;;  %v1455_v57 = vld [vmem:[#allocation2 + $0x40] sm:$0xf]  ;;  %v4660_v1 = vld [vmem:[#allocation2 + $0x44] sm:$0x1] }
  0x52   : > { %3957 = vmatpush3.bf16.msra.mxu0 %v4175_v32  ;;  %v1540_v58 = vsel %vm4460_vm9, %v1535_v61, %v1539_v20  ;;  %v1544_v5 = vrot.slane %v1542_v35, 4  ;;  %v1547_v31 = vrot.slane %v1545_v48, 5  ;;  %v1551_v54 = vshll.u32 %v4655_v47, 16  ;;  %v4179_v7 = vld [vmem:[%s5091_s3 + $0x178] sm:$0xff]  }
  0x53   : > { %3865 = vmatpush3.bf16.msra.mxu1 %v4178_v53  ;;  %v3536_v8 = vcombine.low %v1526_v56, %v1540_v58  ;;  %3958 = vmatprep.subr.bf16.mxu0 %v4177_v6  ;;  %v768_v11 = vor.u32 %v767_v44, %v764_v49  ;;  %v773_v16 = vrot.slane %v771_v45, 5  ;;  %v3547_v32 = vrot.slane %v1724_v4, 9  ;;  %v1725_v3 = vld [vmem:[#allocation2 + $0x18] sm:$0xe]  ;;  %v4673_v53 = vld [vmem:[%s5091_s3 + $0x180] sm:$0xff]  }
  0x54   : > { %3874 = vmatprep.subr.bf16.mxu1 %v4648_v43  ;;  %v1548_v13 = vor.u32 %v1547_v31, %v1544_v5  ;;  %v1556_v20 = vshrl.u32 %v1455_v57, 16  ;;  %v1559_v25 = vshll.u32 %v1455_v57, 16  ;;  %v760_v26 = vsel %vm4460_vm9, %v755_v33, %v759_v2  ;;  %v1726_v56 = vld [vmem:[#allocation2 + $0x20] sm:$0xe] }
  0x55   : > { %3942 = vmatprep.mubr.bf16.mxu0 %v3536_v8  ;;  %v769_v35 = vrot.slane %v768_v11, 4  ;;  %v1565_v61 = vshll.u32 %v4660_v1, 16  ;;  %v1553_v49 = vrot.slane %v1551_v54, 5  ;;  %v3442_v57 = vcombine.low %v4439_v23, %v4441_v24  ;;  %v1728_v11 = vld [vmem:[#allocation2 + $0x30] sm:$0xe] }
  0x56   : > { %v1549_v48 = vrot.slane %v1548_v13, 4  ;;  %v1558_v4 = vrot.slane %v1556_v20, 4  ;;  %v1561_v44 = vrot.slane %v1559_v25, 5  ;;  %3959 = vmatpush3.bf16.msra.mxu0 %v4177_v6  ;;  %v3548_v58 = vrot.slane %v1725_v3, 9 }
  0x57   : > { %v774_v2 = vsel %vm4460_vm9, %v769_v35, %v773_v16  ;;  %v1567_v33 = vrot.slane %v1565_v61, 5  ;;  %3960 = vmatprep.subr.bf16.mxu0 %v4179_v7  ;;  %v1750_v6 = vsel %vm4677_vm12, %v3546_v15, %v1749_v40  ;;  %v1754_v54 = vsel %vm4677_vm12, %v3547_v32, %v1753_v41  ;;  %v1727_v40 = vld [vmem:[#allocation2 + $0x28] sm:$0xe] }
  0x58   : > { %v3433_v5 = vcombine.low %v760_v26, %v774_v2  ;;  %v1562_v31 = vor.u32 %v1561_v44, %v1558_v4  ;;  %v1554_v8 = vsel %vm4460_vm9, %v1549_v48, %v1553_v49  ;;  %v3549_v24 = vrot.slane %v1726_v56, 9  ;;  %v4185_v26 = vld [vmem:[%s5091_s3 + $0x188] sm:$0xff]   ;;  %v1061_v44 = vld [vmem:[#allocation2 + $0x18] sm:$0xe] }
  0x59   : > { %v3570_v22 = vcombine.low %v1750_v6, %v1754_v54  ;;  %v1087_v46 = vrot.slane %v4445_v27, 5  ;;  %v3443_v41 = vcombine.low %v4465_v55, %v4467_v59  ;;  %v3550_v16 = vrot.slane %v1727_v40, 9  ;;  %v4184_v27 = vld [vmem:[%s5091_s3 + $0x88] sm:$0xff]   ;;  %v4189_v54 = vld [vmem:[%s5091_s3 + $0x198] sm:$0xff]  }
  0x5a   : > { %3847 = vmatmul.mubr.bf16.gmra.mrb[4].mxu1 %v3433_v5  ;;  %v1563_v23 = vrot.slane %v1562_v31, 4  ;;  %3961 = vmatpush3.bf16.msra.mxu0 %v4179_v7  ;;  %v1765_v32 = vrot.slane %v4596_v62, 5  ;;  %v3551_v7 = vrot.slane %v1728_v11, 9  ;;  %v1769_v13 = vrot.slane %v4617_v39, 5  ;;  %v1058_v62 = vld [vmem:[#allocation2] sm:$0xe] }
  0x5b   : > { %3866 = vmatprep.mubr.bf16.mxu1 %v3442_v57  ;;  %3970 = vmatprep.subr.bf16.mxu0 %v4673_v53  ;;  %v1091_v20 = vrot.slane %v4447_v29, 5  ;;  %v1095_v25 = vrot.slane %v4469_v0, 5  ;;  %v1099_v3 = vrot.slane %v4476_v9, 5  ;;  %v3444_v55 = vcombine.low %v4505_v12, %v4577_v51  ;;  %v1729_v0 = vld [vmem:[#allocation2 + $0x38] sm:$0xe]  ;;  %v4186_v39 = vld [vmem:[%s5091_s3 + $0x90] sm:$0xff]  }
  0x5c   : > { %v1568_v36 = vsel %vm4460_vm9, %v1563_v23, %v1567_v33  ;;  %v1758_v59 = vsel %vm4677_vm12, %v3548_v58, %v1757_v10  ;;  %v1762_v29 = vsel %vm4677_vm12, %v3549_v24, %v1761_v17  ;;  %v1730_v9 = vld [vmem:[#allocation2 + $0x40] sm:$0xe]  ;;  %v1766_v12 = vsel %vm4677_vm12, %v3550_v16, %v1765_v32  ;;  %v4188_v5 = vld [vmem:[%s5091_s3 + $0x98] sm:$0xff]   ;;  %v4193_v40 = vld [vmem:[%s5091_s3 + $0x1a8] sm:$0xff]  }
  0x5d   : > { %v3537_v15 = vcombine.low %v1554_v8, %v1568_v36  ;;  %v1770_v30 = vsel %vm4677_vm12, %v3551_v7, %v1769_v13  ;;  %v1773_v51 = vrot.slane %v4655_v47, 5  ;;  %v3454_v10 = vrot.slane %v1058_v62, 9  ;;  %v4190_v23 = vld [vmem:[%s5091_s3 + $0xa0] sm:$0xff]   ;;  %v4201_v24 = vld [vmem:[#allocation2 + $0x10] ss:$8 sps:$4 sm:$0xff]   ;;  %v4192_v36 = vld [vmem:[%s5091_s3 + $0xa8] sm:$0xff]  }
  0x5e   : > { %v3571_v17 = vcombine.low %v1758_v59, %v1762_v29  ;;  %v3552_v35 = vrot.slane %v1729_v0, 9  ;;  %v3455_v61 = vrot.slane %v1059_v18, 9  ;;  %v3553_v56 = vrot.slane %v1730_v9, 9  ;;  %v413_v11 = vld [vmem:[#allocation2 + $0x48] sm:$0x1]  ;;  %v4198_v16 = vld [vmem:[%s5091_s3 + $0xb8] sm:$0xff]  }
  0x5f   : > { %3943 = vmatmul.mubr.bf16.gmra.mrb[4].mxu0 %v3537_v15  ;;  %v1777_v48 = vrot.slane %v4660_v1, 5  ;;  %v1088_v49 = vsel %vm4677_vm12, %v3454_v10, %v1087_v46  ;;  %v3572_v47 = vcombine.low %v1766_v12, %v1770_v30  ;;  %v3445_v2 = vcombine.low %v4609_v34, %v4632_v60  ;;  %v4195_v46 = vld [vmem:[%s5091_s3 + $0xb0] sm:$0xff]   ;;  %v1062_v15 = vld [vmem:[#allocation2 + $0x20] sm:$0xe]  ;;  %v2106_v29 = vld [vmem:[#allocation2 + $0x18] sm:$0xf] }
  0x60   : > { %3962 = vmatprep.mubr.bf16.mxu0 %v3570_v22  ;;  %v1092_v4 = vsel %vm4677_vm12, %v3455_v61, %v1091_v20  ;;  %v3457_v58 = vrot.slane %v1061_v44, 9  ;;  %v1774_v1 = vsel %vm4677_vm12, %v3552_v35, %v1773_v51  ;;  %v4191_v22 = vld [vmem:[%s5091_s3 + $0x1a0] sm:$0xff]   ;;  %v414_v32 = vsel %vm4351_vm2, 0, %v413_v11  ;;  %v4196_v7 = vld [vmem:[%s5091_s3 + $0x1b0] sm:$0xff]   ;;  %v4199_v30 = vld [vmem:[%s5091_s3 + $0x1b8] sm:$0xff]  }
  0x61   : > { %v3478_v33 = vcombine.low %v1088_v49, %v1092_v4  ;;  %v1778_v31 = vsel %vm4677_vm12, %v3553_v56, %v1777_v48  ;;  %v1103_v13 = vrot.slane %v4520_v63, 5  ;;  %v1107_v20 = vrot.slane %v4579_v52, 5  ;;  %415 = vst [vmem:[#allocation2 + $0x48] sm:$0x1] %v414_v32  ;;  %v2104_v59 = vld [vmem:[#allocation2 + $0x10] sm:$0xf] }
  0x62   : > { %3867 = vmatmul.mubr.bf16.vlgmr.msra.gmra.mrb[0].mxu1 %v3443_v41  ;;  %v4754_v60 = vsel %vm4677_vm12, %v3457_v58, %v1099_v3  ;;  %v3573_v8 = vcombine.low %v1774_v1, %v1778_v31  ;;  %v1063_v41 = vld [vmem:[#allocation2 + $0x28] sm:$0xe]  ;;  %v2121_v0 = vshrl.u32 %v2104_v59, 16  ;;  %v2124_v9 = vshll.u32 %v2104_v59, 16  ;;  %v4200_v63 = vld [vmem:[%s5091_s3 + $0xc0] sm:$0xff]  }
  0x63   : > { %3875 = vmatpush3.bf16.msra.mxu1 %v4648_v43  ;;  %3870 = vmatprep.mubr.bf16.mxu1 %v3444_v55  ;;  %v1060_v43 = vld [vmem:[#allocation2 + $0x10] sm:$0xe]  ;;  %v3459_v3 = vrot.slane %v1063_v41, 9  ;;  %v1065_v55 = vld [vmem:[#allocation2 + $0x38] sm:$0xe]  ;;  %v2135_v62 = vshrl.u32 %v2106_v29, 16 }
  0x64   : > { %3876 = vmatprep.subr.bf16.mxu1 %v4184_v27  ;;  %v3456_v57 = vrot.slane %v1060_v43, 9  ;;  %v2138_v12 = vshll.u32 %v2106_v29, 16  ;;  %v1111_v18 = vrot.slane %v4619_v42, 5  ;;  %v3461_v10 = vrot.slane %v1065_v55, 9  ;;  %v4804_v4 = vld [vmem:[#allocation2 + $0x14] sm:$0x1] }
  0x65   : > { %v2123_v35 = vrot.slane %v2121_v0, 4  ;;  %v2126_v61 = vrot.slane %v2124_v9, 5  ;;  %v2137_v56 = vrot.slane %v2135_v62, 4  ;;  %v4806_v43 = vld [vmem:[#allocation2 + $0x1c] sm:$0x1]  ;;  %v4204_v42 = vld [vmem:[%s5091_s3 + $0xc8] sm:$0xff]  }
  0x66   : > { %v4750_v34 = vsel %vm4677_vm12, %v3456_v57, %v1095_v25  ;;  %v3458_v25 = vrot.slane %v1062_v15, 9  ;;  %v2140_v48 = vrot.slane %v2138_v12, 5  ;;  %v2144_v58 = vshll.u32 %v4806_v43, 16  ;;  %v4203_v1 = vld [vmem:[#allocation2 + $0x20] ss:$8 sps:$4 sm:$0xff]   ;;  %v4209_v55 = vld [vmem:[%s5091_s3 + $0x1d8] sm:$0xff]  }
  0x67   : > { %3963 = vmatmul.mubr.bf16.vlgmr.msra.gmra.mrb[0].mxu0 %v3571_v17  ;;  %3877 = vmatpush3.bf16.msra.mxu1 %v4184_v27  ;;  %v3479_v6 = vcombine.low %v4750_v34, %v4754_v60  ;;  %v1064_v27 = vld [vmem:[#allocation2 + $0x30] sm:$0xe]  ;;  %v1115_v17 = vrot.slane %v4653_v37, 5  ;;  %v4202_v37 = vld [vmem:[%s5091_s3 + $0x1c0] sm:$0xff]   ;;  %v4205_v31 = vld [vmem:[%s5091_s3 + $0x1c8] sm:$0xff]  }
  0x68   : > { %3971 = vmatpush3.bf16.msra.mxu0 %v4673_v53  ;;  %3878 = vmatprep.subr.bf16.mxu1 %v4186_v39  ;;  %v4187_v53 = vld [vmem:[%s5091_s3 + $0x190] sm:$0xff]   ;;  %v1104_v52 = vsel %vm4677_vm12, %v3458_v25, %v1103_v13  ;;  %v3460_v51 = vrot.slane %v1064_v27, 9  ;;  %v2141_v57 = vor.u32 %v2140_v48, %v2137_v56  ;;  %v445_v32 = vld [vmem:[#allocation2 + $0x4c] sm:$0x1]  ;;  %v2114_v27 = vld [vmem:[#allocation2 + $0x38] sm:$0xf] }
  0x69   : > { %3972 = vmatprep.subr.bf16.mxu0 %v4185_v26  ;;  %3966 = vmatprep.mubr.bf16.mxu0 %v3572_v47  ;;  %v1116_v44 = vsel %vm4677_vm12, %v3461_v10, %v1115_v17  ;;  %v4214_v34 = vld [vmem:[#allocation2 + $0x30] ss:$8 sps:$4 sm:$0xff]   ;;  %v446_v25 = vsel %vm4361_vm4, 0, %v445_v32  ;;  %v2191_v12 = vshrl.u32 %v2114_v27, 16  ;;  %v4857_v10 = vld [vmem:[#allocation2 + $0x34] sm:$0x1] }
  0x6a   : > { %3871 = vmatmul.mubr.bf16.gmra.mrb[4].mxu1 %v3445_v2  ;;  %v1112_v38 = vsel %vm4677_vm12, %v3460_v51, %v1111_v18  ;;  %v2127_v2 = vor.u32 %v2126_v61, %v2123_v35  ;;  %447 = vst [vmem:[#allocation2 + $0x4c] sm:$0x1] %v446_v25  ;;  %v4853_v51 = vld [vmem:[#allocation2 + $0x24] sm:$0x1]  ;;  %v4855_v18 = vld [vmem:[#allocation2 + $0x2c] sm:$0x1] }
  0x6b   : > { %3879 = vmatpush3.bf16.msra.mxu1 %v4186_v39  ;;  %3890 = vmatprep.mubr.bf16.mxu1 %v3478_v33  ;;  %v1108_v39 = vsel %vm4677_vm12, %v3459_v3, %v1107_v20  ;;  %v2130_v33 = vshll.u32 %v4804_v4, 16  ;;  %v3481_v60 = vcombine.low %v1112_v38, %v1116_v44  ;;  %v2112_v20 = vld [vmem:[#allocation2 + $0x30] sm:$0xf]  ;;  %v4210_v3 = vld [vmem:[%s5091_s3 + $0xe0] sm:$0xff]   ;;  %v4859_v17 = vld [vmem:[#allocation2 + $0x3c] sm:$0x1] }
  0x6c   : > { %3973 = vmatpush3.bf16.msra.mxu0 %v4185_v26  ;;  %3880 = vmatprep.subr.bf16.mxu1 %v4188_v5  ;;  %v485_v26 = vld [vmem:[#allocation2 + $0x48] sm:$0xf]  ;;  %v3480_v49 = vcombine.low %v1104_v52, %v1108_v39  ;;  %v2177_v9 = vshrl.u32 %v2112_v20, 16  ;;  %v2180_v62 = vshll.u32 %v2112_v20, 16  ;;  %v2193_v61 = vrot.slane %v2191_v12, 4  ;;  %v4222_v32 = vld [vmem:[%s5091_s3 + $0x200] sm:$0xff]  }
  0x6d   : > { %3974 = vmatprep.subr.bf16.mxu0 %v4187_v53  ;;  %v486_v47 = vsel %vm4391_vm6, %v4365_v21, %v485_v26  ;;  %v4213_v38 = vld [vmem:[%s5091_s3 + $0x1e8] sm:$0xff]   ;;  %v2200_v21 = vshll.u32 %v4859_v17, 16  ;;  %v2391_v25 = vld [vmem:[#allocation2 + $0x38] sm:$0xe]  ;;  %v2428_v12 = vrot.slane %v4857_v10, 5 }
  0x6e   : > { %487 = vst [vmem:[#allocation2 + $0x48] sm:$0xf] %v486_v47  ;;  %v2179_v26 = vrot.slane %v2177_v9, 4  ;;  %v2182_v35 = vrot.slane %v2180_v62, 5  ;;  %v4215_v47 = vld [vmem:[%s5091_s3 + $0xf0] sm:$0xff]  }
  0x6f   : > { %3881 = vmatpush3.bf16.msra.mxu1 %v4188_v5  ;;  %3967 = vmatmul.mubr.bf16.gmra.mrb[4].mxu0 %v3573_v8  ;;  %v4206_v5 = vld [vmem:[%s5091_s3 + $0xd0] sm:$0xff]   ;;  %v2146_v8 = vrot.slane %v2144_v58, 5 }
  0x70   : > { %3975 = vmatpush3.bf16.msra.mxu0 %v4187_v53  ;;  %3882 = vmatprep.subr.bf16.mxu1 %v4190_v23  ;;  %v2128_v53 = vrot.slane %v2127_v2, 4  ;;  %v2158_v2 = vshll.u32 %v4853_v51, 16  ;;  %v2183_v58 = vor.u32 %v2182_v35, %v2179_v26  ;;  %v2432_v26 = vrot.slane %v4859_v17, 5 }
  0x71   : > { %3976 = vmatprep.subr.bf16.mxu0 %v4189_v54  ;;  %3986 = vmatprep.mubr.bf16.mxu0 %v4201_v24  ;;  %v4220_v24 = vld [vmem:[#allocation2 + $0x8] ss:$8 sps:$4 sm:$0xff]   ;;  %v488_v48 = vld [vmem:[#allocation2 + $0x4c] sm:$0x1] }
  0x73   : > { %3883 = vmatpush3.bf16.msra.mxu1 %v4190_v23  ;;  %v2108_v23 = vld [vmem:[#allocation2 + $0x20] sm:$0xf] }
  0x74   : > { %3977 = vmatpush3.bf16.msra.mxu0 %v4189_v54  ;;  %3884 = vmatprep.subr.bf16.mxu1 %v4192_v36  ;;  %v2142_v54 = vrot.slane %v2141_v57, 4  ;;  %v2152_v15 = vshll.u32 %v2108_v23, 16  ;;  %v2172_v57 = vshll.u32 %v4855_v18, 16 }
  0x75   : > { %3978 = vmatprep.subr.bf16.mxu0 %v4191_v22 }
  0x76   : > { %v2147_v11 = vsel %vm4460_vm9, %v2142_v54, %v2146_v8  ;;  %v2154_v0 = vrot.slane %v2152_v15, 5  ;;  %v2160_v54 = vrot.slane %v2158_v2, 5  ;;  %v4881_v15 = vld [vmem:[#allocation2 + $0x44] sm:$0x1] }
  0x77   : > { %3885 = vmatpush3.bf16.msra.mxu1 %v4192_v36  ;;  %v2110_v36 = vld [vmem:[#allocation2 + $0x28] sm:$0xf] }
  0x78   : > { %3979 = vmatpush3.bf16.msra.mxu0 %v4191_v22  ;;  %3886 = vmatprep.subr.bf16.mxu1 %v4195_v46  ;;  %v4208_v22 = vld [vmem:[%s5091_s3 + $0xd8] sm:$0xff]   ;;  %v2166_v13 = vshll.u32 %v2110_v36, 16 }
  0x79   : > { %3980 = vmatprep.subr.bf16.mxu0 %v4193_v40 }
  0x7a   : > { %v2168_v39 = vrot.slane %v2166_v13, 5  ;;  %v4219_v13 = vld [vmem:[%s5091_s3 + $0x1f8] sm:$0xff]  }
  0x7b   : > { %3887 = vmatpush3.bf16.msra.mxu1 %v4195_v46  ;;  %v2149_v46 = vshrl.u32 %v2108_v23, 16  ;;  %v2174_v23 = vrot.slane %v2172_v57, 5 }
  0x7c   : > { %3981 = vmatpush3.bf16.msra.mxu0 %v4193_v40  ;;  %3888 = vmatprep.subr.bf16.mxu1 %v4198_v16  ;;  %v4207_v40 = vld [vmem:[%s5091_s3 + $0x1d0] sm:$0xff]  }
  0x7d   : > { %3982 = vmatprep.subr.bf16.mxu0 %v4196_v7  ;;  %v2151_v29 = vrot.slane %v2149_v46, 4 }
  0x7f   : > { %3889 = vmatpush3.bf16.msra.mxu1 %v4198_v16  ;;  %v2163_v16 = vshrl.u32 %v2110_v36, 16  ;;  %v2155_v44 = vor.u32 %v2154_v0, %v2151_v29  ;;  %v2214_v29 = vshll.u32 %v4881_v15, 16  ;;  %v4224_v0 = vld [vmem:[#allocation2 + $0x28] ss:$8 sps:$4 sm:$0xff]  }
  0x80   : > { %3983 = vmatpush3.bf16.msra.mxu0 %v4196_v7  ;;  %3898 = vmatprep.subr.bf16.mxu1 %v4200_v63  ;;  %v4216_v7 = vld [vmem:[#allocation2 + $0x40] ss:$8 sps:$4 sm:$0xff]  }
  0x81   : > { %3984 = vmatprep.subr.bf16.mxu0 %v4199_v30  ;;  %v2165_v52 = vrot.slane %v2163_v16, 4 }
  0x82   : > { %3891 = vmatmul.mubr.bf16.vlgmr.msra.gmra.mrb[0].mxu1 %v3479_v6  ;;  %v2132_v6 = vrot.slane %v2130_v33, 5 }
  0x83   : > { %3899 = vmatpush3.bf16.msra.mxu1 %v4200_v63  ;;  %3894 = vmatprep.mubr.bf16.mxu1 %v3480_v49  ;;  %v4211_v63 = vld [vmem:[%s5091_s3 + $0x1e0] sm:$0xff]   ;;  %v2169_v33 = vor.u32 %v2168_v39, %v2165_v52  ;;  %v4223_v52 = vld [vmem:[%s5091_s3 + $0x208] sm:$0xff]  }
  0x84   : > { %3985 = vmatpush3.bf16.msra.mxu0 %v4199_v30  ;;  %3900 = vmatprep.subr.bf16.mxu1 %v4204_v42  ;;  %v2133_v41 = vsel %vm4460_vm9, %v2128_v53, %v2132_v6  ;;  %v2194_v30 = vshll.u32 %v2114_v27, 16  ;;  %v2116_v49 = vld [vmem:[#allocation2 + $0x40] sm:$0xf]  ;;  %v4217_v53 = vld [vmem:[%s5091_s3 + $0x1f0] sm:$0xff]   ;;  %v2156_v6 = vrot.slane %v2155_v44, 4 }
  0x85   : > { %3994 = vmatprep.subr.bf16.mxu0 %v4202_v37  ;;  %v3626_v59 = vcombine.low %v2133_v41, %v2147_v11  ;;  %v2205_v14 = vshrl.u32 %v2116_v49, 16  ;;  %v2170_v8 = vrot.slane %v2169_v33, 4  ;;  %v4225_v44 = vld [vmem:[#allocation2 + $0x38] ss:$8 sps:$4 sm:$0xff]   ;;  %v2412_v33 = vrot.slane %v4804_v4, 5 }
  0x86   : > { %v2196_v56 = vrot.slane %v2194_v30, 5  ;;  %v2161_v27 = vsel %vm4460_vm9, %v2156_v6, %v2160_v54  ;;  %v3643_v30 = vrot.slane %v2391_v25, 9  ;;  %v2393_v6 = vld [vmem:[#allocation2 + $0x48] sm:$0xe]  ;;  %v2436_v54 = vrot.slane %v4881_v15, 5 }
  0x87   : > { %3987 = vmatmul.mubr.bf16.vlgmr.msra.gmra.mrb[0].mxu0 %v4203_v1  ;;  %3901 = vmatpush3.bf16.msra.mxu1 %v4204_v42  ;;  %v489_v42 = vsel %vm4351_vm2, %v463_v28, %v488_v48  ;;  %v2186_v1 = vshll.u32 %v4857_v10, 16  ;;  %v2216_v48 = vrot.slane %v2214_v29, 5 }
  0x88   : > { %3995 = vmatpush3.bf16.msra.mxu0 %v4202_v37  ;;  %3902 = vmatprep.subr.bf16.mxu1 %v4206_v5  ;;  %v2118_v37 = vld [vmem:[#allocation2 + $0x48] sm:$0xf]  ;;  %490 = vst [vmem:[#allocation2 + $0x4c] sm:$0x1] %v489_v42  ;;  %v2197_v28 = vor.u32 %v2196_v56, %v2193_v61  ;;  %v2433_v17 = vsel %vm4677_vm12, %v3643_v30, %v2432_v26  ;;  %v4257_v30 = vmov 1983009808  }
  0x89   : > { %3996 = vmatprep.subr.bf16.mxu0 %v4205_v31  ;;  %3990 = vmatprep.mubr.bf16.mxu0 %v4214_v34  ;;  %v2222_v34 = vshll.u32 %v2118_v37, 16  ;;  %v2188_v36 = vrot.slane %v2186_v1, 5  ;;  %v2629_v26 = vunpack.c.l.s4 %v4257_v30 }
  0x8a   : > { %3895 = vmatmul.mubr.bf16.gmra.mrb[4].mxu1 %v3481_v60  ;;  %v4218_v60 = vld [vmem:[%s5091_s3 + $0xf8] sm:$0xff]   ;;  %v2198_v46 = vrot.slane %v2197_v28, 4 }
  0x8b   : > { %3903 = vmatpush3.bf16.msra.mxu1 %v4206_v5  ;;  %3914 = vmatprep.mubr.bf16.mxu1 %v4220_v24  ;;  %v2208_v5 = vshll.u32 %v2116_v49, 16  ;;  %v2184_v24 = vrot.slane %v2183_v58, 4  ;;  %v2224_v16 = vrot.slane %v2222_v34, 5  ;;  %v2386_v49 = vld [vmem:[#allocation2 + $0x10] sm:$0xe]  ;;  %v2416_v58 = vrot.slane %v4806_v43, 5 }
  0x8c   : > { %3997 = vmatpush3.bf16.msra.mxu0 %v4205_v31  ;;  %3904 = vmatprep.subr.bf16.mxu1 %v4208_v22  ;;  %v2219_v31 = vshrl.u32 %v2118_v37, 16  ;;  %v3638_v2 = vrot.slane %v2386_v49, 9  ;;  %v4227_v28 = vld [vmem:[%s5091_s3 + $0x218] sm:$0xff]   ;;  %v4229_v34 = vld [vmem:[%s5091_s3 + $0x228] sm:$0xff]  }
  0x8d   : > { %3998 = vmatprep.subr.bf16.mxu0 %v4207_v40  ;;  %v2210_v41 = vrot.slane %v2208_v5, 5 }
  0x8e   : > { %v2221_v11 = vrot.slane %v2219_v31, 4  ;;  %v2413_v4 = vsel %vm4677_vm12, %v3638_v2, %v2412_v33 }
  0x8f   : > { %3905 = vmatpush3.bf16.msra.mxu1 %v4208_v22  ;;  %3991 = vmatmul.mubr.bf16.gmra.mrb[4].mxu0 %v4216_v7  ;;  %v2202_v22 = vrot.slane %v2200_v21, 5  ;;  %v2390_v7 = vld [vmem:[#allocation2 + $0x30] sm:$0xe]  ;;  %v4889_v20 = vld [vmem:[#allocation2 + $0x4c] sm:$0x1] }
  0x90   : > { %3999 = vmatpush3.bf16.msra.mxu0 %v4207_v40  ;;  %3906 = vmatprep.subr.bf16.mxu1 %v4210_v3  ;;  %v2207_v40 = vrot.slane %v2205_v14, 4  ;;  %v2225_v62 = vor.u32 %v2224_v16, %v2221_v11  ;;  %v2228_v39 = vshll.u32 %v4889_v20, 16  ;;  %v2420_v11 = vrot.slane %v4853_v51, 5 }
  0x91   : > { %4000 = vmatprep.subr.bf16.mxu0 %v4209_v55  ;;  %4010 = vmatprep.mubr.bf16.mxu0 %v3626_v59  ;;  %v2189_v59 = vsel %vm4460_vm9, %v2184_v24, %v2188_v36  ;;  %v3645_v24 = vrot.slane %v2393_v6, 9  ;;  %v4231_v36 = vld [vmem:[%s5091_s3 + $0x238] sm:$0xff]  }
  0x92   : > { %v2211_v9 = vor.u32 %v2210_v41, %v2207_v40  ;;  %v2226_v42 = vrot.slane %v2225_v62, 4  ;;  %v2230_v37 = vrot.slane %v2228_v39, 5  ;;  %v2389_v40 = vld [vmem:[#allocation2 + $0x28] sm:$0xe] }
  0x93   : > { %3907 = vmatpush3.bf16.msra.mxu1 %v4210_v3  ;;  %v4221_v3 = vld [vmem:[#allocation2 + $0x18] ss:$8 sps:$4 sm:$0xff]   ;;  %v3641_v16 = vrot.slane %v2389_v40, 9 }
  0x94   : > { %4001 = vmatpush3.bf16.msra.mxu0 %v4209_v55  ;;  %3908 = vmatprep.subr.bf16.mxu1 %v4212_v19  ;;  %v2175_v55 = vsel %vm4460_vm9, %v2170_v8, %v2174_v23  ;;  %v2212_v56 = vrot.slane %v2211_v9, 4  ;;  %v2231_v14 = vsel %vm4460_vm9, %v2226_v42, %v2230_v37  ;;  %v2440_v8 = vrot.slane %v4889_v20, 5 }
  0x95   : > { %4002 = vmatprep.subr.bf16.mxu0 %v4211_v63  ;;  %v3627_v35 = vcombine.low %v2161_v27, %v2175_v55 }
  0x96   : > { %v2217_v21 = vsel %vm4460_vm9, %v2212_v56, %v2216_v48  ;;  %v2441_v15 = vsel %vm4677_vm12, %v3645_v24, %v2440_v8  ;;  %v4955_v48 = vld [vmem:[%s5092_s4] ss:$0 sm:$0xff] }
  0x97   : > { %3909 = vmatpush3.bf16.msra.mxu1 %v4212_v19  ;;  %v2203_v19 = vsel %vm4460_vm9, %v2198_v46, %v2202_v22  ;;  %v3629_v5 = vcombine.low %v2217_v21, %v2231_v14  ;;  %v2388_v22 = vld [vmem:[#allocation2 + $0x20] sm:$0xe] }
  0x98   : > { %4003 = vmatpush3.bf16.msra.mxu0 %v4211_v63  ;;  %3910 = vmatprep.subr.bf16.mxu1 %v4215_v47  ;;  %v3642_v63 = vrot.slane %v2390_v7, 9  ;;  %v3628_v61 = vcombine.low %v2189_v59, %v2203_v19  ;;  %v3640_v41 = vrot.slane %v2388_v22, 9 }
  0x99   : > { %4004 = vmatprep.subr.bf16.mxu0 %v4213_v38 }
  0x9a   : > { %v2429_v10 = vsel %vm4677_vm12, %v3642_v63, %v2428_v12 }
  0x9b   : > { %3911 = vmatpush3.bf16.msra.mxu1 %v4215_v47  ;;  %v2387_v47 = vld [vmem:[#allocation2 + $0x18] sm:$0xe]  ;;  %v3664_v1 = vcombine.low %v2429_v10, %v2433_v17 }
  0x9c   : > { %4005 = vmatpush3.bf16.msra.mxu0 %v4213_v38  ;;  %3912 = vmatprep.subr.bf16.mxu1 %v4218_v60  ;;  %v4226_v38 = vld [vmem:[%s5091_s3 + $0x210] sm:$0xff]   ;;  %v3639_v57 = vrot.slane %v2387_v47, 9 }
  0x9d   : > { %4006 = vmatprep.subr.bf16.mxu0 %v4217_v53 }
  0x9e   : > { %v2417_v43 = vsel %vm4677_vm12, %v3639_v57, %v2416_v58 }
  0x9f   : > { %3913 = vmatpush3.bf16.msra.mxu1 %v4218_v60  ;;  %v3662_v31 = vcombine.low %v2413_v4, %v2417_v43  ;;  %v4230_v60 = vld [vmem:[%s5091_s3 + $0x230] sm:$0xff]  }
  0xa0   : > { %4007 = vmatpush3.bf16.msra.mxu0 %v4217_v53  ;;  %4042 = vmatprep.subr.bf16.mxu1 %v4222_v32  ;;  %v2392_v53 = vld [vmem:[#allocation2 + $0x40] sm:$0xe] }
  0xa1   : > { %4008 = vmatprep.subr.bf16.mxu0 %v4219_v13  ;;  %v3644_v23 = vrot.slane %v2392_v53, 9 }
  0xa2   : > { %3915 = vmatmul.mubr.bf16.vlgmr.msra.gmra.mrb[0].mxu1 %v4221_v3 }
  0xa3   : > { %4050 = vmatpush3.bf16.msra.mxu1 %v4222_v32  ;;  %3918 = vmatprep.mubr.bf16.mxu1 %v4224_v0  ;;  %v2437_v46 = vsel %vm4677_vm12, %v3644_v23, %v2436_v54 }
  0xa4   : > { %4009 = vmatpush3.bf16.msra.mxu0 %v4219_v13  ;;  %4043 = vmatprep.subr.bf16.mxu1 %v4223_v52  ;;  %v3665_v7 = vcombine.low %v2437_v46, %v2441_v15  ;;  %v2421_v13 = vsel %vm4677_vm12, %v3640_v41, %v2420_v11 }
  0xa5   : > { %4018 = vmatprep.subr.bf16.mxu0 %v4222_v32 }
  0xa7   : > { %4011 = vmatmul.mubr.bf16.vlgmr.msra.gmra.mrb[0].mxu0 %v3627_v35  ;;  %4051 = vmatpush3.bf16.msra.mxu1 %v4223_v52  ;;  %v2631_v35 = vlaneseq }
  0xa8   : > { %4019 = vmatpush3.bf16.msra.mxu0 %v4222_v32  ;;  %4014 = vmatprep.mubr.bf16.mxu0 %v3628_v61  ;;  %v2424_v32 = vrot.slane %v4855_v18, 5  ;;  %v2630_v61 = vunpack.c.0.s8 %v2629_v26 }
  0xa9   : > { %4020 = vmatprep.subr.bf16.mxu0 %v4223_v52  ;;  %4044 = vmatprep.subr.bf16.mxu1 %v4226_v38  ;;  %v2632_v56 = vshrl.u32 %v2631_v35, 7 }
  0xaa   : > { %3919 = vmatmul.mubr.bf16.gmra.mrb[4].mxu1 %v4225_v44  ;;  %v2425_v20 = vsel %vm4677_vm12, %v3641_v16, %v2424_v32 }
  0xab   : > { %4052 = vmatpush3.bf16.msra.mxu1 %v4226_v38  ;;  %4038 = vmatprep.mubr.bf16.mxu1 %v3664_v1  ;;  %v3663_v25 = vcombine.low %v2421_v13, %v2425_v20  ;;  %v4957_v17 = vsub.s32 %v2630_v61, %v2632_v56 }
  0xac   : > { %4021 = vmatpush3.bf16.msra.mxu0 %v4223_v52  ;;  %4045 = vmatprep.subr.bf16.mxu1 %v4227_v28 }
  0xad   : > { %4022 = vmatprep.subr.bf16.mxu0 %v4226_v38 }
  0xaf   : > { %4015 = vmatmul.mubr.bf16.gmra.mrb[4].mxu0 %v3629_v5  ;;  %4053 = vmatpush3.bf16.msra.mxu1 %v4227_v28 }
  0xb0   : > { %4023 = vmatpush3.bf16.msra.mxu0 %v4226_v38  ;;  %4046 = vmatprep.subr.bf16.mxu1 %v4228_v50 }
  0xb1   : > { %4024 = vmatprep.subr.bf16.mxu0 %v4227_v28  ;;  %4034 = vmatprep.mubr.bf16.mxu0 %v3662_v31 }
  0xb3   : > { %4054 = vmatpush3.bf16.msra.mxu1 %v4228_v50 }
  0xb4   : > { %4025 = vmatpush3.bf16.msra.mxu0 %v4227_v28  ;;  %4047 = vmatprep.subr.bf16.mxu1 %v4229_v34 }
  0xb5   : > { %4026 = vmatprep.subr.bf16.mxu0 %v4228_v50 }
  0xb7   : > { %4055 = vmatpush3.bf16.msra.mxu1 %v4229_v34 }
  0xb8   : > { %4027 = vmatpush3.bf16.msra.mxu0 %v4228_v50  ;;  %4048 = vmatprep.subr.bf16.mxu1 %v4230_v60 }
  0xb9   : > { %4028 = vmatprep.subr.bf16.mxu0 %v4229_v34 }
  0xbb   : > { %4056 = vmatpush3.bf16.msra.mxu1 %v4230_v60 }
  0xbc   : > { %4029 = vmatpush3.bf16.msra.mxu0 %v4229_v34  ;;  %4049 = vmatprep.subr.bf16.mxu1 %v4231_v36 }
  0xbd   : > { %4030 = vmatprep.subr.bf16.mxu0 %v4230_v60 }
  0xbf   : > { %4057 = vmatpush3.bf16.msra.mxu1 %v4231_v36 }
  0xc0   : > { %4031 = vmatpush3.bf16.msra.mxu0 %v4230_v60 }
  0xc1   : > { %4032 = vmatprep.subr.bf16.mxu0 %v4231_v36 }
  0xc2   : > { %4039 = vmatmul.mubr.bf16.vlgmr.msra.gmra.mrb[8].mxu1 %v3665_v7 }
  0xc4   : > { %4033 = vmatpush3.bf16.msra.mxu0 %v4231_v36 }
  0xc7   : > { %4035 = vmatmul.mubr.bf16.vlgmr.msra.gmra.mrb[0].mxu0 %v3663_v25 }
 0x175   : > { %v3916_v3 = vpop.f32.mrb[0].mxu1 }
 0x176   : > { %v1402_v51 = vpop.f32.mrb[1].mxu1 }
 0x177   : > { %v3917_v27 = vpop.f32.mrb[2].mxu1 }
 0x178   : > { %v4950_v55 = vpop.f32.mrb[3].mxu1 }
 0x17d   : > { %v3920_v18 = vpop.f32.mrb[4].mxu1 }
 0x17e   : > { %v1418_v59 = vpop.f32.mrb[5].mxu1 }
 0x17f   : > { %v3921_v29 = vpop.f32.mrb[6].mxu1 }
 0x180   : > { %v1421_v0 = vpop.f32.mrb[7].mxu1 }
 0x182   : > { %v4016_v19 = vpop.f32.mrb[4].mxu0 }
 0x183   : > { %v4062_v9 = vadd.f32 %v4016_v19, %v3920_v18  ;;  %v2363_v62 = vpop.f32.mrb[5].mxu0 }
 0x184   : > { %v4064_v63 = vadd.f32 %v2363_v62, %v1418_v59  ;;  %v4017_v45 = vpop.f32.mrb[6].mxu0 }
 0x185   : > { %v4066_v52 = vadd.f32 %v4017_v45, %v3921_v29  ;;  %v2366_v39 = vpop.f32.mrb[7].mxu0 }
 0x186   : > { %v4068_v12 = vadd.f32 %v2366_v39, %v1421_v0 }
 0x195   : > { %v4040_v49 = vpop.f32.mrb[8].mxu1 }
 0x196   : > { %v4063_v47 = vadd.f32 %v4062_v9, %v4040_v49  ;;  %v2573_v42 = vpop.f32.mrb[9].mxu1 }
 0x197   : > { %v4065_v37 = vadd.f32 %v4064_v63, %v2573_v42  ;;  %v4041_v10 = vpop.f32.mrb[10].mxu1 }
 0x198   : > { %v2609_v38 = vadd.f32 %v4063_v47, %v4955_v48  ;;  %v4067_v44 = vadd.f32 %v4066_v52, %v4041_v10  ;;  %v2576_v2 = vpop.f32.mrb[11].mxu1 }
 0x199   : > { %v2607_v33 = vadd.f32 %v4065_v37, %v4955_v48  ;;  %v4069_v57 = vadd.f32 %v4068_v12, %v2576_v2 }
 0x19a   : > { %v4036_v58 = vpop.f32.mrb[0].mxu0  ;;  %v2617_v1 = vmax.f32 %v2609_v38, 0.0  ;;  %v2610_v4 = vadd.f32 %v4067_v44, %v4955_v48 }
 0x19b   : > { %v4058_v21 = vadd.f32 %v4036_v58, %v3916_v3  ;;  %v2557_v14 = vpop.f32.mrb[1].mxu0  ;;  %v2615_v28 = vmax.f32 %v2607_v33, 0.0  ;;  %v2608_v15 = vadd.f32 %v4069_v57, %v4955_v48 }
 0x19c   : > { %v2729_v43 = vcombine.high %v2617_v1, %v2617_v1  ;;  %v2736_v5 = vrot.slane %v2617_v1, %v4957_v17  ;;  %v4059_v50 = vadd.f32 %v2557_v14, %v1402_v51  ;;  %v4037_v31 = vpop.f32.mrb[2].mxu0  ;;  %v2618_v46 = vmax.f32 %v2610_v4, 0.0 }
 0x19d   : > { %v2605_v34 = vadd.f32 %v4058_v21, %v4955_v48  ;;  %v2695_v60 = vcombine.high %v2615_v28, %v2615_v28  ;;  %v2702_v53 = vrot.slane %v2615_v28, %v4957_v17  ;;  %v4060_v6 = vadd.f32 %v4037_v31, %v3917_v27  ;;  %v2560_v54 = vpop.f32.mrb[3].mxu0 }
 0x19e   : > { %v2743_v8 = vrot.slane %v2729_v43, %v4957_v17  ;;  %v2744_v23 = vcombine.high %v2736_v5, %v2736_v5  ;;  %v3699_v24 = vrot.slane %v2736_v5, 9  ;;  %v2603_v36 = vadd.f32 %v4059_v50, %v4955_v48 }
 0x19f   : > { %v2613_v22 = vmax.f32 %v2605_v34, 0.0  ;;  %v2709_v40 = vrot.slane %v2695_v60, %v4957_v17  ;;  %v2710_v32 = vcombine.high %v2702_v53, %v2702_v53  ;;  %v3691_v25 = vrot.slane %v2702_v53, 9 }
 0x1a0   : > { %v2745_v41 = vcombine.high %v2743_v8, %v2743_v8  ;;  %v3700_v11 = vrot.slane %v2744_v23, 9  ;;  %v3701_v16 = vrot.slane %v2743_v8, 9  ;;  %v2611_v20 = vmax.f32 %v2603_v36, 0.0 }
 0x1a1   : > { %v2661_v7 = vcombine.high %v2613_v22, %v2613_v22  ;;  %v2668_v13 = vrot.slane %v2613_v22, %v4957_v17  ;;  %v4970_v51 = vmax.f32 %v2736_v5, %v3699_v24  ;;  %v2711_v18 = vcombine.high %v2709_v40, %v2709_v40 }
 0x1a2   : > { %v3702_v3 = vrot.slane %v2745_v41, 9  ;;  %v4972_v27 = vmax.f32 %v2744_v23, %v3700_v11  ;;  %v2627_v19 = vcombine.high %v2611_v20, %v2611_v20  ;;  %v2917_v9 = vmax.f32 %v2743_v8, %v3701_v16 }
 0x1a3   : > { %v2675_v59 = vrot.slane %v2661_v7, %v4957_v17  ;;  %v2676_v29 = vcombine.high %v2668_v13, %v2668_v13  ;;  %v3683_v0 = vrot.slane %v2668_v13, 9  ;;  %v2634_v63 = vrot.slane %v2611_v20, %v4957_v17 }
 0x1a4   : > { %v4975_v62 = vmax.f32 %v2745_v41, %v3702_v3  ;;  %v3692_v45 = vrot.slane %v2710_v32, 9  ;;  %v3693_v30 = vrot.slane %v2709_v40, 9  ;;  %v2641_v26 = vrot.slane %v2627_v19, %v4957_v17 }
 0x1a5   : > { %v2677_v52 = vcombine.high %v2675_v59, %v2675_v59  ;;  %v3684_v39 = vrot.slane %v2676_v29, 9  ;;  %v3685_v12 = vrot.slane %v2675_v59, 9  ;;  %v2642_v35 = vcombine.high %v2634_v63, %v2634_v63 }
 0x1a6   : > { %v3675_v61 = vrot.slane %v2634_v63, 9  ;;  %v3694_v56 = vrot.slane %v2711_v18, 9  ;;  %v2899_v47 = vmax.f32 %v2668_v13, %v3683_v0  ;;  %v4979_v37 = vmax.f32 %v2702_v53, %v3691_v25 }
 0x1a7   : > { %v3686_v49 = vrot.slane %v2677_v52, 9  ;;  %v2900_v42 = vmax.f32 %v2676_v29, %v3684_v39  ;;  %v2901_v10 = vmax.f32 %v2675_v59, %v3685_v12  ;;  %v2643_v38 = vcombine.high %v2641_v26, %v2641_v26 }
 0x1a8   : > { %v3676_v44 = vrot.slane %v2642_v35, 9  ;;  %v3677_v2 = vrot.slane %v2641_v26, 9  ;;  %v4981_v57 = vmax.f32 %v2634_v63, %v3675_v61  ;;  %v4983_v58 = vmax.f32 %v2710_v32, %v3692_v45 }
 0x1a9   : > { %v2902_v33 = vmax.f32 %v2677_v52, %v3686_v49  ;;  %v2606_v1 = vadd.f32 %v4060_v6, %v4955_v48  ;;  %v3678_v21 = vrot.slane %v2643_v38, 9  ;;  %v4986_v14 = vmax.f32 %v2709_v40, %v3693_v30 }
 0x1aa   : > { %v4988_v28 = vmax.f32 %v2711_v18, %v3694_v56  ;;  %v2746_v4 = vcombine.high %v2618_v46, %v2618_v46  ;;  %v2753_v5 = vrot.slane %v2618_v46, %v4957_v17  ;;  %v4061_v50 = vadd.f32 %v2560_v54, %v4950_v55 }
 0x1ab   : > { %v2614_v43 = vmax.f32 %v2606_v1, 0.0  ;;  %v4992_v31 = vmax.f32 %v2608_v15, 0.0  ;;  %v4994_v34 = vmax.f32 %v2642_v35, %v3676_v44  ;;  %v4996_v60 = vmax.f32 %v2641_v26, %v3677_v2 }
 0x1ac   : > { %v4998_v53 = vmax.f32 %v2643_v38, %v3678_v21  ;;  %v2760_v6 = vrot.slane %v2746_v4, %v4957_v17  ;;  %v2761_v24 = vcombine.high %v2753_v5, %v2753_v5  ;;  %v3703_v36 = vrot.slane %v2753_v5, 9 }
 0x1ad   : > { %v2678_v8 = vcombine.high %v2614_v43, %v2614_v43  ;;  %v2685_v23 = vrot.slane %v2614_v43, %v4957_v17  ;;  %v2604_v46 = vadd.f32 %v4061_v50, %v4955_v48  ;;  %v2712_v55 = vcombine.high %v4992_v31, %v4992_v31 }
 0x1ae   : > { %v2762_v22 = vcombine.high %v2760_v6, %v2760_v6  ;;  %v3705_v40 = vrot.slane %v2760_v6, 9  ;;  %v3704_v11 = vrot.slane %v2761_v24, 9  ;;  %v2919_v32 = vmax.f32 %v2753_v5, %v3703_v36 }
 0x1af   : > { %v2692_v54 = vrot.slane %v2678_v8, %v4957_v17  ;;  %v2693_v15 = vcombine.high %v2685_v23, %v2685_v23  ;;  %v3687_v41 = vrot.slane %v2685_v23, 9  ;;  %v2612_v13 = vmax.f32 %v2604_v46, 0.0 }
 0x1b0   : > { %v3706_v16 = vrot.slane %v2762_v22, 9  ;;  %v2921_v7 = vmax.f32 %v2760_v6, %v3705_v40  ;;  %v2920_v59 = vmax.f32 %v2761_v24, %v3704_v11  ;;  %v2935_v48 = vmax.f32 %v4970_v51, %v2919_v32 }
 0x1b1   : > { %v2694_v20 = vcombine.high %v2692_v54, %v2692_v54  ;;  %v3688_v25 = vrot.slane %v2693_v15, 9  ;;  %v3689_v3 = vrot.slane %v2692_v54, 9  ;;  %v2903_v18 = vmax.f32 %v2685_v23, %v3687_v41 }
 0x1b2   : > { %v2922_v29 = vmax.f32 %v2762_v22, %v3706_v16  ;;  %v2937_v0 = vmax.f32 %v2917_v9, %v2921_v7  ;;  %v2936_v39 = vmax.f32 %v4972_v27, %v2920_v59  ;;  %v2951_v30 = vpack.c.bf16 %v2935_v48, %v2935_v48 }
 0x1b3   : > { %v3690_v19 = vrot.slane %v2694_v20, 9  ;;  %v2904_v63 = vmax.f32 %v2693_v15, %v3688_v25  ;;  %v2905_v45 = vmax.f32 %v2692_v54, %v3689_v3  ;;  %v2927_v52 = vmax.f32 %v2899_v47, %v2903_v18 }
 0x1b4   : > { %v2938_v12 = vmax.f32 %v4975_v62, %v2922_v29  ;;  %v2953_v26 = vpack.c.bf16 %v2937_v0, %v2937_v0  ;;  %v2952_v38 = vpack.c.bf16 %v2936_v39, %v2936_v39  ;;  %v3061_v51 = vrot.slane %v2951_v30, %v4957_v17 }
 0x1b5   : > { %v2906_v35 = vmax.f32 %v2694_v20, %v3690_v19  ;;  %v2928_v61 = vmax.f32 %v2900_v42, %v2904_v63  ;;  %v2929_v56 = vmax.f32 %v2901_v10, %v2905_v45  ;;  %v2943_v49 = vpack.c.bf16 %v2927_v52, %v2927_v52 }
 0x1b6   : > { %v2954_v44 = vpack.c.bf16 %v2938_v12, %v2938_v12  ;;  %v3075_v9 = vrot.slane %v2953_v26, %v4957_v17  ;;  %v3068_v62 = vrot.slane %v2952_v38, %v4957_v17  ;;  %v3173_v10 = vrot.slane %v3061_v51, %v4957_v17 }
 0x1b7   : > { %v2930_v2 = vmax.f32 %v2902_v33, %v2906_v35  ;;  %v2944_v47 = vpack.c.bf16 %v2928_v61, %v2928_v61  ;;  %v2945_v1 = vpack.c.bf16 %v2929_v56, %v2929_v56  ;;  %v3005_v27 = vrot.slane %v2943_v49, %v4957_v17 }
 0x1b8   : > { %v3082_v42 = vrot.slane %v2954_v44, %v4957_v17  ;;  %v3187_v21 = vrot.slane %v3075_v9, %v4957_v17  ;;  %v3180_v50 = vrot.slane %v3068_v62, %v4957_v17  ;;  %v3207_v8 = vunpack.c.l.b16 %v3173_v10 }
 0x1b9   : > { %v2946_v4 = vpack.c.bf16 %v2930_v2, %v2930_v2  ;;  %v3012_v43 = vrot.slane %v2944_v47, %v4957_v17  ;;  %v3019_v5 = vrot.slane %v2945_v1, %v4957_v17  ;;  %v3117_v33 = vrot.slane %v3005_v27, %v4957_v17 }
 0x1ba   : > { %v3194_v6 = vrot.slane %v3082_v42, %v4957_v17  ;;  %v3209_v23 = vunpack.c.l.b16 %v3187_v21  ;;  %v3208_v46 = vunpack.c.l.b16 %v3180_v50  ;;  %v2644_v41 = vcombine.high %v2612_v13, %v2612_v13 }
 0x1bb   : > { %v3026_v24 = vrot.slane %v2946_v4, %v4957_v17  ;;  %v3124_v36 = vrot.slane %v3012_v43, %v4957_v17  ;;  %v3131_v22 = vrot.slane %v3019_v5, %v4957_v17  ;;  %v3199_v40 = vunpack.c.l.b16 %v3117_v33 }
 0x1bc   : > { %v3210_v54 = vunpack.c.l.b16 %v3194_v6  ;;  %v3234_v15 = vrot.slane %v3209_v23, 6  ;;  %v2651_v7 = vrot.slane %v2612_v13, %v4957_v17  ;;  %v3232_v20 = vrot.slane %v3208_v46, 7 }
 0x1bd   : > { %v3138_v11 = vrot.slane %v3026_v24, %v4957_v17  ;;  %v3200_v16 = vunpack.c.l.b16 %v3124_v36  ;;  %v3201_v32 = vunpack.c.l.b16 %v3131_v22  ;;  %v2658_v3 = vrot.slane %v2644_v41, %v4957_v17 }
 0x1be   : > { %v3236_v25 = vrot.slane %v3210_v54, 5  ;;  %v2719_v18 = vrot.slane %v4992_v31, %v4957_v17  ;;  %v2659_v0 = vcombine.high %v2651_v7, %v2651_v7  ;;  %v3233_v19 = vsel %vm3212_vm13, %v3232_v20, %v3207_v8 }
 0x1bf   : > { %v3202_v59 = vunpack.c.l.b16 %v3138_v11  ;;  %v3220_v29 = vrot.slane %v3200_v16, 7  ;;  %v3222_v48 = vrot.slane %v3201_v32, 6  ;;  %v2660_v63 = vcombine.high %v2658_v3, %v2658_v3 }
 0x1c0   : > { %v3679_v45 = vrot.slane %v2651_v7, 9  ;;  %v3681_v52 = vrot.slane %v2658_v3, 9  ;;  %v3235_v12 = vsel %vm3215_vm14, %v3234_v15, %v3233_v19  ;;  %v3680_v30 = vrot.slane %v2659_v0, 9 }
 0x1c1   : > { %v3221_v39 = vsel %vm3212_vm13, %v3220_v29, %v3199_v40  ;;  %v3224_v13 = vrot.slane %v3202_v59, 5  ;;  %v3237_v35 = vsel %vm3218_vm15, %v3236_v25, %v3235_v12  ;;  %v3682_v61 = vrot.slane %v2660_v63, 9 }
 0x1c2   : > { %v3223_v26 = vsel %vm3215_vm14, %v3222_v48, %v3221_v39  ;;  %v2895_v56 = vmax.f32 %v2651_v7, %v3679_v45  ;;  %v3241_v38 = vpack.c.b16 %v3237_v35, %v3237_v35  ;;  %v2896_v44 = vmax.f32 %v2659_v0, %v3680_v30 }
 0x1c3   : > { %v3225_v49 = vsel %vm3218_vm15, %v3224_v13, %v3223_v26  ;;  %v2897_v51 = vmax.f32 %v2658_v3, %v3681_v52  ;;  %v2898_v2 = vmax.f32 %v2660_v63, %v3682_v61  ;;  %v2726_v1 = vrot.slane %v2712_v55, %v4957_v17 }
 0x1c4   : > { %v3239_v9 = vpack.c.b16 %v3225_v49, %v3225_v49  ;;  %v2923_v47 = vmax.f32 %v4981_v57, %v2895_v56  ;;  %3710 = vst.sshfl [vmem:[%s5036_s10 + $0x6] sm:$0x3 pattern:$0x76325410] %v3241_v38  ;;  %v2924_v27 = vmax.f32 %v4994_v34, %v2896_v44  ;;  %v2727_v42 = vcombine.high %v2719_v18, %v2719_v18 }
 0x1c5   : > { %v2925_v62 = vmax.f32 %v4996_v60, %v2897_v51  ;;  %v3695_v10 = vrot.slane %v2719_v18, 9  ;;  %v2926_v21 = vmax.f32 %v4998_v53, %v2898_v2  ;;  %v2728_v43 = vcombine.high %v2726_v1, %v2726_v1 }
 0x1c6   : > { %3708 = vst.sshfl [vmem:[%s5036_s10 + $0x2] sm:$0x3 pattern:$0x76325410] %v3239_v9  ;;  %v2939_v4 = vpack.c.bf16 %v2923_v47, %v2923_v47  ;;  %v3697_v5 = vrot.slane %v2726_v1, 9  ;;  %v2940_v33 = vpack.c.bf16 %v2924_v27, %v2924_v27  ;;  %v3696_v50 = vrot.slane %v2727_v42, 9 }
 0x1c7   : > { %v2941_v57 = vpack.c.bf16 %v2925_v62, %v2925_v62  ;;  %v2911_v6 = vmax.f32 %v2719_v18, %v3695_v10  ;;  %v2942_v8 = vpack.c.bf16 %v2926_v21, %v2926_v21  ;;  %v3698_v55 = vrot.slane %v2728_v43, 9 }
 0x1c8   : > { %v2977_v31 = vrot.slane %v2939_v4, %v4957_v17  ;;  %v2913_v23 = vmax.f32 %v2726_v1, %v3697_v5  ;;  %v2984_v34 = vrot.slane %v2940_v33, %v4957_v17  ;;  %v2912_v24 = vmax.f32 %v2727_v42, %v3696_v50 }
 0x1c9   : > { %v2991_v60 = vrot.slane %v2941_v57, %v4957_v17  ;;  %v2931_v36 = vmax.f32 %v4979_v37, %v2911_v6  ;;  %v2998_v53 = vrot.slane %v2942_v8, %v4957_v17  ;;  %v2914_v40 = vmax.f32 %v2728_v43, %v3698_v55 }
 0x1ca   : > { %v3089_v22 = vrot.slane %v2977_v31, %v4957_v17  ;;  %v2933_v46 = vmax.f32 %v4986_v14, %v2913_v23  ;;  %v3096_v54 = vrot.slane %v2984_v34, %v4957_v17  ;;  %v2932_v41 = vmax.f32 %v4983_v58, %v2912_v24 }
 0x1cb   : > { %v3103_v15 = vrot.slane %v2991_v60, %v4957_v17  ;;  %v2947_v11 = vpack.c.bf16 %v2931_v36, %v2931_v36  ;;  %v3110_v16 = vrot.slane %v2998_v53, %v4957_v17  ;;  %v2934_v32 = vmax.f32 %v4988_v28, %v2914_v40 }
 0x1cc   : > { %v2949_v7 = vpack.c.bf16 %v2933_v46, %v2933_v46  ;;  %v3196_v37 = vunpack.c.l.b16 %v3096_v54  ;;  %v2948_v25 = vpack.c.bf16 %v2932_v41, %v2932_v41  ;;  %v3195_v29 = vunpack.c.l.b16 %v3089_v22 }
 0x1cd   : > { %v3197_v20 = vunpack.c.l.b16 %v3103_v15  ;;  %v3033_v3 = vrot.slane %v2947_v11, %v4957_v17  ;;  %v3198_v18 = vunpack.c.l.b16 %v3110_v16  ;;  %v2950_v59 = vpack.c.bf16 %v2934_v32, %v2934_v32 }
 0x1ce   : > { %v3047_v14 = vrot.slane %v2949_v7, %v4957_v17  ;;  %v3211_v48 = vrot.slane %v3196_v37, 7  ;;  %v3040_v58 = vrot.slane %v2948_v25, %v4957_v17 }
 0x1cf   : > { %v3214_v0 = vrot.slane %v3197_v20, 6  ;;  %v3217_v19 = vrot.slane %v3198_v18, 5  ;;  %v3054_v63 = vrot.slane %v2950_v59, %v4957_v17  ;;  %v3145_v52 = vrot.slane %v3033_v3, %v4957_v17 }
 0x1d0   : > { %v3159_v28 = vrot.slane %v3047_v14, %v4957_v17  ;;  %v3213_v45 = vsel %vm3212_vm13, %v3211_v48, %v3195_v29  ;;  %v3152_v39 = vrot.slane %v3040_v58, %v4957_v17 }
 0x1d1   : > { %v3216_v13 = vsel %vm3215_vm14, %v3214_v0, %v3213_v45  ;;  %v3166_v12 = vrot.slane %v3054_v63, %v4957_v17  ;;  %v3203_v38 = vunpack.c.l.b16 %v3145_v52 }
 0x1d2   : > { %v3205_v30 = vunpack.c.l.b16 %v3159_v28  ;;  %v3219_v26 = vsel %vm3218_vm15, %v3217_v19, %v3216_v13  ;;  %v3204_v35 = vunpack.c.l.b16 %v3152_v39 }
 0x1d3   : > { %v3238_v61 = vpack.c.b16 %v3219_v26, %v3219_v26  ;;  %v3206_v56 = vunpack.c.l.b16 %v3166_v12 }
 0x1d4   : > { %v3228_v49 = vrot.slane %v3205_v30, 6  ;;  %v3226_v44 = vrot.slane %v3204_v35, 7 }
 0x1d5   : > { %3707 = vst.sshfl [vmem:[%s5036_s10] sm:$0x3 pattern:$0x76325410] %v3238_v61  ;;  %v3230_v51 = vrot.slane %v3206_v56, 5 }
 0x1d6   : > { %v3227_v9 = vsel %vm3212_vm13, %v3226_v44, %v3203_v38 }
 0x1d7   : > { %v3229_v2 = vsel %vm3215_vm14, %v3228_v49, %v3227_v9 }
 0x1d8   : > { %v3231_v47 = vsel %vm3218_vm15, %v3230_v51, %v3229_v2 }
 0x1d9   : > { %v3240_v1 = vpack.c.b16 %v3231_v47, %v3231_v47 }
 0x1db   : > { %3709 = vst.sshfl [vmem:[%s5036_s10 + $0x4] sm:$0x3 pattern:$0x76325410] %v3240_v1 }
 0x1dc PF: > { %s15_s20 = sadd.s32 1, %s4254_s20   ;;  %s5104_s18 = smov %s4250_s19 }
 0x1dd   : > { %p12_p5 = scmp.ge.s32.totalorder %s15_s20, 4   ;;  %s5105_s19 = smov %s5107_s1 }
 0x1df   :  { %14 = sbr.rel (!%p12_p5) target bundleno = 2 (0x2), region = 87 }

// kernel: _lambda_.4
= control target key start
LH: loop header
LB: loop body
LE: loop exit
PB: predicated region body
PF: predicated region fallthrough
CT: control target
= control target key end

     0   :  { %s5131_s18 = smov 0   ;;  %s5133_s19 = smov 0   ;;  %s6388_s0 = inlined_call_operand.vmem [shape: bf16[2,16,16,4], index: 0, kind: input, shape index: {}, may-alias: {0,1,2}]   ;;  %s6389_s1 = inlined_call_operand.vmem [shape: bf16[2,16,16,4], index: 1, kind: input, shape index: {}, may-alias: {0,1,2}]   ;;  %s6390_s2 = inlined_call_operand.vmem [shape: bf16[2,16,16,4], index: 2, kind: input, shape index: {}, may-alias: {0,1,2}]   ;;  %s6391_s3 = inlined_call_operand.vmem [shape: bf16[9,4,128], index: 3, kind: input, shape index: {}]   ;;  %s6392_s4 = inlined_call_operand.vmem [shape: f32[1,128], index: 4, kind: input, shape index: {}]   ;;  %s6393_s5 = inlined_call_operand.vmem [shape: bf16[2,8,8,128], index: 5, kind: output, shape index: {}]  }
   0x1   :  { %s5135_s20 = smov 0   ;;  %s5137_s21 = smov 0  }
   0x2   :  { %s5139_s22 = smov 0  }
   0x3 LB: > { %s24_s23 = sadd.s32 1, %s5090_s20  ;;  %s27_s24 = sadd.s32 1, %s5094_s21  ;;  %s5098_s22 = sphi %s5139_s22, %s15_s22   ;;  %s5094_s21 = sphi %s5137_s21, %s6423_s21   ;;  %s5090_s20 = sphi %s5135_s20, %s6422_s20   ;;  %s5086_s19 = sphi %s5133_s19, %s6421_s19   ;;  %s5082_s18 = sphi %s5131_s18, %s6420_s18  }
   0x4   : > { %p25_p0 = scmp.ge.s32.totalorder %s24_s23, 2  ;;  %p4279_p1 = scmp.ge.s32.totalorder %s5098_s22, 1 }
   0x5   : > { %p273_p2 = scmp.lt.s32.totalorder %s5098_s22, 5 }
   0x6   : > { %s6425_s23 = smov (%p25_p0, %s24_s23), 0  ;;  %s6427_s24 = smov (!%p25_p0, %s27_s24), %s5094_s21 }
   0x7   : > { %p274_p3 = pnand %p4279_p1, %p273_p2  ;;  %p29_p4 = scmp.ge.s32.totalorder %s6427_s24, 2 }
   0x9   : > { %s6429_s24 = smov (%p29_p4, %s6427_s24), 0  ;;  %277 = sbr.rel (%p274_p3) target bundleno = 553 (0x229), region = 40 }
  0x10   : > { %vm1037_vm0 = vcmask 1041408   ;;  %v4379_v0 = vld [vmem:[%s6391_s3 + $0x8] sm:$0x3]  ;;  %v4304_v1 = vld [vmem:[%s6391_s3 + $0x2] sm:$0x3]  ;;  %s5172_s29 = sshll.u32 %s5082_s18, 3 }
  0x11   : > { %4996 = vmatprep.subr.msk.bf16.mxu0 %vm1037_vm0, %v4379_v0  ;;  %v5176_v2 = vsel %vm1037_vm0, %v4379_v0, 0  ;;  %4992 = vmatprep.subr.msk.bf16.mxu1 %vm1037_vm0, %v4304_v1  ;;  %p337_p5 = scmp.lt.s32.totalorder %s5086_s19, 1  ;;  %p339_p6 = scmp.lt.s32.totalorder %s5172_s29, 15  ;;  %vm392_vm1 = vcmask 24576   ;;  %vm393_vm2 = vsmask.f32 256 }
  0x12   : > { %4773 = vmatpush3.bf16.msra.mxu0 %v5176_v2  ;;  %vm5183_vm3 = vmand %vm392_vm1, %vm393_vm2  ;;  %v398_v4 = vld [vmem:[#allocation2 + $0xc] sm:$0x1]  ;;  %vm425_vm4 = vsmask.f32 7938  ;;  %v430_v5 = vld [vmem:[#allocation2 + $0x14] sm:$0x1] }
  0x13   : > { %s6431_s19 = smov (!%p337_p5, %s5086_s19), 1  ;;  %v399_v6 = vsel %vm5183_vm3, 0, %v398_v4  ;;  %vm5193_vm5 = vmand %vm392_vm1, %vm425_vm4  ;;  %v1039_v9 = vsel %vm1037_vm0, %v4304_v1, 0  ;;  %v401_v10 = vld [vmem:[#allocation2 + $0x18] sm:$0x1]  ;;  %s5209_s8 = sadd.s32 4294967295, %s5172_s29 }
  0x14   : > { %s340_s30 = scalar_select %p339_p6, %s5172_s29, 15  ;;  %400 = vst [vmem:[#allocation2 + $0xc] sm:$0x1] %v399_v6  ;;  %v431_v8 = vsel %vm5193_vm5, 0, %v430_v5  ;;  %v433_v11 = vld [vmem:[#allocation2 + $0x20] sm:$0x1]  ;;  %4701 = vmatpush3.bf16.msra.mxu1 %v1039_v9 }
  0x15   : > { %s5201_s6 = sshll.u32 %s6431_s19, 5  ;;  %432 = vst [vmem:[#allocation2 + $0x14] sm:$0x1] %v431_v8  ;;  %v402_v12 = vsel %vm5183_vm3, 0, %v401_v10  ;;  %v434_v13 = vsel %vm5193_vm5, 0, %v433_v11  ;;  %p349_p7 = scmp.gt.s32.totalorder %s5209_s8, 0 }
  0x16   : > { %s4281_s7 = sshll.u32 %s340_s30, 1  ;;  %v395_v14 = vld [vmem:[#allocation2] sm:$0x1]  ;;  %403 = vst [vmem:[#allocation2 + $0x18] sm:$0x1] %v402_v12  ;;  %p4286_p8 = scmp.lt.s32.totalorder %s5209_s8, 15 }
  0x17   : > { %s343_s9 = sadd.s32 %s5201_s6, %s4281_s7  ;;  %435 = vst [vmem:[#allocation2 + $0x20] sm:$0x1] %v434_v13  ;;  %v396_v15 = vsel %vm5183_vm3, 0, %v395_v14  ;;  %v427_v16 = vld [vmem:[#allocation2 + $0x8] sm:$0x1]  ;;  %vm495_vm7 = vcmask 27648  }
  0x18   : > { %v5218_v17 = vld [vmem:[%s6391_s3] sm:$0x3]  ;;  %s4283_s12 = sshll.u32 %s343_s9, 2  ;;  %397 = vst [vmem:[#allocation2] sm:$0x1] %v396_v15  ;;  %v428_v18 = vsel %vm5193_vm5, 0, %v427_v16  ;;  %vm5253_vm9 = vmand %vm495_vm7, %vm425_vm4 }
  0x19   : > { %4993 = vmatprep.subr.msk.bf16.mxu1 %vm1037_vm0, %v5218_v17  ;;  %v5228_v19 = vld [vmem:[%s6391_s3 + $0xa] sm:$0x3]  ;;  %s5233_s17 = scalar_lea.vmem %s6388_s0, %s4283_s12  ;;  %vm473_vm6 = vsmask.f32 4368  ;;  %429 = vst [vmem:[#allocation2 + $0x8] sm:$0x1] %v428_v18 }
  0x1a   : > { %p461_p9 = scmp.eq.s32.totalorder %s5082_s18, 0  ;;  %4998 = vmatprep.subr.msk.bf16.mxu0 %vm1037_vm0, %v5228_v19  ;;  %v533_v20 = vld [vmem:[%s5233_s17] sm:$0xf]  ;;  %v534_v21 = vld [vmem:[%s5233_s17 + $0x4] sm:$0xf]  ;;  %vm5244_vm8 = vmor %vm393_vm2, %vm473_vm6  ;;  %v5306_v15 = vsel %vm1037_vm0, %v5218_v17, 0 }
  0x1b   : > { %v535_v22 = vld [vmem:[%s5233_s17 + $0x8] sm:$0xf]  ;;  %v550_v23 = vshrl.u32 %v533_v20, 16  ;;  %v553_v24 = vshll.u32 %v533_v20, 16  ;;  %v558_v25 = vshrl.u32 %v534_v21, 16  ;;  %v561_v26 = vshll.u32 %v534_v21, 16 }
  0x1c   : > { %v404_v27 = vld [vmem:[#allocation2 + $0x24] sm:$0x1]  ;;  %v536_v28 = vld [vmem:[%s5233_s17 + $0xc] sm:$0xf]  ;;  %v567_v29 = vshrl.u32 %v535_v22, 16  ;;  %v570_v30 = vshll.u32 %v535_v22, 16 }
  0x1d   : > { %v436_v31 = vld [vmem:[#allocation2 + $0x2c] sm:$0x1]  ;;  %v552_v33 = vrot.slane %v550_v23, 7  ;;  %v560_v34 = vrot.slane %v558_v25, 7  ;;  %v575_v36 = vshrl.u32 %v536_v28, 16  ;;  %s350_s25 = scalar_select %p349_p7, %s5209_s8, 0 }
  0x1e   : > { %v710_v35 = vld [vmem:[#allocation2 + $0xc] sm:$0xf]  ;;  %v714_v38 = vld [vmem:[#allocation2 + $0x14] sm:$0x1]  ;;  %v569_v39 = vrot.slane %v567_v29, 7  ;;  %v578_v40 = vshll.u32 %v536_v28, 16 }
  0x1f   : > { %v405_v41 = vsel %vm5183_vm3, 0, %v404_v27  ;;  %v555_v42 = vor.u32 %v553_v24, %v552_v33  ;;  %v556_v43 = vrot.slane %v552_v33, 4  ;;  %v563_v44 = vor.u32 %v561_v26, %v560_v34  ;;  %v717_v46 = vld [vmem:[#allocation2 + $0x18] sm:$0xf]  ;;  %s6433_s25 = smov (!%p4286_p8, %s350_s25), 15  ;;  %s4586_s10 = sadd.s32 8, %s5172_s29 }
  0x20   : > { %v565_v45 = vrot.slane %v560_v34, 4  ;;  %406 = vst [vmem:[#allocation2 + $0x24] sm:$0x1] %v405_v41  ;;  %v572_v47 = vor.u32 %v570_v30, %v569_v39  ;;  %v573_v48 = vrot.slane %v569_v39, 4  ;;  %v577_v49 = vrot.slane %v575_v36, 7  ;;  %s4291_s27 = sshll.u32 %s6433_s25, 1 }
  0x21   : > { %v721_v50 = vld [vmem:[#allocation2 + $0x20] sm:$0x1]  ;;  %s462_s26 = scalar_select %p461_p9, 1, 0  ;;  %v564_v51 = vsel %vm5244_vm8, %v556_v43, %v563_v44  ;;  %v711_v52 = vsel %vm5253_vm9, %v555_v42, %v710_v35  ;;  %v437_v54 = vsel %vm5193_vm5, 0, %v436_v31  ;;  %v5312_v18 = vsel %vm1037_vm0, %v5228_v19, 0 }
  0x22   : > { %v715_v53 = vsel %vm5183_vm3, %v565_v45, %v714_v38  ;;  %v537_v55 = vld [vmem:[%s5233_s17 + $0x10] sm:$0xf]  ;;  %v538_v56 = vld [vmem:[%s5233_s17 + $0x14] sm:$0xf]  ;;  %712 = vst [vmem:[#allocation2 + $0xc] sm:$0xf] %v711_v52  ;;  %v580_v57 = vor.u32 %v578_v40, %v577_v49  ;;  %v718_v59 = vsel %vm5253_vm9, %v572_v47, %v717_v46  ;;  %s357_s28 = sadd.s32 %s4291_s27, %s5201_s6 }
  0x23   : > { %713 = vst.msk [vmem:[#allocation2 + $0x10] sm:$0xf] %vm495_vm7, %v564_v51  ;;  %716 = vst [vmem:[#allocation2 + $0x14] sm:$0x1] %v715_v53  ;;  %v582_v58 = vrot.slane %v577_v49, 4  ;;  %v463_v60 = vstv %s462_s26  ;;  %s4293_s30 = sshll.u32 %s357_s28, 2 }
  0x24   : > { %438 = vst [vmem:[#allocation2 + $0x2c] sm:$0x1] %v437_v54  ;;  %v407_v61 = vld [vmem:[#allocation2 + $0x30] sm:$0x1]  ;;  %719 = vst [vmem:[#allocation2 + $0x18] sm:$0xf] %v718_v59  ;;  %v581_v4 = vsel %vm5244_vm8, %v573_v48, %v580_v57  ;;  %s359_s9 = scalar_lea.vmem %s6389_s1, %s4293_s30 }
  0x25   : > { %vm5277_vm10 = vcmp.eq.s32.totalorder %v463_v60, 1  ;;  %v584_v63 = vshrl.u32 %v537_v55, 16  ;;  %v592_v0 = vshrl.u32 %v538_v56, 16  ;;  %v439_v1 = vld [vmem:[#allocation2 + $0x38] sm:$0x1]  ;;  %v722_v5 = vsel %vm5183_vm3, %v582_v58, %v721_v50  ;;  %p5345_p10 = scmp.lt.s32.totalorder %s4586_s10, 15 }
  0x26   : > { %vm791_vm11 = vsmask.f32 3328  ;;  %vm792_vm12 = vsmask.f32 7440  ;;  %v408_v6 = vsel %vm5183_vm3, 0, %v407_v61  ;;  %v587_v12 = vshll.u32 %v537_v55, 16 }
  0x27   : > { %v5291_v8 = vld [vmem:[%s5233_s17 + $0x18] sm:$0xf]  ;;  %720 = vst.msk [vmem:[#allocation2 + $0x1c] sm:$0xf] %vm495_vm7, %v581_v4  ;;  %723 = vst [vmem:[#allocation2 + $0x20] sm:$0x1] %v722_v5 }
  0x28   : > { %v457_v9 = vld [vmem:[%s359_s9] sm:$0xf]  ;;  %v458_v10 = vld [vmem:[%s359_s9 + $0x4] sm:$0xf]  ;;  %v5294_v11 = vrot.slane %v584_v63, 7  ;;  %v440_v16 = vsel %vm5193_vm5, 0, %v439_v1  ;;  %vm5351_vm14 = vmor %vm791_vm11, %vm792_vm12 }
  0x29   : > { %409 = vst [vmem:[#allocation2 + $0x30] sm:$0x1] %v408_v6  ;;  %v5298_v13 = vsel %vm5277_vm10, 0, %v457_v9  ;;  %v5302_v14 = vsel %vm5277_vm10, 0, %v458_v10  ;;  %v5314_v20 = vrot.slane %v592_v0, 7  ;;  %v595_v21 = vshll.u32 %v538_v56, 16 }
  0x2a   : > { %441 = vst [vmem:[#allocation2 + $0x38] sm:$0x1] %v440_v16  ;;  %v601_v22 = vshrl.u32 %v5291_v8, 16  ;;  %v476_v23 = vshrl.u32 %v5298_v13, 16  ;;  %v479_v24 = vshll.u32 %v5298_v13, 16  ;;  %v484_v17 = vshrl.u32 %v5302_v14, 16 }
  0x2b   : > { %v487_v25 = vshll.u32 %v5302_v14, 16  ;;  %v1749_v26 = vld [vmem:[#allocation2 + $0xc] sm:$0xf]  ;;  %v5321_v27 = vld [vmem:[#allocation2 + $0x10] sm:$0xf]  ;;  %v5326_v28 = vor.u32 %v587_v12, %v5294_v11  ;;  %vm1012_vm13 = vcmask 31744   ;;  %v5333_v39 = vor.u32 %v595_v21, %v5314_v20 }
  0x2c   : > { %v5323_v19 = vld [vmem:[#allocation2 + $0x14] sm:$0x1]  ;;  %v1774_v29 = vshrl.u32 %v1749_v26, 16  ;;  %v1777_v30 = vshll.u32 %v1749_v26, 16  ;;  %v1783_v31 = vshll.u32 %v5321_v27, 16  ;;  %v1787_v33 = vshrl.u32 %v5321_v27, 16 }
  0x2d   : > { %v1752_v34 = vld [vmem:[#allocation2 + $0x18] sm:$0xf]  ;;  %v1793_v35 = vshll.u32 %v5323_v19, 16  ;;  %v590_v38 = vrot.slane %v5294_v11, 4  ;;  %v2165_v55 = vrot.slane %v5321_v27, 5  ;;  %v599_v59 = vrot.slane %v5314_v20, 4 }
  0x2e   : > { %v1798_v36 = vshrl.u32 %v1752_v34, 16  ;;  %v1776_v40 = vrot.slane %v1774_v29, 4  ;;  %v1779_v41 = vrot.slane %v1777_v30, 5  ;;  %v1785_v42 = vrot.slane %v1783_v31, 5  ;;  %v5336_v44 = vld [vmem:[#allocation2 + $0x1c] sm:$0xf] }
  0x2f   : > { %v1789_v43 = vrot.slane %v1787_v33, 4  ;;  %v1795_v45 = vrot.slane %v1793_v35, 5  ;;  %v5338_v46 = vld [vmem:[#allocation2 + $0x20] sm:$0x1]  ;;  %v1801_v48 = vshll.u32 %v1752_v34, 16  ;;  %v1807_v49 = vshll.u32 %v5336_v44, 16 }
  0x30   : > { %v1800_v47 = vrot.slane %v1798_v36, 4  ;;  %v1780_v50 = vor.u32 %v1779_v41, %v1776_v40  ;;  %v1811_v52 = vshrl.u32 %v5336_v44, 16  ;;  %v1817_v53 = vshll.u32 %v5338_v46, 16  ;;  %v5356_v58 = vld [vmem:[#allocation2 + $0xc] sm:$0xf]  ;;  %s6435_s10 = smov (!%p5345_p10, %s4586_s10), 15 }
  0x31   : > { %v1790_v51 = vor.u32 %v1789_v43, %v1785_v42  ;;  %v1803_v56 = vrot.slane %v1801_v48, 5  ;;  %v1809_v57 = vrot.slane %v1807_v49, 5  ;;  %v2168_v62 = vrot.slane %v5323_v19, 5  ;;  %v497_v12 = vld [vmem:[#allocation2] sm:$0xf]  ;;  %s6437_s10 = smov (!%p5345_p10, %s6435_s10), 15 }
  0x32   : > { %v1781_v60 = vrot.slane %v1780_v50, 4  ;;  %v1813_v63 = vrot.slane %v1811_v52, 4  ;;  %v1819_v1 = vrot.slane %v1817_v53, 5  ;;  %v478_v4 = vrot.slane %v476_v23, 7  ;;  %v5364_v13 = vld [vmem:[#allocation2 + $0x10] sm:$0xf] }
  0x33   : > { %v1791_v61 = vrot.slane %v1790_v51, 4  ;;  %v1804_v0 = vor.u32 %v1803_v56, %v1800_v47  ;;  %v486_v5 = vrot.slane %v484_v17, 7  ;;  %v819_v14 = vshrl.u32 %v5356_v58, 16  ;;  %v502_v17 = vld [vmem:[#allocation2 + $0x8] sm:$0x1]  ;;  %s5390_s29 = sshll.u32 %s6437_s10, 1 }
  0x34   : > { %v1786_v6 = vsel %vm5351_vm14, %v1781_v60, %v1785_v42  ;;  %v1814_v10 = vor.u32 %v1813_v63, %v1809_v57  ;;  %v481_v21 = vor.u32 %v479_v24, %v478_v4  ;;  %v482_v23 = vrot.slane %v478_v4, 4  ;;  %v5371_v31 = vld [vmem:[#allocation2 + $0x14] sm:$0x1]  ;;  %v540_v40 = vld [vmem:[%s5233_s17 + $0x1c] sm:$0xf]  ;;  %s374_s14 = sadd.s32 %s5390_s29, %s5201_s6  ;;  %p467_p11 = scmp.eq.s32.totalorder %s5082_s18, 1 }
  0x35   : > { %v1796_v9 = vsel %vm5351_vm14, %v1791_v61, %v1795_v45  ;;  %v1805_v20 = vrot.slane %v1804_v0, 4  ;;  %v489_v29 = vor.u32 %v487_v25, %v486_v5  ;;  %v491_v30 = vrot.slane %v486_v5, 4  ;;  %v724_v45 = vld [vmem:[#allocation2 + $0x24] sm:$0xf]  ;;  %v728_v47 = vld [vmem:[#allocation2 + $0x2c] sm:$0x1] }
  0x36   : > { %v4380_v16 = vcombine.low %v1786_v6, %v1796_v9  ;;  %v1815_v26 = vrot.slane %v1814_v10, 4  ;;  %v821_v33 = vrot.slane %v819_v14, 4  ;;  %v498_v35 = vsel %vm5253_vm9, %v481_v21, %v497_v12  ;;  %v5397_v52 = vld [vmem:[%s6391_s3 + $0xc] sm:$0x3]  ;;  %v5408_v61 = vld [vmem:[#allocation2 + $0x18] sm:$0xf] }
  0x37   : > { %v1810_v34 = vsel %vm5351_vm14, %v1805_v20, %v1809_v57  ;;  %v822_v24 = vshll.u32 %v5356_v58, 16  ;;  %v828_v36 = vshll.u32 %v5364_v13, 16  ;;  %v490_v41 = vsel %vm5244_vm8, %v482_v23, %v489_v29  ;;  %499 = vst [vmem:[#allocation2] sm:$0xf] %v498_v35  ;;  %s4300_s27 = sshll.u32 %s374_s14, 2  ;;  %s4301_s14 = sshll.u32 %s5082_s18, 2 }
  0x38   : > { %4774 = vmatprep.mubr.msk.bf16.mxu0 %vm1012_vm13, %v4380_v16  ;;  %v1820_v25 = vsel %vm5351_vm14, %v1815_v26, %v1819_v1  ;;  %v503_v42 = vsel %vm5183_vm3, %v491_v30, %v502_v17  ;;  %v832_v43 = vshrl.u32 %v5364_v13, 16  ;;  %501 = vst.msk [vmem:[#allocation2 + $0x4] sm:$0xf] %vm495_vm7, %v490_v41  ;;  %v838_v51 = vshll.u32 %v5371_v31, 16  ;;  %s5717_s6 = scalar_select %p467_p11, 1, 0 }
  0x39   : > { %v4381_v48 = vcombine.low %v1810_v34, %v1820_v25  ;;  %504 = vst [vmem:[#allocation2 + $0x8] sm:$0x1] %v503_v42  ;;  %v824_v49 = vrot.slane %v822_v24, 5  ;;  %v830_v50 = vrot.slane %v828_v36, 5  ;;  %v2172_v53 = vrot.slane %v5336_v44, 5  ;;  %s5728_s30 = scalar_lea.vmem %s6390_s2, %s4300_s27  ;;  %p6261_p12 = scmp.lt.s32.totalorder %s4301_s14, 7 }
  0x3a   : > { %v2175_v56 = vrot.slane %v5338_v46, 5  ;;  %v834_v57 = vrot.slane %v832_v43, 4  ;;  %v598_v60 = vsel %vm5244_vm8, %v590_v38, %v5333_v39  ;;  %v840_v0 = vrot.slane %v838_v51, 5  ;;  %s4302_s16 = sshll.u32 %s6431_s19, 3 }
  0x3b   : > { %4775 = vmatmul.mubr.msk.bf16.vlgmr.msra.gmra.mrb[0].mxu0 %vm1012_vm13, %v4381_v48  ;;  %v825_v63 = vor.u32 %v824_v49, %v821_v33  ;;  %v725_v1 = vsel %vm5253_vm9, %v5326_v28, %v724_v45  ;;  %727 = vst.msk [vmem:[#allocation2 + $0x28] sm:$0xf] %vm495_vm7, %v598_v60  ;;  %v729_v4 = vsel %vm5183_vm3, %v599_v59, %v728_v47  ;;  %v603_v11 = vrot.slane %v601_v22, 7  ;;  %v5429_v22 = vld [vmem:[#allocation2 + $0x1c] sm:$0xf]  ;;  %s6439_s14 = smov (!%p6261_p12, %s4301_s14), 7 }
  0x3c   : > { %v835_v5 = vor.u32 %v834_v57, %v830_v50  ;;  %4791 = vmatpush3.bf16.msra.mxu0 %v5312_v18  ;;  %726 = vst [vmem:[#allocation2 + $0x24] sm:$0xf] %v725_v1  ;;  %730 = vst [vmem:[#allocation2 + $0x2c] sm:$0x1] %v729_v4  ;;  %v604_v38 = vshll.u32 %v5291_v8, 16  ;;  %v609_v39 = vshrl.u32 %v540_v40, 16  ;;  %s387_s18 = sadd.s32 %s4302_s16, %s6439_s14 }
  0x3d   : > { %v826_v6 = vrot.slane %v825_v63, 4  ;;  %v612_v9 = vshll.u32 %v540_v40, 16  ;;  %v843_v28 = vshrl.u32 %v5408_v61, 16  ;;  %v846_v10 = vshll.u32 %v5408_v61, 16  ;;  %4999 = vmatprep.subr.msk.bf16.mxu0 %vm1037_vm0, %v5397_v52  ;;  %v731_v47 = vld [vmem:[#allocation2 + $0x30] sm:$0xf] }
  0x3e   : > { %v5427_v18 = vrot.slane %v2172_v53, 4  ;;  %v836_v59 = vrot.slane %v835_v5, 4  ;;  %v607_v12 = vrot.slane %v603_v11, 4  ;;  %v611_v14 = vrot.slane %v609_v39, 7  ;;  %v5431_v8 = vld [vmem:[#allocation2] sm:$0xf] }
  0x3f   : > { %v831_v16 = vsel %vm5351_vm14, %v826_v6, %v830_v50  ;;  %v606_v20 = vor.u32 %v604_v38, %v603_v11  ;;  %v845_v21 = vrot.slane %v843_v28, 4  ;;  %v848_v23 = vrot.slane %v846_v10, 5  ;;  %v5435_v17 = vld [vmem:[#allocation2 + $0x4] sm:$0xf]  ;;  %v735_v48 = vld [vmem:[#allocation2 + $0x38] sm:$0x1] }
  0x40   : > { %v5437_v26 = vld [vmem:[#allocation2 + $0x8] sm:$0x1]  ;;  %v795_v29 = vshrl.u32 %v5431_v8, 16  ;;  %v798_v30 = vshll.u32 %v5431_v8, 16  ;;  %v841_v33 = vsel %vm5351_vm14, %v836_v59, %v840_v0  ;;  %v614_v34 = vor.u32 %v612_v9, %v611_v14  ;;  %s4303_s19 = sshll.u32 %s387_s18, 2 }
  0x41   : > { %v804_v35 = vshll.u32 %v5435_v17, 16  ;;  %v808_v24 = vshrl.u32 %v5435_v17, 16  ;;  %v814_v36 = vshll.u32 %v5437_v26, 16  ;;  %v852_v40 = vshll.u32 %v5429_v22, 16  ;;  %s6292_s27 = scalar_lea.vmem %s6393_s5, %s4303_s19 }
  0x42   : > { %v797_v25 = vrot.slane %v795_v29, 4  ;;  %v800_v41 = vrot.slane %v798_v30, 5  ;;  %v4306_v42 = vcombine.low %v831_v16, %v841_v33  ;;  %v5447_v43 = vld [vmem:[#allocation2 + $0x28] sm:$0xf]  ;;  %v615_v45 = vsel %vm5244_vm8, %v607_v12, %v614_v34  ;;  %v5457_v12 = vld [vmem:[#allocation2 + $0x20] sm:$0x1] }
  0x43   : > { %v806_v49 = vrot.slane %v804_v35, 5  ;;  %v810_v50 = vrot.slane %v808_v24, 4  ;;  %v816_v51 = vrot.slane %v814_v36, 5  ;;  %v1755_v57 = vld [vmem:[#allocation2 + $0x24] sm:$0xf]  ;;  %v1831_v60 = vshll.u32 %v5447_v43, 16 }
  0x44   : > { %734 = vst.msk [vmem:[#allocation2 + $0x34] sm:$0xf] %vm495_vm7, %v615_v45  ;;  %v801_v63 = vor.u32 %v800_v41, %v797_v25  ;;  %v5453_v0 = vld [vmem:[#allocation2 + $0x2c] sm:$0x1]  ;;  %v1822_v1 = vshrl.u32 %v1755_v57, 16  ;;  %v1825_v4 = vshll.u32 %v1755_v57, 16  ;;  %v732_v30 = vsel %vm5253_vm9, %v606_v20, %v731_v47 }
  0x45   : > { %v1835_v5 = vshrl.u32 %v5447_v43, 16  ;;  %v811_v11 = vor.u32 %v810_v50, %v806_v49  ;;  %v1833_v38 = vrot.slane %v1831_v60, 5  ;;  %v1841_v39 = vshll.u32 %v5453_v0, 16  ;;  %733 = vst [vmem:[#allocation2 + $0x30] sm:$0xf] %v732_v30 }
  0x46   : > { %v616_v6 = vrot.slane %v611_v14, 4  ;;  %v802_v9 = vrot.slane %v801_v63, 4  ;;  %v1824_v28 = vrot.slane %v1822_v1, 4  ;;  %v1827_v10 = vrot.slane %v1825_v4, 5  ;;  %v5465_v36 = vld [vmem:[#allocation2 + $0x24] sm:$0xf] }
  0x47   : > { %v1837_v59 = vrot.slane %v1835_v5, 4  ;;  %v812_v16 = vrot.slane %v811_v11, 4  ;;  %v1843_v29 = vrot.slane %v1841_v39, 5  ;;  %v849_v14 = vor.u32 %v848_v23, %v845_v21  ;;  %v5478_v21 = vld [vmem:[%s6391_s3 + $0x4] sm:$0x3] }
  0x48   : > { %v736_v33 = vsel %vm5183_vm3, %v616_v6, %v735_v48  ;;  %v807_v34 = vsel %vm5351_vm14, %v802_v9, %v806_v49  ;;  %v1828_v35 = vor.u32 %v1827_v10, %v1824_v28  ;;  %v854_v41 = vrot.slane %v852_v40, 5  ;;  %v5473_v49 = vld [vmem:[#allocation2 + $0x28] sm:$0xf]  ;;  %v5482_v63 = vld [vmem:[#allocation2 + $0x2c] sm:$0x1] }
  0x49   : > { %v1838_v24 = vor.u32 %v1837_v59, %v1833_v38  ;;  %737 = vst [vmem:[#allocation2 + $0x38] sm:$0x1] %v736_v33  ;;  %v817_v25 = vsel %vm5351_vm14, %v812_v16, %v816_v51  ;;  %v856_v45 = vshrl.u32 %v5429_v22, 16  ;;  %v862_v20 = vshll.u32 %v5457_v12, 16 }
  0x4a   : > { %v4305_v47 = vcombine.low %v807_v34, %v817_v25  ;;  %v1829_v48 = vrot.slane %v1828_v35, 4  ;;  %v850_v51 = vrot.slane %v849_v14, 4  ;;  %v867_v11 = vshrl.u32 %v5465_v36, 16 }
  0x4b   : > { %v1839_v50 = vrot.slane %v1838_v24, 4  ;;  %v5471_v57 = vld [vmem:[#allocation2 + $0x34] sm:$0xf]  ;;  %v858_v60 = vrot.slane %v856_v45, 4  ;;  %v864_v5 = vrot.slane %v862_v20, 5  ;;  %v870_v59 = vshll.u32 %v5465_v36, 16 }
  0x4c   : > { %v1855_v23 = vshll.u32 %v5471_v57, 16  ;;  %v1859_v40 = vshrl.u32 %v5471_v57, 16  ;;  %4702 = vmatprep.mubr.msk.bf16.mxu1 %vm1012_vm13, %v4305_v47  ;;  %v1834_v1 = vsel %vm5351_vm14, %v1829_v48, %v1833_v38  ;;  %v869_v10 = vrot.slane %v867_v11, 4 }
  0x4d   : > { %v1844_v4 = vsel %vm5351_vm14, %v1839_v50, %v1843_v29  ;;  %4703 = vmatmul.mubr.msk.bf16.vlgmr.msra.gmra.mrb[0].mxu1 %vm1012_vm13, %v4306_v42  ;;  %v859_v28 = vor.u32 %v858_v60, %v854_v41  ;;  %v876_v38 = vshll.u32 %v5473_v49, 16  ;;  %v880_v16 = vshrl.u32 %v5473_v49, 16  ;;  %v1758_v29 = vld [vmem:[#allocation2 + $0x30] sm:$0xf]  ;;  %v2131_v50 = vld [vmem:[#allocation2 + $0xc] sm:$0xe] }
  0x4e   : > { %v4382_v39 = vcombine.low %v1834_v1, %v1844_v4  ;;  %v5491_v6 = vrot.slane %v1855_v23, 5  ;;  %v1861_v9 = vrot.slane %v1859_v40, 4  ;;  %4719 = vmatpush3.bf16.msra.mxu1 %v5306_v15  ;;  %v855_v33 = vsel %vm5351_vm14, %v850_v51, %v854_v41  ;;  %v2132_v60 = vld [vmem:[#allocation2 + $0x18] sm:$0xe] }
  0x4f   : > { %v860_v34 = vrot.slane %v859_v28, 4  ;;  %v886_v15 = vshll.u32 %v5482_v63, 16  ;;  %4994 = vmatprep.subr.msk.bf16.mxu1 %vm1037_vm0, %v5478_v21  ;;  %v1846_v35 = vshrl.u32 %v1758_v29, 16  ;;  %v1849_v24 = vshll.u32 %v1758_v29, 16 }
  0x50   : > { %4778 = vmatprep.mubr.msk.bf16.mxu0 %vm1012_vm13, %v4382_v39  ;;  %v5498_v30 = vld [vmem:[#allocation2 + $0x38] sm:$0x1]  ;;  %v1862_v42 = vor.u32 %v1861_v9, %v5491_v6  ;;  %v872_v25 = vrot.slane %v870_v59, 5  ;;  %v878_v47 = vrot.slane %v876_v38, 5  ;;  %v882_v48 = vrot.slane %v880_v16, 4 }
  0x51   : > { %v1865_v14 = vshll.u32 %v5498_v30, 16  ;;  %v865_v20 = vsel %vm5351_vm14, %v860_v34, %v864_v5  ;;  %v1848_v23 = vrot.slane %v1846_v35, 4  ;;  %v1851_v41 = vrot.slane %v1849_v24, 5  ;;  %v5509_v39 = vld [vmem:[#allocation2 + $0x30] sm:$0xf] }
  0x52   : > { %v1863_v45 = vrot.slane %v1862_v42, 4  ;;  %v4307_v51 = vcombine.low %v855_v33, %v865_v20  ;;  %v873_v1 = vor.u32 %v872_v25, %v869_v10  ;;  %v883_v4 = vor.u32 %v882_v48, %v878_v47 }
  0x53   : > { %v1867_v40 = vrot.slane %v1865_v14, 5  ;;  %v888_v11 = vrot.slane %v886_v15, 5  ;;  %vm1326_vm15 = vcmask 1042432   ;;  %v1852_v9 = vor.u32 %v1851_v41, %v1848_v23  ;;  %v5531_v15 = vld [vmem:[#allocation2 + $0x34] sm:$0xf] }
  0x54   : > { %4706 = vmatprep.mubr.msk.bf16.mxu1 %vm1012_vm13, %v4307_v51  ;;  %vm1327_vm1 = vcmask 1046532   ;;  %v4396_v5 = vrot.slane %v2131_v50, 9  ;;  %v874_v59 = vrot.slane %v873_v1, 4  ;;  %v884_v38 = vrot.slane %v883_v4, 4  ;;  %v442_v14 = vld [vmem:[#allocation2 + $0x44] sm:$0x1] }
  0x55   : > { %v1868_v28 = vsel %vm5351_vm14, %v1863_v45, %v1867_v40  ;;  %vm5514_vm2 = vmor %vm1326_vm15, %vm1327_vm1  ;;  %v2167_v10 = vrot.slane %v2165_v55, 4  ;;  %v4397_v29 = vrot.slane %v2132_v60, 9  ;;  %v1853_v42 = vrot.slane %v1852_v9, 4  ;;  %v542_v50 = vld [vmem:[%s5233_s17 + $0x24] sm:$0xf] }
  0x56   : > { %v2166_v33 = vsel %vm5514_vm2, %v4396_v5, %v2165_v55  ;;  %v5529_v34 = vsel %vm5514_vm2, %v5427_v18, %v2175_v56  ;;  %v891_v35 = vshrl.u32 %v5509_v39, 16  ;;  %v879_v24 = vsel %vm5351_vm14, %v874_v59, %v878_v47  ;;  %v5548_v56 = vld [vmem:[#allocation2 + $0x38] sm:$0x1]  ;;  %v410_v18 = vld [vmem:[#allocation2 + $0x3c] sm:$0x1] }
  0x57   : > { %v889_v27 = vsel %vm5351_vm14, %v884_v38, %v888_v11  ;;  %v2169_v46 = vsel %vm5514_vm2, %v2167_v10, %v2168_v62  ;;  %v5546_v55 = vsel %vm5514_vm2, %v4397_v29, %v2172_v53  ;;  %v1858_v25 = vsel %vm5351_vm14, %v1853_v42, %v5491_v6  ;;  %v541_v62 = vld [vmem:[%s5233_s17 + $0x20] sm:$0xf]  ;;  %v2133_v51 = vld [vmem:[#allocation2 + $0x24] sm:$0xe]  ;;  %v2134_v38 = vld [vmem:[#allocation2 + $0x30] sm:$0xe] }
  0x58   : > { %v4308_v45 = vcombine.low %v879_v24, %v889_v27  ;;  %v4405_v20 = vcombine.low %v2166_v33, %v2169_v46  ;;  %v4406_v19 = vcombine.low %v5546_v55, %v5529_v34  ;;  %v4383_v47 = vcombine.low %v1858_v25, %v1868_v28  ;;  %v413_v34 = vld [vmem:[#allocation2 + $0x48] sm:$0x1]  ;;  %v445_v55 = vld [vmem:[#allocation2 + $0x50] sm:$0x1] }
  0x59   : > { %v893_v44 = vrot.slane %v891_v35, 4  ;;  %v894_v48 = vshll.u32 %v5509_v39, 16  ;;  %v900_v53 = vshll.u32 %v5531_v15, 16  ;;  %v904_v23 = vshrl.u32 %v5531_v15, 16 }
  0x5a   : > { %4707 = vmatmul.mubr.msk.bf16.gmra.mrb[4].mxu1 %vm1012_vm13, %v4308_v45  ;;  %v910_v41 = vshll.u32 %v5548_v56, 16  ;;  %v411_v6 = vsel %vm5183_vm3, 0, %v410_v18  ;;  %v443_v40 = vsel %vm5193_vm5, 0, %v442_v14  ;;  %4779 = vmatmul.mubr.msk.bf16.gmra.mrb[4].mxu0 %vm1012_vm13, %v4383_v47  ;;  %v618_v4 = vshrl.u32 %v541_v62, 16 }
  0x5b   : > { %v896_v60 = vrot.slane %v894_v48, 5  ;;  %v902_v1 = vrot.slane %v900_v53, 5  ;;  %412 = vst [vmem:[#allocation2 + $0x3c] sm:$0x1] %v411_v6  ;;  %444 = vst [vmem:[#allocation2 + $0x44] sm:$0x1] %v443_v40  ;;  %4792 = vmatprep.mubr.msk.bf16.mxu0 %vm1012_vm13, %v4405_v20 }
  0x5c   : > { %v621_v11 = vshll.u32 %v541_v62, 16  ;;  %v906_v9 = vrot.slane %v904_v23, 4  ;;  %v912_v28 = vrot.slane %v910_v41, 5  ;;  %v626_v5 = vshrl.u32 %v542_v50, 16  ;;  %v543_v20 = vld [vmem:[%s5233_s17 + $0x28] sm:$0xf] }
  0x5d   : > { %v629_v59 = vshll.u32 %v542_v50, 16  ;;  %v897_v10 = vor.u32 %v896_v60, %v893_v44  ;;  %v620_v29 = vrot.slane %v618_v4, 7  ;;  %v2469_v42 = vsel %vm1037_vm0, %v5397_v52, 0  ;;  %v544_v48 = vld [vmem:[%s5233_s17 + $0x2c] sm:$0xf] }
  0x5e   : > { %v4398_v33 = vrot.slane %v2133_v51, 9  ;;  %v907_v35 = vor.u32 %v906_v9, %v902_v1  ;;  %v628_v24 = vrot.slane %v626_v5, 7  ;;  %v2179_v27 = vrot.slane %v5447_v43, 5  ;;  %v416_v53 = vld [vmem:[#allocation2 + $0x54] sm:$0x1] }
  0x5f   : > { %v2182_v46 = vrot.slane %v5453_v0, 5  ;;  %v898_v18 = vrot.slane %v897_v10, 4  ;;  %v623_v14 = vor.u32 %v621_v11, %v620_v29  ;;  %v624_v25 = vrot.slane %v620_v29, 4  ;;  %v5579_v43 = vld [vmem:[%s6391_s3 + $0xe] sm:$0x3] }
  0x60   : > { %v4399_v45 = vrot.slane %v2134_v38, 9  ;;  %v908_v62 = vrot.slane %v907_v35, 4  ;;  %v631_v47 = vor.u32 %v629_v59, %v628_v24  ;;  %v633_v44 = vrot.slane %v628_v24, 4  ;;  %v448_v6 = vld [vmem:[#allocation2 + $0x5c] sm:$0x1] }
  0x61   : > { %v2180_v52 = vsel %vm5514_vm2, %v4398_v33, %v2179_v27  ;;  %v903_v0 = vsel %vm5351_vm14, %v898_v18, %v902_v1  ;;  %v2181_v50 = vrot.slane %v2179_v27, 4  ;;  %v2186_v23 = vrot.slane %v5471_v57, 5  ;;  %v545_v40 = vld [vmem:[%s5233_s17 + $0x30] sm:$0xf]  ;;  %v546_v59 = vld [vmem:[%s5233_s17 + $0x34] sm:$0xf] }
  0x62   : > { %v2189_v41 = vrot.slane %v5498_v30, 5  ;;  %v913_v51 = vsel %vm5351_vm14, %v908_v62, %v912_v28  ;;  %v632_v60 = vsel %vm5244_vm8, %v624_v25, %v631_v47  ;;  %v738_v4 = vld [vmem:[#allocation2 + $0x3c] sm:$0xf]  ;;  %v742_v11 = vld [vmem:[#allocation2 + $0x44] sm:$0x1]  ;;  %v414_v9 = vsel %vm5183_vm3, 0, %v413_v34  ;;  %4793 = vmatmul.mubr.msk.bf16.vlgmr.msra.gmra.mrb[0].mxu0 %vm1012_vm13, %v4406_v19 }
  0x63   : > { %v446_v1 = vsel %vm5193_vm5, 0, %v445_v55  ;;  %v4309_v57 = vcombine.low %v903_v0, %v913_v51  ;;  %v739_v30 = vsel %vm5253_vm9, %v623_v14, %v738_v4  ;;  %741 = vst.msk [vmem:[#allocation2 + $0x40] sm:$0xf] %vm495_vm7, %v632_v60  ;;  %v743_v28 = vsel %vm5183_vm3, %v633_v44, %v742_v11  ;;  %415 = vst [vmem:[#allocation2 + $0x48] sm:$0x1] %v414_v9 }
  0x64   : > { %v2183_v5 = vsel %vm5514_vm2, %v2181_v50, %v2182_v46  ;;  %447 = vst [vmem:[#allocation2 + $0x50] sm:$0x1] %v446_v1  ;;  %740 = vst [vmem:[#allocation2 + $0x3c] sm:$0xf] %v739_v30  ;;  %4809 = vmatpush3.bf16.msra.mxu0 %v2469_v42  ;;  %v2187_v19 = vsel %vm5514_vm2, %v4399_v45, %v2186_v23  ;;  %v2188_v10 = vrot.slane %v2186_v23, 4  ;;  %v635_v29 = vshrl.u32 %v543_v20, 16 }
  0x65   : > { %744 = vst [vmem:[#allocation2 + $0x44] sm:$0x1] %v743_v28  ;;  %v4407_v38 = vcombine.low %v2180_v52, %v2183_v5  ;;  %4710 = vmatprep.mubr.msk.bf16.mxu1 %vm1012_vm13, %v4309_v57  ;;  %v638_v33 = vshll.u32 %v543_v20, 16  ;;  %v643_v34 = vshrl.u32 %v544_v48, 16  ;;  %v646_v35 = vshll.u32 %v544_v48, 16  ;;  %5000 = vmatprep.subr.msk.bf16.mxu0 %vm1037_vm0, %v5579_v43 }
  0x66   : > { %v417_v24 = vsel %vm5183_vm3, 0, %v416_v53  ;;  %v2190_v42 = vsel %vm5514_vm2, %v2188_v10, %v2189_v41  ;;  %v637_v27 = vrot.slane %v635_v29, 7  ;;  %v449_v46 = vsel %vm5193_vm5, 0, %v448_v6  ;;  %v548_v0 = vld [vmem:[%s5233_s17 + $0x3c] sm:$0xf] }
  0x67   : > { %4796 = vmatprep.mubr.msk.bf16.mxu0 %vm1012_vm13, %v4407_v38  ;;  %418 = vst [vmem:[#allocation2 + $0x54] sm:$0x1] %v417_v24  ;;  %v652_v55 = vshrl.u32 %v545_v40, 16  ;;  %v4408_v18 = vcombine.low %v2187_v19, %v2190_v42  ;;  %v645_v14 = vrot.slane %v643_v34, 7  ;;  %450 = vst [vmem:[#allocation2 + $0x5c] sm:$0x1] %v449_v46 }
  0x68   : > { %v655_v25 = vshll.u32 %v545_v40, 16  ;;  %v660_v45 = vshrl.u32 %v546_v59, 16  ;;  %v640_v20 = vor.u32 %v638_v33, %v637_v27  ;;  %v641_v62 = vrot.slane %v637_v27, 4  ;;  %v419_v38 = vld [vmem:[#allocation2 + $0x60] sm:$0x1] }
  0x69   : > { %v654_v47 = vrot.slane %v652_v55, 7  ;;  %v663_v44 = vshll.u32 %v546_v59, 16  ;;  %v648_v52 = vor.u32 %v646_v35, %v645_v14  ;;  %v650_v48 = vrot.slane %v645_v14, 4  ;;  %v451_v35 = vld [vmem:[#allocation2 + $0x68] sm:$0x1] }
  0x6a   : > { %v662_v53 = vrot.slane %v660_v45, 7  ;;  %v5617_v50 = vld [vmem:[#allocation2 + $0x40] sm:$0xf]  ;;  %v745_v23 = vld [vmem:[#allocation2 + $0x48] sm:$0xf]  ;;  %4797 = vmatmul.mubr.msk.bf16.gmra.mrb[4].mxu0 %vm1012_vm13, %v4408_v18  ;;  %vm4069_vm6 = vcmask 1044484  }
  0x6b   : > { %v749_v41 = vld [vmem:[#allocation2 + $0x50] sm:$0x1]  ;;  %v657_v6 = vor.u32 %v655_v25, %v654_v47  ;;  %v5621_v40 = vld [vmem:[#allocation2 + $0x3c] sm:$0xf]  ;;  %v924_v4 = vshll.u32 %v5617_v50, 16  ;;  %v928_v11 = vshrl.u32 %v5617_v50, 16  ;;  %v649_v9 = vsel %vm5244_vm8, %v641_v62, %v648_v52 }
  0x6c   : > { %v5623_v60 = vld [vmem:[#allocation2 + $0x44] sm:$0x1]  ;;  %v746_v1 = vsel %vm5253_vm9, %v640_v20, %v745_v23  ;;  %v915_v57 = vshrl.u32 %v5621_v40, 16  ;;  %v918_v30 = vshll.u32 %v5621_v40, 16  ;;  %748 = vst.msk [vmem:[#allocation2 + $0x4c] sm:$0xf] %vm495_vm7, %v649_v9  ;;  %v750_v5 = vsel %vm5183_vm3, %v650_v48, %v749_v41 }
  0x6d   : > { %v934_v28 = vshll.u32 %v5623_v60, 16  ;;  %747 = vst [vmem:[#allocation2 + $0x48] sm:$0xf] %v746_v1  ;;  %v5638_v59 = vld [vmem:[#allocation2 + $0x40] sm:$0xf]  ;;  %v926_v19 = vrot.slane %v924_v4, 5  ;;  %v665_v33 = vor.u32 %v663_v44, %v662_v53 }
  0x6e   : > { %v930_v10 = vrot.slane %v928_v11, 4  ;;  %751 = vst [vmem:[#allocation2 + $0x50] sm:$0x1] %v750_v5  ;;  %v658_v29 = vrot.slane %v654_v47, 4  ;;  %v752_v34 = vld [vmem:[#allocation2 + $0x54] sm:$0xf] }
  0x6f   : > { %v917_v24 = vrot.slane %v915_v57, 4  ;;  %v920_v42 = vrot.slane %v918_v30, 5  ;;  %v936_v27 = vrot.slane %v934_v28, 5  ;;  %v667_v46 = vrot.slane %v662_v53, 4  ;;  %v756_v55 = vld [vmem:[#allocation2 + $0x5c] sm:$0x1] }
  0x70   : > { %v931_v18 = vor.u32 %v930_v10, %v926_v19  ;;  %v666_v14 = vsel %vm5244_vm8, %v658_v29, %v665_v33  ;;  %v753_v25 = vsel %vm5253_vm9, %v657_v6, %v752_v34  ;;  %v5644_v45 = vld [vmem:[#allocation2 + $0x44] sm:$0x1]  ;;  %v2135_v20 = vld [vmem:[#allocation2 + $0x3c] sm:$0xe]  ;;  %v2193_v62 = vrot.slane %v5638_v59, 5 }
  0x71   : > { %v921_v47 = vor.u32 %v920_v42, %v917_v24  ;;  %754 = vst [vmem:[#allocation2 + $0x54] sm:$0xf] %v753_v25  ;;  %755 = vst.msk [vmem:[#allocation2 + $0x58] sm:$0xf] %vm495_vm7, %v666_v14  ;;  %v757_v44 = vsel %vm5183_vm3, %v667_v46, %v756_v55  ;;  %v4400_v52 = vrot.slane %v2135_v20, 9  ;;  %v2196_v48 = vrot.slane %v5644_v45, 5 }
  0x72   : > { %v932_v53 = vrot.slane %v931_v18, 4  ;;  %758 = vst [vmem:[#allocation2 + $0x5c] sm:$0x1] %v757_v44  ;;  %v2195_v23 = vrot.slane %v2193_v62, 4  ;;  %v420_v41 = vsel %vm5183_vm3, 0, %v419_v38  ;;  %v452_v11 = vsel %vm5193_vm5, 0, %v451_v35 }
  0x73   : > { %v922_v6 = vrot.slane %v921_v47, 4  ;;  %v2194_v4 = vsel %vm5514_vm2, %v4400_v52, %v2193_v62  ;;  %421 = vst [vmem:[#allocation2 + $0x60] sm:$0x1] %v420_v41  ;;  %v5661_v57 = vld [vmem:[#allocation2 + $0x4c] sm:$0xf] }
  0x74   : > { %v937_v9 = vsel %vm5351_vm14, %v932_v53, %v936_v27  ;;  %v5659_v1 = vld [vmem:[#allocation2 + $0x48] sm:$0xf]  ;;  %v2197_v30 = vsel %vm5514_vm2, %v2195_v23, %v2196_v48  ;;  %453 = vst [vmem:[#allocation2 + $0x68] sm:$0x1] %v452_v11  ;;  %v948_v29 = vshll.u32 %v5661_v57, 16  ;;  %v952_v34 = vshrl.u32 %v5661_v57, 16 }
  0x75   : > { %v927_v28 = vsel %vm5351_vm14, %v922_v6, %v926_v19  ;;  %v5667_v5 = vld [vmem:[#allocation2 + $0x50] sm:$0x1]  ;;  %v939_v38 = vshrl.u32 %v5659_v1, 16  ;;  %v942_v10 = vshll.u32 %v5659_v1, 16  ;;  %v4409_v24 = vcombine.low %v2194_v4, %v2197_v30  ;;  %v5682_v25 = vld [vmem:[%s5233_s17 + $0x38] sm:$0xf] }
  0x76   : > { %v4310_v33 = vcombine.low %v927_v28, %v937_v9  ;;  %v958_v35 = vshll.u32 %v5667_v5, 16  ;;  %v950_v46 = vrot.slane %v948_v29, 5  ;;  %v1338_v19 = vrot.slane %v5364_v13, 5  ;;  %v2136_v6 = vld [vmem:[#allocation2 + $0x48] sm:$0xe] }
  0x77   : > { %v941_v42 = vrot.slane %v939_v38, 4  ;;  %v944_v27 = vrot.slane %v942_v10, 5  ;;  %v954_v55 = vrot.slane %v952_v34, 4  ;;  %4800 = vmatprep.mubr.msk.bf16.mxu0 %vm1012_vm13, %v4409_v24  ;;  %v1765_v28 = vld [vmem:[#allocation2 + $0x4c] sm:$0xf]  ;;  %v4401_v24 = vrot.slane %v2136_v6, 9 }
  0x78   : > { %4711 = vmatmul.mubr.msk.bf16.gmra.mrb[8].mxu1 %vm1012_vm13, %v4310_v33  ;;  %v5676_v18 = vld [vmem:[#allocation2 + $0x54] sm:$0xf]  ;;  %v5678_v14 = vld [vmem:[#allocation2 + $0x58] sm:$0xf]  ;;  %v960_v53 = vrot.slane %v958_v35, 5  ;;  %v1903_v51 = vshll.u32 %v1765_v28, 16 }
  0x79   : > { %v945_v20 = vor.u32 %v944_v27, %v941_v42  ;;  %v5684_v62 = vld [vmem:[#allocation2 + $0x5c] sm:$0x1]  ;;  %v963_v47 = vshrl.u32 %v5676_v18, 16  ;;  %v966_v44 = vshll.u32 %v5676_v18, 16  ;;  %v972_v52 = vshll.u32 %v5678_v14, 16 }
  0x7a   : > { %v955_v48 = vor.u32 %v954_v55, %v950_v46  ;;  %v976_v23 = vshrl.u32 %v5678_v14, 16  ;;  %v982_v41 = vshll.u32 %v5684_v62, 16  ;;  %v5692_v29 = vld [vmem:[#allocation2 + $0x50] sm:$0x1]  ;;  %v5694_v33 = vld [vmem:[#allocation2 + $0x58] sm:$0xf] }
  0x7b   : > { %v946_v4 = vrot.slane %v945_v20, 4  ;;  %v965_v11 = vrot.slane %v963_v47, 4  ;;  %v968_v9 = vrot.slane %v966_v44, 5  ;;  %v974_v30 = vrot.slane %v972_v52, 5  ;;  %v5698_v42 = vld [vmem:[#allocation2 + $0x5c] sm:$0x1] }
  0x7c   : > { %v956_v38 = vrot.slane %v955_v48, 4  ;;  %v978_v10 = vrot.slane %v976_v23, 4  ;;  %v2137_v27 = vld [vmem:[#allocation2 + $0x54] sm:$0xe]  ;;  %v669_v55 = vshrl.u32 %v5682_v25, 16  ;;  %v984_v44 = vrot.slane %v982_v41, 5 }
  0x7d   : > { %v951_v34 = vsel %vm5351_vm14, %v946_v4, %v950_v46  ;;  %v969_v35 = vor.u32 %v968_v9, %v965_v11  ;;  %v2200_v52 = vrot.slane %v1765_v28, 5  ;;  %v2203_v46 = vrot.slane %v5692_v29, 5 }
  0x7e   : > { %v961_v20 = vsel %vm5351_vm14, %v956_v38, %v960_v53  ;;  %v979_v47 = vor.u32 %v978_v10, %v974_v30  ;;  %v1907_v4 = vshrl.u32 %v1765_v28, 16  ;;  %v4402_v41 = vrot.slane %v2137_v27, 9 }
  0x7f   : > { %v4311_v48 = vcombine.low %v951_v34, %v961_v20  ;;  %v970_v23 = vrot.slane %v969_v35, 4  ;;  %v2201_v11 = vsel %vm5514_vm2, %v4401_v24, %v2200_v52  ;;  %v2202_v9 = vrot.slane %v2200_v52, 4 }
  0x80   : > { %v980_v6 = vrot.slane %v979_v47, 4  ;;  %v2207_v38 = vrot.slane %v5694_v33, 5  ;;  %v2210_v10 = vrot.slane %v5698_v42, 5  ;;  %v4321_v35 = vcombine.low %v5431_v8, %v5435_v17 }
  0x81   : > { %4714 = vmatprep.mubr.msk.bf16.mxu1 %vm1012_vm13, %v4311_v48  ;;  %v975_v53 = vsel %vm5351_vm14, %v970_v23, %v974_v30  ;;  %v2204_v34 = vsel %vm5514_vm2, %v2202_v9, %v2203_v46  ;;  %v671_v24 = vrot.slane %v669_v55, 7  ;;  %v1341_v52 = vrot.slane %v5371_v31, 5  ;;  %v422_v23 = vld [vmem:[#allocation2 + $0x6c] sm:$0x1]  ;;  %v759_v9 = vld [vmem:[#allocation2 + $0x60] sm:$0xf] }
  0x82   : > { %v985_v28 = vsel %vm5351_vm14, %v980_v6, %v984_v44  ;;  %v4410_v27 = vcombine.low %v2201_v11, %v2204_v34  ;;  %v2208_v20 = vsel %vm5514_vm2, %v4402_v41, %v2207_v38  ;;  %v2209_v47 = vrot.slane %v2207_v38, 4  ;;  %v1303_v44 = vld [vmem:[#allocation2 + $0xc] sm:$0xe]  ;;  %v459_v41 = vld [vmem:[%s5728_s30] sm:$0xf] }
  0x83   : > { %v4312_v30 = vcombine.low %v975_v53, %v985_v28  ;;  %v672_v48 = vshll.u32 %v5682_v25, 16  ;;  %v677_v8 = vshrl.u32 %v548_v0, 16  ;;  %v680_v55 = vshll.u32 %v548_v0, 16  ;;  %v763_v53 = vld [vmem:[#allocation2 + $0x68] sm:$0x1] }
  0x84   : > { %v5735_v46 = vrot.slane %v1903_v51, 5  ;;  %v1909_v6 = vrot.slane %v1907_v4, 4  ;;  %4801 = vmatmul.mubr.msk.bf16.gmra.mrb[8].mxu0 %vm1012_vm13, %v4410_v27  ;;  %v2211_v11 = vsel %vm5514_vm2, %v2209_v47, %v2210_v10  ;;  %v469_v38 = vstv %s5717_s6 }
  0x85   : > { %4715 = vmatmul.mubr.msk.bf16.gmra.mrb[12].mxu1 %vm1012_vm13, %v4312_v30  ;;  %v4411_v31 = vcombine.low %v2208_v20, %v2211_v11  ;;  %v674_v0 = vor.u32 %v672_v48, %v671_v24  ;;  %v675_v25 = vrot.slane %v671_v24, 4  ;;  %v679_v28 = vrot.slane %v677_v8, 7  ;;  %v460_v20 = vld [vmem:[%s5728_s30 + $0x4] sm:$0xf] }
  0x86   : > { %4720 = vmatprep.mubr.msk.bf16.mxu1 %vm1012_vm13, %v4321_v35  ;;  %v4323_v51 = vcombine.low %v5408_v61, %v5429_v22  ;;  %v4338_v4 = vrot.slane %v1303_v44, 9  ;;  %v1340_v34 = vrot.slane %v1338_v19, 4  ;;  %v423_v10 = vsel %vm5183_vm3, 0, %v422_v23  ;;  %v1305_v23 = vld [vmem:[#allocation2 + $0x24] sm:$0xe] }
  0x87   : > { %v1913_v30 = vshll.u32 %v5692_v29, 16  ;;  %4804 = vmatprep.mubr.msk.bf16.mxu0 %vm1012_vm13, %v4411_v31  ;;  %v682_v27 = vor.u32 %v680_v55, %v679_v28  ;;  %v684_v35 = vrot.slane %v679_v28, 4  ;;  %v760_v24 = vsel %vm5253_vm9, %v674_v0, %v759_v9  ;;  %424 = vst [vmem:[#allocation2 + $0x6c] sm:$0x1] %v423_v10  ;;  %v5777_v9 = vld [vmem:[%s6391_s3 + $0x6] sm:$0x3] }
  0x88   : > { %v1910_v61 = vor.u32 %v1909_v6, %v5735_v46  ;;  %761 = vst [vmem:[#allocation2 + $0x60] sm:$0xf] %v760_v24  ;;  %v5759_v47 = vsel %vm5514_vm2, %v4338_v4, %v1338_v19  ;;  %v5763_v29 = vsel %vm5514_vm2, %v1340_v34, %v1341_v52  ;;  %vm470_vm4 = vcmp.eq.s32.totalorder %v469_v38, 1 }
  0x89   : > { %v683_v44 = vsel %vm5244_vm8, %v675_v25, %v682_v27  ;;  %v764_v48 = vsel %vm5183_vm3, %v684_v35, %v763_v53  ;;  %v4347_v8 = vcombine.low %v5759_v47, %v5763_v29  ;;  %v471_v55 = vsel %vm470_vm4, 0, %v459_v41 }
  0x8a   : > { %v1436_v19 = vsel %vm1037_vm0, %v5478_v21, 0  ;;  %762 = vst.msk [vmem:[#allocation2 + $0x64] sm:$0xf] %vm495_vm7, %v683_v44  ;;  %765 = vst [vmem:[#allocation2 + $0x68] sm:$0x1] %v764_v48  ;;  %v472_v52 = vsel %vm470_vm4, 0, %v460_v20  ;;  %v6410_v41 = vcombine.low %v5356_v58, %v5364_v13  ;;  %v4325_v44 = vcombine.low %v5509_v39, %v5531_v15 }
  0x8b   : > { %v506_v6 = vshrl.u32 %v471_v55, 16  ;;  %v509_v11 = vshll.u32 %v471_v55, 16  ;;  %v514_v53 = vshrl.u32 %v472_v52, 16  ;;  %v517_v38 = vshll.u32 %v472_v52, 16  ;;  %v2584_v39 = vld [vmem:[#allocation2 + $0x18] sm:$0xf] }
  0x8c   : > { %v5779_v31 = vrot.slane %v1913_v30, 5  ;;  %v4340_v0 = vrot.slane %v1305_v23, 9  ;;  %v5785_v25 = vrot.slane %v1910_v61, 4  ;;  %v1352_v4 = vrot.slane %v5473_v49, 5 }
  0x8d   : > { %4721 = vmatmul.mubr.msk.bf16.vlgmr.msra.gmra.mrb[0].mxu1 %vm1012_vm13, %v6410_v41  ;;  %v508_v21 = vrot.slane %v506_v6, 7  ;;  %v5788_v28 = vrot.slane %v514_v53, 7  ;;  %v1355_v34 = vrot.slane %v5482_v63, 5  ;;  %v1302_v53 = vld [vmem:[#allocation2] sm:$0xe] }
  0x8e   : > { %4737 = vmatpush3.bf16.msra.mxu1 %v1436_v19  ;;  %4724 = vmatprep.mubr.msk.bf16.mxu1 %vm1012_vm13, %v4323_v51  ;;  %v526_v13 = vld [vmem:[#allocation2 + $0x6c] sm:$0xf]  ;;  %v5797_v35 = vsel %vm5514_vm2, %v4340_v0, %v1352_v4  ;;  %v1354_v51 = vrot.slane %v1352_v4, 4  ;;  %v5830_v41 = vld [vmem:[#allocation2 + $0x1c] sm:$0xf]  ;;  %v2609_v4 = vshrl.u32 %v2584_v39, 16 }
  0x8f   : > { %4995 = vmatprep.subr.msk.bf16.mxu1 %vm1037_vm0, %v5777_v9  ;;  %v511_v10 = vor.u32 %v509_v11, %v508_v21  ;;  %v512_v58 = vrot.slane %v508_v21, 4  ;;  %v2138_v30 = vld [vmem:[#allocation2 + $0x60] sm:$0xe]  ;;  %v519_v27 = vor.u32 %v517_v38, %v5788_v28  ;;  %v6412_v11 = vcombine.low %v5465_v36, %v5473_v49  ;;  %v5043_v0 = vld [vmem:[#allocation2 + $0x18] sm:$0xff]  }
  0x90   : > { %v4403_v24 = vrot.slane %v2138_v30, 9  ;;  %v5811_v55 = vsel %vm5514_vm2, %v1354_v51, %v1355_v34  ;;  %v1331_v38 = vrot.slane %v5435_v17, 5  ;;  %v4326_v36 = vcombine.low %v5621_v40, %v5617_v50  ;;  %v2602_v7 = vld [vmem:[#allocation2 + $0x60] sm:$0xf] }
  0x91   : > { %v527_v20 = vsel %vm5253_vm9, %v511_v10, %v526_v13  ;;  %v5801_v61 = vld [vmem:[#allocation2 + $0x64] sm:$0xf]  ;;  %v5803_v63 = vld [vmem:[#allocation2 + $0x68] sm:$0x1]  ;;  %v520_v48 = vsel %vm5244_vm8, %v512_v58, %v519_v27  ;;  %v2612_v10 = vshll.u32 %v2584_v39, 16  ;;  %v4337_v49 = vrot.slane %v1302_v53, 9 }
  0x92   : > { %6411 = vst [vmem:[#allocation3_spill] sm:$0xff] %v5803_v63  ;;  %528 = vst [vmem:[#allocation2 + $0x6c] sm:$0xf] %v527_v20  ;;  %v2214_v23 = vrot.slane %v5801_v61, 5  ;;  %v2217_v19 = vrot.slane %v5803_v63, 5  ;;  %v2618_v30 = vshll.u32 %v5830_v41, 16  ;;  %v4327_v51 = vcombine.low %v5659_v1, %v5661_v57 }
  0x93   : > { %529 = vst.msk [vmem:[#allocation2 + $0x70] sm:$0xf] %vm495_vm7, %v520_v48  ;;  %v2587_v58 = vld [vmem:[#allocation2 + $0x24] sm:$0xf]  ;;  %v1307_v13 = vld [vmem:[#allocation2 + $0x3c] sm:$0xe]  ;;  %v4328_v1 = vcombine.low %v5676_v18, %v5678_v14 }
  0x94   : > { %v2215_v52 = vsel %vm5514_vm2, %v4403_v24, %v2214_v23  ;;  %v2216_v6 = vrot.slane %v2214_v23, 4  ;;  %v2622_v27 = vshrl.u32 %v5830_v41, 16  ;;  %v1334_v17 = vrot.slane %v5437_v26, 5  ;;  %v5044_v53 = vld [vmem:[#allocation2 + $0x24] sm:$0xff]  }
  0x95   : > { %4725 = vmatmul.mubr.msk.bf16.gmra.mrb[4].mxu1 %vm1012_vm13, %v6412_v11  ;;  %v1333_v24 = vrot.slane %v1331_v38, 4  ;;  %v2851_v20 = vsel %vm1037_vm0, %v5579_v43, 0  ;;  %v1345_v40 = vrot.slane %v5429_v22, 5  ;;  %v2611_v48 = vrot.slane %v2609_v4, 4 }
  0x96   : > { %4728 = vmatprep.mubr.msk.bf16.mxu1 %vm1012_vm13, %v4325_v44  ;;  %v2218_v21 = vsel %vm5514_vm2, %v2216_v6, %v2217_v19  ;;  %v1304_v44 = vld [vmem:[#allocation2 + $0x18] sm:$0xe]  ;;  %v2633_v23 = vshrl.u32 %v2587_v58, 16  ;;  %v5846_v19 = vld [vmem:[#allocation2 + $0x20] sm:$0x1]  ;;  %v2614_v39 = vrot.slane %v2612_v10, 5  ;;  %v1332_v43 = vsel %vm5514_vm2, %v4337_v49, %v1331_v38 }
  0x97   : > { %v4412_v34 = vcombine.low %v2215_v52, %v2218_v21  ;;  %v2636_v26 = vshll.u32 %v2587_v58, 16  ;;  %v4342_v52 = vrot.slane %v1307_v13, 9  ;;  %v1366_v6 = vrot.slane %v5617_v50, 5 }
  0x98   : > { %v5854_v11 = vrot.slane %v2618_v30, 5  ;;  %v2624_v22 = vrot.slane %v2622_v27, 4  ;;  %v1335_v21 = vsel %vm5514_vm2, %v1333_v24, %v1334_v17  ;;  %v1369_v18 = vrot.slane %v5623_v60, 5  ;;  %v5878_v24 = vld [vmem:[%s6391_s3 + $0x10] sm:$0x3] }
  0x99   : > { %4805 = vmatmul.mubr.msk.bf16.gmra.mrb[12].mxu0 %vm1012_vm13, %v4412_v34  ;;  %v5863_v50 = vsel %vm5514_vm2, %v4342_v52, %v1366_v6  ;;  %v1368_v4 = vrot.slane %v1366_v6, 4  ;;  %v5045_v34 = vld [vmem:[#allocation2 + $0x30] sm:$0xff]   ;;  %v4339_v38 = vrot.slane %v1304_v44, 9  ;;  %v1347_v10 = vrot.slane %v1345_v40, 4 }
  0x9a   : > { %4810 = vmatprep.mubr.msk.bf16.mxu0 %vm1012_vm13, %v5043_v0  ;;  %v5859_v0 = vld [vmem:[#allocation2 + $0x28] sm:$0xf]  ;;  %v1348_v58 = vrot.slane %v5457_v12, 5  ;;  %v2628_v13 = vshll.u32 %v5846_v19, 16  ;;  %v2635_v49 = vrot.slane %v2633_v23, 4  ;;  %v2638_v30 = vrot.slane %v2636_v26, 5 }
  0x9b   : > { %v5870_v27 = vsel %vm5514_vm2, %v1368_v4, %v1369_v18  ;;  %v2625_v17 = vor.u32 %v2624_v22, %v5854_v11  ;;  %v2646_v60 = vshrl.u32 %v5859_v0, 16  ;;  %v4346_v44 = vcombine.low %v1332_v43, %v1335_v21  ;;  %v5888_v26 = vld [vmem:[#allocation2 + $0x2c] sm:$0x1]  ;;  %v1306_v6 = vld [vmem:[#allocation2 + $0x30] sm:$0xe] }
  0x9c   : > { %v1349_v23 = vsel %vm5514_vm2, %v1347_v10, %v1348_v58  ;;  %v2639_v52 = vor.u32 %v2638_v30, %v2635_v49  ;;  %v1309_v21 = vld [vmem:[#allocation2 + $0x54] sm:$0xe]  ;;  %v1359_v4 = vrot.slane %v5531_v15, 5  ;;  %v5047_v18 = vld [vmem:[#allocation2 + $0x48] sm:$0xff]   ;;  %v2590_v10 = vld [vmem:[#allocation2 + $0x30] sm:$0xf] }
  0x9d   : > { %4729 = vmatmul.mubr.msk.bf16.gmra.mrb[8].mxu1 %vm1012_vm13, %v4326_v36  ;;  %v2615_v36 = vor.u32 %v2614_v39, %v2611_v48  ;;  %v1346_v48 = vsel %vm5514_vm2, %v4339_v38, %v1345_v40  ;;  %v2626_v43 = vrot.slane %v2625_v17, 4  ;;  %v5046_v40 = vld [vmem:[#allocation2 + $0x3c] sm:$0xff]   ;;  %v2652_v38 = vshll.u32 %v5888_v26, 16  ;;  %v5972_v12 = vld [vmem:[#allocation2 + $0x44] sm:$0x1] }
  0x9e   : > { %4732 = vmatprep.mubr.msk.bf16.mxu1 %vm1012_vm13, %v4327_v51  ;;  %v2642_v51 = vshll.u32 %v5859_v0, 16  ;;  %v5901_v58 = vrot.slane %v2639_v52, 4  ;;  %v4344_v49 = vrot.slane %v1309_v21, 9  ;;  %v1362_v17 = vrot.slane %v5548_v56, 5  ;;  %v5937_v21 = vld [vmem:[#allocation2 + $0x40] sm:$0xf] }
  0x9f   : > { %v2616_v39 = vrot.slane %v2615_v36, 4  ;;  %v5903_v36 = vld [vmem:[#allocation2 + $0x34] sm:$0xf]  ;;  %v5919_v56 = vrot.slane %v2652_v38, 5  ;;  %vm4072_vm7 = vcmask 1045509   ;;  %vm4075_vm8 = vcmask 1046534  }
  0xa0   : > { %v5893_v22 = vrot.slane %v2642_v51, 5  ;;  %v1380_v51 = vrot.slane %v5678_v14, 5  ;;  %v2670_v52 = vshrl.u32 %v5903_v36, 16  ;;  %v2593_v14 = vld [vmem:[#allocation2 + $0x3c] sm:$0xf]  ;;  %v5048_v38 = vld [vmem:[#allocation2 + $0x54] sm:$0xff]  }
  0xa1   : > { %4811 = vmatmul.mubr.msk.bf16.vlgmr.msra.gmra.mrb[0].mxu0 %vm1012_vm13, %v5044_v53  ;;  %v2648_v53 = vrot.slane %v2646_v60, 4  ;;  %v1361_v60 = vrot.slane %v1359_v4, 4  ;;  %vm4078_vm9 = vcmask 1047559  }
  0xa2   : > { %4827 = vmatpush3.bf16.msra.mxu0 %v2851_v20  ;;  %4814 = vmatprep.mubr.msk.bf16.mxu0 %vm1012_vm13, %v5045_v34  ;;  %v2630_v20 = vrot.slane %v2628_v13, 5  ;;  %v4348_v34 = vcombine.low %v1346_v48, %v1349_v23  ;;  %v4341_v13 = vrot.slane %v1306_v6, 9  ;;  %v1383_v48 = vrot.slane %v5684_v62, 5  ;;  %v454_v62 = vld [vmem:[#allocation2 + $0x74] sm:$0x1] }
  0xa3   : > { %5001 = vmatprep.subr.msk.bf16.mxu0 %vm1037_vm0, %v5878_v24  ;;  %v2649_v15 = vor.u32 %v2648_v53, %v5893_v22  ;;  %v1634_v23 = vsel %vm1037_vm0, %v5777_v9, 0  ;;  %v1363_v47 = vsel %vm5514_vm2, %v1361_v60, %v1362_v17  ;;  %v5957_v17 = vld [vmem:[#allocation2 + $0x38] sm:$0x1]  ;;  %v2690_v60 = vshll.u32 %v5937_v21, 16 }
  0xa4   : > { %v2631_v30 = vsel %vm5351_vm14, %v2626_v43, %v2630_v20  ;;  %v5923_v43 = vsel %vm5514_vm2, %v4344_v49, %v1380_v51  ;;  %v1382_v20 = vrot.slane %v1380_v51, 4  ;;  %v1360_v53 = vsel %vm5514_vm2, %v4341_v13, %v1359_v4  ;;  %v5049_v4 = vld [vmem:[#allocation2 + $0x60] sm:$0xff]  }
  0xa5   : > { %4733 = vmatmul.mubr.msk.bf16.gmra.mrb[12].mxu1 %vm1012_vm13, %v4328_v1  ;;  %v2621_v1 = vsel %vm5351_vm14, %v2616_v39, %v5854_v11  ;;  %v2660_v11 = vshll.u32 %v2590_v10, 16  ;;  %v2666_v39 = vshll.u32 %v5903_v36, 16  ;;  %v5933_v9 = vrot.slane %v2649_v15, 4  ;;  %v5951_v15 = vld [vmem:[#allocation2 + $0x4c] sm:$0xf] }
  0xa6   : > { %4738 = vmatprep.mubr.msk.bf16.mxu1 %vm1012_vm13, %v4346_v44  ;;  %v2657_v44 = vshrl.u32 %v2590_v10, 16  ;;  %v5917_v6 = vcombine.low %v2621_v1, %v2631_v30  ;;  %v5945_v10 = vsel %vm5514_vm2, %v1382_v20, %v1383_v48  ;;  %v2596_v1 = vld [vmem:[#allocation2 + $0x48] sm:$0xf]  ;;  %v2672_v49 = vrot.slane %v2670_v52, 4 }
  0xa7   : > { %v5947_v13 = vrot.slane %v2666_v39, 5  ;;  %v2681_v30 = vshrl.u32 %v2593_v14, 16  ;;  %v2684_v51 = vshll.u32 %v2593_v14, 16  ;;  %v2705_v39 = vshrl.u32 %v2596_v1, 16 }
  0xa8   : > { %v2659_v29 = vrot.slane %v2657_v44, 4  ;;  %v2694_v44 = vshrl.u32 %v5937_v21, 16  ;;  %v2708_v52 = vshll.u32 %v2596_v1, 16  ;;  %v2655_v20 = vsel %vm5351_vm14, %v5933_v9, %v5919_v56 }
  0xa9   : > { %4815 = vmatmul.mubr.msk.bf16.gmra.mrb[4].mxu0 %vm1012_vm13, %v5046_v40  ;;  %v1308_v40 = vld [vmem:[#allocation2 + $0x48] sm:$0xe]  ;;  %v2714_v14 = vshll.u32 %v5951_v15, 16  ;;  %v2718_v37 = vshrl.u32 %v5951_v15, 16  ;;  %v2676_v1 = vshll.u32 %v5957_v17, 16  ;;  %v2686_v32 = vrot.slane %v2684_v51, 5 }
  0xaa   : > { %4818 = vmatprep.mubr.msk.bf16.mxu0 %vm1012_vm13, %v5047_v18  ;;  %v1373_v18 = vrot.slane %v5661_v57, 5  ;;  %v2599_v57 = vld [vmem:[#allocation2 + $0x54] sm:$0xf]  ;;  %v5974_v63 = vrot.slane %v2690_v60, 5  ;;  %v2696_v56 = vrot.slane %v2694_v44, 4  ;;  %v5050_v51 = vld [vmem:[#allocation2 + $0x6c] sm:$0xff]  }
  0xab   : > { %v5989_v60 = vrot.slane %v2714_v14, 5  ;;  %v2732_v44 = vshll.u32 %v2599_v57, 16 }
  0xac   : > { %v1375_v48 = vrot.slane %v1373_v18, 4 }
  0xad   : > { %4739 = vmatmul.mubr.msk.bf16.vlgmr.msra.gmra.mrb[0].mxu1 %vm1012_vm13, %v4347_v8  ;;  %v2662_v8 = vrot.slane %v2660_v11, 5  ;;  %v4343_v11 = vrot.slane %v1308_v40, 9 }
  0xae   : > { %4755 = vmatpush3.bf16.msra.mxu1 %v1634_v23  ;;  %4742 = vmatprep.mubr.msk.bf16.mxu1 %vm1012_vm13, %v4348_v34  ;;  %v5059_v34 = vld [vmem:[%s6391_s3 + $0x8] sm:$0x3]  ;;  %v1376_v23 = vrot.slane %v5667_v5, 5  ;;  %v2673_v5 = vor.u32 %v2672_v49, %v5947_v13  ;;  %v2710_v49 = vrot.slane %v2708_v52, 5 }
  0xaf   : > { %4997 = vmatprep.subr.msk.bf16.mxu1 %vm1037_vm0, %v5059_v34  ;;  %v4350_v34 = vcombine.low %v1360_v53, %v1363_v47  ;;  %v2663_v40 = vor.u32 %v2662_v8, %v2659_v29  ;;  %v1374_v9 = vsel %vm5514_vm2, %v4343_v11, %v1373_v18  ;;  %v5978_v53 = vld [vmem:[#allocation2 + $0x58] sm:$0xf]  ;;  %v6413_v47 = vcombine.low %v5797_v35, %v5811_v55  ;;  %v5986_v8 = vld [vmem:[#allocation2 + $0x50] sm:$0x1] }
  0xb0   : > { %v1377_v29 = vsel %vm5514_vm2, %v1375_v48, %v1376_v23  ;;  %v2720_v18 = vrot.slane %v2718_v37, 4  ;;  %v455_v35 = vsel %vm5193_vm5, 0, %v454_v62  ;;  %v2674_v11 = vrot.slane %v2673_v5, 4  ;;  %v6004_v5 = vld [vmem:[#allocation2 + $0x64] sm:$0xf] }
  0xb1   : > { %4819 = vmatmul.mubr.msk.bf16.gmra.mrb[8].mxu0 %vm1012_vm13, %v5048_v38  ;;  %v2683_v38 = vrot.slane %v2681_v30, 4  ;;  %v2729_v30 = vshrl.u32 %v2599_v57, 16  ;;  %v2664_v55 = vrot.slane %v2663_v40, 4  ;;  %v2738_v48 = vshll.u32 %v5978_v53, 16  ;;  %456 = vst [vmem:[#allocation2 + $0x74] sm:$0x1] %v455_v35 }
  0xb2   : > { %4822 = vmatprep.mubr.msk.bf16.mxu0 %vm1012_vm13, %v5049_v4  ;;  %v2707_v4 = vrot.slane %v2705_v39, 4  ;;  %v521_v23 = vrot.slane %v5788_v28, 4  ;;  %v6414_v39 = vsel %vm5351_vm14, %v5901_v58, %v5893_v22  ;;  %v2700_v37 = vshll.u32 %v5972_v12, 16 }
  0xb3   : > { %v4440_v52 = vcombine.low %v6414_v39, %v2655_v20  ;;  %v2742_v57 = vshrl.u32 %v5978_v53, 16  ;;  %v2687_v62 = vor.u32 %v2686_v32, %v2683_v38  ;;  %v4352_v14 = vcombine.low %v1374_v9, %v1377_v29  ;;  %v6015_v38 = vld [vmem:[#allocation2 + $0x5c] sm:$0x1] }
  0xb4   : > { %v2724_v40 = vshll.u32 %v5986_v8, 16  ;;  %v2711_v28 = vor.u32 %v2710_v49, %v2707_v4  ;;  %v2731_v22 = vrot.slane %v2729_v30, 4  ;;  %v2734_v58 = vrot.slane %v2732_v44, 5 }
  0xb5   : > { %4743 = vmatmul.mubr.msk.bf16.gmra.mrb[4].mxu1 %vm1012_vm13, %v6413_v47  ;;  %v2678_v47 = vrot.slane %v2676_v1, 5  ;;  %v2721_v1 = vor.u32 %v2720_v18, %v5989_v60  ;;  %v2669_v32 = vsel %vm5351_vm14, %v2664_v55, %v5947_v13  ;;  %v2753_v9 = vshrl.u32 %v2602_v7, 16 }
  0xb6   : > { %4746 = vmatprep.mubr.msk.bf16.mxu1 %vm1012_vm13, %v4350_v34  ;;  %v2697_v34 = vor.u32 %v2696_v56, %v5974_v63  ;;  %v6017_v56 = vrot.slane %v2738_v48, 5  ;;  %v2744_v29 = vrot.slane %v2742_v57, 4  ;;  %v2756_v4 = vshll.u32 %v2602_v7, 16 }
  0xb7   : > { %v2679_v20 = vsel %vm5351_vm14, %v2674_v11, %v2678_v47  ;;  %v2762_v49 = vshll.u32 %v6004_v5, 16  ;;  %v2766_v30 = vshrl.u32 %v6004_v5, 16  ;;  %v2688_v13 = vrot.slane %v2687_v62, 4 }
  0xb8   : > { %v2702_v18 = vrot.slane %v2700_v37, 5  ;;  %v2726_v44 = vrot.slane %v2724_v40, 5  ;;  %v2712_v35 = vrot.slane %v2711_v28, 4  ;;  %v2722_v55 = vrot.slane %v2721_v1, 4  ;;  %v530_v48 = vld [vmem:[#allocation2 + $0x74] sm:$0x1] }
  0xb9   : > { %4823 = vmatmul.mubr.msk.bf16.gmra.mrb[12].mxu0 %vm1012_vm13, %v5050_v51  ;;  %v2698_v51 = vrot.slane %v2697_v34, 4  ;;  %v2735_v11 = vor.u32 %v2734_v58, %v2731_v22  ;;  %v2748_v47 = vshll.u32 %v6015_v38, 16  ;;  %v3105_v39 = vsel %vm1037_vm0, %v5878_v24, 0  ;;  %v6034_v40 = vld [vmem:[#allocation2 + $0x70] sm:$0xf] }
  0xba   : > { %4828 = vmatprep.mubr.msk.bf16.mxu0 %vm1012_vm13, %v5917_v6  ;;  %v6415_v6 = vcombine.low %v5863_v50, %v5870_v27  ;;  %v4441_v57 = vcombine.low %v2669_v32, %v2679_v20  ;;  %v2755_v7 = vrot.slane %v2753_v9, 4  ;;  %v531_v50 = vsel %vm5183_vm3, %v521_v23, %v530_v48  ;;  %v2605_v27 = vld [vmem:[#allocation2 + $0x6c] sm:$0xf]  ;;  %v6041_v1 = vld [vmem:[#allocation2 + $0x68] sm:$0x1] }
  0xbb   : > { %v2745_v37 = vor.u32 %v2744_v29, %v6017_v56  ;;  %v2758_v62 = vrot.slane %v2756_v4, 5  ;;  %v6032_v34 = vrot.slane %v2762_v49, 5  ;;  %532 = vst [vmem:[#allocation2 + $0x74] sm:$0x1] %v531_v50  ;;  %v2693_v28 = vsel %vm5351_vm14, %v2688_v13, %v5974_v63  ;;  %v5051_v32 = vld [vmem:[#allocation2 + $0xc] sm:$0xff]   ;;  %v5053_v50 = vld [vmem:[#allocation2 + $0x24] sm:$0xff]  }
  0xbc   : > { %v2703_v24 = vsel %vm5351_vm14, %v2698_v51, %v2702_v18  ;;  %v2717_v3 = vsel %vm5351_vm14, %v2712_v35, %v5989_v60  ;;  %v2727_v23 = vsel %vm5351_vm14, %v2722_v55, %v2726_v44  ;;  %v2736_v22 = vrot.slane %v2735_v11, 4  ;;  %v2966_v18 = vld [vmem:[#allocation2 + $0x18] sm:$0xe] }
  0xbd   : > { %4747 = vmatmul.mubr.msk.bf16.gmra.mrb[8].mxu1 %vm1012_vm13, %v6415_v6  ;;  %v2750_v58 = vrot.slane %v2748_v47, 5  ;;  %v2777_v63 = vshrl.u32 %v2605_v27, 16  ;;  %v2780_v20 = vshll.u32 %v2605_v27, 16  ;;  %v2786_v9 = vshll.u32 %v6034_v40, 16  ;;  %v1764_v47 = vld [vmem:[#allocation2 + $0x48] sm:$0xf] }
  0xbe   : > { %4750 = vmatprep.mubr.msk.bf16.mxu1 %vm1012_vm13, %v4352_v14  ;;  %v2768_v14 = vrot.slane %v2766_v30, 4  ;;  %v2790_v29 = vshrl.u32 %v6034_v40, 16  ;;  %v2759_v4 = vor.u32 %v2758_v62, %v2755_v7  ;;  %v2772_v60 = vshll.u32 %v6041_v1, 16  ;;  %v5052_v7 = vld [vmem:[#allocation2 + $0x18] sm:$0xff]  }
  0xbf   : > { %v6416_v30 = vcombine.low %v5923_v43, %v5945_v10  ;;  %v4442_v6 = vcombine.low %v2693_v28, %v2703_v24  ;;  %v4443_v13 = vcombine.low %v2717_v3, %v2727_v23  ;;  %v2741_v51 = vsel %vm5351_vm14, %v2736_v22, %v6017_v56 }
  0xc0   : > { %v2769_v49 = vor.u32 %v2768_v14, %v6032_v34  ;;  %v2779_v44 = vrot.slane %v2777_v63, 4  ;;  %v2782_v35 = vrot.slane %v2780_v20, 5  ;;  %v6062_v55 = vrot.slane %v2786_v9, 5  ;;  %v2967_v63 = vld [vmem:[#allocation2 + $0x24] sm:$0xe] }
  0xc1   : > { %4829 = vmatmul.mubr.msk.bf16.vlgmr.msra.gmra.mrb[0].mxu0 %vm1012_vm13, %v4440_v52  ;;  %v2746_v52 = vrot.slane %v2745_v37, 4  ;;  %v2792_v11 = vrot.slane %v2790_v29, 4  ;;  %v2760_v10 = vrot.slane %v2759_v4, 4  ;;  %v4455_v56 = vrot.slane %v2966_v18, 9  ;;  %v1761_v37 = vld [vmem:[#allocation2 + $0x3c] sm:$0xf] }
  0xc2   : > { %4845 = vmatpush3.bf16.msra.mxu0 %v3105_v39  ;;  %4832 = vmatprep.mubr.msk.bf16.mxu0 %vm1012_vm13, %v4441_v57  ;;  %v2770_v48 = vrot.slane %v2769_v49, 4  ;;  %v2774_v39 = vrot.slane %v2772_v60, 5  ;;  %v6066_v57 = vld [vmem:[#allocation2 + $0x74] sm:$0x1]  ;;  %v3000_v27 = vrot.slane %v5830_v41, 5  ;;  %v1894_v62 = vshrl.u32 %v1764_v47, 16 }
  0xc3   : > { %v2751_v43 = vsel %vm5351_vm14, %v2746_v52, %v2750_v58  ;;  %v1897_v14 = vshll.u32 %v1764_v47, 16  ;;  %v2783_v24 = vor.u32 %v2782_v35, %v2779_v44  ;;  %v2793_v3 = vor.u32 %v2792_v11, %v6062_v55  ;;  %v5054_v35 = vld [vmem:[#allocation2 + $0x30] sm:$0xff]  }
  0xc4   : > { %v4444_v28 = vcombine.low %v2741_v51, %v2751_v43  ;;  %v2796_v23 = vshll.u32 %v6066_v57, 16  ;;  %v2765_v22 = vsel %vm5351_vm14, %v2760_v10, %v6032_v34  ;;  %v2775_v58 = vsel %vm5351_vm14, %v2770_v48, %v2774_v39  ;;  %v5055_v10 = vld [vmem:[#allocation2 + $0x3c] sm:$0xff]  }
  0xc5   : > { %4751 = vmatmul.mubr.msk.bf16.gmra.mrb[12].mxu1 %vm1012_vm13, %v6416_v30  ;;  %v1899_v41 = vrot.slane %v1897_v14, 5  ;;  %v1870_v20 = vshrl.u32 %v1761_v37, 16  ;;  %v1873_v9 = vshll.u32 %v1761_v37, 16  ;;  %v1879_v29 = vshll.u32 %v5638_v59, 16  ;;  %v2968_v37 = vld [vmem:[#allocation2 + $0x30] sm:$0xe] }
  0xc6   : > { %4756 = vmatprep.mubr.msk.bf16.mxu1 %vm1012_vm13, %v5051_v32  ;;  %v1896_v32 = vrot.slane %v1894_v62, 4  ;;  %v1883_v52 = vshrl.u32 %v5638_v59, 16  ;;  %v3002_v4 = vrot.slane %v3000_v27, 4  ;;  %v3003_v34 = vrot.slane %v5846_v19, 5 }
  0xc7   : > { %v3007_v49 = vrot.slane %v5859_v0, 5  ;;  %v4445_v30 = vcombine.low %v2765_v22, %v2775_v58  ;;  %v2798_v51 = vrot.slane %v2796_v23, 5  ;;  %v4456_v18 = vrot.slane %v2967_v63, 9  ;;  %v5056_v58 = vld [vmem:[#allocation2 + $0x48] sm:$0xff]   ;;  %v2969_v63 = vld [vmem:[#allocation2 + $0x3c] sm:$0xe] }
  0xc8   : > { %v1900_v60 = vor.u32 %v1899_v41, %v1896_v32  ;;  %v1872_v11 = vrot.slane %v1870_v20, 4  ;;  %v1875_v47 = vrot.slane %v1873_v9, 5  ;;  %v6085_v59 = vrot.slane %v1879_v29, 5 }
  0xc9   : > { %4833 = vmatmul.mubr.msk.bf16.gmra.mrb[4].mxu0 %vm1012_vm13, %v4442_v6  ;;  %v2784_v6 = vrot.slane %v2783_v24, 4  ;;  %v3001_v19 = vsel %vm5514_vm2, %v4455_v56, %v3000_v27  ;;  %v3009_v43 = vrot.slane %v3007_v49, 4  ;;  %v3010_v0 = vrot.slane %v5888_v26, 5  ;;  %v1767_v27 = vld [vmem:[#allocation2 + $0x54] sm:$0xf] }
  0xca   : > { %4836 = vmatprep.mubr.msk.bf16.mxu0 %vm1012_vm13, %v4443_v13  ;;  %v2794_v13 = vrot.slane %v2793_v3, 4  ;;  %v1901_v44 = vrot.slane %v1900_v60, 4  ;;  %v6417_v26 = vsel %vm5351_vm14, %v5785_v25, %v5779_v31  ;;  %v1889_v14 = vshll.u32 %v5644_v45, 16 }
  0xcb   : > { %v2789_v39 = vsel %vm5351_vm14, %v2784_v6, %v6062_v55  ;;  %v1876_v55 = vor.u32 %v1875_v47, %v1872_v11  ;;  %v3008_v3 = vsel %vm5514_vm2, %v4456_v18, %v3007_v49  ;;  %v3011_v31 = vsel %vm5514_vm2, %v3009_v43, %v3010_v0  ;;  %v1770_v6 = vld [vmem:[#allocation2 + $0x60] sm:$0xf] }
  0xcc   : > { %v1906_v48 = vsel %vm5351_vm14, %v1901_v44, %v5735_v46  ;;  %v3014_v46 = vrot.slane %v5903_v36, 5  ;;  %v1918_v25 = vshrl.u32 %v1767_v27, 16  ;;  %v1921_v36 = vshll.u32 %v1767_v27, 16 }
  0xcd   : > { %4757 = vmatmul.mubr.msk.bf16.vlgmr.msra.gmra.mrb[0].mxu1 %vm1012_vm13, %v5052_v7  ;;  %v2799_v7 = vsel %vm5351_vm14, %v2794_v13, %v2798_v51  ;;  %v6107_v56 = vcombine.low %v1906_v48, %v6417_v26  ;;  %v1927_v23 = vshll.u32 %v5694_v33, 16  ;;  %v1931_v22 = vshrl.u32 %v5694_v33, 16  ;;  %v5058_v26 = vld [vmem:[#allocation2 + $0x60] sm:$0xff]  }
  0xce   : > { %4863 = vmatpush3.bf16.msra.mxu1 %v5176_v2  ;;  %4760 = vmatprep.mubr.msk.bf16.mxu1 %vm1012_vm13, %v5053_v50  ;;  %v1885_v2 = vrot.slane %v1883_v52, 4  ;;  %v3004_v50 = vsel %vm5514_vm2, %v3002_v4, %v3003_v34  ;;  %v4457_v32 = vrot.slane %v2968_v37, 9  ;;  %v3016_v41 = vrot.slane %v3014_v46, 4  ;;  %v5057_v34 = vld [vmem:[#allocation2 + $0x54] sm:$0xff]  }
  0xcf   : > { %v4464_v24 = vcombine.low %v3001_v19, %v3004_v50  ;;  %v3017_v45 = vrot.slane %v5957_v17, 5  ;;  %v3021_v20 = vrot.slane %v5937_v21, 5  ;;  %v1877_v9 = vrot.slane %v1876_v55, 4  ;;  %v2971_v37 = vld [vmem:[#allocation2 + $0x54] sm:$0xe] }
  0xd0   : > { %v1886_v62 = vor.u32 %v1885_v2, %v6085_v59  ;;  %v1891_v52 = vrot.slane %v1889_v14, 5  ;;  %v4465_v4 = vcombine.low %v3008_v3, %v3011_v31  ;;  %v1920_v49 = vrot.slane %v1918_v25, 4 }
  0xd1   : > { %4837 = vmatmul.mubr.msk.bf16.gmra.mrb[8].mxu0 %vm1012_vm13, %v4444_v28  ;;  %v4446_v28 = vcombine.low %v2789_v39, %v2799_v7  ;;  %v1923_v60 = vrot.slane %v1921_v36, 5  ;;  %v1929_v33 = vrot.slane %v1927_v23, 5  ;;  %v3015_v17 = vsel %vm5514_vm2, %v4457_v32, %v3014_v46  ;;  %v2972_v23 = vld [vmem:[#allocation2 + $0x60] sm:$0xe] }
  0xd2   : > { %4840 = vmatprep.mubr.msk.bf16.mxu0 %vm1012_vm13, %v4445_v30  ;;  %v1887_v29 = vrot.slane %v1886_v62, 4  ;;  %v1933_v30 = vrot.slane %v1931_v22, 4  ;;  %v3018_v21 = vsel %vm5514_vm2, %v3016_v41, %v3017_v45  ;;  %v4458_v13 = vrot.slane %v2969_v63, 9  ;;  %v6418_v41 = vld [vmem:[#allocation3_spill] sm:$0xff] }
  0xd3   : > { %v3028_v51 = vrot.slane %v5951_v15, 5  ;;  %v3023_v18 = vrot.slane %v3021_v20, 4  ;;  %v3024_v44 = vrot.slane %v5972_v12, 5  ;;  %v1882_v11 = vsel %vm5351_vm14, %v1877_v9, %v6085_v59 }
  0xd4   : > { %v1892_v47 = vsel %vm5351_vm14, %v1887_v29, %v1891_v52  ;;  %v1942_v2 = vshrl.u32 %v1770_v6, 16  ;;  %v1945_v19 = vshll.u32 %v1770_v6, 16  ;;  %v1951_v43 = vshll.u32 %v5801_v61, 16 }
  0xd5   : > { %4761 = vmatmul.mubr.msk.bf16.gmra.mrb[4].mxu1 %vm1012_vm13, %v5054_v35  ;;  %v2970_v35 = vld [vmem:[#allocation2 + $0x48] sm:$0xe]  ;;  %v1955_v15 = vshrl.u32 %v5801_v61, 16  ;;  %v4466_v0 = vcombine.low %v3015_v17, %v3018_v21  ;;  %v1934_v48 = vor.u32 %v1933_v30, %v1929_v33  ;;  %v1937_v12 = vshll.u32 %v5698_v42, 16  ;;  %v2973_v21 = vld [vmem:[#allocation2 + $0x6c] sm:$0xe] }
  0xd6   : > { %4764 = vmatprep.mubr.msk.bf16.mxu1 %vm1012_vm13, %v5055_v10  ;;  %v1924_v10 = vor.u32 %v1923_v60, %v1920_v49  ;;  %v4459_v39 = vrot.slane %v2970_v35, 9  ;;  %v3030_v7 = vrot.slane %v3028_v51, 4  ;;  %v3031_v59 = vrot.slane %v5986_v8, 5 }
  0xd7   : > { %v3022_v50 = vsel %vm5514_vm2, %v4458_v13, %v3021_v20  ;;  %v3035_v46 = vrot.slane %v5978_v53, 5  ;;  %v4384_v27 = vcombine.low %v1882_v11, %v1892_v47  ;;  %v1944_v61 = vrot.slane %v1942_v2, 4 }
  0xd8   : > { %v1947_v55 = vrot.slane %v1945_v19, 5  ;;  %v1953_v62 = vrot.slane %v1951_v43, 5  ;;  %v1957_v14 = vrot.slane %v1955_v15, 4  ;;  %v3025_v42 = vsel %vm5514_vm2, %v3023_v18, %v3024_v44 }
  0xd9   : > { %4841 = vmatmul.mubr.msk.bf16.gmra.mrb[12].mxu0 %vm1012_vm13, %v4446_v28  ;;  %v1925_v8 = vrot.slane %v1924_v10, 4  ;;  %v1935_v28 = vrot.slane %v1934_v48, 4  ;;  %v3029_v3 = vsel %vm5514_vm2, %v4459_v39, %v3028_v51  ;;  %v3032_v53 = vsel %vm5514_vm2, %v3030_v7, %v3031_v59 }
  0xda   : > { %4846 = vmatprep.mubr.msk.bf16.mxu0 %vm1012_vm13, %v4464_v24  ;;  %v1939_v24 = vrot.slane %v1937_v12, 5  ;;  %v3042_v31 = vrot.slane %v6004_v5, 5  ;;  %v4460_v25 = vrot.slane %v2971_v37, 9  ;;  %v3038_v36 = vrot.slane %v6015_v38, 5 }
  0xdb   : > { %v4467_v22 = vcombine.low %v3022_v50, %v3025_v42  ;;  %v1958_v32 = vor.u32 %v1957_v14, %v1953_v62  ;;  %v1961_v45 = vshll.u32 %v6418_v41, 16  ;;  %v4468_v63 = vcombine.low %v3029_v3, %v3032_v53 }
  0xdc   : > { %v3037_v20 = vrot.slane %v3035_v46, 4  ;;  %v1930_v9 = vsel %vm5351_vm14, %v1925_v8, %v1929_v33  ;;  %v1940_v5 = vsel %vm5351_vm14, %v1935_v28, %v1939_v24  ;;  %v4461_v29 = vrot.slane %v2972_v23, 9 }
  0xdd   : > { %4765 = vmatmul.mubr.msk.bf16.gmra.mrb[8].mxu1 %vm1012_vm13, %v5056_v58  ;;  %v1948_v58 = vor.u32 %v1947_v55, %v1944_v61  ;;  %v3044_v52 = vrot.slane %v3042_v31, 4  ;;  %v3045_v38 = vrot.slane %v6041_v1, 5  ;;  %v1959_v49 = vrot.slane %v1958_v32, 4 }
  0xde   : > { %4768 = vmatprep.mubr.msk.bf16.mxu1 %vm1012_vm13, %v5057_v34  ;;  %v1963_v60 = vrot.slane %v1961_v45, 5  ;;  %v3036_v30 = vsel %vm5514_vm2, %v4460_v25, %v3035_v46  ;;  %v3039_v33 = vsel %vm5514_vm2, %v3037_v20, %v3038_v36  ;;  %v3049_v6 = vrot.slane %v6034_v40, 5  ;;  %v6200_v46 = vld [vmem:[%s6392_s4] ss:$0 sm:$0xff] }
  0xdf   : > { %v1949_v34 = vrot.slane %v1948_v58, 4  ;;  %v3043_v17 = vsel %vm5514_vm2, %v4461_v29, %v3042_v31  ;;  %v3046_v1 = vsel %vm5514_vm2, %v3044_v52, %v3045_v38  ;;  %v4469_v13 = vcombine.low %v3036_v30, %v3039_v33 }
  0xe0   : > { %v1964_v18 = vsel %vm5351_vm14, %v1959_v49, %v1963_v60  ;;  %v4470_v40 = vcombine.low %v3043_v17, %v3046_v1  ;;  %v4462_v44 = vrot.slane %v2973_v21, 9  ;;  %v3051_v35 = vrot.slane %v3049_v6, 4 }
  0xe1   : > { %4847 = vmatmul.mubr.msk.bf16.vlgmr.msra.gmra.mrb[0].mxu0 %vm1012_vm13, %v4465_v4  ;;  %v4386_v4 = vcombine.low %v1930_v9, %v1940_v5  ;;  %v1954_v51 = vsel %vm5351_vm14, %v1949_v34, %v1953_v62  ;;  %v3052_v11 = vrot.slane %v6066_v57, 5  ;;  %v5100_v39 = vmov 1983009808  }
  0xe2   : > { %4850 = vmatprep.mubr.msk.bf16.mxu0 %vm1012_vm13, %v4466_v0  ;;  %v4387_v47 = vcombine.low %v1954_v51, %v1964_v18  ;;  %v3277_v16 = vunpack.c.l.s4 %v5100_v39  ;;  %v3279_v7 = vlaneseq  ;;  %vm4060_vm0 = vcmask 1041409  }
  0xe3   : > { %v3053_v2 = vsel %vm5514_vm2, %v3051_v35, %v3052_v11  ;;  %vm4063_vm3 = vcmask 1042434   ;;  %vm4066_vm5 = vcmask 1043459  }
  0xe4   : > { %v3278_v59 = vunpack.c.0.s8 %v3277_v16  ;;  %v3280_v50 = vshrl.u32 %v3279_v7, 7 }
  0xe5   : > { %4769 = vmatmul.mubr.msk.bf16.gmra.mrb[12].mxu1 %vm1012_vm13, %v5058_v26 }
  0xe6   : > { %4782 = vmatprep.mubr.msk.bf16.mxu1 %vm1012_vm13, %v4384_v27  ;;  %v6203_v14 = vsub.s32 %v3278_v59, %v3280_v50 }
  0xe9   : > { %4851 = vmatmul.mubr.msk.bf16.gmra.mrb[4].mxu0 %vm1012_vm13, %v4467_v22 }
  0xea   : > { %4854 = vmatprep.mubr.msk.bf16.mxu0 %vm1012_vm13, %v4468_v63 }
  0xed   : > { %4783 = vmatmul.mubr.msk.bf16.vlgmr.msra.gmra.mrb[8].mxu1 %vm1012_vm13, %v6107_v56  ;;  %v3050_v56 = vsel %vm5514_vm2, %v4462_v44, %v3049_v6 }
  0xee   : > { %4786 = vmatprep.mubr.msk.bf16.mxu1 %vm1012_vm13, %v4386_v4  ;;  %v4471_v54 = vcombine.low %v3050_v56, %v3053_v2 }
  0xf1   : > { %4855 = vmatmul.mubr.msk.bf16.gmra.mrb[8].mxu0 %vm1012_vm13, %v4469_v13 }
  0xf2   : > { %4858 = vmatprep.mubr.msk.bf16.mxu0 %vm1012_vm13, %v4470_v40 }
  0xf5   : > { %4787 = vmatmul.mubr.msk.bf16.gmra.mrb[12].mxu1 %vm1012_vm13, %v4387_v47 }
  0xf9   : > { %4859 = vmatmul.mubr.msk.bf16.gmra.mrb[12].mxu0 %vm1012_vm13, %v4471_v54 }
 0x1a0   : > { %v4758_v19 = vpop.f32.mrb[0].mxu1 }
 0x1a1   : > { %v1670_v43 = vpop.f32.mrb[1].mxu1 }
 0x1a2   : > { %v4759_v15 = vpop.f32.mrb[2].mxu1 }
 0x1a3   : > { %v1673_v57 = vpop.f32.mrb[3].mxu1 }
 0x1a8   : > { %v6189_v0 = vpop.f32.mrb[4].mxu1 }
 0x1a9   : > { %v6191_v10 = vpop.f32.mrb[5].mxu1 }
 0x1aa   : > { %v6193_v48 = vpop.f32.mrb[6].mxu1 }
 0x1ab   : > { %v6195_v12 = vpop.f32.mrb[7].mxu1 }
 0x1b4   : > { %v4848_v26 = vpop.f32.mrb[0].mxu0 }
 0x1b5   : > { %v4864_v27 = vadd.f32 %v4848_v26, %v4758_v19  ;;  %v3141_v37 = vpop.f32.mrb[1].mxu0 }
 0x1b6   : > { %v4865_v61 = vadd.f32 %v3141_v37, %v1670_v43  ;;  %v4849_v55 = vpop.f32.mrb[2].mxu0 }
 0x1b7   : > { %v3229_v62 = vadd.f32 %v4864_v27, %v6200_v46  ;;  %v4866_v42 = vadd.f32 %v4849_v55, %v4759_v15  ;;  %v3144_v8 = vpop.f32.mrb[3].mxu0 }
 0x1b8   : > { %v3227_v28 = vadd.f32 %v4865_v61, %v6200_v46  ;;  %v4867_v24 = vadd.f32 %v3144_v8, %v1673_v57 }
 0x1b9   : > { %v3245_v3 = vmax.f32 %v3229_v62, 0.0  ;;  %v3230_v53 = vadd.f32 %v4866_v42, %v6200_v46 }
 0x1ba   : > { %v3243_v31 = vmax.f32 %v3227_v28, 0.0  ;;  %v3228_v25 = vadd.f32 %v4867_v24, %v6200_v46 }
 0x1bb   : > { %v3309_v36 = vcombine.high %v3245_v3, %v3245_v3  ;;  %v3316_v23 = vrot.slane %v3245_v3, %v6203_v14  ;;  %v3246_v22 = vmax.f32 %v3230_v53, 0.0 }
 0x1bc   : > { %v3275_v58 = vcombine.high %v3243_v31, %v3243_v31  ;;  %v3282_v32 = vrot.slane %v3243_v31, %v6203_v14  ;;  %v6210_v41 = vmax.f32 %v3228_v25, 0.0  ;;  %v6212_v45 = vpop.f32.mrb[4].mxu0 }
 0x1bd   : > { %v3323_v63 = vrot.slane %v3309_v36, %v6203_v14  ;;  %v3324_v20 = vcombine.high %v3316_v23, %v3316_v23  ;;  %v4489_v9 = vrot.slane %v3316_v23, 9  ;;  %v3326_v5 = vcombine.high %v3246_v22, %v3246_v22  ;;  %v6215_v29 = vpop.f32.mrb[5].mxu0 }
 0x1be   : > { %v3289_v52 = vrot.slane %v3275_v58, %v6203_v14  ;;  %v3290_v38 = vcombine.high %v3282_v32, %v3282_v32  ;;  %v4481_v4 = vrot.slane %v3282_v32, 9  ;;  %v3333_v34 = vrot.slane %v3246_v22, %v6203_v14  ;;  %v4853_v49 = vpop.f32.mrb[6].mxu0 }
 0x1bf   : > { %v3325_v60 = vcombine.high %v3323_v63, %v3323_v63  ;;  %v4490_v30 = vrot.slane %v3324_v20, 9  ;;  %v4491_v33 = vrot.slane %v3323_v63, 9  ;;  %v3811_v6 = vmax.f32 %v3316_v23, %v4489_v9  ;;  %v6219_v17 = vpop.f32.mrb[7].mxu0 }
 0x1c0   : > { %v6221_v1 = vpop.f32.mrb[8].mxu1  ;;  %v3291_v21 = vcombine.high %v3289_v52, %v3289_v52  ;;  %v4482_v13 = vrot.slane %v3290_v38, 9  ;;  %v4483_v51 = vrot.slane %v3289_v52, 9  ;;  %v3803_v18 = vmax.f32 %v3282_v32, %v4481_v4 }
 0x1c1   : > { %v6223_v40 = vpop.f32.mrb[9].mxu1  ;;  %v4492_v44 = vrot.slane %v3325_v60, 9  ;;  %v3812_v35 = vmax.f32 %v3324_v20, %v4490_v30  ;;  %v3813_v11 = vmax.f32 %v3323_v63, %v4491_v33  ;;  %v3340_v47 = vrot.slane %v3326_v5, %v6203_v14 }
 0x1c2   : > { %v6226_v56 = vpop.f32.mrb[10].mxu1  ;;  %v4484_v2 = vrot.slane %v3291_v21, 9  ;;  %v3804_v54 = vmax.f32 %v3290_v38, %v4482_v13  ;;  %v3805_v19 = vmax.f32 %v3289_v52, %v4483_v51  ;;  %v3867_v43 = vmax.f32 %v3803_v18, %v3811_v6 }
 0x1c3   : > { %v6228_v15 = vpop.f32.mrb[11].mxu1  ;;  %v3814_v57 = vmax.f32 %v3325_v60, %v4492_v44  ;;  %v3341_v39 = vcombine.high %v3333_v34, %v3333_v34  ;;  %v3342_v16 = vcombine.high %v3340_v47, %v3340_v47  ;;  %v4493_v7 = vrot.slane %v3333_v34, 9 }
 0x1c4   : > { %v3806_v59 = vmax.f32 %v3291_v21, %v4484_v2  ;;  %v3868_v50 = vmax.f32 %v3804_v54, %v3812_v35  ;;  %v3869_v26 = vmax.f32 %v3805_v19, %v3813_v11  ;;  %v4587_v27 = vpack.c.bf16 %v3867_v43, %v3867_v43  ;;  %v6230_v37 = vpop.f32.mrb[8].mxu0 }
 0x1c5   : > { %v4494_v61 = vrot.slane %v3341_v39, 9  ;;  %v4495_v55 = vrot.slane %v3340_v47, 9  ;;  %v4496_v62 = vrot.slane %v3342_v16, 9  ;;  %v3815_v42 = vmax.f32 %v3333_v34, %v4493_v7  ;;  %v6232_v8 = vpop.f32.mrb[9].mxu0 }
 0x1c6   : > { %v3870_v28 = vmax.f32 %v3806_v59, %v3814_v57  ;;  %v4588_v24 = vpack.c.bf16 %v3868_v50, %v3868_v50  ;;  %v4589_v3 = vpack.c.bf16 %v3869_v26, %v3869_v26  ;;  %v4027_v53 = vunpack.c.l.b16 %v4587_v27  ;;  %v6234_v31 = vpop.f32.mrb[10].mxu0 }
 0x1c7   : > { %v3816_v25 = vmax.f32 %v3341_v39, %v4494_v61  ;;  %v3817_v36 = vmax.f32 %v3340_v47, %v4495_v55  ;;  %v3818_v23 = vmax.f32 %v3342_v16, %v4496_v62  ;;  %v3292_v22 = vcombine.high %v6210_v41, %v6210_v41  ;;  %v6238_v58 = vpop.f32.mrb[11].mxu0 }
 0x1c8   : > { %v6240_v32 = vpop.f32.mrb[12].mxu1  ;;  %v4590_v63 = vpack.c.bf16 %v3870_v28, %v3870_v28  ;;  %v4028_v20 = vunpack.c.l.b16 %v4588_v24  ;;  %v4029_v9 = vunpack.c.l.b16 %v4589_v3  ;;  %v3299_v5 = vrot.slane %v6210_v41, %v6203_v14 }
 0x1c9   : > { %v6244_v52 = vpop.f32.mrb[13].mxu1  ;;  %v3306_v38 = vrot.slane %v3292_v22, %v6203_v14  ;;  %v4868_v4 = vadd.f32 %v6212_v45, %v6189_v0  ;;  %v4869_v34 = vadd.f32 %v6215_v29, %v6191_v10  ;;  %v4870_v60 = vadd.f32 %v4853_v49, %v6193_v48 }
 0x1ca   : > { %v6253_v30 = vpop.f32.mrb[14].mxu1  ;;  %v4030_v33 = vunpack.c.l.b16 %v4590_v63  ;;  %v4059_v6 = vrot.slane %v4028_v20, 7  ;;  %v4062_v21 = vrot.slane %v4029_v9, 6  ;;  %v3307_v41 = vcombine.high %v3299_v5, %v3299_v5 }
 0x1cb   : > { %v6255_v13 = vpop.f32.mrb[15].mxu1  ;;  %v3308_v51 = vcombine.high %v3306_v38, %v3306_v38  ;;  %v4485_v18 = vrot.slane %v3299_v5, 9  ;;  %v4487_v44 = vrot.slane %v3306_v38, 9  ;;  %v3233_v35 = vadd.f32 %v4868_v4, %v6200_v46 }
 0x1cc   : > { %v4061_v0 = vsel %vm4060_vm0, %v4059_v6, %v4027_v53  ;;  %v4065_v45 = vrot.slane %v4030_v33, 5  ;;  %v4486_v10 = vrot.slane %v3307_v41, 9  ;;  %v3231_v48 = vadd.f32 %v4869_v34, %v6200_v46  ;;  %v6266_v29 = vpop.f32.mrb[12].mxu0 }
 0x1cd   : > { %v4064_v49 = vsel %vm4063_vm3, %v4062_v21, %v4061_v0  ;;  %v4488_v11 = vrot.slane %v3308_v51, 9  ;;  %v3807_v47 = vmax.f32 %v3299_v5, %v4485_v18  ;;  %v3809_v2 = vmax.f32 %v3306_v38, %v4487_v44  ;;  %v6269_v54 = vpop.f32.mrb[13].mxu0 }
 0x1ce   : > { %v3808_v19 = vmax.f32 %v3307_v41, %v4486_v10  ;;  %v4067_v43 = vsel %vm4066_vm5, %v4065_v45, %v4064_v49  ;;  %v3249_v57 = vmax.f32 %v3233_v35, 0.0  ;;  %v3247_v39 = vmax.f32 %v3231_v48, 0.0  ;;  %v6272_v16 = vpop.f32.mrb[14].mxu0 }
 0x1cf   : > { %v3810_v7 = vmax.f32 %v3308_v51, %v4488_v11  ;;  %v3871_v59 = vmax.f32 %v3807_v47, %v3815_v42  ;;  %v3873_v50 = vmax.f32 %v3809_v2, %v3817_v36  ;;  %v3234_v26 = vadd.f32 %v4870_v60, %v6200_v46  ;;  %v6275_v27 = vpop.f32.mrb[15].mxu0 }
 0x1d0   : > { %v3872_v61 = vmax.f32 %v3808_v19, %v3816_v25  ;;  %v3377_v55 = vcombine.high %v3249_v57, %v3249_v57  ;;  %v3384_v62 = vrot.slane %v3249_v57, %v6203_v14  ;;  %v3343_v28 = vcombine.high %v3247_v39, %v3247_v39 }
 0x1d1   : > { %v3874_v24 = vmax.f32 %v3810_v7, %v3818_v23  ;;  %v4591_v3 = vpack.c.bf16 %v3871_v59, %v3871_v59  ;;  %v4593_v53 = vpack.c.bf16 %v3873_v50, %v3873_v50  ;;  %v3350_v42 = vrot.slane %v3247_v39, %v6203_v14 }
 0x1d2   : > { %v4592_v36 = vpack.c.bf16 %v3872_v61, %v3872_v61  ;;  %v3391_v22 = vrot.slane %v3377_v55, %v6203_v14  ;;  %v3392_v63 = vcombine.high %v3384_v62, %v3384_v62  ;;  %v4505_v20 = vrot.slane %v3384_v62, 9 }
 0x1d3   : > { %v4594_v9 = vpack.c.bf16 %v3874_v24, %v3874_v24  ;;  %v4031_v5 = vunpack.c.l.b16 %v4591_v3  ;;  %v4033_v38 = vunpack.c.l.b16 %v4593_v53  ;;  %v3357_v25 = vrot.slane %v3343_v28, %v6203_v14 }
 0x1d4   : > { %v4032_v4 = vunpack.c.l.b16 %v4592_v36  ;;  %v3393_v34 = vcombine.high %v3391_v22, %v3391_v22  ;;  %v4506_v60 = vrot.slane %v3392_v63, 9  ;;  %v4507_v33 = vrot.slane %v3391_v22, 9 }
 0x1d5   : > { %v4034_v23 = vunpack.c.l.b16 %v4594_v9  ;;  %v4068_v6 = vrot.slane %v4031_v5, 4  ;;  %v4074_v21 = vrot.slane %v4033_v38, 2  ;;  %v3827_v41 = vmax.f32 %v3384_v62, %v4505_v20 }
 0x1d6   : > { %v4071_v51 = vrot.slane %v4032_v4, 3  ;;  %v4508_v18 = vrot.slane %v3393_v34, 9  ;;  %v3828_v44 = vmax.f32 %v3392_v63, %v4506_v60  ;;  %v3829_v35 = vmax.f32 %v3391_v22, %v4507_v33 }
 0x1d7   : > { %v4070_v0 = vsel %vm4069_vm6, %v4068_v6, %v4067_v43  ;;  %v4077_v45 = vrot.slane %v4034_v23, 1  ;;  %v3358_v10 = vcombine.high %v3350_v42, %v3350_v42  ;;  %v3359_v48 = vcombine.high %v3357_v25, %v3357_v25 }
 0x1d8   : > { %v4073_v49 = vsel %vm4072_vm7, %v4071_v51, %v4070_v0  ;;  %v3830_v11 = vmax.f32 %v3393_v34, %v4508_v18  ;;  %v4497_v47 = vrot.slane %v3350_v42, 9  ;;  %v4499_v2 = vrot.slane %v3357_v25, 9 }
 0x1d9   : > { %v4076_v19 = vsel %vm4075_vm8, %v4074_v21, %v4073_v49  ;;  %v4498_v57 = vrot.slane %v3358_v10, 9  ;;  %v4500_v39 = vrot.slane %v3359_v48, 9  ;;  %v3250_v7 = vmax.f32 %v3234_v26, 0.0 }
 0x1da   : > { %v4079_v43 = vsel %vm4078_vm9, %v4077_v45, %v4076_v19  ;;  %v3819_v59 = vmax.f32 %v3350_v42, %v4497_v47  ;;  %v3821_v50 = vmax.f32 %v3357_v25, %v4499_v2  ;;  %v4871_v61 = vadd.f32 %v6219_v17, %v6195_v12 }
 0x1db   : > { %v4122_v55 = vpack.c.b16 %v4079_v43, %v4079_v43  ;;  %v3820_v62 = vmax.f32 %v3358_v10, %v4498_v57  ;;  %v3822_v28 = vmax.f32 %v3359_v48, %v4500_v39  ;;  %v3394_v24 = vcombine.high %v3250_v7, %v3250_v7 }
 0x1dc   : > { %v3875_v3 = vmax.f32 %v3819_v59, %v3827_v41  ;;  %v3877_v53 = vmax.f32 %v3821_v50, %v3829_v35  ;;  %v3401_v26 = vrot.slane %v3250_v7, %v6203_v14  ;;  %v3232_v36 = vadd.f32 %v4871_v61, %v6200_v46 }
 0x1dd   : > { %4130 = vst [vmem:[%s6292_s27] sm:$0xf] %v4122_v55  ;;  %v3876_v22 = vmax.f32 %v3820_v62, %v3828_v44  ;;  %v3878_v63 = vmax.f32 %v3822_v28, %v3830_v11  ;;  %v3408_v20 = vrot.slane %v3394_v24, %v6203_v14  ;;  %v4872_v42 = vadd.f32 %v6230_v37, %v6221_v1 }
 0x1de   : > { %v4595_v9 = vpack.c.bf16 %v3875_v3, %v3875_v3  ;;  %v4597_v12 = vpack.c.bf16 %v3877_v53, %v3877_v53  ;;  %v3409_v17 = vcombine.high %v3401_v26, %v3401_v26  ;;  %v4509_v5 = vrot.slane %v3401_v26, 9 }
 0x1df   : > { %v4596_v38 = vpack.c.bf16 %v3876_v22, %v3876_v22  ;;  %v4598_v25 = vpack.c.bf16 %v3878_v63, %v3878_v63  ;;  %v3410_v4 = vcombine.high %v3408_v20, %v3408_v20  ;;  %v4511_v34 = vrot.slane %v3408_v20, 9 }
 0x1e0   : > { %v4035_v60 = vunpack.c.l.b16 %v4595_v9  ;;  %v4037_v33 = vunpack.c.l.b16 %v4597_v12  ;;  %v4510_v23 = vrot.slane %v3409_v17, 9  ;;  %v3831_v6 = vmax.f32 %v3401_v26, %v4509_v5 }
 0x1e1   : > { %v4036_v21 = vunpack.c.l.b16 %v4596_v38  ;;  %v4038_v41 = vunpack.c.l.b16 %v4598_v25  ;;  %v4512_v51 = vrot.slane %v3410_v4, 9  ;;  %v3833_v18 = vmax.f32 %v3408_v20, %v4511_v34 }
 0x1e2   : > { %v4082_v44 = vrot.slane %v4037_v33, 6  ;;  %v3832_v35 = vmax.f32 %v3409_v17, %v4510_v23  ;;  %v3248_v0 = vmax.f32 %v3232_v36, 0.0  ;;  %v3237_v1 = vadd.f32 %v4872_v42, %v6200_v46 }
 0x1e3   : > { %v4080_v37 = vrot.slane %v4036_v21, 7  ;;  %v4084_v45 = vrot.slane %v4038_v41, 5  ;;  %v3834_v10 = vmax.f32 %v3410_v4, %v4512_v51  ;;  %v4873_v48 = vadd.f32 %v6232_v8, %v6223_v40 }
 0x1e4   : > { %v3360_v49 = vcombine.high %v3248_v0, %v3248_v0  ;;  %v3367_v11 = vrot.slane %v3248_v0, %v6203_v14  ;;  %v3253_v47 = vmax.f32 %v3237_v1, 0.0  ;;  %v6309_v2 = vadd.f32 %v6234_v31, %v6226_v56 }
 0x1e5   : > { %v4081_v19 = vsel %vm4060_vm0, %v4080_v37, %v4035_v60  ;;  %v3235_v57 = vadd.f32 %v4873_v48, %v6200_v46  ;;  %v4875_v39 = vadd.f32 %v6238_v58, %v6228_v15  ;;  %v6317_v7 = vadd.f32 %v6266_v29, %v6240_v32 }
 0x1e6   : > { %v4083_v40 = vsel %vm4063_vm3, %v4082_v44, %v4081_v19  ;;  %v3374_v8 = vrot.slane %v3360_v49, %v6203_v14  ;;  %v3375_v43 = vcombine.high %v3367_v11, %v3367_v11  ;;  %v4501_v59 = vrot.slane %v3367_v11, 9 }
 0x1e7   : > { %v4085_v56 = vsel %vm4066_vm5, %v4084_v45, %v4083_v40  ;;  %v3445_v31 = vcombine.high %v3253_v47, %v3253_v47  ;;  %v3452_v50 = vrot.slane %v3253_v47, %v6203_v14  ;;  %v3251_v61 = vmax.f32 %v3235_v57, 0.0 }
 0x1e8   : > { %v3376_v55 = vcombine.high %v3374_v8, %v3374_v8  ;;  %v4502_v62 = vrot.slane %v3375_v43, 9  ;;  %v4503_v28 = vrot.slane %v3374_v8, 9  ;;  %v3823_v15 = vmax.f32 %v3367_v11, %v4501_v59 }
 0x1e9   : > { %v3459_v58 = vrot.slane %v3445_v31, %v6203_v14  ;;  %v3460_v32 = vcombine.high %v3452_v50, %v3452_v50  ;;  %v4521_v29 = vrot.slane %v3452_v50, 9  ;;  %v3411_v24 = vcombine.high %v3251_v61, %v3251_v61 }
 0x1ea   : > { %v4504_v3 = vrot.slane %v3376_v55, 9  ;;  %v3824_v53 = vmax.f32 %v3375_v43, %v4502_v62  ;;  %v3825_v26 = vmax.f32 %v3374_v8, %v4503_v28  ;;  %v3879_v36 = vmax.f32 %v3823_v15, %v3831_v6 }
 0x1eb   : > { %v3461_v22 = vcombine.high %v3459_v58, %v3459_v58  ;;  %v4522_v63 = vrot.slane %v3460_v32, 9  ;;  %v4523_v20 = vrot.slane %v3459_v58, 9  ;;  %v3843_v42 = vmax.f32 %v3452_v50, %v4521_v29 }
 0x1ec   : > { %v3826_v9 = vmax.f32 %v3376_v55, %v4504_v3  ;;  %v3880_v12 = vmax.f32 %v3824_v53, %v3832_v35  ;;  %v3881_v17 = vmax.f32 %v3825_v26, %v3833_v18  ;;  %v4599_v5 = vpack.c.bf16 %v3879_v36, %v3879_v36 }
 0x1ed   : > { %v4524_v38 = vrot.slane %v3461_v22, 9  ;;  %v3844_v25 = vmax.f32 %v3460_v32, %v4522_v63  ;;  %v3845_v4 = vmax.f32 %v3459_v58, %v4523_v20  ;;  %v3418_v34 = vrot.slane %v3251_v61, %v6203_v14 }
 0x1ee   : > { %v3882_v60 = vmax.f32 %v3826_v9, %v3834_v10  ;;  %v4600_v33 = vpack.c.bf16 %v3880_v12, %v3880_v12  ;;  %v4601_v23 = vpack.c.bf16 %v3881_v17, %v3881_v17  ;;  %v4039_v21 = vunpack.c.l.b16 %v4599_v5 }
 0x1ef   : > { %v3846_v41 = vmax.f32 %v3461_v22, %v4524_v38  ;;  %v3425_v6 = vrot.slane %v3411_v24, %v6203_v14  ;;  %v3426_v51 = vcombine.high %v3418_v34, %v3418_v34  ;;  %v4513_v44 = vrot.slane %v3418_v34, 9 }
 0x1f0   : > { %v4602_v0 = vpack.c.bf16 %v3882_v60, %v3882_v60  ;;  %v4040_v1 = vunpack.c.l.b16 %v4600_v33  ;;  %v4041_v37 = vunpack.c.l.b16 %v4601_v23  ;;  %v4086_v35 = vrot.slane %v4039_v21, 4 }
 0x1f1   : > { %v3427_v18 = vcombine.high %v3425_v6, %v3425_v6  ;;  %v4514_v45 = vrot.slane %v3426_v51, 9  ;;  %v4515_v48 = vrot.slane %v3425_v6, 9  ;;  %v3835_v49 = vmax.f32 %v3418_v34, %v4513_v44 }
 0x1f2   : > { %v4042_v11 = vunpack.c.l.b16 %v4602_v0  ;;  %v4087_v47 = vsel %vm4069_vm6, %v4086_v35, %v4085_v56  ;;  %v4088_v10 = vrot.slane %v4040_v1, 3  ;;  %v4090_v19 = vrot.slane %v4041_v37, 2 }
 0x1f3   : > { %v4516_v57 = vrot.slane %v3427_v18, 9  ;;  %v3836_v40 = vmax.f32 %v3426_v51, %v4514_v45  ;;  %v3837_v8 = vmax.f32 %v3425_v6, %v4515_v48  ;;  %v3883_v43 = vmax.f32 %v3835_v49, %v3843_v42 }
 0x1f4   : > { %v4089_v59 = vsel %vm4072_vm7, %v4088_v10, %v4087_v47  ;;  %v4092_v31 = vrot.slane %v4042_v11, 1  ;;  %v3238_v50 = vadd.f32 %v6309_v2, %v6200_v46  ;;  %v3236_v61 = vadd.f32 %v4875_v39, %v6200_v46 }
 0x1f5   : > { %v4091_v55 = vsel %vm4075_vm8, %v4090_v19, %v4089_v59  ;;  %v3838_v62 = vmax.f32 %v3427_v18, %v4516_v57  ;;  %v3884_v28 = vmax.f32 %v3836_v40, %v3844_v25  ;;  %v3885_v56 = vmax.f32 %v3837_v8, %v3845_v4 }
 0x1f6   : > { %v4093_v15 = vsel %vm4078_vm9, %v4092_v31, %v4091_v55  ;;  %v4603_v58 = vpack.c.bf16 %v3883_v43, %v3883_v43  ;;  %v3254_v32 = vmax.f32 %v3238_v50, 0.0  ;;  %v3252_v29 = vmax.f32 %v3236_v61, 0.0 }
 0x1f7   : > { %v4123_v24 = vpack.c.b16 %v4093_v15, %v4093_v15  ;;  %v3886_v3 = vmax.f32 %v3838_v62, %v3846_v41  ;;  %v4604_v53 = vpack.c.bf16 %v3884_v28, %v3884_v28  ;;  %v4605_v26 = vpack.c.bf16 %v3885_v56, %v3885_v56 }
 0x1f8   : > { %v4043_v36 = vunpack.c.l.b16 %v4603_v58  ;;  %v3462_v22 = vcombine.high %v3254_v32, %v3254_v32  ;;  %v3469_v2 = vrot.slane %v3254_v32, %v6203_v14  ;;  %v3428_v39 = vcombine.high %v3252_v29, %v3252_v29 }
 0x1f9   : > { %4131 = vst [vmem:[%s6292_s27 + $0x4] sm:$0xf] %v4123_v24  ;;  %v4606_v63 = vpack.c.bf16 %v3886_v3, %v3886_v3  ;;  %v4044_v20 = vunpack.c.l.b16 %v4604_v53  ;;  %v4045_v42 = vunpack.c.l.b16 %v4605_v26  ;;  %v3435_v9 = vrot.slane %v3252_v29, %v6203_v14 }
 0x1fa   : > { %v3476_v12 = vrot.slane %v3462_v22, %v6203_v14  ;;  %v3477_v17 = vcombine.high %v3469_v2, %v3469_v2  ;;  %v4525_v5 = vrot.slane %v3469_v2, 9  ;;  %v3442_v38 = vrot.slane %v3428_v39, %v6203_v14 }
 0x1fb   : > { %v4046_v25 = vunpack.c.l.b16 %v4606_v63  ;;  %v4094_v4 = vrot.slane %v4044_v20, 7  ;;  %v4096_v34 = vrot.slane %v4045_v42, 6  ;;  %v3443_v60 = vcombine.high %v3435_v9, %v3435_v9 }
 0x1fc   : > { %v3478_v33 = vcombine.high %v3476_v12, %v3476_v12  ;;  %v4526_v23 = vrot.slane %v3477_v17, 9  ;;  %v4527_v21 = vrot.slane %v3476_v12, 9  ;;  %v3847_v41 = vmax.f32 %v3469_v2, %v4525_v5 }
 0x1fd   : > { %v4095_v6 = vsel %vm4060_vm0, %v4094_v4, %v4043_v36  ;;  %v4098_v51 = vrot.slane %v4046_v25, 5  ;;  %v3444_v44 = vcombine.high %v3442_v38, %v3442_v38  ;;  %v4517_v0 = vrot.slane %v3435_v9, 9 }
 0x1fe   : > { %v4097_v1 = vsel %vm4063_vm3, %v4096_v34, %v4095_v6  ;;  %v4528_v37 = vrot.slane %v3478_v33, 9  ;;  %v3848_v35 = vmax.f32 %v3477_v17, %v4526_v23  ;;  %v3849_v18 = vmax.f32 %v3476_v12, %v4527_v21 }
 0x1ff   : > { %v4518_v45 = vrot.slane %v3443_v60, 9  ;;  %v4519_v48 = vrot.slane %v3442_v38, 9  ;;  %v4520_v49 = vrot.slane %v3444_v44, 9  ;;  %v3839_v11 = vmax.f32 %v3435_v9, %v4517_v0 }
 0x200   : > { %v3850_v47 = vmax.f32 %v3478_v33, %v4528_v37  ;;  %v4099_v10 = vsel %vm4066_vm5, %v4098_v51, %v4097_v1  ;;  %v3241_v19 = vadd.f32 %v6317_v7, %v6200_v46  ;;  %v4877_v57 = vadd.f32 %v6269_v54, %v6244_v52 }
 0x201   : > { %v3840_v40 = vmax.f32 %v3443_v60, %v4518_v45  ;;  %v3841_v8 = vmax.f32 %v3442_v38, %v4519_v48  ;;  %v3842_v43 = vmax.f32 %v3444_v44, %v4520_v49  ;;  %v3887_v59 = vmax.f32 %v3839_v11, %v3847_v41 }
 0x202   : > { %v3257_v31 = vmax.f32 %v3241_v19, 0.0  ;;  %v3239_v50 = vadd.f32 %v4877_v57, %v6200_v46  ;;  %v4878_v61 = vadd.f32 %v6272_v16, %v6253_v30  ;;  %v4879_v55 = vadd.f32 %v6275_v27, %v6255_v13 }
 0x203   : > { %v3888_v62 = vmax.f32 %v3840_v40, %v3848_v35  ;;  %v3889_v28 = vmax.f32 %v3841_v8, %v3849_v18  ;;  %v3890_v56 = vmax.f32 %v3842_v43, %v3850_v47  ;;  %v4607_v7 = vpack.c.bf16 %v3887_v59, %v3887_v59 }
 0x204   : > { %v3513_v15 = vcombine.high %v3257_v31, %v3257_v31  ;;  %v3520_v52 = vrot.slane %v3257_v31, %v6203_v14  ;;  %v3255_v54 = vmax.f32 %v3239_v50, 0.0  ;;  %v3242_v58 = vadd.f32 %v4878_v61, %v6200_v46 }
 0x205   : > { %v4608_v32 = vpack.c.bf16 %v3888_v62, %v3888_v62  ;;  %v4609_v29 = vpack.c.bf16 %v3889_v28, %v3889_v28  ;;  %v4610_v24 = vpack.c.bf16 %v3890_v56, %v3890_v56  ;;  %v4047_v3 = vunpack.c.l.b16 %v4607_v7 }
 0x206   : > { %v3527_v53 = vrot.slane %v3513_v15, %v6203_v14  ;;  %v3528_v30 = vcombine.high %v3520_v52, %v3520_v52  ;;  %v4537_v16 = vrot.slane %v3520_v52, 9  ;;  %v3479_v26 = vcombine.high %v3255_v54, %v3255_v54 }
 0x207   : > { %v4048_v13 = vunpack.c.l.b16 %v4608_v32  ;;  %v4049_v27 = vunpack.c.l.b16 %v4609_v29  ;;  %v4050_v36 = vunpack.c.l.b16 %v4610_v24  ;;  %v4100_v22 = vrot.slane %v4047_v3, 4 }
 0x208   : > { %v3529_v2 = vcombine.high %v3527_v53, %v3527_v53  ;;  %v4538_v39 = vrot.slane %v3528_v30, 9  ;;  %v4539_v63 = vrot.slane %v3527_v53, 9  ;;  %v3859_v12 = vmax.f32 %v3520_v52, %v4537_v16 }
 0x209   : > { %v4101_v20 = vsel %vm4069_vm6, %v4100_v22, %v4099_v10  ;;  %v4102_v42 = vrot.slane %v4048_v13, 3  ;;  %v4104_v9 = vrot.slane %v4049_v27, 2  ;;  %v4106_v17 = vrot.slane %v4050_v36, 1 }
 0x20a   : > { %v4540_v5 = vrot.slane %v3529_v2, 9  ;;  %v3860_v38 = vmax.f32 %v3528_v30, %v4538_v39  ;;  %v3486_v25 = vrot.slane %v3255_v54, %v6203_v14  ;;  %v3861_v34 = vmax.f32 %v3527_v53, %v4539_v63 }
 0x20b   : > { %v4103_v4 = vsel %vm4072_vm7, %v4102_v42, %v4101_v20  ;;  %v3493_v60 = vrot.slane %v3479_v26, %v6203_v14  ;;  %v3258_v33 = vmax.f32 %v3242_v58, 0.0  ;;  %v3240_v6 = vadd.f32 %v4879_v55, %v6200_v46 }
 0x20c   : > { %v4105_v23 = vsel %vm4075_vm8, %v4104_v9, %v4103_v4  ;;  %v3494_v21 = vcombine.high %v3486_v25, %v3486_v25  ;;  %v4529_v41 = vrot.slane %v3486_v25, 9  ;;  %v3862_v48 = vmax.f32 %v3529_v2, %v4540_v5 }
 0x20d   : > { %v4107_v51 = vsel %vm4078_vm9, %v4106_v17, %v4105_v23  ;;  %v3495_v44 = vcombine.high %v3493_v60, %v3493_v60  ;;  %v4531_v0 = vrot.slane %v3493_v60, 9  ;;  %v3530_v1 = vcombine.high %v3258_v33, %v3258_v33 }
 0x20e   : > { %v4124_v37 = vpack.c.b16 %v4107_v51, %v4107_v51  ;;  %v4530_v35 = vrot.slane %v3494_v21, 9  ;;  %v3851_v18 = vmax.f32 %v3486_v25, %v4529_v41  ;;  %v3537_v45 = vrot.slane %v3258_v33, %v6203_v14 }
 0x20f   : > { %v4532_v49 = vrot.slane %v3495_v44, 9  ;;  %v3853_v11 = vmax.f32 %v3493_v60, %v4531_v0  ;;  %v3544_v47 = vrot.slane %v3530_v1, %v6203_v14  ;;  %v3256_v46 = vmax.f32 %v3240_v6, 0.0 }
 0x210   : > { %4132 = vst [vmem:[%s6292_s27 + $0x8] sm:$0xf] %v4124_v37  ;;  %v3852_v10 = vmax.f32 %v3494_v21, %v4530_v35  ;;  %v3891_v19 = vmax.f32 %v3851_v18, %v3859_v12  ;;  %v3545_v57 = vcombine.high %v3537_v45, %v3537_v45  ;;  %v4541_v43 = vrot.slane %v3537_v45, 9 }
 0x211   : > { %v3854_v40 = vmax.f32 %v3495_v44, %v4532_v49  ;;  %v3893_v8 = vmax.f32 %v3853_v11, %v3861_v34  ;;  %v3546_v31 = vcombine.high %v3544_v47, %v3544_v47  ;;  %v4543_v50 = vrot.slane %v3544_v47, 9 }
 0x212   : > { %v3892_v59 = vmax.f32 %v3852_v10, %v3860_v38  ;;  %v4611_v62 = vpack.c.bf16 %v3891_v19, %v3891_v19  ;;  %v4542_v56 = vrot.slane %v3545_v57, 9  ;;  %v3496_v7 = vcombine.high %v3256_v46, %v3256_v46 }
 0x213   : > { %v3894_v61 = vmax.f32 %v3854_v40, %v3862_v48  ;;  %v4613_v55 = vpack.c.bf16 %v3893_v8, %v3893_v8  ;;  %v3863_v54 = vmax.f32 %v3537_v45, %v4541_v43  ;;  %v3503_v58 = vrot.slane %v3256_v46, %v6203_v14 }
 0x214   : > { %v4612_v28 = vpack.c.bf16 %v3892_v59, %v3892_v59  ;;  %v4544_v29 = vrot.slane %v3546_v31, 9  ;;  %v3865_v24 = vmax.f32 %v3544_v47, %v4543_v50  ;;  %v3510_v3 = vrot.slane %v3496_v7, %v6203_v14 }
 0x215   : > { %v4614_v15 = vpack.c.bf16 %v3894_v61, %v3894_v61  ;;  %v4053_v52 = vunpack.c.l.b16 %v4613_v55  ;;  %v3511_v16 = vcombine.high %v3503_v58, %v3503_v58  ;;  %v4533_v26 = vrot.slane %v3503_v58, 9 }
 0x216   : > { %v4052_v32 = vunpack.c.l.b16 %v4612_v28  ;;  %v4051_v13 = vunpack.c.l.b16 %v4611_v62  ;;  %v3512_v36 = vcombine.high %v3510_v3, %v3510_v3  ;;  %v4535_v22 = vrot.slane %v3510_v3, 9 }
 0x217   : > { %v4054_v53 = vunpack.c.l.b16 %v4614_v15  ;;  %v4110_v30 = vrot.slane %v4053_v52, 6  ;;  %v3864_v39 = vmax.f32 %v3545_v57, %v4542_v56  ;;  %v4534_v63 = vrot.slane %v3511_v16, 9 }
 0x218   : > { %v4108_v27 = vrot.slane %v4052_v32, 7  ;;  %v3855_v20 = vmax.f32 %v3503_v58, %v4533_v26  ;;  %v3866_v9 = vmax.f32 %v3546_v31, %v4544_v29  ;;  %v4536_v12 = vrot.slane %v3512_v36, 9 }
 0x219   : > { %v4112_v2 = vrot.slane %v4054_v53, 5  ;;  %v3857_v17 = vmax.f32 %v3510_v3, %v4535_v22  ;;  %v3856_v14 = vmax.f32 %v3511_v16, %v4534_v63 }
 0x21a   : > { %v4109_v42 = vsel %vm4060_vm0, %v4108_v27, %v4051_v13  ;;  %v3895_v38 = vmax.f32 %v3855_v20, %v3863_v54  ;;  %v3858_v25 = vmax.f32 %v3512_v36, %v4536_v12 }
 0x21b   : > { %v4111_v5 = vsel %vm4063_vm3, %v4110_v30, %v4109_v42  ;;  %v3897_v4 = vmax.f32 %v3857_v17, %v3865_v24  ;;  %v3896_v60 = vmax.f32 %v3856_v14, %v3864_v39 }
 0x21c   : > { %v4113_v34 = vsel %vm4066_vm5, %v4112_v2, %v4111_v5  ;;  %v4615_v33 = vpack.c.bf16 %v3895_v38, %v3895_v38  ;;  %v3898_v23 = vmax.f32 %v3858_v25, %v3866_v9 }
 0x21d   : > { %v4617_v21 = vpack.c.bf16 %v3897_v4, %v3897_v4  ;;  %v4616_v41 = vpack.c.bf16 %v3896_v60, %v3896_v60 }
 0x21e   : > { %v4055_v6 = vunpack.c.l.b16 %v4615_v33  ;;  %v4618_v51 = vpack.c.bf16 %v3898_v23, %v3898_v23 }
 0x21f   : > { %v4057_v44 = vunpack.c.l.b16 %v4617_v21  ;;  %v4056_v0 = vunpack.c.l.b16 %v4616_v41 }
 0x220   : > { %v4114_v1 = vrot.slane %v4055_v6, 4  ;;  %v4058_v37 = vunpack.c.l.b16 %v4618_v51 }
 0x221   : > { %v4116_v18 = vrot.slane %v4056_v0, 3  ;;  %v4118_v45 = vrot.slane %v4057_v44, 2 }
 0x222   : > { %v4115_v35 = vsel %vm4069_vm6, %v4114_v1, %v4113_v34  ;;  %v4120_v49 = vrot.slane %v4058_v37, 1 }
 0x223   : > { %v4117_v48 = vsel %vm4072_vm7, %v4116_v18, %v4115_v35 }
 0x224   : > { %v4119_v11 = vsel %vm4075_vm8, %v4118_v45, %v4117_v48 }
 0x225   : > { %v4121_v47 = vsel %vm4078_vm9, %v4120_v49, %v4119_v11 }
 0x226   : > { %v4125_v10 = vpack.c.b16 %v4121_v47, %v4121_v47 }
 0x228   : > { %4133 = vst [vmem:[%s6292_s27 + $0xc] sm:$0xf] %v4125_v10 }
 0x229 PF: > { %s15_s22 = sadd.s32 1, %s5098_s22   ;;  %s6420_s18 = smov %s5090_s20 }
 0x22a   : > { %p12_p13 = scmp.ge.s32.totalorder %s15_s22, 6   ;;  %s6421_s19 = smov %s5094_s21 }
 0x22b   : > { %s6422_s20 = smov %s6425_s23  ;;  %s6423_s21 = smov %s6429_s24 }
 0x22c   :  { %14 = sbr.rel (!%p12_p13) target bundleno = 3 (0x3), region = 87 }

</bundles_post_ra>
